<compile_context>
chip_gen: v5e
topology: v5e:2x2
jax: 0.10.0
libtpu: 0.0.40
codegen_flags: <defaults>
</compile_context>

<pallas_src>
import jax
import jax.numpy as jnp
from jax.experimental import pallas as pl
from jax.experimental.pallas import tpu as pltpu


# ----------------------------------------------------------------------------
# Kernel
# ----------------------------------------------------------------------------
def local_mhra_kernel(x_ref, w1_ref, b1_ref, w2_ref, w3_ref, b3_ref, o_ref):
    # x_ref block: (1, T, HWt, C) bf16;  o_ref block: (1, T, HWt, C) bf16
    # w1: (C, Crp) bf16 (BN folded), b1: (1, Crp) f32 (BN folded)
    # w2: (3, Crp)  f32 depthwise taps
    # w3: (Crp, C) bf16,            b3: (1, C)   f32 (conv2 bias folded in)
    _, T, HWt, C = x_ref.shape
    Crp = w1_ref.shape[1]
    rows = T * HWt

    x = x_ref[0].reshape(rows, C)                              # bf16

    # --- Conv3d 1x1x1: C -> Cr (BatchNorm folded), MXU bf16, f32 acc ---------
    h = jnp.dot(x, w1_ref[...], preferred_element_type=jnp.float32)
    h = h + b1_ref[...]                                        # (rows, Crp) f32

    w2 = w2_ref[...]                                           # (3, Crp) f32
    w2_prev = w2[0:1, :]
    w2_cent = w2[1:2, :]
    w2_next = w2[2:3, :]
    w3 = w3_ref[...]                                           # (Crp, C) bf16
    b3 = b3_ref[...]                                           # (1, C) f32

    # --- Depthwise temporal conv (3,1,1) + Conv3d 1x1x1: Cr -> C --------------
    # Streamed per t-slice: d_t = w2[0]*h[t-1] + w2[1]*h[t] + w2[2]*h[t+1]
    # (zero temporal padding; conv2's bias is pre-folded into b3).  d_t stays
    # in f32 registers and each output slice is stored exactly once (bf16).
    for t in range(T):
        d_t = h[t * HWt:(t + 1) * HWt] * w2_cent
        if t > 0:
            d_t = d_t + h[(t - 1) * HWt:t * HWt] * w2_prev
        if t < T - 1:
            d_t = d_t + h[(t + 1) * HWt:(t + 2) * HWt] * w2_next
        o_t = jnp.dot(d_t.astype(jnp.bfloat16), w3,
                      preferred_element_type=jnp.float32) + b3
        o_ref[0, t, :, :] = o_t.astype(o_ref.dtype)


# ----------------------------------------------------------------------------
# Tiling / VMEM planning
# ----------------------------------------------------------------------------
def _round_up(n, m):
    return ((n + m - 1) // m) * m


def _vmem_capacity_bytes():
    try:
        info = pltpu.get_tpu_info()
        for name in ("vmem_capacity_bytes", "vmem_bytes", "vmem_size_bytes"):
            v = getattr(info, name, None)
            if v:
                return int(v)
    except Exception:
        pass
    return 128 * 1024 * 1024


def _plan():
    """Generation-aware block budget: (max_rows, vmem_limit_bytes, min_steps)."""
    cap = _vmem_capacity_bytes()
    if cap <= 96 * 1024 * 1024:
        # v7x-class: 64 MiB VMEM per TC, 2 TCs -> smaller tiles, >=8 grid steps.
        return 1024, 40 * 1024 * 1024, 8
    # v5e / v6e: 128 MiB VMEM, 1 TC -> bigger tiles to amortize grid-step cost.
    return 2048, 64 * 1024 * 1024, 2


def _pick_tile_hw(HWp, T, B, max_rows, min_steps):
    """Largest multiple-of-8 divisor of HWp with T*tile <= max_rows and at
    least ceil(min_steps/B) HW tiles.  Falls back to 8 (always divides HWp)."""
    assert HWp % 8 == 0
    min_tiles = -(-min_steps // max(B, 1))
    best = 8
    for d in range(8, HWp + 1, 8):
        if HWp % d:
            continue
        if T * d <= max_rows and HWp // d >= min_tiles:
            best = d
    return best


# ----------------------------------------------------------------------------
# pallas_call wrapper (channels-last)
# ----------------------------------------------------------------------------
def local_mhra_bthwc(x, prepared):
    """x: [B, T, HWp, C] bf16, HWp a multiple of 8, channels UNPADDED.

    Returns [B, T, HWp, C] bfloat16 (f32-accumulated, cast at the store).
    """
    B, T, HWp, C = x.shape
    assert x.dtype == jnp.bfloat16, "pass bf16 activations (kernel is HBM-bound)"
    assert HWp % 8 == 0, "pad HW to a multiple of 8 before calling"
    assert prepared["w1"].shape[0] == C and prepared["w3"].shape[1] == C
    Crp = prepared["w1"].shape[1]

    max_rows, vmem_limit, min_steps = _plan()
    tile_hw = _pick_tile_hw(HWp, T, B, max_rows, min_steps)
    n_hw = HWp // tile_hw

    act_bytes = 2 * B * T * HWp * C * 2               # read x + write o, bf16
    w_bytes = sum(int(v.size) * v.dtype.itemsize
                  for v in (prepared["w1"], prepared["b1"], prepared["w2"],
                            prepared["w3"], prepared["b3"]))
    cost = pl.CostEstimate(flops=int(4 * B * T * HWp * C * Crp),
                           transcendentals=0,
                           bytes_accessed=int(act_bytes + w_bytes))

    def full(shape):
        return pl.BlockSpec(shape, lambda b, j: (0,) * len(shape))

    return pl.pallas_call(
        local_mhra_kernel,
        out_shape=jax.ShapeDtypeStruct((B, T, HWp, C), jnp.bfloat16),
        grid_spec=pltpu.PrefetchScalarGridSpec(
            num_scalar_prefetch=0,
            grid=(B, n_hw),
            in_specs=[
                pl.BlockSpec((1, T, tile_hw, C), lambda b, j: (b, 0, j, 0)),
                full((C, Crp)),     # w1 (BN folded), bf16
                full((1, Crp)),     # b1 (BN folded), f32
                full((3, Crp)),     # w2 depthwise taps, f32
                full((Crp, C)),     # w3, bf16
                full((1, C)),       # b3 (b2 folded in), f32
            ],
            out_specs=pl.BlockSpec((1, T, tile_hw, C),
                                   lambda b, j: (b, 0, j, 0)),
        ),
        compiler_params=pltpu.CompilerParams(
            dimension_semantics=("parallel", "parallel"),
            vmem_limit_bytes=vmem_limit),
        cost_estimate=cost,
    )(x, prepared["w1"], prepared["b1"], prepared["w2"],
      prepared["w3"], prepared["b3"])


def local_mhra(x_ncthw, prepared):
    """Wrapper matching the PyTorch module: x is [B, C, T, H, W] -> same shape.

    In a full model, keep activations bf16 channels-last [B, T, HW, C] and call
    local_mhra_bthwc directly to avoid these layout round trips.
    """
    B, C, T, H, W = x_ncthw.shape
    HW = H * W
    HWp = _round_up(HW, 8)
    x = jnp.transpose(x_ncthw, (0, 2, 3, 4, 1)).reshape(B, T, HW, C)
    if HWp > HW:
        x = jnp.pad(x, ((0, 0), (0, 0), (0, HWp - HW), (0, 0)))
    x = x.astype(jnp.bfloat16)
    o = local_mhra_bthwc(x, prepared)                      # (B, T, HWp, C) bf16
    o = o[:, :, :HW, :].astype(jnp.float32).reshape(B, T, H, W, C)
    return jnp.transpose(o, (0, 4, 1, 2, 3))


# ----------------------------------------------------------------------------
# Parameters
# ----------------------------------------------------------------------------
def make_params(key, d_model, dw_reduction=1.5, pos_kernel_size=3,
                dtype=jnp.float32):
    """Raw (module-equivalent) parameters, eval-mode BN expressed as affine."""
    re_d_model = int(d_model // dw_reduction)
    assert pos_kernel_size == 3
    ks = jax.random.split(key, 10)
    gamma = jax.random.normal(ks[0], (d_model,), dtype) * 0.1 + 1.0
    beta = jax.random.normal(ks[1], (d_model,), dtype) * 0.1
    run_mean = jax.random.normal(ks[2], (d_model,), dtype) * 0.1
    run_var = jnp.abs(jax.random.normal(ks[3], (d_model,), dtype) * 0.1) + 1.0
    eps = 1e-5
    scale = gamma / jnp.sqrt(run_var + eps)
    shift = beta - run_mean * scale
    w1 = jax.random.normal(ks[4], (d_model, re_d_model), dtype) * 0.2
    b1 = jax.random.normal(ks[5], (re_d_model,), dtype) * 0.1
    w2 = jax.random.normal(ks[6], (3, re_d_model), dtype) * 0.2   # taps x Cr
    b2 = jax.random.normal(ks[7], (re_d_model,), dtype) * 0.1
    w3 = jax.random.normal(ks[8], (re_d_model, d_model), dtype) * 0.2
    b3 = jax.random.normal(ks[9], (d_model,), dtype) * 0.1
    return {"bn_scale": scale, "bn_shift": shift,
            "w1": w1, "b1": b1, "w2": w2, "b2": b2, "w3": w3, "b3": b3}


def prepare_params(raw):
    """Fold BN into w1/b1, fold b2 into b3, pad only the Cr dim to 128, cast
    MXU weights to bf16.  Done once, outside the kernel.  C stays unpadded."""
    C, Cr = raw["w1"].shape
    Crp = _round_up(Cr, 128)

    w1f = raw["bn_scale"][:, None] * raw["w1"]            # (C, Cr)
    b1f = raw["bn_shift"] @ raw["w1"] + raw["b1"]         # (Cr,)
    b3f = raw["b2"] @ raw["w3"] + raw["b3"]               # (C,)

    w1p = jnp.pad(w1f, ((0, 0), (0, Crp - Cr))).astype(jnp.bfloat16)
    w3p = jnp.pad(raw["w3"], ((0, Crp - Cr), (0, 0))).astype(jnp.bfloat16)
    w2p = jnp.pad(raw["w2"], ((0, 0), (0, Crp - Cr))).astype(jnp.float32)
    b1p = jnp.pad(b1f, (0, Crp - Cr)).reshape(1, Crp).astype(jnp.float32)
    b3p = b3f.reshape(1, C).astype(jnp.float32)
    return {"w1": w1p, "b1": b1p, "w2": w2p, "w3": w3p, "b3": b3p}


# ----------------------------------------------------------------------------
# Pure-JAX reference (full f32, original module semantics)
# ----------------------------------------------------------------------------
def local_mhra_reference(x_ncthw, raw):
    x = jnp.transpose(x_ncthw, (0, 2, 3, 4, 1))                    # [B,T,H,W,C]
    y = x * raw["bn_scale"] + raw["bn_shift"]
    h = jnp.einsum("bthwc,cr->bthwr", y, raw["w1"]) + raw["b1"]
    hp = jnp.pad(h, ((0, 0), (1, 1), (0, 0), (0, 0), (0, 0)))
    d = (hp[:, :-2] * raw["w2"][0]
         + hp[:, 1:-1] * raw["w2"][1]
         + hp[:, 2:] * raw["w2"][2]) + raw["b2"]
    o = jnp.einsum("bthwr,rc->bthwc", d, raw["w3"]) + raw["b3"]
    return jnp.transpose(o, (0, 4, 1, 2, 3))


if __name__ == "__main__":
    key = jax.random.PRNGKey(0)
    k_x, k_p = jax.random.split(key)

    # B, C, T, H, W  (Cr = int(8 // 1.5) = 5, padded to 128 internally).
    # HW=256 exercises HW tiling; C=8 exercises the unpadded-channel path.
    B, d_model, T, H, W = 2, 8, 8, 16, 16
    x = jax.random.normal(k_x, (B, d_model, T, H, W), jnp.float32)

    raw = make_params(k_p, d_model)
    prepared = prepare_params(raw)

    out = jax.block_until_ready(local_mhra(x, prepared))
    ref = jax.block_until_ready(local_mhra_reference(x, raw))

    assert out.shape == x.shape, (out.shape, x.shape)
    max_err = float(jnp.max(jnp.abs(out - ref)))
    # bf16 matmul path + bf16 output vs f32 reference -> loosened tolerance.
    assert jnp.allclose(out, ref, atol=5e-2, rtol=5e-2), max_err
    print("KERNEL_OK")
</pallas_src>

<mosaic_0001>
module attributes {stable_mosaic.version = 11 : i64} {
  func.func @local_mhra_kernel(%arg0: i32, %arg1: i32, %arg2: memref<1x8x256x8xbf16, #tpu.memory_space<vmem>>, %arg3: memref<8x128xbf16, #tpu.memory_space<vmem>>, %arg4: memref<1x128xf32, #tpu.memory_space<vmem>>, %arg5: memref<3x128xf32, #tpu.memory_space<vmem>>, %arg6: memref<128x8xbf16, #tpu.memory_space<vmem>>, %arg7: memref<1x8xf32, #tpu.memory_space<vmem>>, %arg8: memref<1x8x256x8xbf16, #tpu.memory_space<vmem>>) attributes {dimension_semantics = [#tpu.dimension_semantics<parallel>, #tpu.dimension_semantics<parallel>], iteration_bounds = array<i64: 2, 1>, scalar_prefetch = 0 : i64, scratch_operands = 0 : i64, tpu.core_type = #tpu.core_type<tc>, window_params = [{transform_indices = @transform_0, window_bounds = array<i64: 1, 8, 256, 8>}, {pipeline_mode = #tpu.pipeline_mode<synchronous>, transform_indices = @transform_1, window_bounds = array<i64: 8, 128>}, {pipeline_mode = #tpu.pipeline_mode<synchronous>, transform_indices = @transform_2, window_bounds = array<i64: 1, 128>}, {pipeline_mode = #tpu.pipeline_mode<synchronous>, transform_indices = @transform_3, window_bounds = array<i64: 3, 128>}, {pipeline_mode = #tpu.pipeline_mode<synchronous>, transform_indices = @transform_4, window_bounds = array<i64: 128, 8>}, {pipeline_mode = #tpu.pipeline_mode<synchronous>, transform_indices = @transform_5, window_bounds = array<i64: 1, 8>}, {transform_indices = @transform_6, window_bounds = array<i64: 1, 8, 256, 8>}]} {
    %c0 = arith.constant 0 : index
    %c0_0 = arith.constant 0 : index
    %c0_1 = arith.constant 0 : index
    %c0_2 = arith.constant 0 : index
    %0 = vector.load %arg2[%c0, %c0_0, %c0_1, %c0_2] : memref<1x8x256x8xbf16, #tpu.memory_space<vmem>>, vector<1x8x256x8xbf16>
    %1 = vector.shape_cast %0 : vector<1x8x256x8xbf16> to vector<8x256x8xbf16>
    %2 = vector.shape_cast %1 : vector<8x256x8xbf16> to vector<2048x8xbf16>
    %c0_3 = arith.constant 0 : index
    %c0_4 = arith.constant 0 : index
    %3 = vector.load %arg3[%c0_3, %c0_4] : memref<8x128xbf16, #tpu.memory_space<vmem>>, vector<8x128xbf16>
    %cst = arith.constant dense<0.000000e+00> : vector<2048x128xf32>
    %4 = tpu.matmul %2, %3, %cst {dimension_numbers = #tpu.dot_dimension_numbers<[1], [0], [0], [1], [0, 0, 1, 1], [], []>} : vector<2048x8xbf16>, vector<8x128xbf16>, vector<2048x128xf32> -> vector<2048x128xf32>
    %c0_5 = arith.constant 0 : index
    %c0_6 = arith.constant 0 : index
    %5 = vector.load %arg4[%c0_5, %c0_6] : memref<1x128xf32, #tpu.memory_space<vmem>>, vector<1x128xf32>
    %6 = vector.broadcast %5 : vector<1x128xf32> to vector<2048x128xf32>
    %7 = arith.addf %4, %6 : vector<2048x128xf32>
    %c0_7 = arith.constant 0 : index
    %c0_8 = arith.constant 0 : index
    %8 = vector.load %arg5[%c0_7, %c0_8] : memref<3x128xf32, #tpu.memory_space<vmem>>, vector<3x128xf32>
    %9 = vector.extract_strided_slice %8 {offsets = [0, 0], sizes = [1, 128], strides = [1, 1]} : vector<3x128xf32> to vector<1x128xf32>
    %10 = vector.extract_strided_slice %8 {offsets = [1, 0], sizes = [1, 128], strides = [1, 1]} : vector<3x128xf32> to vector<1x128xf32>
    %11 = vector.extract_strided_slice %8 {offsets = [2, 0], sizes = [1, 128], strides = [1, 1]} : vector<3x128xf32> to vector<1x128xf32>
    %c0_9 = arith.constant 0 : index
    %c0_10 = arith.constant 0 : index
    %12 = vector.load %arg6[%c0_9, %c0_10] : memref<128x8xbf16, #tpu.memory_space<vmem>>, vector<128x8xbf16>
    %c0_11 = arith.constant 0 : index
    %c0_12 = arith.constant 0 : index
    %13 = vector.load %arg7[%c0_11, %c0_12] : memref<1x8xf32, #tpu.memory_space<vmem>>, vector<1x8xf32>
    %14 = vector.extract_strided_slice %7 {offsets = [0, 0], sizes = [256, 128], strides = [1, 1]} : vector<2048x128xf32> to vector<256x128xf32>
    %15 = vector.broadcast %10 : vector<1x128xf32> to vector<256x128xf32>
    %16 = arith.mulf %14, %15 : vector<256x128xf32>
    %17 = vector.extract_strided_slice %7 {offsets = [256, 0], sizes = [256, 128], strides = [1, 1]} : vector<2048x128xf32> to vector<256x128xf32>
    %18 = vector.broadcast %11 : vector<1x128xf32> to vector<256x128xf32>
    %19 = arith.mulf %17, %18 : vector<256x128xf32>
    %20 = arith.addf %16, %19 : vector<256x128xf32>
    %21 = arith.truncf %20 : vector<256x128xf32> to vector<256x128xbf16>
    %cst_13 = arith.constant dense<0.000000e+00> : vector<256x8xf32>
    %22 = tpu.matmul %21, %12, %cst_13 {dimension_numbers = #tpu.dot_dimension_numbers<[1], [0], [0], [1], [0, 0, 1, 1], [], []>} : vector<256x128xbf16>, vector<128x8xbf16>, vector<256x8xf32> -> vector<256x8xf32>
    %23 = vector.broadcast %13 : vector<1x8xf32> to vector<256x8xf32>
    %24 = arith.addf %22, %23 : vector<256x8xf32>
    %25 = arith.truncf %24 : vector<256x8xf32> to vector<256x8xbf16>
    %c0_14 = arith.constant 0 : index
    %c0_15 = arith.constant 0 : index
    %c0_16 = arith.constant 0 : index
    %c0_17 = arith.constant 0 : index
    %26 = vector.load %arg8[%c0_14, %c0_15, %c0_16, %c0_17] : memref<1x8x256x8xbf16, #tpu.memory_space<vmem>>, vector<1x1x256x8xbf16>
    %27 = vector.shape_cast %26 : vector<1x1x256x8xbf16> to vector<256x8xbf16>
    %28 = vector.shape_cast %25 : vector<256x8xbf16> to vector<1x1x256x8xbf16>
    tpu.vector_store %arg8[%c0_14, %c0_15, %c0_16, %c0_17], %28 {strides = array<i32>} : memref<1x8x256x8xbf16, #tpu.memory_space<vmem>>, vector<1x1x256x8xbf16>,
    %29 = vector.extract_strided_slice %7 {offsets = [256, 0], sizes = [256, 128], strides = [1, 1]} : vector<2048x128xf32> to vector<256x128xf32>
    %30 = vector.broadcast %10 : vector<1x128xf32> to vector<256x128xf32>
    %31 = arith.mulf %29, %30 : vector<256x128xf32>
    %32 = vector.extract_strided_slice %7 {offsets = [0, 0], sizes = [256, 128], strides = [1, 1]} : vector<2048x128xf32> to vector<256x128xf32>
    %33 = vector.broadcast %9 : vector<1x128xf32> to vector<256x128xf32>
    %34 = arith.mulf %32, %33 : vector<256x128xf32>
    %35 = arith.addf %31, %34 : vector<256x128xf32>
    %36 = vector.extract_strided_slice %7 {offsets = [512, 0], sizes = [256, 128], strides = [1, 1]} : vector<2048x128xf32> to vector<256x128xf32>
    %37 = vector.broadcast %11 : vector<1x128xf32> to vector<256x128xf32>
    %38 = arith.mulf %36, %37 : vector<256x128xf32>
    %39 = arith.addf %35, %38 : vector<256x128xf32>
    %40 = arith.truncf %39 : vector<256x128xf32> to vector<256x128xbf16>
    %cst_18 = arith.constant dense<0.000000e+00> : vector<256x8xf32>
    %41 = tpu.matmul %40, %12, %cst_18 {dimension_numbers = #tpu.dot_dimension_numbers<[1], [0], [0], [1], [0, 0, 1, 1], [], []>} : vector<256x128xbf16>, vector<128x8xbf16>, vector<256x8xf32> -> vector<256x8xf32>
    %42 = vector.broadcast %13 : vector<1x8xf32> to vector<256x8xf32>
    %43 = arith.addf %41, %42 : vector<256x8xf32>
    %44 = arith.truncf %43 : vector<256x8xf32> to vector<256x8xbf16>
    %c0_19 = arith.constant 0 : index
    %c1 = arith.constant 1 : index
    %c0_20 = arith.constant 0 : index
    %c0_21 = arith.constant 0 : index
    %45 = vector.load %arg8[%c0_19, %c1, %c0_20, %c0_21] : memref<1x8x256x8xbf16, #tpu.memory_space<vmem>>, vector<1x1x256x8xbf16>
    %46 = vector.shape_cast %45 : vector<1x1x256x8xbf16> to vector<256x8xbf16>
    %47 = vector.shape_cast %44 : vector<256x8xbf16> to vector<1x1x256x8xbf16>
    tpu.vector_store %arg8[%c0_19, %c1, %c0_20, %c0_21], %47 {strides = array<i32>} : memref<1x8x256x8xbf16, #tpu.memory_space<vmem>>, vector<1x1x256x8xbf16>,
    %48 = vector.extract_strided_slice %7 {offsets = [512, 0], sizes = [256, 128], strides = [1, 1]} : vector<2048x128xf32> to vector<256x128xf32>
    %49 = vector.broadcast %10 : vector<1x128xf32> to vector<256x128xf32>
    %50 = arith.mulf %48, %49 : vector<256x128xf32>
    %51 = vector.extract_strided_slice %7 {offsets = [256, 0], sizes = [256, 128], strides = [1, 1]} : vector<2048x128xf32> to vector<256x128xf32>
    %52 = vector.broadcast %9 : vector<1x128xf32> to vector<256x128xf32>
    %53 = arith.mulf %51, %52 : vector<256x128xf32>
    %54 = arith.addf %50, %53 : vector<256x128xf32>
    %55 = vector.extract_strided_slice %7 {offsets = [768, 0], sizes = [256, 128], strides = [1, 1]} : vector<2048x128xf32> to vector<256x128xf32>
    %56 = vector.broadcast %11 : vector<1x128xf32> to vector<256x128xf32>
    %57 = arith.mulf %55, %56 : vector<256x128xf32>
    %58 = arith.addf %54, %57 : vector<256x128xf32>
    %59 = arith.truncf %58 : vector<256x128xf32> to vector<256x128xbf16>
    %cst_22 = arith.constant dense<0.000000e+00> : vector<256x8xf32>
    %60 = tpu.matmul %59, %12, %cst_22 {dimension_numbers = #tpu.dot_dimension_numbers<[1], [0], [0], [1], [0, 0, 1, 1], [], []>} : vector<256x128xbf16>, vector<128x8xbf16>, vector<256x8xf32> -> vector<256x8xf32>
    %61 = vector.broadcast %13 : vector<1x8xf32> to vector<256x8xf32>
    %62 = arith.addf %60, %61 : vector<256x8xf32>
    %63 = arith.truncf %62 : vector<256x8xf32> to vector<256x8xbf16>
    %c0_23 = arith.constant 0 : index
    %c2 = arith.constant 2 : index
    %c0_24 = arith.constant 0 : index
    %c0_25 = arith.constant 0 : index
    %64 = vector.load %arg8[%c0_23, %c2, %c0_24, %c0_25] : memref<1x8x256x8xbf16, #tpu.memory_space<vmem>>, vector<1x1x256x8xbf16>
    %65 = vector.shape_cast %64 : vector<1x1x256x8xbf16> to vector<256x8xbf16>
    %66 = vector.shape_cast %63 : vector<256x8xbf16> to vector<1x1x256x8xbf16>
    tpu.vector_store %arg8[%c0_23, %c2, %c0_24, %c0_25], %66 {strides = array<i32>} : memref<1x8x256x8xbf16, #tpu.memory_space<vmem>>, vector<1x1x256x8xbf16>,
    %67 = vector.extract_strided_slice %7 {offsets = [768, 0], sizes = [256, 128], strides = [1, 1]} : vector<2048x128xf32> to vector<256x128xf32>
    %68 = vector.broadcast %10 : vector<1x128xf32> to vector<256x128xf32>
    %69 = arith.mulf %67, %68 : vector<256x128xf32>
    %70 = vector.extract_strided_slice %7 {offsets = [512, 0], sizes = [256, 128], strides = [1, 1]} : vector<2048x128xf32> to vector<256x128xf32>
    %71 = vector.broadcast %9 : vector<1x128xf32> to vector<256x128xf32>
    %72 = arith.mulf %70, %71 : vector<256x128xf32>
    %73 = arith.addf %69, %72 : vector<256x128xf32>
    %74 = vector.extract_strided_slice %7 {offsets = [1024, 0], sizes = [256, 128], strides = [1, 1]} : vector<2048x128xf32> to vector<256x128xf32>
    %75 = vector.broadcast %11 : vector<1x128xf32> to vector<256x128xf32>
    %76 = arith.mulf %74, %75 : vector<256x128xf32>
    %77 = arith.addf %73, %76 : vector<256x128xf32>
    %78 = arith.truncf %77 : vector<256x128xf32> to vector<256x128xbf16>
    %cst_26 = arith.constant dense<0.000000e+00> : vector<256x8xf32>
    %79 = tpu.matmul %78, %12, %cst_26 {dimension_numbers = #tpu.dot_dimension_numbers<[1], [0], [0], [1], [0, 0, 1, 1], [], []>} : vector<256x128xbf16>, vector<128x8xbf16>, vector<256x8xf32> -> vector<256x8xf32>
    %80 = vector.broadcast %13 : vector<1x8xf32> to vector<256x8xf32>
    %81 = arith.addf %79, %80 : vector<256x8xf32>
    %82 = arith.truncf %81 : vector<256x8xf32> to vector<256x8xbf16>
    %c0_27 = arith.constant 0 : index
    %c3 = arith.constant 3 : index
    %c0_28 = arith.constant 0 : index
    %c0_29 = arith.constant 0 : index
    %83 = vector.load %arg8[%c0_27, %c3, %c0_28, %c0_29] : memref<1x8x256x8xbf16, #tpu.memory_space<vmem>>, vector<1x1x256x8xbf16>
    %84 = vector.shape_cast %83 : vector<1x1x256x8xbf16> to vector<256x8xbf16>
    %85 = vector.shape_cast %82 : vector<256x8xbf16> to vector<1x1x256x8xbf16>
    tpu.vector_store %arg8[%c0_27, %c3, %c0_28, %c0_29], %85 {strides = array<i32>} : memref<1x8x256x8xbf16, #tpu.memory_space<vmem>>, vector<1x1x256x8xbf16>,
    %86 = vector.extract_strided_slice %7 {offsets = [1024, 0], sizes = [256, 128], strides = [1, 1]} : vector<2048x128xf32> to vector<256x128xf32>
    %87 = vector.broadcast %10 : vector<1x128xf32> to vector<256x128xf32>
    %88 = arith.mulf %86, %87 : vector<256x128xf32>
    %89 = vector.extract_strided_slice %7 {offsets = [768, 0], sizes = [256, 128], strides = [1, 1]} : vector<2048x128xf32> to vector<256x128xf32>
    %90 = vector.broadcast %9 : vector<1x128xf32> to vector<256x128xf32>
    %91 = arith.mulf %89, %90 : vector<256x128xf32>
    %92 = arith.addf %88, %91 : vector<256x128xf32>
    %93 = vector.extract_strided_slice %7 {offsets = [1280, 0], sizes = [256, 128], strides = [1, 1]} : vector<2048x128xf32> to vector<256x128xf32>
    %94 = vector.broadcast %11 : vector<1x128xf32> to vector<256x128xf32>
    %95 = arith.mulf %93, %94 : vector<256x128xf32>
    %96 = arith.addf %92, %95 : vector<256x128xf32>
    %97 = arith.truncf %96 : vector<256x128xf32> to vector<256x128xbf16>
    %cst_30 = arith.constant dense<0.000000e+00> : vector<256x8xf32>
    %98 = tpu.matmul %97, %12, %cst_30 {dimension_numbers = #tpu.dot_dimension_numbers<[1], [0], [0], [1], [0, 0, 1, 1], [], []>} : vector<256x128xbf16>, vector<128x8xbf16>, vector<256x8xf32> -> vector<256x8xf32>
    %99 = vector.broadcast %13 : vector<1x8xf32> to vector<256x8xf32>
    %100 = arith.addf %98, %99 : vector<256x8xf32>
    %101 = arith.truncf %100 : vector<256x8xf32> to vector<256x8xbf16>
    %c0_31 = arith.constant 0 : index
    %c4 = arith.constant 4 : index
    %c0_32 = arith.constant 0 : index
    %c0_33 = arith.constant 0 : index
    %102 = vector.load %arg8[%c0_31, %c4, %c0_32, %c0_33] : memref<1x8x256x8xbf16, #tpu.memory_space<vmem>>, vector<1x1x256x8xbf16>
    %103 = vector.shape_cast %102 : vector<1x1x256x8xbf16> to vector<256x8xbf16>
    %104 = vector.shape_cast %101 : vector<256x8xbf16> to vector<1x1x256x8xbf16>
    tpu.vector_store %arg8[%c0_31, %c4, %c0_32, %c0_33], %104 {strides = array<i32>} : memref<1x8x256x8xbf16, #tpu.memory_space<vmem>>, vector<1x1x256x8xbf16>,
    %105 = vector.extract_strided_slice %7 {offsets = [1280, 0], sizes = [256, 128], strides = [1, 1]} : vector<2048x128xf32> to vector<256x128xf32>
    %106 = vector.broadcast %10 : vector<1x128xf32> to vector<256x128xf32>
    %107 = arith.mulf %105, %106 : vector<256x128xf32>
    %108 = vector.extract_strided_slice %7 {offsets = [1024, 0], sizes = [256, 128], strides = [1, 1]} : vector<2048x128xf32> to vector<256x128xf32>
    %109 = vector.broadcast %9 : vector<1x128xf32> to vector<256x128xf32>
    %110 = arith.mulf %108, %109 : vector<256x128xf32>
    %111 = arith.addf %107, %110 : vector<256x128xf32>
    %112 = vector.extract_strided_slice %7 {offsets = [1536, 0], sizes = [256, 128], strides = [1, 1]} : vector<2048x128xf32> to vector<256x128xf32>
    %113 = vector.broadcast %11 : vector<1x128xf32> to vector<256x128xf32>
    %114 = arith.mulf %112, %113 : vector<256x128xf32>
    %115 = arith.addf %111, %114 : vector<256x128xf32>
    %116 = arith.truncf %115 : vector<256x128xf32> to vector<256x128xbf16>
    %cst_34 = arith.constant dense<0.000000e+00> : vector<256x8xf32>
    %117 = tpu.matmul %116, %12, %cst_34 {dimension_numbers = #tpu.dot_dimension_numbers<[1], [0], [0], [1], [0, 0, 1, 1], [], []>} : vector<256x128xbf16>, vector<128x8xbf16>, vector<256x8xf32> -> vector<256x8xf32>
    %118 = vector.broadcast %13 : vector<1x8xf32> to vector<256x8xf32>
    %119 = arith.addf %117, %118 : vector<256x8xf32>
    %120 = arith.truncf %119 : vector<256x8xf32> to vector<256x8xbf16>
    %c0_35 = arith.constant 0 : index
    %c5 = arith.constant 5 : index
    %c0_36 = arith.constant 0 : index
    %c0_37 = arith.constant 0 : index
    %121 = vector.load %arg8[%c0_35, %c5, %c0_36, %c0_37] : memref<1x8x256x8xbf16, #tpu.memory_space<vmem>>, vector<1x1x256x8xbf16>
    %122 = vector.shape_cast %121 : vector<1x1x256x8xbf16> to vector<256x8xbf16>
    %123 = vector.shape_cast %120 : vector<256x8xbf16> to vector<1x1x256x8xbf16>
    tpu.vector_store %arg8[%c0_35, %c5, %c0_36, %c0_37], %123 {strides = array<i32>} : memref<1x8x256x8xbf16, #tpu.memory_space<vmem>>, vector<1x1x256x8xbf16>,
    %124 = vector.extract_strided_slice %7 {offsets = [1536, 0], sizes = [256, 128], strides = [1, 1]} : vector<2048x128xf32> to vector<256x128xf32>
    %125 = vector.broadcast %10 : vector<1x128xf32> to vector<256x128xf32>
    %126 = arith.mulf %124, %125 : vector<256x128xf32>
    %127 = vector.extract_strided_slice %7 {offsets = [1280, 0], sizes = [256, 128], strides = [1, 1]} : vector<2048x128xf32> to vector<256x128xf32>
    %128 = vector.broadcast %9 : vector<1x128xf32> to vector<256x128xf32>
    %129 = arith.mulf %127, %128 : vector<256x128xf32>
    %130 = arith.addf %126, %129 : vector<256x128xf32>
    %131 = vector.extract_strided_slice %7 {offsets = [1792, 0], sizes = [256, 128], strides = [1, 1]} : vector<2048x128xf32> to vector<256x128xf32>
    %132 = vector.broadcast %11 : vector<1x128xf32> to vector<256x128xf32>
    %133 = arith.mulf %131, %132 : vector<256x128xf32>
    %134 = arith.addf %130, %133 : vector<256x128xf32>
    %135 = arith.truncf %134 : vector<256x128xf32> to vector<256x128xbf16>
    %cst_38 = arith.constant dense<0.000000e+00> : vector<256x8xf32>
    %136 = tpu.matmul %135, %12, %cst_38 {dimension_numbers = #tpu.dot_dimension_numbers<[1], [0], [0], [1], [0, 0, 1, 1], [], []>} : vector<256x128xbf16>, vector<128x8xbf16>, vector<256x8xf32> -> vector<256x8xf32>
    %137 = vector.broadcast %13 : vector<1x8xf32> to vector<256x8xf32>
    %138 = arith.addf %136, %137 : vector<256x8xf32>
    %139 = arith.truncf %138 : vector<256x8xf32> to vector<256x8xbf16>
    %c0_39 = arith.constant 0 : index
    %c6 = arith.constant 6 : index
    %c0_40 = arith.constant 0 : index
    %c0_41 = arith.constant 0 : index
    %140 = vector.load %arg8[%c0_39, %c6, %c0_40, %c0_41] : memref<1x8x256x8xbf16, #tpu.memory_space<vmem>>, vector<1x1x256x8xbf16>
    %141 = vector.shape_cast %140 : vector<1x1x256x8xbf16> to vector<256x8xbf16>
    %142 = vector.shape_cast %139 : vector<256x8xbf16> to vector<1x1x256x8xbf16>
    tpu.vector_store %arg8[%c0_39, %c6, %c0_40, %c0_41], %142 {strides = array<i32>} : memref<1x8x256x8xbf16, #tpu.memory_space<vmem>>, vector<1x1x256x8xbf16>,
    %143 = vector.extract_strided_slice %7 {offsets = [1792, 0], sizes = [256, 128], strides = [1, 1]} : vector<2048x128xf32> to vector<256x128xf32>
    %144 = vector.broadcast %10 : vector<1x128xf32> to vector<256x128xf32>
    %145 = arith.mulf %143, %144 : vector<256x128xf32>
    %146 = vector.extract_strided_slice %7 {offsets = [1536, 0], sizes = [256, 128], strides = [1, 1]} : vector<2048x128xf32> to vector<256x128xf32>
    %147 = vector.broadcast %9 : vector<1x128xf32> to vector<256x128xf32>
    %148 = arith.mulf %146, %147 : vector<256x128xf32>
    %149 = arith.addf %145, %148 : vector<256x128xf32>
    %150 = arith.truncf %149 : vector<256x128xf32> to vector<256x128xbf16>
    %cst_42 = arith.constant dense<0.000000e+00> : vector<256x8xf32>
    %151 = tpu.matmul %150, %12, %cst_42 {dimension_numbers = #tpu.dot_dimension_numbers<[1], [0], [0], [1], [0, 0, 1, 1], [], []>} : vector<256x128xbf16>, vector<128x8xbf16>, vector<256x8xf32> -> vector<256x8xf32>
    %152 = vector.broadcast %13 : vector<1x8xf32> to vector<256x8xf32>
    %153 = arith.addf %151, %152 : vector<256x8xf32>
    %154 = arith.truncf %153 : vector<256x8xf32> to vector<256x8xbf16>
    %c0_43 = arith.constant 0 : index
    %c7 = arith.constant 7 : index
    %c0_44 = arith.constant 0 : index
    %c0_45 = arith.constant 0 : index
    %155 = vector.load %arg8[%c0_43, %c7, %c0_44, %c0_45] : memref<1x8x256x8xbf16, #tpu.memory_space<vmem>>, vector<1x1x256x8xbf16>
    %156 = vector.shape_cast %155 : vector<1x1x256x8xbf16> to vector<256x8xbf16>
    %157 = vector.shape_cast %154 : vector<256x8xbf16> to vector<1x1x256x8xbf16>
    tpu.vector_store %arg8[%c0_43, %c7, %c0_44, %c0_45], %157 {strides = array<i32>} : memref<1x8x256x8xbf16, #tpu.memory_space<vmem>>, vector<1x1x256x8xbf16>,
    return
  }
  func.func @transform_0(%arg0: i32, %arg1: i32) -> (i32, i32, i32, i32) {
    %c0_i32 = arith.constant 0 : i32
    %c0_i32_0 = arith.constant 0 : i32
    %c0_i32_1 = arith.constant 0 : i32
    return %arg0, %c0_i32, %arg1, %c0_i32_0 : i32, i32, i32, i32
  }
  func.func @transform_1(%arg0: i32, %arg1: i32) -> (i32, i32) {
    %c0_i32 = arith.constant 0 : i32
    %c0_i32_0 = arith.constant 0 : i32
    %c0_i32_1 = arith.constant 0 : i32
    return %c0_i32, %c0_i32_0 : i32, i32
  }
  func.func @transform_2(%arg0: i32, %arg1: i32) -> (i32, i32) {
    %c0_i32 = arith.constant 0 : i32
    %c0_i32_0 = arith.constant 0 : i32
    %c0_i32_1 = arith.constant 0 : i32
    return %c0_i32, %c0_i32_0 : i32, i32
  }
  func.func @transform_3(%arg0: i32, %arg1: i32) -> (i32, i32) {
    %c0_i32 = arith.constant 0 : i32
    %c0_i32_0 = arith.constant 0 : i32
    %c0_i32_1 = arith.constant 0 : i32
    return %c0_i32, %c0_i32_0 : i32, i32
  }
  func.func @transform_4(%arg0: i32, %arg1: i32) -> (i32, i32) {
    %c0_i32 = arith.constant 0 : i32
    %c0_i32_0 = arith.constant 0 : i32
    %c0_i32_1 = arith.constant 0 : i32
    return %c0_i32, %c0_i32_0 : i32, i32
  }
  func.func @transform_5(%arg0: i32, %arg1: i32) -> (i32, i32) {
    %c0_i32 = arith.constant 0 : i32
    %c0_i32_0 = arith.constant 0 : i32
    %c0_i32_1 = arith.constant 0 : i32
    return %c0_i32, %c0_i32_0 : i32, i32
  }
  func.func @transform_6(%arg0: i32, %arg1: i32) -> (i32, i32, i32, i32) {
    %c0_i32 = arith.constant 0 : i32
    %c0_i32_0 = arith.constant 0 : i32
    %c0_i32_1 = arith.constant 0 : i32
    return %arg0, %c0_i32, %arg1, %c0_i32_0 : i32, i32, i32, i32
  }
}

</mosaic_0001>

<bundles_post_ra>
// kernel: tpu_custom_call.1
= control target key start
LH: loop header
LB: loop body
LE: loop exit
PB: predicated region body
PF: predicated region fallthrough
CT: control target
= control target key end

     0   :  { %s6052_s21 = smov 0   ;;  %s6054_s22 = smov 0   ;;  %s10442_s0 = inlined_call_operand.vmem [shape: bf16[2,8,256,8], index: 0, kind: input, shape index: {}]   ;;  %s10443_s1 = inlined_call_operand.vmem [shape: bf16[8,128], index: 1, kind: input, shape index: {}]   ;;  %s10444_s2 = inlined_call_operand.vmem [shape: f32[1,128], index: 2, kind: input, shape index: {}]   ;;  %s10445_s3 = inlined_call_operand.vmem [shape: f32[3,128], index: 3, kind: input, shape index: {}]   ;;  %s10446_s4 = inlined_call_operand.vmem [shape: bf16[128,8], index: 4, kind: input, shape index: {}]   ;;  %s10447_s5 = inlined_call_operand.vmem [shape: f32[1,8], index: 5, kind: input, shape index: {}]   ;;  %s10448_s6 = inlined_call_operand.vmem [shape: bf16[2,8,256,8], index: 6, kind: output, shape index: {}]  }
   0x1   :  { %s6056_s23 = smov 0  }
   0x2 LB: > { %s28_s24 = sadd.s32 1, %s6011_s22  ;;  %p4906_p0 = scmp.ge.s32.totalorder %s6015_s23, 1  ;;  %s6015_s23 = sphi %s6056_s23, %s16_s23   ;;  %s6011_s22 = sphi %s6054_s22, %s11572_s22   ;;  %s6007_s21 = sphi %s6052_s21, %s11571_s21  }
   0x3   : > { %p30_p1 = scmp.ge.s32.totalorder %s28_s24, 2  ;;  %p233_p2 = scmp.lt.s32.totalorder %s6015_s23, 3 }
   0x5   : > { %s11574_s24 = smov (%p30_p1, %s28_s24), 0  ;;  %p234_p3 = pnand %p4906_p0, %p233_p2 }
   0x7   : > { %237 = sbr.rel (%p234_p3) target bundleno = 1827 (0x723), region = 44 }
   0xc   : > { %v548_v0 = vld [vmem:[%s10443_s1] sm:$0xf]  ;;  %vm1578_vm0 = vcmask 1043456   ;;  %p272_p4 = scmp.lt.s32.totalorder %s6007_s21, 1  ;;  %vm1193_vm1 = vcmask 64512   ;;  %vm2535_vm2 = vcmask 60416  }
   0xd   : > { %v1580_v1 = vsel %vm1578_vm0, %v548_v0, 0 }
   0xe   : > { %1589 = vmatpush.bf16.msra.mxu0 %v1580_v1  ;;  %s11576_s21 = smov (!%p272_p4, %s6007_s21), 1  ;;  %5949 = vmatpush.bf16.msra.mxu3 %v1580_v1 }
   0xf   : > { %5947 = vmatpush.bf16.msra.mxu1 %v1580_v1  ;;  %5948 = vmatpush.bf16.msra.mxu2 %v1580_v1  ;;  %s5809_s27 = sshll.u32 %s11576_s21, 10 }
  0x10   : > { %s6081_s30 = scalar_lea.vmem %s10442_s0, %s5809_s27  ;;  %s6885_s13 = scalar_lea.vmem %s10448_s6, %s5809_s27 }
  0x11   : > { %v5811_v2 = vld [vmem:[%s6081_s30] sm:$0xff]  ;;  %v5812_v3 = vld [vmem:[%s6081_s30 + $0x8] sm:$0xff]  ;;  %v5813_v4 = vld [vmem:[%s6081_s30 + $0x10] sm:$0xff] }
  0x12   : > { %5423 = vmatmul.msk.bf16.vlgmr.msra.gmra.mxu0 %vm1193_vm1, %v5811_v2  ;;  %v5814_v5 = vld [vmem:[%s6081_s30 + $0x18] sm:$0xff]  ;;  %v5815_v6 = vld [vmem:[%s6081_s30 + $0x20] sm:$0xff]  ;;  %v5816_v7 = vld [vmem:[%s6081_s30 + $0x28] sm:$0xff] }
  0x13   : > { %v5906_v8 = vld [vmem:[%s6081_s30 + $0x2f8] sm:$0xff]  ;;  %v5817_v9 = vld [vmem:[%s6081_s30 + $0x30] sm:$0xff]  ;;  %v5907_v10 = vld [vmem:[%s6081_s30 + $0x300] sm:$0xff] }
  0x14   : > { %5518 = vmatmul.msk.bf16.vlgmr.msra.gmra.mxu3 %vm1193_vm1, %v5906_v8  ;;  %v5818_v11 = vld [vmem:[%s6081_s30 + $0x38] sm:$0xff]  ;;  %v5876_v12 = vld [vmem:[%s6081_s30 + $0x208] sm:$0xff]  ;;  %v5819_v14 = vld [vmem:[%s6081_s30 + $0x40] sm:$0xff] }
  0x15   : > { %5488 = vmatmul.msk.bf16.vlgmr.msra.gmra.mxu1 %vm1193_vm1, %v5876_v12  ;;  %v5908_v13 = vld [vmem:[%s6081_s30 + $0x308] sm:$0xff]  ;;  %v5877_v15 = vld [vmem:[%s6081_s30 + $0x210] sm:$0xff]  ;;  %v5878_v20 = vld [vmem:[%s6081_s30 + $0x218] sm:$0xff] }
  0x16   : > { %v5909_v18 = vld [vmem:[%s6081_s30 + $0x310] sm:$0xff]  ;;  %v5820_v19 = vld [vmem:[%s6081_s30 + $0x48] sm:$0xff]  ;;  %v5910_v23 = vld [vmem:[%s6081_s30 + $0x318] sm:$0xff] }
  0x17   : > { %v5821_v24 = vld [vmem:[%s6081_s30 + $0x50] sm:$0xff]  ;;  %v5879_v25 = vld [vmem:[%s6081_s30 + $0x220] sm:$0xff]  ;;  %v5822_v29 = vld [vmem:[%s6081_s30 + $0x58] sm:$0xff] }
  0x18   : > { %v5911_v28 = vld [vmem:[%s6081_s30 + $0x320] sm:$0xff]  ;;  %v5880_v30 = vld [vmem:[%s6081_s30 + $0x228] sm:$0xff]  ;;  %v5881_v35 = vld [vmem:[%s6081_s30 + $0x230] sm:$0xff] }
  0x19   : > { %v5912_v33 = vld [vmem:[%s6081_s30 + $0x328] sm:$0xff]  ;;  %v5823_v34 = vld [vmem:[%s6081_s30 + $0x60] sm:$0xff]  ;;  %v5913_v38 = vld [vmem:[%s6081_s30 + $0x330] sm:$0xff] }
  0x1a   : > { %v5824_v39 = vld [vmem:[%s6081_s30 + $0x68] sm:$0xff]  ;;  %v5882_v40 = vld [vmem:[%s6081_s30 + $0x238] sm:$0xff]  ;;  %v5825_v44 = vld [vmem:[%s6081_s30 + $0x70] sm:$0xff] }
  0x1b   : > { %v5914_v43 = vld [vmem:[%s6081_s30 + $0x338] sm:$0xff]  ;;  %v5883_v45 = vld [vmem:[%s6081_s30 + $0x240] sm:$0xff]  ;;  %v5884_v53 = vld [vmem:[%s6081_s30 + $0x248] sm:$0xff] }
  0x1c   : > { %v5915_v50 = vld [vmem:[%s6081_s30 + $0x340] sm:$0xff]  ;;  %v5826_v52 = vld [vmem:[%s6081_s30 + $0x78] sm:$0xff]  ;;  %v5916_v59 = vld [vmem:[%s6081_s30 + $0x348] sm:$0xff] }
  0x1d   : > { %v5827_v61 = vld [vmem:[%s6081_s30 + $0x80] sm:$0xff]  ;;  %v5885_v62 = vld [vmem:[%s6081_s30 + $0x250] sm:$0xff] }
  0x22   : > { %5424 = vmatmul.msk.bf16.gmra.mxu0 %vm1193_vm1, %v5812_v3 }
  0x24   : > { %5519 = vmatmul.msk.bf16.gmra.mxu3 %vm1193_vm1, %v5907_v10 }
  0x25   : > { %5489 = vmatmul.msk.bf16.gmra.mxu1 %vm1193_vm1, %v5877_v15  ;;  %v5829_v15 = vld [vmem:[%s6081_s30 + $0x90] sm:$0xff] }
  0x32   : > { %5425 = vmatmul.msk.bf16.gmra.mxu0 %vm1193_vm1, %v5813_v4  ;;  %v5917_v4 = vld [vmem:[%s6081_s30 + $0x350] sm:$0xff] }
  0x34   : > { %5520 = vmatmul.msk.bf16.gmra.mxu3 %vm1193_vm1, %v5908_v13  ;;  %v5918_v13 = vld [vmem:[%s6081_s30 + $0x358] sm:$0xff] }
  0x35   : > { %5490 = vmatmul.msk.bf16.gmra.mxu1 %vm1193_vm1, %v5878_v20 }
  0x42   : > { %5426 = vmatmul.msk.bf16.gmra.mxu0 %vm1193_vm1, %v5814_v5 }
  0x44   : > { %5521 = vmatmul.msk.bf16.gmra.mxu3 %vm1193_vm1, %v5909_v18  ;;  %v5887_v18 = vld [vmem:[%s6081_s30 + $0x260] sm:$0xff] }
  0x45   : > { %5491 = vmatmul.msk.bf16.gmra.mxu1 %vm1193_vm1, %v5879_v25 }
  0x52   : > { %5427 = vmatmul.msk.bf16.gmra.mxu0 %vm1193_vm1, %v5815_v6  ;;  %v5828_v6 = vld [vmem:[%s6081_s30 + $0x88] sm:$0xff] }
  0x54   : > { %5522 = vmatmul.msk.bf16.gmra.mxu3 %vm1193_vm1, %v5910_v23 }
  0x55   : > { %5492 = vmatmul.msk.bf16.gmra.mxu1 %vm1193_vm1, %v5880_v30  ;;  %v5830_v30 = vld [vmem:[%s6081_s30 + $0x98] sm:$0xff] }
  0x62   : > { %5428 = vmatmul.msk.bf16.gmra.mxu0 %vm1193_vm1, %v5816_v7  ;;  %v5886_v7 = vld [vmem:[%s6081_s30 + $0x258] sm:$0xff] }
  0x64   : > { %5523 = vmatmul.msk.bf16.gmra.mxu3 %vm1193_vm1, %v5911_v28  ;;  %v5919_v28 = vld [vmem:[%s6081_s30 + $0x360] sm:$0xff] }
  0x65   : > { %5493 = vmatmul.msk.bf16.gmra.mxu1 %vm1193_vm1, %v5881_v35 }
  0x72   : > { %5429 = vmatmul.msk.bf16.gmra.mxu0 %vm1193_vm1, %v5817_v9 }
  0x74   : > { %5524 = vmatmul.msk.bf16.gmra.mxu3 %vm1193_vm1, %v5912_v33  ;;  %v5888_v33 = vld [vmem:[%s6081_s30 + $0x268] sm:$0xff] }
  0x75   : > { %5494 = vmatmul.msk.bf16.gmra.mxu1 %vm1193_vm1, %v5882_v40 }
  0x82   : > { %5430 = vmatmul.msk.bf16.gmra.mxu0 %vm1193_vm1, %v5818_v11 }
  0x84   : > { %5525 = vmatmul.msk.bf16.gmra.mxu3 %vm1193_vm1, %v5913_v38 }
  0x85   : > { %5495 = vmatmul.msk.bf16.gmra.mxu1 %vm1193_vm1, %v5883_v45  ;;  %v5831_v45 = vld [vmem:[%s6081_s30 + $0xa0] sm:$0xff] }
  0x8f   : > { %v6109_v16 = vpop.f32.mrf.mxu0 }
  0x92   : > { %5431 = vmatmul.msk.bf16.gmra.mxu0 %vm1193_vm1, %v5819_v14  ;;  %v6181_v51 = vpop.f32.mrf.mxu1 }
  0x94   : > { %5526 = vmatmul.msk.bf16.gmra.mxu3 %vm1193_vm1, %v5914_v43  ;;  %v5920_v43 = vld [vmem:[%s6081_s30 + $0x368] sm:$0xff] }
  0x95   : > { %5496 = vmatmul.msk.bf16.gmra.mxu1 %vm1193_vm1, %v5884_v53 }
  0x97   : > { %v6113_v17 = vpop.f32.mrf.mxu0  ;;  %v6171_v47 = vpop.f32.mrf.mxu3 }
  0x9a   : > { %v6191_v56 = vpop.f32.mrf.mxu1 }
  0x9b   : > { %10710 = vst [vmem:[#allocation3_spill] sm:$0xff] %v6191_v56 }
  0x9f   : > { %v6119_v21 = vpop.f32.mrf.mxu0  ;;  %v6177_v49 = vpop.f32.mrf.mxu3 }
  0xa0   : > { %10709 = vst [vmem:[#allocation2_spill] sm:$0xff] %v6177_v49 }
  0xa2   : > { %5432 = vmatmul.msk.bf16.gmra.mxu0 %vm1193_vm1, %v5820_v19  ;;  %v6199_v60 = vpop.f32.mrf.mxu1 }
  0xa4   : > { %5527 = vmatmul.msk.bf16.gmra.mxu3 %vm1193_vm1, %v5915_v50  ;;  %v5889_v50 = vld [vmem:[%s6081_s30 + $0x270] sm:$0xff] }
  0xa5   : > { %5497 = vmatmul.msk.bf16.gmra.mxu1 %vm1193_vm1, %v5885_v62 }
  0xa7   : > { %v6123_v22 = vpop.f32.mrf.mxu0  ;;  %v6187_v55 = vpop.f32.mrf.mxu3 }
  0xaa   : > { %v6209_v1 = vpop.f32.mrf.mxu1 }
  0xab   : > { %10711 = vst [vmem:[#allocation4_spill] sm:$0xff] %v6209_v1  ;;  %v5834_v1 = vld [vmem:[%s6081_s30 + $0xb8] sm:$0xff] }
  0xaf   : > { %v6129_v26 = vpop.f32.mrf.mxu0  ;;  %v6195_v58 = vpop.f32.mrf.mxu3 }
  0xb2   : > { %5433 = vmatmul.msk.bf16.gmra.mxu0 %vm1193_vm1, %v5821_v24  ;;  %v6217_v5 = vpop.f32.mrf.mxu1 }
  0xb4   : > { %5528 = vmatmul.msk.bf16.gmra.mxu3 %vm1193_vm1, %v5916_v59 }
  0xb5   : > { %5498 = vmatmul.msk.bf16.gmra.mxu1 %vm1193_vm1, %v5886_v7  ;;  %v5832_v7 = vld [vmem:[%s6081_s30 + $0xa8] sm:$0xff] }
  0xb7   : > { %v6133_v27 = vpop.f32.mrf.mxu0  ;;  %v6205_v0 = vpop.f32.mrf.mxu3 }
  0xba   : > { %v6227_v10 = vpop.f32.mrf.mxu1 }
  0xbb   : > { %10712 = vst [vmem:[#allocation5_spill] sm:$0xff] %v6227_v10  ;;  %v6383_v10 = vld [vmem:[%s10446_s4] sm:$0xff] }
  0xbf   : > { %v6139_v31 = vpop.f32.mrf.mxu0  ;;  %v6213_v3 = vpop.f32.mrf.mxu3 }
  0xc2   : > { %5434 = vmatmul.msk.bf16.gmra.mxu0 %vm1193_vm1, %v5822_v29  ;;  %v6235_v14 = vpop.f32.mrf.mxu1 }
  0xc3   : > { %10713 = vst [vmem:[#allocation6_spill] sm:$0xff] %v6235_v14  ;;  %v5892_v14 = vld [vmem:[%s6081_s30 + $0x288] sm:$0xff] }
  0xc4   : > { %5529 = vmatmul.msk.bf16.gmra.mxu3 %vm1193_vm1, %v5917_v4  ;;  %v5921_v4 = vld [vmem:[%s6081_s30 + $0x370] sm:$0xff]  ;;  %5504 = vmatmul.msk.bf16.vlgmr.msra.gmra.mxu2 %vm1193_vm1, %v5892_v14 }
  0xc5   : > { %5499 = vmatmul.msk.bf16.gmra.mxu1 %vm1193_vm1, %v5887_v18 }
  0xc7   : > { %v6143_v32 = vpop.f32.mrf.mxu0  ;;  %v6223_v9 = vpop.f32.mrf.mxu3 }
  0xca   : > { %v6245_v23 = vpop.f32.mrf.mxu1 }
  0xcb   : > { %10714 = vst [vmem:[#allocation7_spill] sm:$0xff] %v6245_v23 }
  0xcf   : > { %v6149_v36 = vpop.f32.mrf.mxu0  ;;  %v6231_v12 = vpop.f32.mrf.mxu3 }
  0xd2   : > { %5435 = vmatmul.msk.bf16.gmra.mxu0 %vm1193_vm1, %v5823_v34  ;;  %v6253_v29 = vpop.f32.mrf.mxu1 }
  0xd3   : > { %10715 = vst [vmem:[#allocation8_spill] sm:$0xff] %v6253_v29 }
  0xd4   : > { %5530 = vmatmul.msk.bf16.gmra.mxu3 %vm1193_vm1, %v5918_v13  ;;  %v5890_v13 = vld [vmem:[%s6081_s30 + $0x278] sm:$0xff] }
  0xd5   : > { %5500 = vmatmul.msk.bf16.gmra.mxu1 %vm1193_vm1, %v5888_v33 }
  0xd7   : > { %v6153_v37 = vpop.f32.mrf.mxu0  ;;  %v6241_v20 = vpop.f32.mrf.mxu3 }
  0xda   : > { %v6263_v38 = vpop.f32.mrf.mxu1 }
  0xdb   : > { %10716 = vst [vmem:[#allocation9_spill] sm:$0xff] %v6263_v38  ;;  %v6350_v38 = vld [vmem:[%s10446_s4 + $0x18] sm:$0xff] }
  0xdf   : > { %v6159_v41 = vpop.f32.mrf.mxu0  ;;  %v6249_v25 = vpop.f32.mrf.mxu3 }
  0xe2   : > { %5436 = vmatmul.msk.bf16.gmra.mxu0 %vm1193_vm1, %v5824_v39 }
  0xe4   : > { %5531 = vmatmul.msk.bf16.gmra.mxu3 %vm1193_vm1, %v5919_v28  ;;  %v6300_v28 = vld [vmem:[%s10446_s4 + $0x38] sm:$0xff] }
  0xe5   : > { %5501 = vmatmul.msk.bf16.gmra.mxu1 %vm1193_vm1, %v5889_v50  ;;  %2745 = vmatpush.bf16.msrb.mxu2 %v6300_v28  ;;  %v6324_v50 = vld [vmem:[%s10446_s4 + $0x28] sm:$0xff] }
  0xe6   : > { %2414 = vmatpush.bf16.msrb.mxu1 %v6300_v28  ;;  %3075 = vmatpush.bf16.msrb.mxu3 %v6300_v28 }
  0xe7   : > { %v6163_v42 = vpop.f32.mrf.mxu0  ;;  %v6259_v35 = vpop.f32.mrf.mxu3 }
  0xef   : > { %v6169_v46 = vpop.f32.mrf.mxu0  ;;  %v6267_v40 = vpop.f32.mrf.mxu3 }
  0xf0   : > { %10718 = vst [vmem:[#allocation11_spill] sm:$0xff] %v6267_v40 }
  0xf2   : > { %5437 = vmatmul.msk.bf16.gmra.mxu0 %vm1193_vm1, %v5825_v44  ;;  %v6271_v44 = vpop.f32.mrf.mxu1 }
  0xf3   : > { %10719 = vst [vmem:[#allocation12_spill] sm:$0xff] %v6271_v44 }
  0xf4   : > { %5532 = vmatmul.msk.bf16.gmra.mxu3 %vm1193_vm1, %v5920_v43 }
  0xf5   : > { %5502 = vmatmul.msk.bf16.gmra.mxu1 %vm1193_vm1, %v5890_v13 }
  0xf7   : > { %v6175_v48 = vpop.f32.mrf.mxu0  ;;  %v6277_v53 = vpop.f32.mrf.mxu3 }
  0xf8   : > { %10721 = vst [vmem:[#allocation14_spill] sm:$0xff] %v6277_v53  ;;  %v5836_v53 = vld [vmem:[%s6081_s30 + $0xc8] sm:$0xff] }
  0xfa   : > { %v6281_v59 = vpop.f32.mrf.mxu1 }
  0xfb   : > { %10722 = vst [vmem:[#allocation15_spill] sm:$0xff] %v6281_v59 }
  0xff   : > { %v6185_v54 = vpop.f32.mrf.mxu0  ;;  %v6285_v62 = vpop.f32.mrf.mxu3 }
 0x100   : > { %10724 = vst [vmem:[#allocation17_spill] sm:$0xff] %v6285_v62 }
 0x102   : > { %5438 = vmatmul.msk.bf16.gmra.mxu0 %vm1193_vm1, %v5826_v52 }
 0x104   : > { %5533 = vmatmul.msk.bf16.gmra.mxu3 %vm1193_vm1, %v5921_v4  ;;  %v5922_v4 = vld [vmem:[%s6081_s30 + $0x378] sm:$0xff] }
 0x107   : > { %v6193_v57 = vpop.f32.mrf.mxu0  ;;  %v6295_v18 = vpop.f32.mrf.mxu3 }
 0x108   : > { %10727 = vst [vmem:[#allocation20_spill] sm:$0xff] %v6295_v18 }
 0x10f   : > { %v6203_v63 = vpop.f32.mrf.mxu0 }
 0x112   : > { %5439 = vmatmul.msk.bf16.gmra.mxu0 %vm1193_vm1, %v5827_v61 }
 0x114   : > { %5534 = vmatmul.msk.bf16.gmra.mxu3 %vm1193_vm1, %v5922_v4  ;;  %v6360_v4 = vld [vmem:[%s10446_s4 + $0x10] sm:$0xff] }
 0x117   : > { %v6211_v2 = vpop.f32.mrf.mxu0 }
 0x11f   : > { %v6221_v8 = vpop.f32.mrf.mxu0 }
 0x122   : > { %5440 = vmatmul.msk.bf16.gmra.mxu0 %vm1193_vm1, %v5828_v6  ;;  %v6289_v6 = vpop.f32.mrf.mxu1 }
 0x123   : > { %10725 = vst [vmem:[#allocation18_spill] sm:$0xff] %v6289_v6  ;;  %v2231_v6 = vld [vmem:[%s10445_s3] sm:$0x7] }
 0x124   : > { %v6432_v44 = vperm.slane %v2231_v6, 1 }
 0x127   : > { %v6229_v11 = vpop.f32.mrf.mxu0 }
 0x12a   : > { %v6312_v33 = vpop.f32.mrf.mxu1 }
 0x12b   : > { %10728 = vst [vmem:[#allocation21_spill] sm:$0xff] %v6312_v33  ;;  %v5833_v33 = vld [vmem:[%s6081_s30 + $0xb0] sm:$0xff] }
 0x12f   : > { %v6239_v19 = vpop.f32.mrf.mxu0 }
 0x132   : > { %5441 = vmatmul.msk.bf16.gmra.mxu0 %vm1193_vm1, %v5829_v15  ;;  %v6336_v13 = vpop.f32.mrf.mxu1 }
 0x133   : > { %10731 = vst [vmem:[#allocation24_spill] sm:$0xff] %v6336_v13 }
 0x137   : > { %v6247_v24 = vpop.f32.mrf.mxu0 }
 0x13a   : > { %v6362_v40 = vpop.f32.mrf.mxu1 }
 0x13b   : > { %10734 = vst [vmem:[#allocation27_spill] sm:$0xff] %v6362_v40  ;;  %v5923_v40 = vld [vmem:[%s6081_s30 + $0x380] sm:$0xff] }
 0x13c   : > { %5535 = vmatmul.msk.bf16.gmra.mxu3 %vm1193_vm1, %v5923_v40 }
 0x13f   : > { %v6257_v34 = vpop.f32.mrf.mxu0 }
 0x142   : > { %5442 = vmatmul.msk.bf16.gmra.mxu0 %vm1193_vm1, %v5830_v30  ;;  %v6309_v30 = vld [vmem:[%s10446_s4 + $0x30] sm:$0xff] }
 0x143   : > { %2415 = vmatpush.bf16.msrb.mxu1 %v6309_v30  ;;  %2746 = vmatpush.bf16.msrb.mxu2 %v6309_v30 }
 0x144   : > { %3076 = vmatpush.bf16.msrb.mxu3 %v6309_v30 }
 0x147   : > { %v6265_v39 = vpop.f32.mrf.mxu0  ;;  %2416 = vmatpush.bf16.msrb.mxu1 %v6324_v50  ;;  %2747 = vmatpush.bf16.msrb.mxu2 %v6324_v50 }
 0x148   : > { %10717 = vst [vmem:[#allocation10_spill] sm:$0xff] %v6265_v39  ;;  %3077 = vmatpush.bf16.msrb.mxu3 %v6324_v50 }
 0x14f   : > { %v6275_v52 = vpop.f32.mrf.mxu0 }
 0x150   : > { %10720 = vst [vmem:[#allocation13_spill] sm:$0xff] %v6275_v52 }
 0x152   : > { %5443 = vmatmul.msk.bf16.gmra.mxu0 %vm1193_vm1, %v5831_v45  ;;  %v6319_v45 = vpop.f32.mrf.mxu3 }
 0x153   : > { %10730 = vst [vmem:[#allocation23_spill] sm:$0xff] %v6319_v45  ;;  %v5891_v45 = vld [vmem:[%s6081_s30 + $0x280] sm:$0xff] }
 0x154   : > { %5503 = vmatmul.msk.bf16.gmra.mxu1 %vm1193_vm1, %v5891_v45 }
 0x157   : > { %v6283_v61 = vpop.f32.mrf.mxu0 }
 0x158   : > { %10723 = vst [vmem:[#allocation16_spill] sm:$0xff] %v6283_v61 }
 0x15a   : > { %v6345_v62 = vpop.f32.mrf.mxu3 }
 0x15b   : > { %10733 = vst [vmem:[#allocation26_spill] sm:$0xff] %v6345_v62 }
 0x15f   : > { %v6293_v15 = vpop.f32.mrf.mxu0 }
 0x160   : > { %10726 = vst [vmem:[#allocation19_spill] sm:$0xff] %v6293_v15 }
 0x162   : > { %5444 = vmatmul.msk.bf16.gmra.mxu0 %vm1193_vm1, %v5832_v7  ;;  %v6332_v7 = vld [vmem:[%s10446_s4 + $0x20] sm:$0xff]  ;;  %v6369_v23 = vpop.f32.mrf.mxu3 }
 0x163   : > { %2417 = vmatpush.bf16.msrb.mxu1 %v6332_v7  ;;  %2748 = vmatpush.bf16.msrb.mxu2 %v6332_v7  ;;  %10736 = vst [vmem:[#allocation29_spill] sm:$0xff] %v6369_v23  ;;  %v6386_v23 = vpop.f32.mrf.mxu1 }
 0x164   : > { %3078 = vmatpush.bf16.msrb.mxu3 %v6332_v7  ;;  %10737 = vst [vmem:[#allocation30_spill] sm:$0xff] %v6386_v23 }
 0x167   : > { %v6317_v43 = vpop.f32.mrf.mxu0  ;;  %2418 = vmatpush.bf16.msrb.mxu1 %v6350_v38  ;;  %2749 = vmatpush.bf16.msrb.mxu2 %v6350_v38 }
 0x168   : > { %10729 = vst [vmem:[#allocation22_spill] sm:$0xff] %v6317_v43  ;;  %3079 = vmatpush.bf16.msrb.mxu3 %v6350_v38 }
 0x16a   : > { %v6394_v49 = vpop.f32.mrf.mxu3 }
 0x16b   : > { %2419 = vmatpush.bf16.msrb.mxu1 %v6360_v4  ;;  %2750 = vmatpush.bf16.msrb.mxu2 %v6360_v4  ;;  %10739 = vst [vmem:[#allocation32_spill] sm:$0xff] %v6394_v49  ;;  %v6401_v40 = vpop.f32.mrf.mxu1  ;;  %v6412_v49 = vld [vmem:[%s10444_s2] ss:$0 sm:$0xff] }
 0x16c   : > { %3080 = vmatpush.bf16.msrb.mxu3 %v6360_v4  ;;  %10740 = vst [vmem:[#allocation33_spill] sm:$0xff] %v6401_v40  ;;  %v1599_v14 = vadd.f32 %v6412_v49, %v6123_v22 }
 0x16f   : > { %v6343_v59 = vpop.f32.mrf.mxu0 }
 0x170   : > { %10732 = vst [vmem:[#allocation25_spill] sm:$0xff] %v6343_v59 }
 0x172   : > { %5445 = vmatmul.msk.bf16.gmra.mxu0 %vm1193_vm1, %v5833_v33  ;;  %v6374_v33 = vld [vmem:[%s10446_s4 + $0x8] sm:$0xff]  ;;  %v6405_v13 = vpop.f32.mrf.mxu3 }
 0x173   : > { %2420 = vmatpush.bf16.msrb.mxu1 %v6374_v33  ;;  %2751 = vmatpush.bf16.msrb.mxu2 %v6374_v33  ;;  %10742 = vst [vmem:[#allocation35_spill] sm:$0xff] %v6405_v13  ;;  %v6421_v40 = vpop.f32.mrf.mxu1  ;;  %v1592_v13 = vadd.f32 %v6412_v49, %v6109_v16 }
 0x174   : > { %3081 = vmatpush.bf16.msrb.mxu3 %v6374_v33  ;;  %10743 = vst [vmem:[#allocation36_spill] sm:$0xff] %v6421_v40  ;;  %v6443_v40 = vperm.slane %v2231_v6, 2 }
 0x177   : > { %v6367_v45 = vpop.f32.mrf.mxu0  ;;  %2421 = vmatpush.bf16.msrb.mxu1 %v6383_v10  ;;  %2752 = vmatpush.bf16.msrb.mxu2 %v6383_v10 }
 0x178   : > { %10735 = vst [vmem:[#allocation28_spill] sm:$0xff] %v6367_v45  ;;  %3082 = vmatpush.bf16.msrb.mxu3 %v6383_v10 }
 0x17a   : > { %v6428_v62 = vpop.f32.mrf.mxu3 }
 0x17b   : > { %3405 = vmatpush.bf16.msra.mxu1 %v6300_v28  ;;  %10744 = vst [vmem:[#allocation37_spill] sm:$0xff] %v6428_v62  ;;  %v6447_v43 = vpop.f32.mrf.mxu1  ;;  %3735 = vmatpush.bf16.msra.mxu2 %v6300_v28 }
 0x17c   : > { %4065 = vmatpush.bf16.msra.mxu3 %v6300_v28  ;;  %10747 = vst [vmem:[#allocation40_spill] sm:$0xff] %v6447_v43 }
 0x17f   : > { %v6392_v56 = vpop.f32.mrf.mxu0  ;;  %3406 = vmatpush.bf16.msra.mxu1 %v6309_v30  ;;  %3736 = vmatpush.bf16.msra.mxu2 %v6309_v30 }
 0x180   : > { %10738 = vst [vmem:[#allocation31_spill] sm:$0xff] %v6392_v56  ;;  %4066 = vmatpush.bf16.msra.mxu3 %v6309_v30  ;;  %v5835_v56 = vld [vmem:[%s6081_s30 + $0xc0] sm:$0xff] }
 0x182   : > { %5446 = vmatmul.msk.bf16.gmra.mxu0 %vm1193_vm1, %v5834_v1  ;;  %v5924_v1 = vld [vmem:[%s6081_s30 + $0x388] sm:$0xff]  ;;  %v6451_v29 = vpop.f32.mrf.mxu3 }
 0x183   : > { %3407 = vmatpush.bf16.msra.mxu1 %v6324_v50  ;;  %5536 = vmatmul.msk.bf16.gmra.mxu3 %vm1193_vm1, %v5924_v1  ;;  %10748 = vst [vmem:[#allocation41_spill] sm:$0xff] %v6451_v29 }
 0x184   : > { %4067 = vmatpush.bf16.msra.mxu3 %v6324_v50  ;;  %3737 = vmatpush.bf16.msra.mxu2 %v6324_v50 }
 0x187   : > { %v6403_v23 = vpop.f32.mrf.mxu0  ;;  %3408 = vmatpush.bf16.msra.mxu1 %v6332_v7 }
 0x188   : > { %10741 = vst [vmem:[#allocation34_spill] sm:$0xff] %v6403_v23  ;;  %4068 = vmatpush.bf16.msra.mxu3 %v6332_v7  ;;  %v6425_v23 = vperm.slane %v2231_v6, 0  ;;  %3738 = vmatpush.bf16.msra.mxu2 %v6332_v7 }
 0x18a   : > { %v2601_v1 = vmul.f32 %v6425_v23, %v1592_v13  ;;  %v6479_v52 = vpop.f32.mrf.mxu3 }
 0x18b   : > { %3409 = vmatpush.bf16.msra.mxu1 %v6350_v38 }
 0x18c   : > { %4069 = vmatpush.bf16.msra.mxu3 %v6350_v38  ;;  %3739 = vmatpush.bf16.msra.mxu2 %v6350_v38 }
 0x18f   : > { %v1671_v45 = vpop.f32.mrf.mxu0  ;;  %3410 = vmatpush.bf16.msra.mxu1 %v6360_v4 }
 0x190   : > { %v6435_v59 = vadd.f32 %v6412_v49, %v1671_v45  ;;  %4070 = vmatpush.bf16.msra.mxu3 %v6360_v4  ;;  %v1594_v45 = vadd.f32 %v6412_v49, %v6113_v17  ;;  %3740 = vmatpush.bf16.msra.mxu2 %v6360_v4 }
 0x192   : > { %10745 = vst [vmem:[#allocation38_spill] sm:$0xff] %v6435_v59  ;;  %v2568_v16 = vmul.f32 %v6432_v44, %v6435_v59  ;;  %5447 = vmatmul.msk.bf16.gmra.mxu0 %vm1193_vm1, %v5835_v56  ;;  %v2283_v56 = vmul.f32 %v6443_v40, %v6435_v59  ;;  %v2602_v17 = vmul.f32 %v6425_v23, %v1594_v45 }
 0x193   : > { %3411 = vmatpush.bf16.msra.mxu1 %v6374_v33 }
 0x194   : > { %v6445_v62 = vadd.f32 %v2601_v1, %v2568_v16  ;;  %4071 = vmatpush.bf16.msra.mxu3 %v6374_v33  ;;  %v2250_v1 = vmul.f32 %v6432_v44, %v1592_v13  ;;  %v2251_v16 = vmul.f32 %v6432_v44, %v1594_v45  ;;  %v6473_v13 = vpop.f32.mrf.mxu1  ;;  %v1597_v45 = vadd.f32 %v6412_v49, %v6119_v21 }
 0x195   : > { %3741 = vmatpush.bf16.msra.mxu2 %v6374_v33 }
 0x196   : > { %10746 = vst [vmem:[#allocation39_spill] sm:$0xff] %v6445_v62  ;;  %v5925_v62 = vld [vmem:[%s6081_s30 + $0x390] sm:$0xff] }
 0x197   : > { %v1673_v18 = vpop.f32.mrf.mxu0  ;;  %3412 = vmatpush.bf16.msra.mxu1 %v6383_v10  ;;  %5537 = vmatmul.msk.bf16.gmra.mxu3 %vm1193_vm1, %v5925_v62 }
 0x198   : > { %v6458_v6 = vadd.f32 %v6412_v49, %v1673_v18  ;;  %4072 = vmatpush.bf16.msra.mxu3 %v6383_v10  ;;  %v2315_v18 = vadd.f32 %v2283_v56, %v2250_v1  ;;  %v5926_v1 = vld [vmem:[%s6081_s30 + $0x398] sm:$0xff] }
 0x199   : > { %3742 = vmatpush.bf16.msra.mxu2 %v6383_v10 }
 0x19a   : > { %10749 = vst [vmem:[#allocation42_spill] sm:$0xff] %v6458_v6  ;;  %v2284_v43 = vmul.f32 %v6443_v40, %v6458_v6  ;;  %v2569_v29 = vmul.f32 %v6432_v44, %v6458_v6 }
 0x19c   : > { %v2316_v59 = vadd.f32 %v2284_v43, %v2251_v16  ;;  %v6470_v15 = vadd.f32 %v2602_v17, %v2569_v29  ;;  %v2603_v29 = vmul.f32 %v6425_v23, %v1597_v45  ;;  %v6499_v43 = vpop.f32.mrf.mxu3  ;;  %v2604_v16 = vmul.f32 %v6425_v23, %v1599_v14 }
 0x19d   : > { %10751 = vst [vmem:[#allocation44_spill] sm:$0xff] %v6499_v43  ;;  %v5893_v43 = vld [vmem:[%s6081_s30 + $0x290] sm:$0xff] }
 0x19e   : > { %v2347_v61 = vpack.c.bf16 %v2316_v59, %v2315_v18  ;;  %v6493_v59 = vpop.f32.mrf.mxu1  ;;  %5505 = vmatmul.msk.bf16.gmra.mxu2 %vm1193_vm1, %v5893_v43  ;;  %v1604_v43 = vadd.f32 %v6412_v49, %v6133_v27 }
 0x19f   : > { %v1676_v6 = vpop.f32.mrf.mxu0  ;;  %10750 = vst [vmem:[#allocation43_spill] sm:$0xff] %v6493_v59  ;;  %v5837_v59 = vld [vmem:[%s6081_s30 + $0xd0] sm:$0xff] }
 0x1a0   : > { %v6482_v39 = vadd.f32 %v6412_v49, %v1676_v6  ;;  %2422 = vmatmul.bf16.vlgmr.msrb.gmra.mxu1 %v2347_v61  ;;  %v2253_v6 = vmul.f32 %v6432_v44, %v1599_v14 }
 0x1a1   : > { %4395 = vmatpush.bf16.msrb.mxu1 %v6300_v28  ;;  %v2252_v28 = vmul.f32 %v6432_v44, %v1597_v45 }
 0x1a2   : > { %v2570_v62 = vmul.f32 %v6432_v44, %v6482_v39  ;;  %5448 = vmatmul.msk.bf16.gmra.mxu0 %vm1193_vm1, %v5836_v53  ;;  %v2285_v53 = vmul.f32 %v6443_v40, %v6482_v39 }
 0x1a4   : > { %v6491_v21 = vadd.f32 %v2603_v29, %v2570_v62  ;;  %v2317_v17 = vadd.f32 %v2285_v53, %v2252_v28  ;;  %v1602_v62 = vadd.f32 %v6412_v49, %v6129_v26  ;;  %v6527_v14 = vpop.f32.mrf.mxu3 }
 0x1a5   : > { %4396 = vmatpush.bf16.msrb.mxu1 %v6309_v30 }
 0x1a6   : > { %v6517_v29 = vpop.f32.mrf.mxu1  ;;  %v2605_v28 = vmul.f32 %v6425_v23, %v1602_v62 }
 0x1a7   : > { %v1678_v61 = vpop.f32.mrf.mxu0  ;;  %5538 = vmatmul.msk.bf16.gmra.mxu3 %vm1193_vm1, %v5926_v1  ;;  %10752 = vst [vmem:[#allocation45_spill] sm:$0xff] %v6517_v29  ;;  %v5895_v29 = vld [vmem:[%s6081_s30 + $0x2a0] sm:$0xff] }
 0x1a8   : > { %v6504_v56 = vadd.f32 %v6412_v49, %v1678_v61 }
 0x1a9   : > { %4397 = vmatpush.bf16.msrb.mxu1 %v6324_v50 }
 0x1aa   : > { %v2286_v22 = vmul.f32 %v6443_v40, %v6504_v56  ;;  %v2571_v30 = vmul.f32 %v6432_v44, %v6504_v56 }
 0x1ac   : > { %v2318_v18 = vadd.f32 %v2286_v22, %v2253_v6  ;;  %v6519_v45 = vadd.f32 %v2604_v16, %v2571_v30  ;;  %v6547_v30 = vpop.f32.mrf.mxu3  ;;  %v2255_v16 = vmul.f32 %v6432_v44, %v1604_v43 }
 0x1ad   : > { %4398 = vmatpush.bf16.msrb.mxu1 %v6332_v7  ;;  %10754 = vst [vmem:[#allocation47_spill] sm:$0xff] %v6547_v30  ;;  %v5894_v30 = vld [vmem:[%s6081_s30 + $0x298] sm:$0xff] }
 0x1ae   : > { %v2348_v61 = vpack.c.bf16 %v2318_v18, %v2317_v17  ;;  %v6541_v6 = vpop.f32.mrf.mxu1  ;;  %v5927_v17 = vld [vmem:[%s6081_s30 + $0x3a0] sm:$0xff]  ;;  %v2606_v18 = vmul.f32 %v6425_v23, %v1604_v43  ;;  %5506 = vmatmul.msk.bf16.gmra.mxu2 %vm1193_vm1, %v5894_v30 }
 0x1af   : > { %v1681_v50 = vpop.f32.mrf.mxu0  ;;  %10753 = vst [vmem:[#allocation46_spill] sm:$0xff] %v6541_v6  ;;  %v5838_v6 = vld [vmem:[%s6081_s30 + $0xd8] sm:$0xff] }
 0x1b0   : > { %v6530_v53 = vadd.f32 %v6412_v49, %v1681_v50  ;;  %2427 = vmatmul.bf16.gmra.mxu1 %v2348_v61 }
 0x1b1   : > { %4399 = vmatpush.bf16.msrb.mxu1 %v6350_v38  ;;  %v2254_v38 = vmul.f32 %v6432_v44, %v1602_v62 }
 0x1b2   : > { %v2572_v26 = vmul.f32 %v6432_v44, %v6530_v53  ;;  %5449 = vmatmul.msk.bf16.gmra.mxu0 %vm1193_vm1, %v5837_v59  ;;  %v2287_v59 = vmul.f32 %v6443_v40, %v6530_v53 }
 0x1b4   : > { %v6539_v7 = vadd.f32 %v2605_v28, %v2572_v26  ;;  %v2319_v61 = vadd.f32 %v2287_v59, %v2254_v38  ;;  %v1607_v26 = vadd.f32 %v6412_v49, %v6139_v31  ;;  %v6575_v43 = vpop.f32.mrf.mxu3 }
 0x1b5   : > { %4400 = vmatpush.bf16.msrb.mxu1 %v6360_v4  ;;  %10756 = vst [vmem:[#allocation49_spill] sm:$0xff] %v6575_v43 }
 0x1b6   : > { %v6565_v28 = vpop.f32.mrf.mxu1  ;;  %v2607_v38 = vmul.f32 %v6425_v23, %v1607_v26 }
 0x1b7   : > { %v1683_v22 = vpop.f32.mrf.mxu0  ;;  %5539 = vmatmul.msk.bf16.gmra.mxu3 %vm1193_vm1, %v5927_v17  ;;  %10755 = vst [vmem:[#allocation48_spill] sm:$0xff] %v6565_v28  ;;  %v5839_v28 = vld [vmem:[%s6081_s30 + $0xe0] sm:$0xff] }
 0x1b8   : > { %v6552_v1 = vadd.f32 %v6412_v49, %v1683_v22 }
 0x1b9   : > { %4401 = vmatpush.bf16.msrb.mxu1 %v6374_v33 }
 0x1ba   : > { %v2288_v27 = vmul.f32 %v6443_v40, %v6552_v1  ;;  %v2573_v4 = vmul.f32 %v6432_v44, %v6552_v1 }
 0x1bc   : > { %v2320_v50 = vadd.f32 %v2288_v27, %v2255_v16  ;;  %v6567_v62 = vadd.f32 %v2606_v18, %v2573_v4  ;;  %v1609_v27 = vadd.f32 %v6412_v49, %v6143_v32  ;;  %v6591_v17 = vpop.f32.mrf.mxu3 }
 0x1bd   : > { %4402 = vmatpush.bf16.msrb.mxu1 %v6383_v10  ;;  %10759 = vst [vmem:[#allocation52_spill] sm:$0xff] %v6591_v17 }
 0x1be   : > { %v2349_v22 = vpack.c.bf16 %v2320_v50, %v2319_v61  ;;  %v6587_v10 = vpop.f32.mrf.mxu1  ;;  %v2257_v61 = vmul.f32 %v6432_v44, %v1609_v27  ;;  %5507 = vmatmul.msk.bf16.gmra.mxu2 %vm1193_vm1, %v5895_v29 }
 0x1bf   : > { %v1686_v33 = vpop.f32.mrf.mxu0  ;;  %10758 = vst [vmem:[#allocation51_spill] sm:$0xff] %v6587_v10 }
 0x1c0   : > { %v6578_v59 = vadd.f32 %v6412_v49, %v1686_v33  ;;  %2432 = vmatmul.bf16.gmra.mxu1 %v2349_v22  ;;  %v5928_v22 = vld [vmem:[%s6081_s30 + $0x3a8] sm:$0xff]  ;;  %v2608_v33 = vmul.f32 %v6425_v23, %v1609_v27 }
 0x1c2   : > { %v2574_v31 = vmul.f32 %v6432_v44, %v6578_v59  ;;  %5450 = vmatmul.msk.bf16.gmra.mxu0 %vm1193_vm1, %v5838_v6  ;;  %v2289_v30 = vmul.f32 %v6443_v40, %v6578_v59  ;;  %v2256_v6 = vmul.f32 %v6432_v44, %v1607_v26  ;;  %v1612_v26 = vadd.f32 %v6412_v49, %v6149_v36 }
 0x1c4   : > { %v6585_v16 = vadd.f32 %v2607_v38, %v2574_v31  ;;  %v2321_v38 = vadd.f32 %v2289_v30, %v2256_v6  ;;  %v6615_v43 = vpop.f32.mrf.mxu3  ;;  %v2609_v27 = vmul.f32 %v6425_v23, %v1612_v26 }
 0x1c6   : > { %10757 = vst [vmem:[#allocation50_spill] sm:$0xff] %v6585_v16  ;;  %v6607_v10 = vpop.f32.mrf.mxu1 }
 0x1c7   : > { %v1688_v4 = vpop.f32.mrf.mxu0  ;;  %5540 = vmatmul.msk.bf16.gmra.mxu3 %vm1193_vm1, %v5928_v22  ;;  %10761 = vst [vmem:[#allocation54_spill] sm:$0xff] %v6607_v10  ;;  %v6642_v22 = vadd.f32 %v6412_v49, %v6171_v47  ;;  %v1617_v47 = vadd.f32 %v6412_v49, %v6159_v41  ;;  %v5840_v10 = vld [vmem:[%s6081_s30 + $0xe8] sm:$0xff] }
 0x1c8   : > { %v6596_v18 = vadd.f32 %v6412_v49, %v1688_v4 }
 0x1c9   : > { %10766 = vst [vmem:[#allocation59_spill] sm:$0xff] %v6642_v22  ;;  %v2611_v41 = vmul.f32 %v6425_v23, %v1617_v47 }
 0x1ca   : > { %10760 = vst [vmem:[#allocation53_spill] sm:$0xff] %v6596_v18  ;;  %v2290_v50 = vmul.f32 %v6443_v40, %v6596_v18  ;;  %v2575_v32 = vmul.f32 %v6432_v44, %v6596_v18 }
 0x1cc   : > { %v2322_v31 = vadd.f32 %v2290_v50, %v2257_v61  ;;  %v6609_v4 = vadd.f32 %v2608_v33, %v2575_v32  ;;  %v1614_v61 = vadd.f32 %v6412_v49, %v6153_v37  ;;  %v6631_v50 = vpop.f32.mrf.mxu3  ;;  %v2258_v32 = vmul.f32 %v6432_v44, %v1612_v26 }
 0x1cd   : > { %10764 = vst [vmem:[#allocation57_spill] sm:$0xff] %v6631_v50 }
 0x1ce   : > { %v2350_v17 = vpack.c.bf16 %v2322_v31, %v2321_v38  ;;  %v6627_v6 = vpop.f32.mrf.mxu1  ;;  %v5929_v38 = vld [vmem:[%s6081_s30 + $0x3b0] sm:$0xff]  ;;  %v2610_v31 = vmul.f32 %v6425_v23, %v1614_v61 }
 0x1cf   : > { %v1691_v16 = vpop.f32.mrf.mxu0  ;;  %10763 = vst [vmem:[#allocation56_spill] sm:$0xff] %v6627_v6  ;;  %v3919_v6 = vmul.f32 %v6432_v44, %v6642_v22  ;;  %v5897_v22 = vld [vmem:[%s6081_s30 + $0x2b0] sm:$0xff] }
 0x1d0   : > { %v6618_v18 = vadd.f32 %v6412_v49, %v1691_v16  ;;  %2437 = vmatmul.bf16.gmra.mxu1 %v2350_v17 }
 0x1d2   : > { %v2576_v30 = vmul.f32 %v6432_v44, %v6618_v18  ;;  %5451 = vmatmul.msk.bf16.gmra.mxu0 %vm1193_vm1, %v5839_v28  ;;  %v2291_v29 = vmul.f32 %v6443_v40, %v6618_v18  ;;  %v2259_v28 = vmul.f32 %v6432_v44, %v1614_v61 }
 0x1d4   : > { %v6625_v36 = vadd.f32 %v2609_v27, %v2576_v30  ;;  %v2323_v27 = vadd.f32 %v2291_v29, %v2258_v32  ;;  %v6662_v29 = vpop.f32.mrf.mxu3 }
 0x1d5   : > { %10768 = vst [vmem:[#allocation61_spill] sm:$0xff] %v6662_v29 }
 0x1d6   : > { %10762 = vst [vmem:[#allocation55_spill] sm:$0xff] %v6625_v36  ;;  %v1986_v26 = vpop.f32.mrf.mxu1 }
 0x1d7   : > { %v1693_v16 = vpop.f32.mrf.mxu0  ;;  %5541 = vmatmul.msk.bf16.gmra.mxu3 %vm1193_vm1, %v5929_v38  ;;  %v6659_v36 = vadd.f32 %v6412_v49, %v1986_v26 }
 0x1d8   : > { %v6636_v17 = vadd.f32 %v6412_v49, %v1693_v16 }
 0x1d9   : > { %10767 = vst [vmem:[#allocation60_spill] sm:$0xff] %v6659_v36 }
 0x1da   : > { %10765 = vst [vmem:[#allocation58_spill] sm:$0xff] %v6636_v17  ;;  %v2292_v37 = vmul.f32 %v6443_v40, %v6636_v17  ;;  %v2577_v33 = vmul.f32 %v6432_v44, %v6636_v17  ;;  %v5896_v17 = vld [vmem:[%s6081_s30 + $0x2a8] sm:$0xff] }
 0x1db   : > { %5508 = vmatmul.msk.bf16.gmra.mxu2 %vm1193_vm1, %v5896_v17 }
 0x1dc   : > { %v2324_v30 = vadd.f32 %v2292_v37, %v2259_v28  ;;  %v6651_v16 = vadd.f32 %v2610_v31, %v2577_v33  ;;  %v3951_v28 = vmul.f32 %v6425_v23, %v6659_v36 }
 0x1de   : > { %v2351_v50 = vpack.c.bf16 %v2324_v30, %v2323_v27  ;;  %v6674_v33 = vadd.f32 %v3951_v28, %v3919_v6  ;;  %v6680_v27 = vpop.f32.mrf.mxu3 }
 0x1df   : > { %v1696_v61 = vpop.f32.mrf.mxu0  ;;  %10771 = vst [vmem:[#allocation64_spill] sm:$0xff] %v6680_v27  ;;  %v5841_v27 = vld [vmem:[%s6081_s30 + $0xf0] sm:$0xff] }
 0x1e0   : > { %v6665_v32 = vadd.f32 %v6412_v49, %v1696_v61  ;;  %2442 = vmatmul.bf16.gmra.mxu1 %v2351_v50  ;;  %10769 = vst [vmem:[#allocation62_spill] sm:$0xff] %v6674_v33  ;;  %v1619_v50 = vadd.f32 %v6412_v49, %v6163_v42  ;;  %v5930_v61 = vld [vmem:[%s6081_s30 + $0x3b8] sm:$0xff]  ;;  %v6701_v33 = vpop.f32.mrf.mxu1 }
 0x1e1   : > { %10774 = vst [vmem:[#allocation67_spill] sm:$0xff] %v6701_v33 }
 0x1e2   : > { %v2578_v37 = vmul.f32 %v6432_v44, %v6665_v32  ;;  %5452 = vmatmul.msk.bf16.gmra.mxu0 %vm1193_vm1, %v5840_v10  ;;  %v2293_v17 = vmul.f32 %v6443_v40, %v6665_v32  ;;  %v2260_v10 = vmul.f32 %v6432_v44, %v1617_v47  ;;  %v2261_v6 = vmul.f32 %v6432_v44, %v1619_v50 }
 0x1e3   : > { %v2612_v28 = vmul.f32 %v6425_v23, %v1619_v50  ;;  %v1622_v47 = vadd.f32 %v6412_v49, %v6169_v46 }
 0x1e4   : > { %v6676_v38 = vadd.f32 %v2611_v41, %v2578_v37  ;;  %v2325_v41 = vadd.f32 %v2293_v17, %v2260_v10  ;;  %v1624_v10 = vadd.f32 %v6412_v49, %v6175_v48 }
 0x1e5   : > { %v2613_v50 = vmul.f32 %v6425_v23, %v1622_v47 }
 0x1e6   : > { %10770 = vst [vmem:[#allocation63_spill] sm:$0xff] %v6676_v38  ;;  %v6704_v29 = vpop.f32.mrf.mxu3 }
 0x1e7   : > { %v1698_v31 = vpop.f32.mrf.mxu0  ;;  %5542 = vmatmul.msk.bf16.gmra.mxu3 %vm1193_vm1, %v5930_v61  ;;  %v2262_v61 = vmul.f32 %v6432_v44, %v1622_v47 }
 0x1e8   : > { %v6685_v30 = vadd.f32 %v6412_v49, %v1698_v31 }
 0x1ea   : > { %10772 = vst [vmem:[#allocation65_spill] sm:$0xff] %v6685_v30  ;;  %v2294_v26 = vmul.f32 %v6443_v40, %v6685_v30  ;;  %v2579_v42 = vmul.f32 %v6432_v44, %v6685_v30 }
 0x1eb   : > { %5509 = vmatmul.msk.bf16.gmra.mxu2 %vm1193_vm1, %v5897_v22 }
 0x1ec   : > { %v2326_v37 = vadd.f32 %v2294_v26, %v2261_v6  ;;  %v6696_v36 = vadd.f32 %v2612_v28, %v2579_v42  ;;  %v1991_v42 = vpop.f32.mrf.mxu1 }
 0x1ee   : > { %10773 = vst [vmem:[#allocation66_spill] sm:$0xff] %v6696_v36  ;;  %v2352_v31 = vpack.c.bf16 %v2326_v37, %v2325_v41  ;;  %v6718_v26 = vpop.f32.mrf.mxu3  ;;  %v5931_v41 = vld [vmem:[%s6081_s30 + $0x3c0] sm:$0xff]  ;;  %v2614_v37 = vmul.f32 %v6425_v23, %v1624_v10 }
 0x1ef   : > { %v1701_v38 = vpop.f32.mrf.mxu0  ;;  %10777 = vst [vmem:[#allocation70_spill] sm:$0xff] %v6718_v26  ;;  %v5842_v26 = vld [vmem:[%s6081_s30 + $0xf8] sm:$0xff]  ;;  %v5843_v36 = vld [vmem:[%s6081_s30 + $0x100] sm:$0xff] }
 0x1f0   : > { %v6707_v30 = vadd.f32 %v6412_v49, %v1701_v38  ;;  %2447 = vmatmul.bf16.gmra.mxu1 %v2352_v31  ;;  %v6735_v31 = vadd.f32 %v6412_v49, %v6187_v55 }
 0x1f2   : > { %10775 = vst [vmem:[#allocation68_spill] sm:$0xff] %v6707_v30  ;;  %v2580_v46 = vmul.f32 %v6432_v44, %v6707_v30  ;;  %5453 = vmatmul.msk.bf16.gmra.mxu0 %vm1193_vm1, %v5841_v27  ;;  %v2295_v38 = vmul.f32 %v6443_v40, %v6707_v30  ;;  %v2263_v27 = vmul.f32 %v6432_v44, %v1624_v10  ;;  %v5898_v30 = vld [vmem:[%s6081_s30 + $0x2b8] sm:$0xff] }
 0x1f3   : > { %10779 = vst [vmem:[#allocation72_spill] sm:$0xff] %v6735_v31  ;;  %v4219_v55 = vmul.f32 %v6432_v44, %v6735_v31 }
 0x1f4   : > { %v6714_v17 = vadd.f32 %v2613_v50, %v2580_v46  ;;  %v2327_v50 = vadd.f32 %v2295_v38, %v2262_v61 }
 0x1f6   : > { %10776 = vst [vmem:[#allocation69_spill] sm:$0xff] %v6714_v17  ;;  %v1627_v17 = vadd.f32 %v6412_v49, %v6185_v54  ;;  %v2151_v33 = vpop.f32.mrf.mxu3 }
 0x1f7   : > { %v1703_v6 = vpop.f32.mrf.mxu0  ;;  %5543 = vmatmul.msk.bf16.gmra.mxu3 %vm1193_vm1, %v5931_v41 }
 0x1f8   : > { %v6723_v22 = vadd.f32 %v6412_v49, %v1703_v6  ;;  %v6738_v6 = vadd.f32 %v6412_v49, %v1991_v42  ;;  %v2615_v61 = vmul.f32 %v6425_v23, %v1627_v17 }
 0x1fa   : > { %10778 = vst [vmem:[#allocation71_spill] sm:$0xff] %v6723_v22  ;;  %v2296_v28 = vmul.f32 %v6443_v40, %v6723_v22  ;;  %v2581_v48 = vmul.f32 %v6432_v44, %v6723_v22  ;;  %v4251_v42 = vmul.f32 %v6425_v23, %v6738_v6 }
 0x1fb   : > { %10780 = vst [vmem:[#allocation73_spill] sm:$0xff] %v6738_v6  ;;  %5510 = vmatmul.msk.bf16.gmra.mxu2 %vm1193_vm1, %v5898_v30  ;;  %v2152_v30 = vadd.f32 %v6412_v49, %v2151_v33 }
 0x1fc   : > { %v2328_v46 = vadd.f32 %v2296_v28, %v2263_v27  ;;  %v6741_v47 = vadd.f32 %v2614_v37, %v2581_v48  ;;  %v1993_v27 = vpop.f32.mrf.mxu1  ;;  %v6761_v28 = vadd.f32 %v6412_v49, %v6195_v58  ;;  %v4283_v37 = vadd.f32 %v4251_v42, %v4219_v55 }
 0x1fd   : > { %v6764_v48 = vadd.f32 %v6412_v49, %v1993_v27 }
 0x1fe   : > { %10781 = vst [vmem:[#allocation74_spill] sm:$0xff] %v6741_v47  ;;  %v2353_v22 = vpack.c.bf16 %v2328_v46, %v2327_v50  ;;  %v1629_v50 = vadd.f32 %v6412_v49, %v6193_v57  ;;  %v4549_v46 = vmul.f32 %v6432_v44, %v2152_v30  ;;  %v4220_v58 = vmul.f32 %v6432_v44, %v6761_v28  ;;  %v2153_v33 = vpop.f32.mrf.mxu3 }
 0x1ff   : > { %v1706_v10 = vpop.f32.mrf.mxu0  ;;  %10783 = vst [vmem:[#allocation76_spill] sm:$0xff] %v6761_v28  ;;  %v4582_v6 = vmul.f32 %v6425_v23, %v6761_v28 }
 0x200   : > { %v6750_v38 = vadd.f32 %v6412_v49, %v1706_v10  ;;  %2452 = vmatmul.bf16.gmra.mxu1 %v2353_v22  ;;  %10784 = vst [vmem:[#allocation77_spill] sm:$0xff] %v6764_v48  ;;  %v4581_v22 = vmul.f32 %v6425_v23, %v6735_v31  ;;  %v2616_v31 = vmul.f32 %v6425_v23, %v1629_v50 }
 0x202   : > { %10782 = vst [vmem:[#allocation75_spill] sm:$0xff] %v6750_v38  ;;  %v2582_v54 = vmul.f32 %v6432_v44, %v6750_v38  ;;  %5454 = vmatmul.msk.bf16.gmra.mxu0 %vm1193_vm1, %v5842_v26  ;;  %v4315_v26 = vmul.f32 %v6443_v40, %v2152_v30  ;;  %v2297_v10 = vmul.f32 %v6443_v40, %v6750_v38 }
 0x203   : > { %v6786_v42 = vadd.f32 %v4581_v22, %v4549_v46  ;;  %v2265_v30 = vmul.f32 %v6432_v44, %v1629_v50  ;;  %v2154_v22 = vadd.f32 %v6412_v49, %v2153_v33  ;;  %v1632_v38 = vadd.f32 %v6412_v49, %v6203_v63 }
 0x204   : > { %v6768_v41 = vadd.f32 %v2615_v61, %v2582_v54  ;;  %v4252_v61 = vmul.f32 %v6425_v23, %v6764_v48  ;;  %v6784_v57 = vadd.f32 %v4315_v26, %v4283_v37  ;;  %v2264_v54 = vmul.f32 %v6432_v44, %v1627_v17  ;;  %v5932_v26 = vld [vmem:[%s6081_s30 + $0x3c8] sm:$0xff] }
 0x205   : > { %10788 = vst [vmem:[#allocation81_spill] sm:$0xff] %v6786_v42  ;;  %v4550_v50 = vmul.f32 %v6432_v44, %v2154_v22  ;;  %v2617_v63 = vmul.f32 %v6425_v23, %v1632_v38  ;;  %v1637_v42 = vadd.f32 %v6412_v49, %v6221_v8 }
 0x206   : > { %10785 = vst [vmem:[#allocation78_spill] sm:$0xff] %v6768_v41  ;;  %v2329_v46 = vadd.f32 %v2297_v10, %v2264_v54  ;;  %v4284_v17 = vadd.f32 %v4252_v61, %v4220_v58  ;;  %v4316_v41 = vmul.f32 %v6443_v40, %v2154_v22  ;;  %v5899_v10 = vld [vmem:[%s6081_s30 + $0x2c0] sm:$0xff]  ;;  %v1634_v22 = vadd.f32 %v6412_v49, %v6211_v2 }
 0x207   : > { %v1708_v27 = vpop.f32.mrf.mxu0  ;;  %10787 = vst [vmem:[#allocation80_spill] sm:$0xff] %v6784_v57  ;;  %5544 = vmatmul.msk.bf16.gmra.mxu3 %vm1193_vm1, %v5932_v26  ;;  %v6809_v33 = vadd.f32 %v4582_v6, %v4550_v50  ;;  %v6823_v6 = vadd.f32 %v6412_v49, %v6205_v0  ;;  %v2266_v2 = vmul.f32 %v6432_v44, %v1632_v38  ;;  %v6862_v38 = vld [vmem:[%s10447_s5] ss:$0 sm:$0xff] }
 0x208   : > { %v6782_v55 = vadd.f32 %v6412_v49, %v1708_v27 }
 0x209   : > { %10790 = vst [vmem:[#allocation83_spill] sm:$0xff] %v6809_v33 }
 0x20a   : > { %10786 = vst [vmem:[#allocation79_spill] sm:$0xff] %v6782_v55  ;;  %v2298_v48 = vmul.f32 %v6443_v40, %v6782_v55  ;;  %v2583_v37 = vmul.f32 %v6432_v44, %v6782_v55  ;;  %v6807_v55 = vadd.f32 %v4316_v41, %v4284_v17 }
 0x20b   : > { %5511 = vmatmul.msk.bf16.gmra.mxu2 %vm1193_vm1, %v5899_v10  ;;  %v2267_v10 = vmul.f32 %v6432_v44, %v1634_v22 }
 0x20c   : > { %v2330_v27 = vadd.f32 %v2298_v48, %v2265_v30  ;;  %v6802_v28 = vadd.f32 %v2616_v31, %v2583_v37  ;;  %10789 = vst [vmem:[#allocation82_spill] sm:$0xff] %v6807_v55  ;;  %v2156_v48 = vpop.f32.mrf.mxu3  ;;  %v5844_v55 = vld [vmem:[%s6081_s30 + $0x108] sm:$0xff] }
 0x20d   : > { %v6833_v37 = vadd.f32 %v6412_v49, %v2156_v48 }
 0x20e   : > { %v2354_v47 = vpack.c.bf16 %v2330_v27, %v2329_v46 }
 0x20f   : > { %v1711_v58 = vpop.f32.mrf.mxu0  ;;  %v4551_v0 = vmul.f32 %v6432_v44, %v6833_v37 }
 0x210   : > { %v6813_v61 = vadd.f32 %v6412_v49, %v1711_v58  ;;  %2457 = vmatmul.bf16.gmra.mxu1 %v2354_v47  ;;  %v4583_v47 = vmul.f32 %v6425_v23, %v6823_v6  ;;  %v2618_v58 = vmul.f32 %v6425_v23, %v1634_v22 }
 0x212   : > { %v2584_v41 = vmul.f32 %v6432_v44, %v6813_v61  ;;  %5455 = vmatmul.msk.bf16.gmra.mxu0 %vm1193_vm1, %v5843_v36  ;;  %v6841_v36 = vadd.f32 %v6412_v49, %v6213_v3  ;;  %v2299_v17 = vmul.f32 %v6443_v40, %v6813_v61  ;;  %v6848_v50 = vadd.f32 %v4583_v47, %v4551_v0  ;;  %v5933_v47 = vld [vmem:[%s6081_s30 + $0x3d0] sm:$0xff] }
 0x214   : > { %v6830_v30 = vadd.f32 %v2617_v63, %v2584_v41  ;;  %v2158_v46 = vpop.f32.mrf.mxu3  ;;  %10791 = vst [vmem:[#allocation84_spill] sm:$0xff] %v6848_v50  ;;  %v4584_v48 = vmul.f32 %v6425_v23, %v6841_v36  ;;  %v2331_v22 = vadd.f32 %v2299_v17, %v2266_v2  ;;  %v5900_v50 = vld [vmem:[%s6081_s30 + $0x2c8] sm:$0xff] }
 0x215   : > { %v6865_v41 = vadd.f32 %v6412_v49, %v2158_v46 }
 0x217   : > { %v1713_v26 = vpop.f32.mrf.mxu0  ;;  %5545 = vmatmul.msk.bf16.gmra.mxu3 %vm1193_vm1, %v5933_v47  ;;  %v4221_v47 = vmul.f32 %v6432_v44, %v6823_v6 }
 0x218   : > { %v6846_v27 = vadd.f32 %v6412_v49, %v1713_v26  ;;  %v4552_v26 = vmul.f32 %v6432_v44, %v6865_v41 }
 0x21a   : > { %v2300_v3 = vmul.f32 %v6443_v40, %v6846_v27  ;;  %v2585_v63 = vmul.f32 %v6432_v44, %v6846_v27  ;;  %v6877_v46 = vadd.f32 %v4584_v48, %v4552_v26  ;;  %v6898_v48 = vadd.f32 %v6412_v49, %v6223_v9 }
 0x21b   : > { %5512 = vmatmul.msk.bf16.gmra.mxu2 %vm1193_vm1, %v5900_v50 }
 0x21c   : > { %v2332_v0 = vadd.f32 %v2300_v3, %v2267_v10  ;;  %v6871_v54 = vadd.f32 %v2618_v58, %v2585_v63  ;;  %10792 = vst [vmem:[#allocation85_spill] sm:$0xff] %v6877_v46  ;;  %v2161_v2 = vpop.f32.mrf.mxu3  ;;  %v2619_v58 = vmul.f32 %v6425_v23, %v1637_v42  ;;  %v1996_v3 = vpop.f32.mrf.mxu2  ;;  %v1639_v63 = vadd.f32 %v6412_v49, %v6229_v11 }
 0x21d   : > { %v2423_v31 = vpop.f32.mrf.mxu1  ;;  %v6910_v50 = vadd.f32 %v6412_v49, %v2161_v2  ;;  %v6927_v2 = vadd.f32 %v6412_v49, %v6231_v12 }
 0x21e   : > { %v2424_v33 = vadd.f32 %v6862_v38, %v2423_v31  ;;  %v2355_v57 = vpack.c.bf16 %v2332_v0, %v2331_v22  ;;  %v6892_v31 = vadd.f32 %v6412_v49, %v6181_v51  ;;  %v2269_v12 = vmul.f32 %v6432_v44, %v1639_v63 }
 0x21f   : > { %v1716_v17 = vpop.f32.mrf.mxu0  ;;  %10796 = vst [vmem:[#allocation89_spill] sm:$0xff] %v6910_v50  ;;  %v4553_v26 = vmul.f32 %v6432_v44, %v6910_v50 }
 0x220   : > { %v2503_v10 = vpack.c.bf16 %v2424_v33, %v2424_v33  ;;  %v6888_v8 = vadd.f32 %v6412_v49, %v1716_v17  ;;  %2462 = vmatmul.bf16.gmra.mxu1 %v2355_v57  ;;  %10794 = vst [vmem:[#allocation87_spill] sm:$0xff] %v6892_v31  ;;  %v4585_v57 = vmul.f32 %v6425_v23, %v6898_v48 }
 0x221   : > { %v3923_v9 = vmul.f32 %v6425_v23, %v6892_v31  ;;  %v2268_v17 = vmul.f32 %v6432_v44, %v1637_v42 }
 0x222   : > { %10793 = vst [vmem:[#allocation86_spill] sm:$0xff] %v6888_v8  ;;  %v2586_v33 = vmul.f32 %v6432_v44, %v6888_v8  ;;  %5456 = vmatmul.msk.bf16.gmra.mxu0 %vm1193_vm1, %v5844_v55  ;;  %v6919_v55 = vadd.f32 %v6412_v49, %v1996_v3  ;;  %v2301_v3 = vmul.f32 %v6443_v40, %v6888_v8  ;;  %v5845_v8 = vld [vmem:[%s6081_s30 + $0x110] sm:$0xff] }
 0x223   : > { %2536 = vst.msk [vmem:[%s6885_s13] sm:$0xf] %vm2535_vm2, %v2503_v10  ;;  %v6938_v42 = vadd.f32 %v4585_v57, %v4553_v26 }
 0x224   : > { %v6907_v51 = vadd.f32 %v2619_v58, %v2586_v33  ;;  %10797 = vst [vmem:[#allocation90_spill] sm:$0xff] %v6919_v55  ;;  %v3891_v10 = vmul.f32 %v6432_v44, %v6919_v55  ;;  %v4253_v58 = vmul.f32 %v6425_v23, %v6919_v55  ;;  %v2163_v33 = vpop.f32.mrf.mxu3  ;;  %v4586_v55 = vmul.f32 %v6425_v23, %v6927_v2 }
 0x225   : > { %v2425_v22 = vpop.f32.mrf.mxu1  ;;  %10799 = vst [vmem:[#allocation92_spill] sm:$0xff] %v6938_v42  ;;  %v6955_v26 = vadd.f32 %v6412_v49, %v2163_v33  ;;  %v1642_v42 = vadd.f32 %v6412_v49, %v6239_v19 }
 0x226   : > { %10795 = vst [vmem:[#allocation88_spill] sm:$0xff] %v6907_v51  ;;  %v2426_v0 = vadd.f32 %v6862_v38, %v2425_v22  ;;  %v2620_v51 = vmul.f32 %v6425_v23, %v1639_v63  ;;  %v6942_v50 = vadd.f32 %v3923_v9, %v3891_v10  ;;  %v6944_v46 = vadd.f32 %v4253_v58, %v4221_v47  ;;  %v5934_v9 = vld [vmem:[%s6081_s30 + $0x3d8] sm:$0xff]  ;;  %v6960_v10 = vpop.f32.mrf.mxu2 }
 0x227   : > { %v1718_v11 = vpop.f32.mrf.mxu0  ;;  %10801 = vst [vmem:[#allocation94_spill] sm:$0xff] %v6955_v26  ;;  %v2333_v63 = vadd.f32 %v2301_v3, %v2268_v17  ;;  %5546 = vmatmul.msk.bf16.gmra.mxu3 %vm1193_vm1, %v5934_v9  ;;  %v5901_v3 = vld [vmem:[%s6081_s30 + $0x2d0] sm:$0xff]  ;;  %v2621_v19 = vmul.f32 %v6425_v23, %v1642_v42 }
 0x228   : > { %v2504_v22 = vpack.c.bf16 %v2426_v0, %v2426_v0  ;;  %v6936_v31 = vadd.f32 %v6412_v49, %v1718_v11  ;;  %10800 = vst [vmem:[#allocation93_spill] sm:$0xff] %v6944_v46  ;;  %v4554_v11 = vmul.f32 %v6432_v44, %v6955_v26 }
 0x22a   : > { %10798 = vst [vmem:[#allocation91_spill] sm:$0xff] %v6936_v31  ;;  %v2302_v0 = vmul.f32 %v6443_v40, %v6936_v31  ;;  %v2587_v57 = vmul.f32 %v6432_v44, %v6936_v31  ;;  %v6969_v17 = vadd.f32 %v4586_v55, %v4554_v11  ;;  %v6983_v55 = vadd.f32 %v6412_v49, %v6241_v20 }
 0x22b   : > { %2537 = vst.msk [vmem:[%s6885_s13 + $0x4] sm:$0xf] %vm2535_vm2, %v2504_v22  ;;  %5513 = vmatmul.msk.bf16.gmra.mxu2 %vm1193_vm1, %v5901_v3  ;;  %v2270_v3 = vmul.f32 %v6432_v44, %v1642_v42 }
 0x22c   : > { %v2334_v47 = vadd.f32 %v2302_v0, %v2269_v12  ;;  %v6963_v58 = vadd.f32 %v2620_v51, %v2587_v57  ;;  %10802 = vst [vmem:[#allocation95_spill] sm:$0xff] %v6969_v17  ;;  %v2166_v0 = vpop.f32.mrf.mxu3  ;;  %v6977_v51 = vadd.f32 %v6412_v49, %v6199_v60 }
 0x22d   : > { %v2428_v22 = vpop.f32.mrf.mxu1  ;;  %v6995_v9 = vadd.f32 %v6412_v49, %v2166_v0 }
 0x22e   : > { %v2429_v33 = vadd.f32 %v6862_v38, %v2428_v22  ;;  %v2356_v31 = vpack.c.bf16 %v2334_v47, %v2333_v63  ;;  %10804 = vst [vmem:[#allocation97_spill] sm:$0xff] %v6977_v51  ;;  %v2001_v63 = vpop.f32.mrf.mxu2  ;;  %v3925_v20 = vmul.f32 %v6425_v23, %v6977_v51  ;;  %v4223_v47 = vmul.f32 %v6432_v44, %v6898_v48 }
 0x22f   : > { %v1721_v12 = vpop.f32.mrf.mxu0  ;;  %10806 = vst [vmem:[#allocation99_spill] sm:$0xff] %v6995_v9 }
 0x230   : > { %v2505_v26 = vpack.c.bf16 %v2429_v33, %v2429_v33  ;;  %v6973_v46 = vadd.f32 %v6412_v49, %v1721_v12  ;;  %2467 = vmatmul.bf16.gmra.mxu1 %v2356_v31  ;;  %v4587_v31 = vmul.f32 %v6425_v23, %v6983_v55  ;;  %v4555_v33 = vmul.f32 %v6432_v44, %v6995_v9 }
 0x231   : > { %v7012_v12 = vadd.f32 %v6412_v49, %v6249_v25 }
 0x232   : > { %10803 = vst [vmem:[#allocation96_spill] sm:$0xff] %v6973_v46  ;;  %v2588_v57 = vmul.f32 %v6432_v44, %v6973_v46  ;;  %5457 = vmatmul.msk.bf16.gmra.mxu0 %vm1193_vm1, %v5845_v8  ;;  %v7004_v8 = vadd.f32 %v6412_v49, %v2001_v63  ;;  %v2303_v63 = vmul.f32 %v6443_v40, %v6973_v46  ;;  %v5846_v46 = vld [vmem:[%s6081_s30 + $0x118] sm:$0xff] }
 0x233   : > { %2538 = vst.msk [vmem:[%s6885_s13 + $0x8] sm:$0xf] %vm2535_vm2, %v2505_v26  ;;  %v1644_v26 = vadd.f32 %v6412_v49, %v6247_v24  ;;  %v7023_v42 = vadd.f32 %v4587_v31, %v4555_v33 }
 0x234   : > { %v6992_v60 = vadd.f32 %v2621_v19, %v2588_v57  ;;  %10807 = vst [vmem:[#allocation100_spill] sm:$0xff] %v7004_v8  ;;  %v3893_v0 = vmul.f32 %v6432_v44, %v7004_v8  ;;  %v4255_v19 = vmul.f32 %v6425_v23, %v7004_v8  ;;  %v2168_v57 = vpop.f32.mrf.mxu3  ;;  %v4588_v8 = vmul.f32 %v6425_v23, %v7012_v12 }
 0x235   : > { %v2430_v11 = vpop.f32.mrf.mxu1  ;;  %10809 = vst [vmem:[#allocation102_spill] sm:$0xff] %v7023_v42  ;;  %v2271_v25 = vmul.f32 %v6432_v44, %v1644_v26  ;;  %v7040_v33 = vadd.f32 %v6412_v49, %v2168_v57  ;;  %v1647_v42 = vadd.f32 %v6412_v49, %v6257_v34 }
 0x236   : > { %10805 = vst [vmem:[#allocation98_spill] sm:$0xff] %v6992_v60  ;;  %v2431_v22 = vadd.f32 %v6862_v38, %v2430_v11  ;;  %v2622_v60 = vmul.f32 %v6425_v23, %v1644_v26  ;;  %v7027_v9 = vadd.f32 %v3925_v20, %v3893_v0  ;;  %v7029_v17 = vadd.f32 %v4255_v19, %v4223_v47  ;;  %v5935_v20 = vld [vmem:[%s6081_s30 + $0x3e0] sm:$0xff]  ;;  %v7045_v0 = vpop.f32.mrf.mxu2 }
 0x237   : > { %v1723_v24 = vpop.f32.mrf.mxu0  ;;  %10811 = vst [vmem:[#allocation104_spill] sm:$0xff] %v7040_v33  ;;  %v2335_v26 = vadd.f32 %v2303_v63, %v2270_v3  ;;  %5547 = vmatmul.msk.bf16.gmra.mxu3 %vm1193_vm1, %v5935_v20  ;;  %v5902_v63 = vld [vmem:[%s6081_s30 + $0x2d8] sm:$0xff]  ;;  %v2623_v34 = vmul.f32 %v6425_v23, %v1647_v42 }
 0x238   : > { %v2506_v11 = vpack.c.bf16 %v2431_v22, %v2431_v22  ;;  %v7021_v51 = vadd.f32 %v6412_v49, %v1723_v24  ;;  %10810 = vst [vmem:[#allocation103_spill] sm:$0xff] %v7029_v17  ;;  %v4556_v24 = vmul.f32 %v6432_v44, %v7040_v33 }
 0x23a   : > { %10808 = vst [vmem:[#allocation101_spill] sm:$0xff] %v7021_v51  ;;  %v2304_v22 = vmul.f32 %v6443_v40, %v7021_v51  ;;  %v2589_v31 = vmul.f32 %v6432_v44, %v7021_v51  ;;  %v7054_v3 = vadd.f32 %v4588_v8, %v4556_v24  ;;  %v7068_v8 = vadd.f32 %v6412_v49, %v6259_v35 }
 0x23b   : > { %2539 = vst.msk [vmem:[%s6885_s13 + $0xc] sm:$0xf] %vm2535_vm2, %v2506_v11  ;;  %5514 = vmatmul.msk.bf16.gmra.mxu2 %vm1193_vm1, %v5902_v63 }
 0x23c   : > { %v2336_v47 = vadd.f32 %v2304_v22, %v2271_v25  ;;  %v7048_v19 = vadd.f32 %v2622_v60, %v2589_v31  ;;  %10813 = vst [vmem:[#allocation106_spill] sm:$0xff] %v7054_v3  ;;  %v2171_v22 = vpop.f32.mrf.mxu3  ;;  %v7062_v60 = vadd.f32 %v6412_v49, %v6217_v5 }
 0x23d   : > { %v2433_v11 = vpop.f32.mrf.mxu1  ;;  %10816 = vst [vmem:[#allocation109_spill] sm:$0xff] %v7068_v8  ;;  %v7080_v20 = vadd.f32 %v6412_v49, %v2171_v22 }
 0x23e   : > { %10812 = vst [vmem:[#allocation105_spill] sm:$0xff] %v7048_v19  ;;  %v2434_v57 = vadd.f32 %v6862_v38, %v2433_v11  ;;  %v2357_v51 = vpack.c.bf16 %v2336_v47, %v2335_v26  ;;  %v2006_v26 = vpop.f32.mrf.mxu2  ;;  %v3927_v35 = vmul.f32 %v6425_v23, %v7062_v60 }
 0x23f   : > { %v1726_v25 = vpop.f32.mrf.mxu0  ;;  %10815 = vst [vmem:[#allocation108_spill] sm:$0xff] %v7062_v60  ;;  %v7087_v24 = vadd.f32 %v6412_v49, %v2006_v26  ;;  %v4557_v63 = vmul.f32 %v6432_v44, %v7080_v20 }
 0x240   : > { %v2507_v33 = vpack.c.bf16 %v2434_v57, %v2434_v57  ;;  %v7058_v17 = vadd.f32 %v6412_v49, %v1726_v25  ;;  %2472 = vmatmul.bf16.gmra.mxu1 %v2357_v51  ;;  %v4589_v51 = vmul.f32 %v6425_v23, %v7068_v8  ;;  %10818 = vst [vmem:[#allocation111_spill] sm:$0xff] %v7080_v20 }
 0x241   : > { %10819 = vst [vmem:[#allocation112_spill] sm:$0xff] %v7087_v24  ;;  %v3895_v22 = vmul.f32 %v6432_v44, %v7087_v24 }
 0x242   : > { %10814 = vst [vmem:[#allocation107_spill] sm:$0xff] %v7058_v17  ;;  %v2590_v31 = vmul.f32 %v6432_v44, %v7058_v17  ;;  %5458 = vmatmul.msk.bf16.gmra.mxu0 %vm1193_vm1, %v5846_v46  ;;  %v10820_v46 = vld [vmem:[#allocation10_spill] sm:$0xff]  ;;  %v2305_v26 = vmul.f32 %v6443_v40, %v7058_v17 }
 0x243   : > { %2540 = vst.msk [vmem:[%s6885_s13 + $0x10] sm:$0xf] %vm2535_vm2, %v2507_v33  ;;  %v4225_v33 = vmul.f32 %v6432_v44, %v6983_v55  ;;  %v1649_v11 = vadd.f32 %v6412_v49, %v10820_v46  ;;  %v7108_v20 = vadd.f32 %v3927_v35, %v3895_v22  ;;  %v5847_v17 = vld [vmem:[%s6081_s30 + $0x120] sm:$0xff] }
 0x244   : > { %v7077_v5 = vadd.f32 %v2623_v34, %v2590_v31  ;;  %v4257_v34 = vmul.f32 %v6425_v23, %v7087_v24  ;;  %v7098_v31 = vpop.f32.mrf.mxu3 }
 0x245   : > { %v2435_v47 = vpop.f32.mrf.mxu1  ;;  %10821 = vst [vmem:[#allocation10_spill] sm:$0xff] %v7098_v31  ;;  %v2273_v24 = vmul.f32 %v6432_v44, %v1649_v11  ;;  %v2624_v31 = vmul.f32 %v6425_v23, %v1649_v11 }
 0x246   : > { %10817 = vst [vmem:[#allocation110_spill] sm:$0xff] %v7077_v5  ;;  %v2436_v57 = vadd.f32 %v6862_v38, %v2435_v47  ;;  %v7105_v47 = vadd.f32 %v4589_v51, %v4557_v63  ;;  %v2272_v5 = vmul.f32 %v6432_v44, %v1647_v42  ;;  %v7110_v3 = vadd.f32 %v4257_v34, %v4225_v33  ;;  %v5936_v63 = vld [vmem:[%s6081_s30 + $0x3e8] sm:$0xff]  ;;  %v10827_v34 = vld [vmem:[#allocation13_spill] sm:$0xff] }
 0x247   : > { %v1728_v25 = vpop.f32.mrf.mxu0  ;;  %10824 = vst [vmem:[#allocation115_spill] sm:$0xff] %v7108_v20  ;;  %5548 = vmatmul.msk.bf16.gmra.mxu3 %vm1193_vm1, %v5936_v63  ;;  %v1652_v11 = vadd.f32 %v6412_v49, %v10827_v34  ;;  %v10831_v63 = vld [vmem:[#allocation14_spill] sm:$0xff]  ;;  %v4227_v34 = vmul.f32 %v6432_v44, %v7068_v8 }
 0x248   : > { %v2508_v46 = vpack.c.bf16 %v2436_v57, %v2436_v57  ;;  %v7103_v60 = vadd.f32 %v6412_v49, %v1728_v25  ;;  %10823 = vst [vmem:[#allocation114_spill] sm:$0xff] %v7105_v47  ;;  %v2337_v42 = vadd.f32 %v2305_v26, %v2272_v5  ;;  %v7121_v25 = vpop.f32.mrf.mxu2  ;;  %v10829_v26 = vld [vmem:[#allocation6_spill] sm:$0xff] }
 0x249   : > { %10825 = vst [vmem:[#allocation116_spill] sm:$0xff] %v7110_v3  ;;  %v5903_v3 = vld [vmem:[%s6081_s30 + $0x2e0] sm:$0xff] }
 0x24a   : > { %10822 = vst [vmem:[#allocation113_spill] sm:$0xff] %v7103_v60  ;;  %v2306_v57 = vmul.f32 %v6443_v40, %v7103_v60  ;;  %v2591_v51 = vmul.f32 %v6432_v44, %v7103_v60 }
 0x24b   : > { %2541 = vst.msk [vmem:[%s6885_s13 + $0x14] sm:$0xf] %vm2535_vm2, %v2508_v46  ;;  %5515 = vmatmul.msk.bf16.gmra.mxu2 %vm1193_vm1, %v5903_v3 }
 0x24c   : > { %v2338_v35 = vadd.f32 %v2306_v57, %v2273_v24  ;;  %v7124_v33 = vadd.f32 %v2624_v31, %v2591_v51  ;;  %v2176_v19 = vpop.f32.mrf.mxu3  ;;  %v7136_v31 = vadd.f32 %v6412_v49, %v10829_v26  ;;  %v2625_v57 = vmul.f32 %v6425_v23, %v1652_v11  ;;  %v7143_v51 = vld [vmem:[%s10444_s2] ss:$0 sm:$0xff] }
 0x24d   : > { %v2438_v22 = vpop.f32.mrf.mxu1 }
 0x24e   : > { %10826 = vst [vmem:[#allocation117_spill] sm:$0xff] %v7124_v33  ;;  %v2439_v46 = vadd.f32 %v6862_v38, %v2438_v22  ;;  %v2358_v47 = vpack.c.bf16 %v2338_v35, %v2337_v42  ;;  %v7147_v42 = vadd.f32 %v7143_v51, %v10831_v63  ;;  %v3929_v22 = vmul.f32 %v6425_v23, %v7136_v31 }
 0x24f   : > { %v1731_v60 = vpop.f32.mrf.mxu0  ;;  %10830 = vst [vmem:[#allocation6_spill] sm:$0xff] %v7136_v31 }
 0x250   : > { %v2509_v5 = vpack.c.bf16 %v2439_v46, %v2439_v46  ;;  %v7132_v24 = vadd.f32 %v6412_v49, %v1731_v60  ;;  %2477 = vmatmul.bf16.gmra.mxu1 %v2358_v47  ;;  %10832 = vst [vmem:[#allocation14_spill] sm:$0xff] %v7147_v42  ;;  %v4591_v49 = vmul.f32 %v6425_v23, %v7147_v42  ;;  %v2011_v35 = vpop.f32.mrf.mxu2 }
 0x251   : > { %v7159_v47 = vadd.f32 %v7143_v51, %v2176_v19 }
 0x252   : > { %10828 = vst [vmem:[#allocation13_spill] sm:$0xff] %v7132_v24  ;;  %v2592_v60 = vmul.f32 %v6432_v44, %v7132_v24  ;;  %5459 = vmatmul.msk.bf16.gmra.mxu0 %vm1193_vm1, %v5847_v17  ;;  %v10836_v17 = vld [vmem:[#allocation16_spill] sm:$0xff] }
 0x253   : > { %2542 = vst.msk [vmem:[%s6885_s13 + $0x18] sm:$0xf] %vm2535_vm2, %v2509_v5  ;;  %v7166_v5 = vadd.f32 %v7143_v51, %v2011_v35  ;;  %v1654_v26 = vadd.f32 %v7143_v51, %v10836_v17  ;;  %v4559_v19 = vmul.f32 %v6432_v44, %v7159_v47  ;;  %v2307_v35 = vmul.f32 %v6443_v40, %v7132_v24  ;;  %v5848_v24 = vld [vmem:[%s6081_s30 + $0x128] sm:$0xff] }
 0x254   : > { %v7156_v3 = vadd.f32 %v2625_v57, %v2592_v60  ;;  %10834 = vst [vmem:[#allocation119_spill] sm:$0xff] %v7159_v47  ;;  %v2274_v47 = vmul.f32 %v6432_v44, %v1652_v11 }
 0x255   : > { %v2440_v46 = vpop.f32.mrf.mxu1  ;;  %10835 = vst [vmem:[#allocation120_spill] sm:$0xff] %v7166_v5  ;;  %v3897_v60 = vmul.f32 %v6432_v44, %v7166_v5  ;;  %v4259_v31 = vmul.f32 %v6425_v23, %v7166_v5  ;;  %v2275_v5 = vmul.f32 %v6432_v44, %v1654_v26 }
 0x256   : > { %10833 = vst [vmem:[#allocation118_spill] sm:$0xff] %v7156_v3  ;;  %v2441_v57 = vadd.f32 %v6862_v38, %v2440_v46  ;;  %v7177_v3 = vpop.f32.mrf.mxu3  ;;  %v7184_v46 = vadd.f32 %v4591_v49, %v4559_v19  ;;  %v5937_v19 = vld [vmem:[%s6081_s30 + $0x3f0] sm:$0xff]  ;;  %v2339_v11 = vadd.f32 %v2307_v35, %v2274_v47 }
 0x257   : > { %v1733_v63 = vpop.f32.mrf.mxu0  ;;  %10837 = vst [vmem:[#allocation16_spill] sm:$0xff] %v7177_v3  ;;  %v7187_v8 = vadd.f32 %v3929_v22, %v3897_v60  ;;  %v7189_v20 = vadd.f32 %v4259_v31, %v4227_v34  ;;  %v2626_v3 = vmul.f32 %v6425_v23, %v1654_v26  ;;  %5549 = vmatmul.msk.bf16.gmra.mxu3 %vm1193_vm1, %v5937_v19  ;;  %v10844_v26 = vld [vmem:[#allocation19_spill] sm:$0xff]  ;;  %v10846_v35 = vld [vmem:[#allocation8_spill] sm:$0xff] }
 0x258   : > { %v2510_v17 = vpack.c.bf16 %v2441_v57, %v2441_v57  ;;  %v7182_v33 = vadd.f32 %v7143_v51, %v1733_v63  ;;  %10839 = vst [vmem:[#allocation122_spill] sm:$0xff] %v7184_v46  ;;  %v7200_v63 = vpop.f32.mrf.mxu2  ;;  %v1657_v60 = vadd.f32 %v7143_v51, %v10844_v26  ;;  %v4229_v26 = vmul.f32 %v6432_v44, %v7147_v42 }
 0x259   : > { %10840 = vst [vmem:[#allocation123_spill] sm:$0xff] %v7187_v8 }
 0x25a   : > { %10838 = vst [vmem:[#allocation121_spill] sm:$0xff] %v7182_v33  ;;  %v2308_v57 = vmul.f32 %v6443_v40, %v7182_v33  ;;  %v2593_v49 = vmul.f32 %v6432_v44, %v7182_v33 }
 0x25b   : > { %10841 = vst [vmem:[#allocation124_spill] sm:$0xff] %v7189_v20  ;;  %v5904_v20 = vld [vmem:[%s6081_s30 + $0x2e8] sm:$0xff] }
 0x25c   : > { %2543 = vst.msk [vmem:[%s6885_s13 + $0x1c] sm:$0xf] %vm2535_vm2, %v2510_v17  ;;  %v2340_v22 = vadd.f32 %v2308_v57, %v2275_v5  ;;  %v7203_v31 = vadd.f32 %v2626_v3, %v2593_v49  ;;  %v7215_v3 = vadd.f32 %v7143_v51, %v10846_v35  ;;  %5516 = vmatmul.msk.bf16.gmra.mxu2 %vm1193_vm1, %v5904_v20  ;;  %v10848_v49 = vld [vmem:[#allocation20_spill] sm:$0xff] }
 0x25d   : > { %10842 = vst [vmem:[#allocation125_spill] sm:$0xff] %v7200_v63  ;;  %v2443_v34 = vpop.f32.mrf.mxu1  ;;  %v2627_v57 = vmul.f32 %v6425_v23, %v1657_v60  ;;  %v7221_v19 = vadd.f32 %v7143_v51, %v10848_v49 }
 0x25e   : > { %10843 = vst [vmem:[#allocation126_spill] sm:$0xff] %v7203_v31  ;;  %v2444_v17 = vadd.f32 %v6862_v38, %v2443_v34  ;;  %v2359_v46 = vpack.c.bf16 %v2340_v22, %v2339_v11  ;;  %v2181_v8 = vpop.f32.mrf.mxu3  ;;  %v3931_v34 = vmul.f32 %v6425_v23, %v7215_v3 }
 0x25f   : > { %v1736_v33 = vpop.f32.mrf.mxu0  ;;  %10847 = vst [vmem:[#allocation8_spill] sm:$0xff] %v7215_v3  ;;  %v7233_v20 = vadd.f32 %v7143_v51, %v2181_v8 }
 0x260   : > { %v2511_v47 = vpack.c.bf16 %v2444_v17, %v2444_v17  ;;  %v7211_v5 = vadd.f32 %v7143_v51, %v1736_v33  ;;  %2482 = vmatmul.bf16.gmra.mxu1 %v2359_v46  ;;  %10849 = vst [vmem:[#allocation20_spill] sm:$0xff] %v7221_v19  ;;  %v4593_v33 = vmul.f32 %v6425_v23, %v7221_v19  ;;  %v2016_v22 = vpop.f32.mrf.mxu2 }
 0x261   : > { %10851 = vst [vmem:[#allocation128_spill] sm:$0xff] %v7233_v20  ;;  %v4561_v8 = vmul.f32 %v6432_v44, %v7233_v20  ;;  %v2276_v20 = vmul.f32 %v6432_v44, %v1657_v60 }
 0x262   : > { %10845 = vst [vmem:[#allocation19_spill] sm:$0xff] %v7211_v5  ;;  %v2594_v11 = vmul.f32 %v6432_v44, %v7211_v5  ;;  %5460 = vmatmul.msk.bf16.gmra.mxu0 %vm1193_vm1, %v5848_v24  ;;  %v10853_v24 = vld [vmem:[#allocation22_spill] sm:$0xff] }
 0x263   : > { %2544 = vst.msk [vmem:[%s6885_s13 + $0x20] sm:$0xf] %vm2535_vm2, %v2511_v47  ;;  %v7240_v47 = vadd.f32 %v7143_v51, %v2016_v22  ;;  %v1659_v35 = vadd.f32 %v7143_v51, %v10853_v24  ;;  %v2309_v22 = vmul.f32 %v6443_v40, %v7211_v5  ;;  %v5849_v5 = vld [vmem:[%s6081_s30 + $0x130] sm:$0xff] }
 0x264   : > { %v7230_v46 = vadd.f32 %v2627_v57, %v2594_v11 }
 0x265   : > { %v2445_v17 = vpop.f32.mrf.mxu1  ;;  %10852 = vst [vmem:[#allocation129_spill] sm:$0xff] %v7240_v47  ;;  %v3899_v11 = vmul.f32 %v6432_v44, %v7240_v47  ;;  %v4261_v3 = vmul.f32 %v6425_v23, %v7240_v47  ;;  %v2277_v47 = vmul.f32 %v6432_v44, %v1659_v35  ;;  %v2341_v60 = vadd.f32 %v2309_v22, %v2276_v20  ;;  %v10863_v22 = vld [vmem:[#allocation12_spill] sm:$0xff] }
 0x266   : > { %10850 = vst [vmem:[#allocation127_spill] sm:$0xff] %v7230_v46  ;;  %v2446_v57 = vadd.f32 %v6862_v38, %v2445_v17  ;;  %v7251_v46 = vpop.f32.mrf.mxu3  ;;  %v7258_v17 = vadd.f32 %v4593_v33, %v4561_v8  ;;  %v5938_v8 = vld [vmem:[%s6081_s30 + $0x3f8] sm:$0xff] }
 0x267   : > { %v1738_v49 = vpop.f32.mrf.mxu0  ;;  %10854 = vst [vmem:[#allocation22_spill] sm:$0xff] %v7251_v46  ;;  %v7261_v42 = vadd.f32 %v3931_v34, %v3899_v11  ;;  %v7263_v63 = vadd.f32 %v4261_v3, %v4229_v26  ;;  %v2628_v46 = vmul.f32 %v6425_v23, %v1659_v35  ;;  %5550 = vmatmul.msk.bf16.gmra.mxu3 %vm1193_vm1, %v5938_v8  ;;  %v10861_v35 = vld [vmem:[#allocation25_spill] sm:$0xff] }
 0x268   : > { %v2512_v24 = vpack.c.bf16 %v2446_v57, %v2446_v57  ;;  %v7256_v31 = vadd.f32 %v7143_v51, %v1738_v49  ;;  %10856 = vst [vmem:[#allocation131_spill] sm:$0xff] %v7258_v17  ;;  %v7274_v49 = vpop.f32.mrf.mxu2  ;;  %v1662_v11 = vadd.f32 %v7143_v51, %v10861_v35  ;;  %v4231_v35 = vmul.f32 %v6432_v44, %v7221_v19 }
 0x269   : > { %10857 = vst [vmem:[#allocation132_spill] sm:$0xff] %v7261_v42 }
 0x26a   : > { %10855 = vst [vmem:[#allocation130_spill] sm:$0xff] %v7256_v31  ;;  %v2310_v57 = vmul.f32 %v6443_v40, %v7256_v31  ;;  %v2595_v33 = vmul.f32 %v6432_v44, %v7256_v31 }
 0x26b   : > { %10858 = vst [vmem:[#allocation133_spill] sm:$0xff] %v7263_v63  ;;  %v5905_v63 = vld [vmem:[%s6081_s30 + $0x2f0] sm:$0xff] }
 0x26c   : > { %2545 = vst.msk [vmem:[%s6885_s13 + $0x24] sm:$0xf] %vm2535_vm2, %v2512_v24  ;;  %v2342_v34 = vadd.f32 %v2310_v57, %v2277_v47  ;;  %v7277_v3 = vadd.f32 %v2628_v46, %v2595_v33  ;;  %v7289_v46 = vadd.f32 %v7143_v51, %v10863_v22  ;;  %5517 = vmatmul.msk.bf16.gmra.mxu2 %vm1193_vm1, %v5905_v63  ;;  %v10865_v33 = vld [vmem:[#allocation26_spill] sm:$0xff] }
 0x26d   : > { %10859 = vst [vmem:[#allocation134_spill] sm:$0xff] %v7274_v49  ;;  %v2448_v26 = vpop.f32.mrf.mxu1  ;;  %v2629_v57 = vmul.f32 %v6425_v23, %v1662_v11  ;;  %v7295_v8 = vadd.f32 %v7143_v51, %v10865_v33 }
 0x26e   : > { %10860 = vst [vmem:[#allocation135_spill] sm:$0xff] %v7277_v3  ;;  %v2449_v24 = vadd.f32 %v6862_v38, %v2448_v26  ;;  %v2360_v17 = vpack.c.bf16 %v2342_v34, %v2341_v60  ;;  %v2186_v42 = vpop.f32.mrf.mxu3  ;;  %v3933_v26 = vmul.f32 %v6425_v23, %v7289_v46 }
 0x26f   : > { %v1741_v31 = vpop.f32.mrf.mxu0  ;;  %10864 = vst [vmem:[#allocation12_spill] sm:$0xff] %v7289_v46  ;;  %v7307_v63 = vadd.f32 %v7143_v51, %v2186_v42 }
 0x270   : > { %v2513_v20 = vpack.c.bf16 %v2449_v24, %v2449_v24  ;;  %v7285_v47 = vadd.f32 %v7143_v51, %v1741_v31  ;;  %2487 = vmatmul.bf16.gmra.mxu1 %v2360_v17  ;;  %10866 = vst [vmem:[#allocation26_spill] sm:$0xff] %v7295_v8  ;;  %v4595_v31 = vmul.f32 %v6425_v23, %v7295_v8  ;;  %v2021_v34 = vpop.f32.mrf.mxu2 }
 0x271   : > { %10868 = vst [vmem:[#allocation137_spill] sm:$0xff] %v7307_v63  ;;  %v4563_v42 = vmul.f32 %v6432_v44, %v7307_v63  ;;  %v2278_v63 = vmul.f32 %v6432_v44, %v1662_v11 }
 0x272   : > { %10862 = vst [vmem:[#allocation25_spill] sm:$0xff] %v7285_v47  ;;  %v2596_v60 = vmul.f32 %v6432_v44, %v7285_v47  ;;  %5461 = vmatmul.msk.bf16.gmra.mxu0 %vm1193_vm1, %v5849_v5  ;;  %v10870_v5 = vld [vmem:[#allocation28_spill] sm:$0xff] }
 0x273   : > { %2546 = vst.msk [vmem:[%s6885_s13 + $0x28] sm:$0xf] %vm2535_vm2, %v2513_v20  ;;  %v7314_v20 = vadd.f32 %v7143_v51, %v2021_v34  ;;  %v1664_v22 = vadd.f32 %v7143_v51, %v10870_v5  ;;  %v2311_v34 = vmul.f32 %v6443_v40, %v7285_v47 }
 0x274   : > { %v7304_v17 = vadd.f32 %v2629_v57, %v2596_v60 }
 0x275   : > { %v2450_v24 = vpop.f32.mrf.mxu1  ;;  %10869 = vst [vmem:[#allocation138_spill] sm:$0xff] %v7314_v20  ;;  %v3901_v60 = vmul.f32 %v6432_v44, %v7314_v20  ;;  %v4263_v46 = vmul.f32 %v6425_v23, %v7314_v20  ;;  %v2279_v20 = vmul.f32 %v6432_v44, %v1664_v22 }
 0x276   : > { %10867 = vst [vmem:[#allocation136_spill] sm:$0xff] %v7304_v17  ;;  %v2451_v57 = vadd.f32 %v6862_v38, %v2450_v24  ;;  %v7325_v17 = vpop.f32.mrf.mxu3  ;;  %v7332_v24 = vadd.f32 %v4595_v31, %v4563_v42  ;;  %v2343_v42 = vadd.f32 %v2311_v34, %v2278_v63  ;;  %v10880_v63 = vld [vmem:[#allocation18_spill] sm:$0xff]  ;;  %v10882_v34 = vld [vmem:[#allocation32_spill] sm:$0xff] }
 0x277   : > { %v1743_v33 = vpop.f32.mrf.mxu0  ;;  %10871 = vst [vmem:[#allocation28_spill] sm:$0xff] %v7325_v17  ;;  %v7335_v19 = vadd.f32 %v3933_v26, %v3901_v60  ;;  %v7337_v49 = vadd.f32 %v4263_v46, %v4231_v35  ;;  %v2630_v17 = vmul.f32 %v6425_v23, %v1664_v22  ;;  %v10878_v35 = vld [vmem:[#allocation31_spill] sm:$0xff] }
 0x278   : > { %v2514_v3 = vpack.c.bf16 %v2451_v57, %v2451_v57  ;;  %v7330_v5 = vadd.f32 %v7143_v51, %v1743_v33  ;;  %10873 = vst [vmem:[#allocation140_spill] sm:$0xff] %v7332_v24  ;;  %v7347_v11 = vpop.f32.mrf.mxu2  ;;  %v1667_v60 = vadd.f32 %v7143_v51, %v10878_v35  ;;  %v5850_v24 = vld [vmem:[%s6081_s30 + $0x138] sm:$0xff] }
 0x279   : > { %10874 = vst [vmem:[#allocation141_spill] sm:$0xff] %v7335_v19 }
 0x27a   : > { %10872 = vst [vmem:[#allocation139_spill] sm:$0xff] %v7330_v5  ;;  %v2312_v57 = vmul.f32 %v6443_v40, %v7330_v5  ;;  %v2597_v31 = vmul.f32 %v6432_v44, %v7330_v5 }
 0x27b   : > { %10875 = vst [vmem:[#allocation142_spill] sm:$0xff] %v7337_v49 }
 0x27c   : > { %2547 = vst.msk [vmem:[%s6885_s13 + $0x2c] sm:$0xf] %vm2535_vm2, %v2514_v3  ;;  %v2344_v33 = vadd.f32 %v2312_v57, %v2279_v20  ;;  %v7349_v26 = vadd.f32 %v2630_v17, %v2597_v31  ;;  %v7360_v20 = vadd.f32 %v7143_v51, %v10880_v63  ;;  %v2631_v17 = vmul.f32 %v6425_v23, %v1667_v60 }
 0x27d   : > { %10876 = vst [vmem:[#allocation143_spill] sm:$0xff] %v7347_v11  ;;  %v2453_v46 = vpop.f32.mrf.mxu1  ;;  %v7365_v57 = vadd.f32 %v7143_v51, %v10882_v34 }
 0x27e   : > { %10877 = vst [vmem:[#allocation144_spill] sm:$0xff] %v7349_v26  ;;  %v2454_v22 = vadd.f32 %v6862_v38, %v2453_v46  ;;  %v2361_v3 = vpack.c.bf16 %v2344_v33, %v2343_v42  ;;  %v2191_v49 = vpop.f32.mrf.mxu3  ;;  %v3935_v35 = vmul.f32 %v6425_v23, %v7360_v20 }
 0x27f   : > { %v1746_v47 = vpop.f32.mrf.mxu0  ;;  %10881 = vst [vmem:[#allocation18_spill] sm:$0xff] %v7360_v20  ;;  %v7377_v33 = vadd.f32 %v7143_v51, %v2191_v49 }
 0x280   : > { %v2515_v19 = vpack.c.bf16 %v2454_v22, %v2454_v22  ;;  %v7356_v5 = vadd.f32 %v7143_v51, %v1746_v47  ;;  %2492 = vmatmul.bf16.gmra.mxu1 %v2361_v3  ;;  %10883 = vst [vmem:[#allocation32_spill] sm:$0xff] %v7365_v57  ;;  %v4597_v47 = vmul.f32 %v6425_v23, %v7365_v57  ;;  %v2026_v46 = vpop.f32.mrf.mxu2 }
 0x281   : > { %10885 = vst [vmem:[#allocation146_spill] sm:$0xff] %v7377_v33  ;;  %v7384_v3 = vadd.f32 %v7143_v51, %v2026_v46  ;;  %v4565_v49 = vmul.f32 %v6432_v44, %v7377_v33  ;;  %v2280_v33 = vmul.f32 %v6432_v44, %v1667_v60 }
 0x282   : > { %10879 = vst [vmem:[#allocation31_spill] sm:$0xff] %v7356_v5  ;;  %v2598_v31 = vmul.f32 %v6432_v44, %v7356_v5  ;;  %5462 = vmatmul.msk.bf16.gmra.mxu0 %vm1193_vm1, %v5850_v24  ;;  %v10887_v24 = vld [vmem:[#allocation34_spill] sm:$0xff]  ;;  %v2313_v46 = vmul.f32 %v6443_v40, %v7356_v5 }
 0x283   : > { %2548 = vst.msk [vmem:[%s6885_s13 + $0x30] sm:$0xf] %vm2535_vm2, %v2515_v19  ;;  %v4233_v19 = vmul.f32 %v6432_v44, %v7295_v8  ;;  %v1669_v63 = vadd.f32 %v7143_v51, %v10887_v24  ;;  %v4265_v20 = vmul.f32 %v6425_v23, %v7384_v3 }
 0x284   : > { %v7374_v42 = vadd.f32 %v2631_v17, %v2598_v31  ;;  %10886 = vst [vmem:[#allocation147_spill] sm:$0xff] %v7384_v3  ;;  %v3903_v31 = vmul.f32 %v6432_v44, %v7384_v3 }
 0x285   : > { %v2455_v22 = vpop.f32.mrf.mxu1  ;;  %v7407_v11 = vadd.f32 %v4265_v20, %v4233_v19  ;;  %v2281_v3 = vmul.f32 %v6432_v44, %v1669_v63 }
 0x286   : > { %10884 = vst [vmem:[#allocation145_spill] sm:$0xff] %v7374_v42  ;;  %v2456_v17 = vadd.f32 %v6862_v38, %v2455_v22  ;;  %v7395_v42 = vpop.f32.mrf.mxu3  ;;  %v7402_v22 = vadd.f32 %v4597_v47, %v4565_v49  ;;  %v7405_v8 = vadd.f32 %v3935_v35, %v3903_v31  ;;  %v2345_v49 = vadd.f32 %v2313_v46, %v2280_v33  ;;  %v10898_v46 = vld [vmem:[#allocation37_spill] sm:$0xff] }
 0x287   : > { %v1748_v34 = vpop.f32.mrf.mxu0  ;;  %10888 = vst [vmem:[#allocation34_spill] sm:$0xff] %v7395_v42  ;;  %v2632_v42 = vmul.f32 %v6425_v23, %v1669_v63  ;;  %v5851_v63 = vld [vmem:[%s6081_s30 + $0x140] sm:$0xff] }
 0x288   : > { %v2516_v26 = vpack.c.bf16 %v2456_v17, %v2456_v17  ;;  %v7400_v24 = vadd.f32 %v7143_v51, %v1748_v34  ;;  %10890 = vst [vmem:[#allocation149_spill] sm:$0xff] %v7402_v22  ;;  %v7417_v60 = vpop.f32.mrf.mxu2 }
 0x289   : > { %10891 = vst [vmem:[#allocation150_spill] sm:$0xff] %v7405_v8 }
 0x28a   : > { %10889 = vst [vmem:[#allocation148_spill] sm:$0xff] %v7400_v24  ;;  %v2314_v17 = vmul.f32 %v6443_v40, %v7400_v24  ;;  %v2599_v47 = vmul.f32 %v6432_v44, %v7400_v24  ;;  %v10895_v24 = vld [vmem:[#allocation24_spill] sm:$0xff] }
 0x28b   : > { %10892 = vst [vmem:[#allocation151_spill] sm:$0xff] %v7407_v11  ;;  %v7428_v33 = vadd.f32 %v7143_v51, %v10895_v24 }
 0x28c   : > { %2549 = vst.msk [vmem:[%s6885_s13 + $0x34] sm:$0xf] %vm2535_vm2, %v2516_v26  ;;  %v2346_v34 = vadd.f32 %v2314_v17, %v2281_v3  ;;  %v7419_v35 = vadd.f32 %v2632_v42, %v2599_v47  ;;  %v10897_v3 = vld [vmem:[#allocation38_spill] sm:$0xff]  ;;  %v7434_v17 = vadd.f32 %v7143_v51, %v10898_v46 }
 0x28d   : > { %v2458_v20 = vpop.f32.mrf.mxu1  ;;  %10896 = vst [vmem:[#allocation24_spill] sm:$0xff] %v7428_v33  ;;  %v2931_v42 = vmul.f32 %v6425_v23, %v10897_v3 }
 0x28e   : > { %10893 = vst [vmem:[#allocation152_spill] sm:$0xff] %v7419_v35  ;;  %v2459_v19 = vadd.f32 %v6862_v38, %v2458_v20  ;;  %v2362_v31 = vpack.c.bf16 %v2346_v34, %v2345_v49  ;;  %v2196_v26 = vpop.f32.mrf.mxu3  ;;  %v3937_v20 = vmul.f32 %v6425_v23, %v7428_v33 }
 0x28f   : > { %v1751_v22 = vpop.f32.mrf.mxu0  ;;  %v7446_v24 = vadd.f32 %v7143_v51, %v2196_v26 }
 0x290   : > { %v2517_v5 = vpack.c.bf16 %v2459_v19, %v2459_v19  ;;  %v7424_v11 = vadd.f32 %v7143_v51, %v1751_v22  ;;  %2497 = vmatmul.bf16.gmra.mxu1 %v2362_v31  ;;  %v4599_v22 = vmul.f32 %v6425_v23, %v7434_v17  ;;  %v2031_v34 = vpop.f32.mrf.mxu2 }
 0x291   : > { %10900 = vst [vmem:[#allocation37_spill] sm:$0xff] %v7446_v24  ;;  %v7453_v31 = vadd.f32 %v7143_v51, %v2031_v34  ;;  %v4567_v3 = vmul.f32 %v6432_v44, %v7446_v24 }
 0x292   : > { %10894 = vst [vmem:[#allocation153_spill] sm:$0xff] %v7424_v11  ;;  %v2899_v47 = vmul.f32 %v6432_v44, %v7424_v11  ;;  %5463 = vmatmul.msk.bf16.gmra.mxu0 %vm1193_vm1, %v5851_v63 }
 0x293   : > { %2550 = vst.msk [vmem:[%s6885_s13 + $0x38] sm:$0xf] %vm2535_vm2, %v2517_v5  ;;  %v4235_v5 = vmul.f32 %v6432_v44, %v7365_v57  ;;  %v3905_v26 = vmul.f32 %v6432_v44, %v7453_v31  ;;  %v4267_v46 = vmul.f32 %v6425_v23, %v7453_v31  ;;  %v7467_v34 = vadd.f32 %v4599_v22, %v4567_v3  ;;  %v10905_v57 = vld [vmem:[#allocation42_spill] sm:$0xff] }
 0x294   : > { %v7443_v49 = vadd.f32 %v2931_v42, %v2899_v47  ;;  %10901 = vst [vmem:[#allocation154_spill] sm:$0xff] %v7453_v31  ;;  %v2665_v47 = vmul.f32 %v6443_v40, %v7424_v11  ;;  %v2932_v8 = vmul.f32 %v6425_v23, %v10905_v57  ;;  %v10906_v31 = vld [vmem:[#allocation39_spill] sm:$0xff] }
 0x295   : > { %v2460_v19 = vpop.f32.mrf.mxu1  ;;  %10903 = vst [vmem:[#allocation156_spill] sm:$0xff] %v7467_v34  ;;  %v7471_v24 = vadd.f32 %v3937_v20, %v3905_v26  ;;  %v7473_v35 = vadd.f32 %v4267_v46, %v4235_v5 }
 0x296   : > { %10899 = vst [vmem:[#allocation38_spill] sm:$0xff] %v7443_v49  ;;  %v2461_v63 = vadd.f32 %v6862_v38, %v2460_v19  ;;  %v7469_v19 = vpop.f32.mrf.mxu3  ;;  %v2697_v22 = vadd.f32 %v2665_v47, %v10906_v31  ;;  %v10908_v31 = vld [vmem:[#allocation30_spill] sm:$0xff]  ;;  %v2933_v47 = vmul.f32 %v6425_v23, %v6482_v39 }
 0x297   : > { %v1753_v42 = vpop.f32.mrf.mxu0  ;;  %10904 = vst [vmem:[#allocation157_spill] sm:$0xff] %v7469_v19 }
 0x298   : > { %v2518_v33 = vpack.c.bf16 %v2461_v63, %v2461_v63  ;;  %v7465_v49 = vadd.f32 %v7143_v51, %v1753_v42  ;;  %v7487_v20 = vpop.f32.mrf.mxu2 }
 0x29a   : > { %10902 = vst [vmem:[#allocation155_spill] sm:$0xff] %v7465_v49  ;;  %v2666_v63 = vmul.f32 %v6443_v40, %v7465_v49  ;;  %v2900_v42 = vmul.f32 %v6432_v44, %v7465_v49 }
 0x29b   : > { %2551 = vst.msk [vmem:[%s6885_s13 + $0x3c] sm:$0xf] %vm2535_vm2, %v2518_v33  ;;  %v5852_v33 = vld [vmem:[%s6081_s30 + $0x148] sm:$0xff] }
 0x29c   : > { %v2698_v3 = vadd.f32 %v2666_v63, %v6470_v15  ;;  %v7485_v34 = vadd.f32 %v2932_v8, %v2900_v42  ;;  %v7496_v15 = vadd.f32 %v7143_v51, %v10908_v31  ;;  %v5977_v8 = vld [vmem:[%s10446_s4 + $0x38] sm:$0xff]  ;;  %v7505_v63 = vadd.f32 %v7143_v51, %v6479_v52 }
 0x29d   : > { %v2463_v5 = vpop.f32.mrf.mxu1 }
 0x29e   : > { %v2464_v57 = vadd.f32 %v6862_v38, %v2463_v5  ;;  %v2729_v26 = vpack.c.bf16 %v2698_v3, %v2697_v22  ;;  %v2201_v49 = vpop.f32.mrf.mxu3  ;;  %10909 = vst [vmem:[#allocation39_spill] sm:$0xff] %v7496_v15  ;;  %v4601_v22 = vmul.f32 %v6425_v23, %v7505_v63  ;;  %v3939_v52 = vmul.f32 %v6425_v23, %v7496_v15 }
 0x29f   : > { %v1756_v46 = vpop.f32.mrf.mxu0  ;;  %v7517_v5 = vadd.f32 %v7143_v51, %v2201_v49 }
 0x2a0   : > { %v2519_v19 = vpack.c.bf16 %v2464_v57, %v2464_v57  ;;  %v7492_v11 = vadd.f32 %v7143_v51, %v1756_v46  ;;  %2753 = vmatmul.bf16.vlgmr.msrb.gmra.mxu2 %v2729_v26  ;;  %v2036_v39 = vpop.f32.mrf.mxu2 }
 0x2a1   : > { %4661 = vmatpush.bf16.msrb.mxu2 %v5977_v8  ;;  %10911 = vst [vmem:[#allocation158_spill] sm:$0xff] %v7517_v5  ;;  %v7524_v26 = vadd.f32 %v7143_v51, %v2036_v39  ;;  %v4569_v46 = vmul.f32 %v6432_v44, %v7517_v5 }
 0x2a2   : > { %10907 = vst [vmem:[#allocation42_spill] sm:$0xff] %v7492_v11  ;;  %v2901_v42 = vmul.f32 %v6432_v44, %v7492_v11  ;;  %5464 = vmatmul.msk.bf16.gmra.mxu0 %vm1193_vm1, %v5852_v33  ;;  %v5978_v33 = vld [vmem:[%s10446_s4 + $0x30] sm:$0xff] }
 0x2a3   : > { %2552 = vst.msk [vmem:[%s6885_s13 + $0x40] sm:$0xf] %vm2535_vm2, %v2519_v19  ;;  %v4237_v19 = vmul.f32 %v6432_v44, %v7434_v17  ;;  %v3907_v8 = vmul.f32 %v6432_v44, %v7524_v26 }
 0x2a4   : > { %v7514_v3 = vadd.f32 %v2933_v47, %v2901_v42  ;;  %10912 = vst [vmem:[#allocation159_spill] sm:$0xff] %v7524_v26  ;;  %v4269_v47 = vmul.f32 %v6425_v23, %v7524_v26  ;;  %v2667_v42 = vmul.f32 %v6443_v40, %v7492_v11  ;;  %v5979_v26 = vld [vmem:[%s10446_s4 + $0x28] sm:$0xff] }
 0x2a5   : > { %v2465_v57 = vpop.f32.mrf.mxu1  ;;  %4662 = vmatpush.bf16.msrb.mxu2 %v5978_v33  ;;  %v7541_v33 = vadd.f32 %v4601_v22, %v4569_v46 }
 0x2a6   : > { %10910 = vst [vmem:[#allocation30_spill] sm:$0xff] %v7514_v3  ;;  %v2466_v49 = vadd.f32 %v6862_v38, %v2465_v57  ;;  %v7543_v57 = vpop.f32.mrf.mxu3  ;;  %v7545_v3 = vadd.f32 %v3939_v52, %v3907_v8  ;;  %v7547_v5 = vadd.f32 %v4269_v47, %v4237_v19  ;;  %v2699_v19 = vadd.f32 %v2667_v42, %v6491_v21  ;;  %v10918_v42 = vld [vmem:[#allocation36_spill] sm:$0xff] }
 0x2a7   : > { %v1758_v31 = vpop.f32.mrf.mxu0  ;;  %10914 = vst [vmem:[#allocation161_spill] sm:$0xff] %v7541_v33  ;;  %v5853_v33 = vld [vmem:[%s6081_s30 + $0x150] sm:$0xff] }
 0x2a8   : > { %v2520_v39 = vpack.c.bf16 %v2466_v49, %v2466_v49  ;;  %v7539_v15 = vadd.f32 %v7143_v51, %v1758_v31  ;;  %10915 = vst [vmem:[#allocation162_spill] sm:$0xff] %v7543_v57  ;;  %v2934_v49 = vmul.f32 %v6425_v23, %v6504_v56  ;;  %v7562_v31 = vpop.f32.mrf.mxu2  ;;  %v5980_v56 = vld [vmem:[%s10446_s4 + $0x20] sm:$0xff] }
 0x2a9   : > { %4663 = vmatpush.bf16.msrb.mxu2 %v5979_v26 }
 0x2aa   : > { %10913 = vst [vmem:[#allocation160_spill] sm:$0xff] %v7539_v15  ;;  %v2668_v22 = vmul.f32 %v6443_v40, %v7539_v15  ;;  %v2902_v52 = vmul.f32 %v6432_v44, %v7539_v15 }
 0x2ab   : > { %2553 = vst.msk [vmem:[%s6885_s13 + $0x44] sm:$0xf] %vm2535_vm2, %v2520_v39 }
 0x2ac   : > { %v2700_v46 = vadd.f32 %v2668_v22, %v6519_v45  ;;  %v7564_v8 = vadd.f32 %v2934_v49, %v2902_v52  ;;  %v7576_v49 = vadd.f32 %v7143_v51, %v10918_v42  ;;  %v5981_v22 = vld [vmem:[%s10446_s4 + $0x18] sm:$0xff]  ;;  %v2935_v52 = vmul.f32 %v6425_v23, %v6530_v53 }
 0x2ad   : > { %v2468_v26 = vpop.f32.mrf.mxu1  ;;  %4664 = vmatpush.bf16.msrb.mxu2 %v5980_v56 }
 0x2ae   : > { %10916 = vst [vmem:[#allocation163_spill] sm:$0xff] %v7564_v8  ;;  %v2469_v47 = vadd.f32 %v6862_v38, %v2468_v26  ;;  %v2730_v39 = vpack.c.bf16 %v2700_v46, %v2699_v19  ;;  %v2206_v45 = vpop.f32.mrf.mxu3  ;;  %v7585_v19 = vadd.f32 %v7143_v51, %v6527_v14  ;;  %v3941_v14 = vmul.f32 %v6425_v23, %v7576_v49 }
 0x2af   : > { %v1761_v15 = vpop.f32.mrf.mxu0  ;;  %10919 = vst [vmem:[#allocation36_spill] sm:$0xff] %v7576_v49  ;;  %v7597_v56 = vadd.f32 %v7143_v51, %v2206_v45 }
 0x2b0   : > { %v2521_v57 = vpack.c.bf16 %v2469_v47, %v2469_v47  ;;  %v7572_v21 = vadd.f32 %v7143_v51, %v1761_v15  ;;  %2758 = vmatmul.bf16.gmra.mxu2 %v2730_v39  ;;  %10920 = vst [vmem:[#allocation165_spill] sm:$0xff] %v7585_v19  ;;  %v4603_v46 = vmul.f32 %v6425_v23, %v7585_v19  ;;  %v2041_v53 = vpop.f32.mrf.mxu2 }
 0x2b1   : > { %4665 = vmatpush.bf16.msrb.mxu2 %v5981_v22  ;;  %10922 = vst [vmem:[#allocation167_spill] sm:$0xff] %v7597_v56  ;;  %v7604_v39 = vadd.f32 %v7143_v51, %v2041_v53  ;;  %v4571_v42 = vmul.f32 %v6432_v44, %v7597_v56 }
 0x2b2   : > { %10917 = vst [vmem:[#allocation164_spill] sm:$0xff] %v7572_v21  ;;  %v2903_v15 = vmul.f32 %v6432_v44, %v7572_v21  ;;  %5465 = vmatmul.msk.bf16.gmra.mxu0 %vm1193_vm1, %v5853_v33  ;;  %v5982_v33 = vld [vmem:[%s10446_s4 + $0x10] sm:$0xff]  ;;  %v2669_v53 = vmul.f32 %v6443_v40, %v7572_v21  ;;  %v10941_v21 = vld [vmem:[#allocation53_spill] sm:$0xff] }
 0x2b3   : > { %2554 = vst.msk [vmem:[%s6885_s13 + $0x48] sm:$0xf] %vm2535_vm2, %v2521_v57  ;;  %v4239_v57 = vmul.f32 %v6432_v44, %v7505_v63 }
 0x2b4   : > { %v7594_v26 = vadd.f32 %v2935_v52, %v2903_v15  ;;  %10923 = vst [vmem:[#allocation168_spill] sm:$0xff] %v7604_v39  ;;  %v3909_v52 = vmul.f32 %v6432_v44, %v7604_v39  ;;  %v4271_v15 = vmul.f32 %v6425_v23, %v7604_v39  ;;  %v5983_v39 = vld [vmem:[%s10446_s4 + $0x8] sm:$0xff] }
 0x2b5   : > { %v2470_v47 = vpop.f32.mrf.mxu1  ;;  %4666 = vmatpush.bf16.msrb.mxu2 %v5982_v33  ;;  %v7621_v33 = vadd.f32 %v4603_v46, %v4571_v42 }
 0x2b6   : > { %10921 = vst [vmem:[#allocation166_spill] sm:$0xff] %v7594_v26  ;;  %v2471_v45 = vadd.f32 %v6862_v38, %v2470_v47  ;;  %v7623_v47 = vpop.f32.mrf.mxu3  ;;  %v7625_v8 = vadd.f32 %v3941_v14, %v3909_v52  ;;  %v7627_v56 = vadd.f32 %v4271_v15, %v4239_v57  ;;  %v2701_v57 = vadd.f32 %v2669_v53, %v6539_v7 }
 0x2b7   : > { %v1763_v22 = vpop.f32.mrf.mxu0  ;;  %10925 = vst [vmem:[#allocation170_spill] sm:$0xff] %v7621_v33  ;;  %v5854_v33 = vld [vmem:[%s6081_s30 + $0x158] sm:$0xff]  ;;  %v7656_v53 = vadd.f32 %v7143_v51, %v6473_v13 }
 0x2b8   : > { %v2522_v49 = vpack.c.bf16 %v2471_v45, %v2471_v45  ;;  %v7619_v26 = vadd.f32 %v7143_v51, %v1763_v22  ;;  %10926 = vst [vmem:[#allocation171_spill] sm:$0xff] %v7623_v47  ;;  %v2936_v45 = vmul.f32 %v6425_v23, %v6552_v1  ;;  %v7642_v22 = vpop.f32.mrf.mxu2  ;;  %v5984_v1 = vld [vmem:[%s10446_s4] sm:$0xff] }
 0x2b9   : > { %10927 = vst [vmem:[#allocation172_spill] sm:$0xff] %v7627_v56  ;;  %4667 = vmatpush.bf16.msrb.mxu2 %v5983_v39  ;;  %v2938_v56 = vmul.f32 %v6425_v23, %v10941_v21 }
 0x2ba   : > { %10924 = vst [vmem:[#allocation169_spill] sm:$0xff] %v7619_v26  ;;  %v2670_v46 = vmul.f32 %v6443_v40, %v7619_v26  ;;  %v2904_v14 = vmul.f32 %v6432_v44, %v7619_v26 }
 0x2bb   : > { %2555 = vst.msk [vmem:[%s6885_s13 + $0x4c] sm:$0xf] %vm2535_vm2, %v2522_v49 }
 0x2bc   : > { %v2702_v42 = vadd.f32 %v2670_v46, %v6567_v62  ;;  %v7644_v52 = vadd.f32 %v2936_v45, %v2904_v14  ;;  %10930 = vst [vmem:[#allocation175_spill] sm:$0xff] %v7656_v53  ;;  %v2937_v45 = vmul.f32 %v6425_v23, %v6578_v59  ;;  %v10931_v46 = vld [vmem:[#allocation49_spill] sm:$0xff] }
 0x2bd   : > { %v2473_v39 = vpop.f32.mrf.mxu1  ;;  %4668 = vmatpush.bf16.msrb.mxu2 %v5984_v1  ;;  %v7662_v14 = vadd.f32 %v7143_v51, %v10931_v46 }
 0x2be   : > { %10928 = vst [vmem:[#allocation173_spill] sm:$0xff] %v7644_v52  ;;  %v2474_v49 = vadd.f32 %v6862_v38, %v2473_v39  ;;  %v2731_v15 = vpack.c.bf16 %v2702_v42, %v2701_v57  ;;  %v2211_v62 = vpop.f32.mrf.mxu3  ;;  %v3943_v42 = vmul.f32 %v6425_v23, %v7656_v53 }
 0x2bf   : > { %v1766_v26 = vpop.f32.mrf.mxu0  ;;  %10932 = vst [vmem:[#allocation49_spill] sm:$0xff] %v7662_v14  ;;  %v7674_v13 = vadd.f32 %v7143_v51, %v2211_v62 }
 0x2c0   : > { %v2523_v47 = vpack.c.bf16 %v2474_v49, %v2474_v49  ;;  %v7652_v7 = vadd.f32 %v7143_v51, %v1766_v26  ;;  %2763 = vmatmul.bf16.gmra.mxu2 %v2731_v15  ;;  %v4605_v26 = vmul.f32 %v6425_v23, %v7662_v14  ;;  %v2046_v59 = vpop.f32.mrf.mxu2 }
 0x2c1   : > { %10934 = vst [vmem:[#allocation177_spill] sm:$0xff] %v7674_v13  ;;  %v7681_v1 = vadd.f32 %v7143_v51, %v2046_v59  ;;  %v4573_v15 = vmul.f32 %v6432_v44, %v7674_v13 }
 0x2c2   : > { %10929 = vst [vmem:[#allocation174_spill] sm:$0xff] %v7652_v7  ;;  %v2905_v38 = vmul.f32 %v6432_v44, %v7652_v7  ;;  %5466 = vmatmul.msk.bf16.gmra.mxu0 %vm1193_vm1, %v5854_v33  ;;  %v7686_v33 = vld [vmem:[%s10447_s5] ss:$0 sm:$0xff] }
 0x2c3   : > { %2556 = vst.msk [vmem:[%s6885_s13 + $0x50] sm:$0xf] %vm2535_vm2, %v2523_v47  ;;  %v4241_v47 = vmul.f32 %v6432_v44, %v7585_v19  ;;  %v4273_v46 = vmul.f32 %v6425_v23, %v7681_v1 }
 0x2c4   : > { %v7671_v57 = vadd.f32 %v2937_v45, %v2905_v38  ;;  %10935 = vst [vmem:[#allocation178_spill] sm:$0xff] %v7681_v1  ;;  %v3911_v45 = vmul.f32 %v6432_v44, %v7681_v1  ;;  %v2671_v38 = vmul.f32 %v6443_v40, %v7652_v7  ;;  %v10942_v1 = vld [vmem:[#allocation50_spill] sm:$0xff] }
 0x2c5   : > { %v2475_v39 = vpop.f32.mrf.mxu1  ;;  %v7706_v52 = vadd.f32 %v4273_v46, %v4241_v47 }
 0x2c6   : > { %10933 = vst [vmem:[#allocation176_spill] sm:$0xff] %v7671_v57  ;;  %v2476_v49 = vadd.f32 %v7686_v33, %v2475_v39  ;;  %v7700_v57 = vadd.f32 %v4605_v26, %v4573_v15  ;;  %v7702_v39 = vpop.f32.mrf.mxu3  ;;  %v7704_v13 = vadd.f32 %v3943_v42, %v3911_v45  ;;  %v2703_v26 = vadd.f32 %v2671_v38, %v10942_v1  ;;  %v10946_v1 = vld [vmem:[#allocation45_spill] sm:$0xff] }
 0x2c7   : > { %v1768_v62 = vpop.f32.mrf.mxu0  ;;  %10938 = vst [vmem:[#allocation181_spill] sm:$0xff] %v7702_v39  ;;  %v7729_v38 = vadd.f32 %v7143_v51, %v10946_v1 }
 0x2c8   : > { %v2524_v59 = vpack.c.bf16 %v2476_v49, %v2476_v49  ;;  %v7698_v53 = vadd.f32 %v7143_v51, %v1768_v62  ;;  %10937 = vst [vmem:[#allocation180_spill] sm:$0xff] %v7700_v57  ;;  %v7718_v42 = vpop.f32.mrf.mxu2 }
 0x2c9   : > { %10939 = vst [vmem:[#allocation182_spill] sm:$0xff] %v7704_v13 }
 0x2ca   : > { %10936 = vst [vmem:[#allocation179_spill] sm:$0xff] %v7698_v53  ;;  %v2672_v49 = vmul.f32 %v6443_v40, %v7698_v53  ;;  %v2906_v62 = vmul.f32 %v6432_v44, %v7698_v53 }
 0x2cb   : > { %10940 = vst [vmem:[#allocation183_spill] sm:$0xff] %v7706_v52 }
 0x2cc   : > { %2557 = vst.msk [vmem:[%s6885_s13 + $0x54] sm:$0xf] %vm2535_vm2, %v2524_v59  ;;  %v2704_v15 = vadd.f32 %v2672_v49, %v6609_v4  ;;  %v7720_v47 = vadd.f32 %v2938_v56, %v2906_v62  ;;  %v5855_v59 = vld [vmem:[%s6081_s30 + $0x160] sm:$0xff]  ;;  %v2939_v4 = vmul.f32 %v6425_v23, %v6618_v18  ;;  %v7735_v56 = vadd.f32 %v7143_v51, %v6615_v43 }
 0x2cd   : > { %10943 = vst [vmem:[#allocation53_spill] sm:$0xff] %v7718_v42  ;;  %v2478_v45 = vpop.f32.mrf.mxu1  ;;  %v3945_v43 = vmul.f32 %v6425_v23, %v7729_v38 }
 0x2ce   : > { %10944 = vst [vmem:[#allocation50_spill] sm:$0xff] %v7720_v47  ;;  %v2479_v21 = vadd.f32 %v7686_v33, %v2478_v45  ;;  %v2732_v46 = vpack.c.bf16 %v2704_v15, %v2703_v26  ;;  %v2216_v53 = vpop.f32.mrf.mxu3  ;;  %v10957_v47 = vld [vmem:[#allocation58_spill] sm:$0xff] }
 0x2cf   : > { %v1771_v57 = vpop.f32.mrf.mxu0  ;;  %10947 = vst [vmem:[#allocation45_spill] sm:$0xff] %v7729_v38  ;;  %v7747_v26 = vadd.f32 %v7143_v51, %v2216_v53  ;;  %v2940_v52 = vmul.f32 %v6425_v23, %v10957_v47 }
 0x2d0   : > { %v2525_v39 = vpack.c.bf16 %v2479_v21, %v2479_v21  ;;  %v7725_v7 = vadd.f32 %v7143_v51, %v1771_v57  ;;  %2768 = vmatmul.bf16.gmra.mxu2 %v2732_v46  ;;  %10948 = vst [vmem:[#allocation185_spill] sm:$0xff] %v7735_v56  ;;  %v4607_v57 = vmul.f32 %v6425_v23, %v7735_v56  ;;  %v2051_v18 = vpop.f32.mrf.mxu2 }
 0x2d1   : > { %10950 = vst [vmem:[#allocation187_spill] sm:$0xff] %v7747_v26  ;;  %v7754_v45 = vadd.f32 %v7143_v51, %v2051_v18  ;;  %v4575_v46 = vmul.f32 %v6432_v44, %v7747_v26 }
 0x2d2   : > { %10945 = vst [vmem:[#allocation184_spill] sm:$0xff] %v7725_v7  ;;  %v2907_v49 = vmul.f32 %v6432_v44, %v7725_v7  ;;  %5467 = vmatmul.msk.bf16.gmra.mxu0 %vm1193_vm1, %v5855_v59 }
 0x2d3   : > { %2558 = vst.msk [vmem:[%s6885_s13 + $0x58] sm:$0xf] %vm2535_vm2, %v2525_v39  ;;  %v4243_v39 = vmul.f32 %v6432_v44, %v7662_v14  ;;  %v3913_v53 = vmul.f32 %v6432_v44, %v7754_v45  ;;  %v4275_v1 = vmul.f32 %v6425_v23, %v7754_v45  ;;  %v7768_v18 = vadd.f32 %v4607_v57, %v4575_v46 }
 0x2d4   : > { %v7744_v62 = vadd.f32 %v2939_v4, %v2907_v49  ;;  %10951 = vst [vmem:[#allocation188_spill] sm:$0xff] %v7754_v45  ;;  %v2673_v4 = vmul.f32 %v6443_v40, %v7725_v7  ;;  %v10958_v45 = vld [vmem:[#allocation55_spill] sm:$0xff] }
 0x2d5   : > { %v2480_v15 = vpop.f32.mrf.mxu1  ;;  %10953 = vst [vmem:[#allocation190_spill] sm:$0xff] %v7768_v18  ;;  %v7774_v26 = vadd.f32 %v4275_v1, %v4243_v39 }
 0x2d6   : > { %10949 = vst [vmem:[#allocation186_spill] sm:$0xff] %v7744_v62  ;;  %v2481_v21 = vadd.f32 %v7686_v33, %v2480_v15  ;;  %v7770_v15 = vpop.f32.mrf.mxu3  ;;  %v7772_v62 = vadd.f32 %v3945_v43, %v3913_v53  ;;  %v2705_v57 = vadd.f32 %v2673_v4, %v10958_v45  ;;  %v10962_v45 = vld [vmem:[#allocation48_spill] sm:$0xff] }
 0x2d7   : > { %v1773_v59 = vpop.f32.mrf.mxu0  ;;  %10954 = vst [vmem:[#allocation191_spill] sm:$0xff] %v7770_v15  ;;  %v7797_v4 = vadd.f32 %v7143_v51, %v10962_v45 }
 0x2d8   : > { %v2526_v49 = vpack.c.bf16 %v2481_v21, %v2481_v21  ;;  %v7766_v38 = vadd.f32 %v7143_v51, %v1773_v59  ;;  %10955 = vst [vmem:[#allocation192_spill] sm:$0xff] %v7772_v62  ;;  %v7786_v43 = vpop.f32.mrf.mxu2 }
 0x2d9   : > { %10956 = vst [vmem:[#allocation193_spill] sm:$0xff] %v7774_v26  ;;  %v10974_v26 = vld [vmem:[#allocation65_spill] sm:$0xff] }
 0x2da   : > { %10952 = vst [vmem:[#allocation189_spill] sm:$0xff] %v7766_v38  ;;  %v2674_v21 = vmul.f32 %v6443_v40, %v7766_v38  ;;  %v2908_v59 = vmul.f32 %v6432_v44, %v7766_v38 }
 0x2db   : > { %2559 = vst.msk [vmem:[%s6885_s13 + $0x5c] sm:$0xf] %vm2535_vm2, %v2526_v49  ;;  %v5856_v49 = vld [vmem:[%s6081_s30 + $0x168] sm:$0xff] }
 0x2dc   : > { %v2706_v46 = vadd.f32 %v2674_v21, %v6651_v16  ;;  %10959 = vst [vmem:[#allocation58_spill] sm:$0xff] %v7786_v43  ;;  %v7788_v39 = vadd.f32 %v2940_v52, %v2908_v59  ;;  %v2941_v16 = vmul.f32 %v6425_v23, %v6665_v32  ;;  %v10964_v52 = vld [vmem:[#allocation61_spill] sm:$0xff] }
 0x2dd   : > { %v2483_v53 = vpop.f32.mrf.mxu1  ;;  %10963 = vst [vmem:[#allocation48_spill] sm:$0xff] %v7797_v4  ;;  %v7803_v21 = vadd.f32 %v7143_v51, %v10964_v52 }
 0x2de   : > { %10960 = vst [vmem:[#allocation55_spill] sm:$0xff] %v7788_v39  ;;  %v2484_v47 = vadd.f32 %v7686_v33, %v2483_v53  ;;  %v2733_v1 = vpack.c.bf16 %v2706_v46, %v2705_v57  ;;  %v2221_v38 = vpop.f32.mrf.mxu3  ;;  %v3947_v53 = vmul.f32 %v6425_v23, %v7797_v4 }
 0x2df   : > { %v1776_v18 = vpop.f32.mrf.mxu0  ;;  %10965 = vst [vmem:[#allocation61_spill] sm:$0xff] %v7803_v21  ;;  %v7815_v46 = vadd.f32 %v7143_v51, %v2221_v38 }
 0x2e0   : > { %v2527_v15 = vpack.c.bf16 %v2484_v47, %v2484_v47  ;;  %v7793_v7 = vadd.f32 %v7143_v51, %v1776_v18  ;;  %2773 = vmatmul.bf16.gmra.mxu2 %v2733_v1  ;;  %v4609_v18 = vmul.f32 %v6425_v23, %v7803_v21  ;;  %v2056_v32 = vpop.f32.mrf.mxu2 }
 0x2e1   : > { %10967 = vst [vmem:[#allocation196_spill] sm:$0xff] %v7815_v46  ;;  %v7822_v1 = vadd.f32 %v7143_v51, %v2056_v32  ;;  %v4577_v45 = vmul.f32 %v6432_v44, %v7815_v46 }
 0x2e2   : > { %10961 = vst [vmem:[#allocation194_spill] sm:$0xff] %v7793_v7  ;;  %v2909_v59 = vmul.f32 %v6432_v44, %v7793_v7  ;;  %5468 = vmatmul.msk.bf16.gmra.mxu0 %vm1193_vm1, %v5856_v49 }
 0x2e3   : > { %2560 = vst.msk [vmem:[%s6885_s13 + $0x60] sm:$0xf] %vm2535_vm2, %v2527_v15  ;;  %v4245_v15 = vmul.f32 %v6432_v44, %v7735_v56  ;;  %v3915_v38 = vmul.f32 %v6432_v44, %v7822_v1  ;;  %v4277_v52 = vmul.f32 %v6425_v23, %v7822_v1  ;;  %v7836_v32 = vadd.f32 %v4609_v18, %v4577_v45  ;;  %v10975_v45 = vld [vmem:[#allocation63_spill] sm:$0xff] }
 0x2e4   : > { %v7812_v57 = vadd.f32 %v2941_v16, %v2909_v59  ;;  %10968 = vst [vmem:[#allocation197_spill] sm:$0xff] %v7822_v1  ;;  %v2675_v59 = vmul.f32 %v6443_v40, %v7793_v7  ;;  %v2942_v56 = vmul.f32 %v6425_v23, %v10974_v26  ;;  %v2147_v18 = vadd.f32 %v7143_v51, %v6704_v29  ;;  %v10979_v7 = vld [vmem:[#allocation2_spill] sm:$0xff]  ;;  %v10981_v29 = vld [vmem:[#allocation59_spill] sm:$0xff] }
 0x2e5   : > { %v2485_v47 = vpop.f32.mrf.mxu1  ;;  %10970 = vst [vmem:[#allocation199_spill] sm:$0xff] %v7836_v32  ;;  %v7840_v46 = vadd.f32 %v3947_v53, %v3915_v38  ;;  %v7842_v39 = vadd.f32 %v4277_v52, %v4245_v15  ;;  %v10976_v53 = vld [vmem:[#allocation66_spill] sm:$0xff] }
 0x2e6   : > { %10966 = vst [vmem:[#allocation195_spill] sm:$0xff] %v7812_v57  ;;  %v2486_v49 = vadd.f32 %v7686_v33, %v2485_v47  ;;  %v7838_v47 = vpop.f32.mrf.mxu3  ;;  %v2707_v1 = vadd.f32 %v2675_v59, %v10975_v45  ;;  %v4281_v59 = vmul.f32 %v6425_v23, %v10981_v29  ;;  %v10988_v29 = vld [vmem:[#allocation70_spill] sm:$0xff] }
 0x2e7   : > { %v1778_v16 = vpop.f32.mrf.mxu0  ;;  %10971 = vst [vmem:[#allocation200_spill] sm:$0xff] %v7838_v47  ;;  %v5857_v47 = vld [vmem:[%s6081_s30 + $0x170] sm:$0xff] }
 0x2e8   : > { %v2528_v4 = vpack.c.bf16 %v2486_v49, %v2486_v49  ;;  %v7834_v57 = vadd.f32 %v7143_v51, %v1778_v16  ;;  %10972 = vst [vmem:[#allocation201_spill] sm:$0xff] %v7840_v46  ;;  %v7856_v15 = vpop.f32.mrf.mxu2  ;;  %v7884_v46 = vadd.f32 %v7143_v51, %v10988_v29 }
 0x2e9   : > { %10973 = vst [vmem:[#allocation202_spill] sm:$0xff] %v7842_v39 }
 0x2ea   : > { %10969 = vst [vmem:[#allocation198_spill] sm:$0xff] %v7834_v57  ;;  %v2676_v49 = vmul.f32 %v6443_v40, %v7834_v57  ;;  %v2910_v16 = vmul.f32 %v6432_v44, %v7834_v57  ;;  %v7864_v57 = vadd.f32 %v7143_v51, %v10979_v7 }
 0x2eb   : > { %2561 = vst.msk [vmem:[%s6885_s13 + $0x64] sm:$0xf] %vm2535_vm2, %v2528_v4 }
 0x2ec   : > { %v2708_v38 = vadd.f32 %v2676_v49, %v10976_v53  ;;  %10977 = vst [vmem:[#allocation65_spill] sm:$0xff] %v7856_v15  ;;  %v7858_v52 = vadd.f32 %v2942_v56, %v2910_v16  ;;  %v4249_v49 = vmul.f32 %v6432_v44, %v2147_v18  ;;  %v10983_v53 = vld [vmem:[#allocation54_spill] sm:$0xff] }
 0x2ed   : > { %v2488_v26 = vpop.f32.mrf.mxu1  ;;  %10980 = vst [vmem:[#allocation66_spill] sm:$0xff] %v7864_v57 }
 0x2ee   : > { %10978 = vst [vmem:[#allocation63_spill] sm:$0xff] %v7858_v52  ;;  %v2489_v4 = vadd.f32 %v7686_v33, %v2488_v26  ;;  %v2734_v32 = vpack.c.bf16 %v2708_v38, %v2707_v1  ;;  %v2226_v16 = vpop.f32.mrf.mxu3  ;;  %v7874_v1 = vadd.f32 %v7143_v51, %v10983_v53  ;;  %v10985_v38 = vld [vmem:[#allocation67_spill] sm:$0xff]  ;;  %v10987_v26 = vld [vmem:[#allocation68_spill] sm:$0xff]  ;;  %v4611_v53 = vmul.f32 %v6425_v23, %v2147_v18 }
 0x2ef   : > { %v1781_v39 = vpop.f32.mrf.mxu0  ;;  %v7878_v7 = vadd.f32 %v7143_v51, %v10985_v38  ;;  %v2943_v52 = vmul.f32 %v6425_v23, %v10987_v26  ;;  %v2227_v29 = vadd.f32 %v7143_v51, %v2226_v16  ;;  %v4313_v26 = vadd.f32 %v4281_v59, %v4249_v49 }
 0x2f0   : > { %v2529_v45 = vpack.c.bf16 %v2489_v4, %v2489_v4  ;;  %v7870_v56 = vadd.f32 %v7143_v51, %v1781_v39  ;;  %2778 = vmatmul.bf16.gmra.mxu2 %v2734_v32  ;;  %10984 = vst [vmem:[#allocation54_spill] sm:$0xff] %v7874_v1  ;;  %v3920_v32 = vmul.f32 %v6432_v44, %v7864_v57  ;;  %v2061_v15 = vpop.f32.mrf.mxu2 }
 0x2f1   : > { %10986 = vst [vmem:[#allocation67_spill] sm:$0xff] %v7878_v7  ;;  %v4282_v4 = vmul.f32 %v6425_v23, %v7864_v57  ;;  %v3952_v62 = vmul.f32 %v6425_v23, %v7878_v7  ;;  %v7906_v57 = vadd.f32 %v7143_v51, %v2061_v15  ;;  %v4345_v59 = vmul.f32 %v6443_v40, %v2227_v29 }
 0x2f2   : > { %10982 = vst [vmem:[#allocation2_spill] sm:$0xff] %v7870_v56  ;;  %v2911_v39 = vmul.f32 %v6432_v44, %v7870_v56  ;;  %5469 = vmatmul.msk.bf16.gmra.mxu0 %vm1193_vm1, %v5857_v47  ;;  %v4247_v47 = vmul.f32 %v6432_v44, %v7803_v21  ;;  %v4579_v49 = vmul.f32 %v6432_v44, %v2227_v29 }
 0x2f3   : > { %2562 = vst.msk [vmem:[%s6885_s13 + $0x68] sm:$0xf] %vm2535_vm2, %v2529_v45  ;;  %v3949_v45 = vmul.f32 %v6425_v23, %v7874_v1  ;;  %v2677_v1 = vmul.f32 %v6443_v40, %v7870_v56  ;;  %v3917_v15 = vmul.f32 %v6432_v44, %v7906_v57  ;;  %v7923_v43 = vadd.f32 %v4345_v59, %v4313_v26  ;;  %v10997_v59 = vld [vmem:[#allocation74_spill] sm:$0xff] }
 0x2f4   : > { %v7896_v38 = vadd.f32 %v2943_v52, %v2911_v39  ;;  %10990 = vst [vmem:[#allocation70_spill] sm:$0xff] %v7906_v57  ;;  %v4250_v52 = vmul.f32 %v6432_v44, %v7884_v46  ;;  %v4015_v39 = vmul.f32 %v6443_v40, %v2147_v18  ;;  %v7925_v29 = vadd.f32 %v4611_v53, %v4579_v49  ;;  %v10994_v18 = vld [vmem:[#allocation71_spill] sm:$0xff] }
 0x2f5   : > { %v2490_v14 = vpop.f32.mrf.mxu1  ;;  %10992 = vst [vmem:[#allocation204_spill] sm:$0xff] %v7923_v43  ;;  %v2944_v19 = vmul.f32 %v6425_v23, %v10994_v18  ;;  %v7929_v56 = vadd.f32 %v3949_v45, %v3917_v15  ;;  %v10996_v45 = vld [vmem:[#allocation69_spill] sm:$0xff]  ;;  %v3984_v49 = vadd.f32 %v3952_v62, %v3920_v32 }
 0x2f6   : > { %10989 = vst [vmem:[#allocation68_spill] sm:$0xff] %v7896_v38  ;;  %v2491_v16 = vadd.f32 %v7686_v33, %v2490_v14  ;;  %v4279_v38 = vmul.f32 %v6425_v23, %v7906_v57  ;;  %v2228_v13 = vpop.f32.mrf.mxu3 }
 0x2f7   : > { %v1783_v7 = vpop.f32.mrf.mxu0  ;;  %10993 = vst [vmem:[#allocation205_spill] sm:$0xff] %v7925_v29  ;;  %v7934_v11 = vadd.f32 %v7143_v51, %v2228_v13  ;;  %v5858_v29 = vld [vmem:[%s6081_s30 + $0x178] sm:$0xff] }
 0x2f8   : > { %v2530_v21 = vpack.c.bf16 %v2491_v16, %v2491_v16  ;;  %v7921_v14 = vadd.f32 %v7143_v51, %v1783_v7  ;;  %v7931_v42 = vadd.f32 %v4279_v38, %v4247_v47  ;;  %v4016_v7 = vmul.f32 %v6443_v40, %v7884_v46 }
 0x2f9   : > { %10995 = vst [vmem:[#allocation71_spill] sm:$0xff] %v7934_v11  ;;  %v4314_v16 = vadd.f32 %v4282_v4, %v4250_v52  ;;  %v4346_v38 = vmul.f32 %v6443_v40, %v7934_v11  ;;  %v2709_v47 = vadd.f32 %v2677_v1, %v10996_v45 }
 0x2fa   : > { %10991 = vst [vmem:[#allocation203_spill] sm:$0xff] %v7921_v14  ;;  %v2678_v53 = vmul.f32 %v6443_v40, %v7921_v14  ;;  %v2912_v26 = vmul.f32 %v6432_v44, %v7921_v14  ;;  %v11000_v14 = vld [vmem:[#allocation62_spill] sm:$0xff]  ;;  %v7957_v52 = vadd.f32 %v4016_v7, %v3984_v49 }
 0x2fb   : > { %2563 = vst.msk [vmem:[%s6885_s13 + $0x6c] sm:$0xf] %vm2535_vm2, %v2530_v21  ;;  %v7950_v21 = vadd.f32 %v4346_v38, %v4314_v16  ;;  %v7955_v4 = vadd.f32 %v4015_v39, %v11000_v14  ;;  %v11004_v14 = vld [vmem:[#allocation75_spill] sm:$0xff] }
 0x2fc   : > { %v2710_v51 = vadd.f32 %v2678_v53, %v10997_v59  ;;  %v7948_v13 = vadd.f32 %v2944_v19, %v2912_v26  ;;  %11002 = vst [vmem:[#allocation206_spill] sm:$0xff] %v7957_v52  ;;  %v7962_v19 = vld [vmem:[%s10444_s2] ss:$0 sm:$0xff]  ;;  %v2945_v7 = vmul.f32 %v6425_v23, %v11004_v14  ;;  %v5860_v52 = vld [vmem:[%s6081_s30 + $0x188] sm:$0xff] }
 0x2fd   : > { %v2493_v15 = vpop.f32.mrf.mxu1  ;;  %10999 = vst [vmem:[#allocation74_spill] sm:$0xff] %v7950_v21  ;;  %v7984_v26 = vadd.f32 %v7962_v19, %v6960_v10  ;;  %v3987_v10 = vmul.f32 %v6443_v40, %v6823_v6  ;;  %v5859_v21 = vld [vmem:[%s6081_s30 + $0x180] sm:$0xff] }
 0x2fe   : > { %10998 = vst [vmem:[#allocation69_spill] sm:$0xff] %v7948_v13  ;;  %v2494_v18 = vadd.f32 %v7686_v33, %v2493_v15  ;;  %v2735_v57 = vpack.c.bf16 %v2710_v51, %v2709_v47 }
 0x2ff   : > { %11001 = vst [vmem:[#allocation62_spill] sm:$0xff] %v7955_v4  ;;  %v1786_v11 = vpop.f32.mrf.mxu0  ;;  %v3892_v59 = vmul.f32 %v6432_v44, %v7984_v26  ;;  %v8015_v32 = vadd.f32 %v3987_v10, %v6942_v50 }
 0x300   : > { %v2531_v1 = vpack.c.bf16 %v2494_v18, %v2494_v18  ;;  %v7965_v62 = vadd.f32 %v7962_v19, %v1786_v11  ;;  %2783 = vmatmul.bf16.gmra.mxu2 %v2735_v57  ;;  %v11005_v11 = vld [vmem:[#allocation3_spill] sm:$0xff]  ;;  %v3988_v18 = vmul.f32 %v6443_v40, %v6841_v36 }
 0x301   : > { %v7980_v57 = vadd.f32 %v7962_v19, %v11005_v11 }
 0x302   : > { %11003 = vst [vmem:[#allocation207_spill] sm:$0xff] %v7965_v62  ;;  %v2913_v53 = vmul.f32 %v6432_v44, %v7965_v62  ;;  %5470 = vmatmul.msk.bf16.gmra.mxu0 %vm1193_vm1, %v5858_v29  ;;  %v2679_v51 = vmul.f32 %v6443_v40, %v7965_v62  ;;  %v11105_v62 = vld [vmem:[#allocation133_spill] sm:$0xff] }
 0x303   : > { %2564 = vst.msk [vmem:[%s6885_s13 + $0x70] sm:$0xf] %vm2535_vm2, %v2531_v1  ;;  %v3924_v47 = vmul.f32 %v6425_v23, %v7980_v57  ;;  %v11008_v1 = vld [vmem:[#allocation79_spill] sm:$0xff] }
 0x304   : > { %v7986_v16 = vadd.f32 %v2945_v7, %v2913_v53  ;;  %v2946_v14 = vmul.f32 %v6425_v23, %v11008_v1 }
 0x305   : > { %v2495_v38 = vpop.f32.mrf.mxu1  ;;  %v3956_v11 = vadd.f32 %v3924_v47, %v3892_v59 }
 0x306   : > { %11006 = vst [vmem:[#allocation75_spill] sm:$0xff] %v7986_v16  ;;  %v2496_v45 = vadd.f32 %v7686_v33, %v2495_v38  ;;  %v11009_v38 = vld [vmem:[#allocation78_spill] sm:$0xff]  ;;  %v11083_v16 = vld [vmem:[#allocation124_spill] sm:$0xff] }
 0x307   : > { %v1788_v29 = vpop.f32.mrf.mxu0  ;;  %11011 = vst [vmem:[#allocation78_spill] sm:$0xff] %v8015_v32  ;;  %v8017_v1 = vadd.f32 %v3988_v18, %v3956_v11  ;;  %v8039_v18 = vadd.f32 %v7962_v19, %v7045_v0  ;;  %v4254_v0 = vmul.f32 %v6425_v23, %v7984_v26  ;;  %v11020_v32 = vld [vmem:[#allocation93_spill] sm:$0xff] }
 0x308   : > { %v2532_v49 = vpack.c.bf16 %v2496_v45, %v2496_v45  ;;  %v7996_v15 = vadd.f32 %v7962_v19, %v1788_v29  ;;  %v2711_v45 = vadd.f32 %v2679_v51, %v11009_v38 }
 0x309   : > { %11012 = vst [vmem:[#allocation208_spill] sm:$0xff] %v8017_v1 }
 0x30a   : > { %11007 = vst [vmem:[#allocation3_spill] sm:$0xff] %v7996_v15  ;;  %v2680_v7 = vmul.f32 %v6443_v40, %v7996_v15  ;;  %v2914_v53 = vmul.f32 %v6432_v44, %v7996_v15 }
 0x30b   : > { %2565 = vst.msk [vmem:[%s6885_s13 + $0x74] sm:$0xf] %vm2535_vm2, %v2532_v49 }
 0x30c   : > { %v2712_v6 = vadd.f32 %v2680_v7, %v6802_v28  ;;  %v8012_v29 = vadd.f32 %v2946_v14, %v2914_v53  ;;  %v2947_v28 = vmul.f32 %v6425_v23, %v6813_v61  ;;  %v3894_v7 = vmul.f32 %v6432_v44, %v8039_v18 }
 0x30d   : > { %v2498_v39 = vpop.f32.mrf.mxu1 }
 0x30e   : > { %11010 = vst [vmem:[#allocation79_spill] sm:$0xff] %v8012_v29  ;;  %v2499_v49 = vadd.f32 %v7686_v33, %v2498_v39  ;;  %v2736_v43 = vpack.c.bf16 %v2712_v6, %v2711_v45  ;;  %v11014_v39 = vld [vmem:[#allocation4_spill] sm:$0xff]  ;;  %v3989_v6 = vmul.f32 %v6443_v40, %v6898_v48 }
 0x30f   : > { %v1791_v4 = vpop.f32.mrf.mxu0  ;;  %v8035_v10 = vadd.f32 %v7962_v19, %v11014_v39 }
 0x310   : > { %v2533_v59 = vpack.c.bf16 %v2499_v49, %v2499_v49  ;;  %v8024_v51 = vadd.f32 %v7962_v19, %v1791_v4  ;;  %2788 = vmatmul.bf16.gmra.mxu2 %v2736_v43  ;;  %v4317_v49 = vmul.f32 %v6443_v40, %v6833_v37 }
 0x311   : > { %v3926_v14 = vmul.f32 %v6425_v23, %v8035_v10 }
 0x312   : > { %11013 = vst [vmem:[#allocation209_spill] sm:$0xff] %v8024_v51  ;;  %v2915_v50 = vmul.f32 %v6432_v44, %v8024_v51  ;;  %5471 = vmatmul.msk.bf16.gmra.mxu0 %vm1193_vm1, %v5859_v21  ;;  %v4222_v21 = vmul.f32 %v6432_v44, %v6841_v36  ;;  %v2681_v11 = vmul.f32 %v6443_v40, %v8024_v51 }
 0x313   : > { %2566 = vst.msk [vmem:[%s6885_s13 + $0x78] sm:$0xf] %vm2535_vm2, %v2533_v59  ;;  %v3990_v36 = vmul.f32 %v6443_v40, %v6927_v2  ;;  %v8063_v59 = vpop.f32.mrf.mxu2  ;;  %v8086_v1 = vadd.f32 %v4317_v49, %v11020_v32  ;;  %v8110_v49 = vadd.f32 %v7962_v19, %v7121_v25  ;;  %v4224_v25 = vmul.f32 %v6432_v44, %v6927_v2 }
 0x314   : > { %v8041_v4 = vadd.f32 %v2947_v28, %v2915_v50  ;;  %v2948_v28 = vmul.f32 %v6425_v23, %v6846_v27  ;;  %v4318_v50 = vmul.f32 %v6443_v40, %v6865_v41  ;;  %v4286_v47 = vadd.f32 %v4254_v0, %v4222_v21  ;;  %v11026_v0 = vld [vmem:[#allocation86_spill] sm:$0xff] }
 0x315   : > { %v2500_v43 = vpop.f32.mrf.mxu1  ;;  %v8080_v27 = vadd.f32 %v3989_v6, %v7027_v9  ;;  %11021 = vst [vmem:[#allocation93_spill] sm:$0xff] %v8086_v1  ;;  %v2949_v32 = vmul.f32 %v6425_v23, %v11026_v0  ;;  %v11027_v6 = vld [vmem:[#allocation5_spill] sm:$0xff]  ;;  %v3991_v0 = vmul.f32 %v6443_v40, %v6983_v55  ;;  %v11033_v9 = vld [vmem:[#allocation88_spill] sm:$0xff] }
 0x316   : > { %11015 = vst [vmem:[#allocation4_spill] sm:$0xff] %v8041_v4  ;;  %v2501_v61 = vadd.f32 %v7686_v33, %v2500_v43  ;;  %v3958_v43 = vadd.f32 %v3926_v14, %v3894_v7  ;;  %v8088_v4 = vadd.f32 %v4318_v50, %v4286_v47 }
 0x317   : > { %v1793_v53 = vpop.f32.mrf.mxu0  ;;  %11018 = vst [vmem:[#allocation212_spill] sm:$0xff] %v8080_v27 }
 0x318   : > { %v2534_v38 = vpack.c.bf16 %v2501_v61, %v2501_v61  ;;  %v8055_v45 = vadd.f32 %v7962_v19, %v1793_v53  ;;  %v2713_v61 = vadd.f32 %v2681_v11, %v6830_v30  ;;  %v8082_v41 = vadd.f32 %v3990_v36, %v3958_v43  ;;  %11022 = vst [vmem:[#allocation214_spill] sm:$0xff] %v8088_v4  ;;  %v11035_v4 = vld [vmem:[#allocation115_spill] sm:$0xff] }
 0x319   : > { %v8106_v36 = vadd.f32 %v7962_v19, %v11027_v6 }
 0x31a   : > { %11016 = vst [vmem:[#allocation210_spill] sm:$0xff] %v8055_v45  ;;  %v2682_v48 = vmul.f32 %v6443_v40, %v8055_v45  ;;  %v2916_v39 = vmul.f32 %v6432_v44, %v8055_v45  ;;  %v11060_v45 = vld [vmem:[#allocation116_spill] sm:$0xff] }
 0x31b   : > { %2567 = vst.msk [vmem:[%s6885_s13 + $0x7c] sm:$0xf] %vm2535_vm2, %v2534_v38  ;;  %v3928_v43 = vmul.f32 %v6425_v23, %v8106_v36 }
 0x31c   : > { %v2714_v37 = vadd.f32 %v2682_v48, %v6871_v54  ;;  %v8077_v53 = vadd.f32 %v2948_v28, %v2916_v39  ;;  %11019 = vst [vmem:[#allocation213_spill] sm:$0xff] %v8082_v41 }
 0x31e   : > { %11017 = vst [vmem:[#allocation211_spill] sm:$0xff] %v8077_v53  ;;  %v2737_v38 = vpack.c.bf16 %v2714_v37, %v2713_v61 }
 0x31f   : > { %v1796_v11 = vpop.f32.mrf.mxu0 }
 0x320   : > { %v8095_v21 = vadd.f32 %v7962_v19, %v1796_v11  ;;  %2793 = vmatmul.bf16.gmra.mxu2 %v2737_v38  ;;  %v4256_v38 = vmul.f32 %v6425_v23, %v8039_v18 }
 0x322   : > { %11025 = vst [vmem:[#allocation215_spill] sm:$0xff] %v8095_v21  ;;  %v2917_v47 = vmul.f32 %v6432_v44, %v8095_v21  ;;  %5472 = vmatmul.msk.bf16.gmra.mxu0 %vm1193_vm1, %v5860_v52  ;;  %v3896_v52 = vmul.f32 %v6432_v44, %v8110_v49  ;;  %v2683_v61 = vmul.f32 %v6443_v40, %v8095_v21  ;;  %v11038_v21 = vld [vmem:[#allocation103_spill] sm:$0xff] }
 0x323   : > { %v2754_v28 = vpop.f32.mrf.mxu2 }
 0x324   : > { %v8112_v50 = vadd.f32 %v2949_v32, %v2917_v47  ;;  %v2755_v48 = vadd.f32 %v7686_v33, %v2754_v28  ;;  %v3992_v32 = vmul.f32 %v6443_v40, %v7012_v12  ;;  %v11030_v47 = vld [vmem:[#allocation89_spill] sm:$0xff]  ;;  %v11031_v28 = vld [vmem:[#allocation91_spill] sm:$0xff]  ;;  %v2715_v54 = vadd.f32 %v2683_v61, %v11033_v9 }
 0x325   : > { %v4319_v6 = vmul.f32 %v6443_v40, %v11030_v47  ;;  %v2950_v2 = vmul.f32 %v6425_v23, %v11031_v28  ;;  %v3960_v14 = vadd.f32 %v3928_v43, %v3896_v52  ;;  %v4288_v28 = vadd.f32 %v4256_v38, %v4224_v25  ;;  %v11053_v25 = vld [vmem:[#allocation104_spill] sm:$0xff] }
 0x326   : > { %11028 = vst [vmem:[#allocation86_spill] sm:$0xff] %v8112_v50  ;;  %v2834_v39 = vpack.c.bf16 %v2755_v48, %v2755_v48  ;;  %v11032_v48 = vld [vmem:[#allocation94_spill] sm:$0xff] }
 0x327   : > { %v1798_v37 = vpop.f32.mrf.mxu0  ;;  %v4320_v30 = vmul.f32 %v6443_v40, %v11032_v48  ;;  %v8150_v48 = vadd.f32 %v3991_v0, %v11035_v4  ;;  %v8152_v27 = vadd.f32 %v3992_v32, %v3960_v14  ;;  %v8156_v53 = vadd.f32 %v4319_v6, %v11038_v21  ;;  %v11045_v21 = vld [vmem:[#allocation7_spill] sm:$0xff] }
 0x328   : > { %5583 = vst.msk [vmem:[%s6885_s13 + $0x80] sm:$0xf] %vm2535_vm2, %v2834_v39  ;;  %v8128_v11 = vadd.f32 %v7962_v19, %v1798_v37  ;;  %v8178_v38 = vadd.f32 %v7962_v19, %v11045_v21  ;;  %v4322_v14 = vmul.f32 %v6443_v40, %v11053_v25 }
 0x329   : > { %11036 = vst [vmem:[#allocation91_spill] sm:$0xff] %v8150_v48  ;;  %v8158_v9 = vadd.f32 %v4320_v30, %v4288_v28 }
 0x32a   : > { %11029 = vst [vmem:[#allocation5_spill] sm:$0xff] %v8128_v11  ;;  %v2684_v39 = vmul.f32 %v6443_v40, %v8128_v11  ;;  %v2918_v37 = vmul.f32 %v6432_v44, %v8128_v11  ;;  %v5861_v11 = vld [vmem:[%s6081_s30 + $0x190] sm:$0xff] }
 0x32b   : > { %v2756_v55 = vpop.f32.mrf.mxu2  ;;  %11037 = vst [vmem:[#allocation94_spill] sm:$0xff] %v8152_v27  ;;  %v11057_v27 = vld [vmem:[#allocation123_spill] sm:$0xff] }
 0x32c   : > { %v2757_v47 = vadd.f32 %v7686_v33, %v2756_v55  ;;  %v2716_v7 = vadd.f32 %v2684_v39, %v6963_v58  ;;  %v8147_v1 = vadd.f32 %v2950_v2, %v2918_v37  ;;  %11039 = vst [vmem:[#allocation88_spill] sm:$0xff] %v8156_v53  ;;  %v11048_v2 = vld [vmem:[#allocation11_spill] sm:$0xff]  ;;  %v11055_v53 = vld [vmem:[#allocation105_spill] sm:$0xff] }
 0x32d   : > { %11040 = vst [vmem:[#allocation115_spill] sm:$0xff] %v8158_v9  ;;  %v2094_v39 = vadd.f32 %v7962_v19, %v11048_v2  ;;  %v11052_v2 = vld [vmem:[#allocation101_spill] sm:$0xff] }
 0x32e   : > { %11034 = vst [vmem:[#allocation89_spill] sm:$0xff] %v8147_v1  ;;  %v2835_v41 = vpack.c.bf16 %v2757_v47, %v2757_v47  ;;  %v2738_v50 = vpack.c.bf16 %v2716_v7, %v2715_v54  ;;  %v11044_v7 = vld [vmem:[#allocation96_spill] sm:$0xff] }
 0x32f   : > { %v1801_v43 = vpop.f32.mrf.mxu0  ;;  %v2951_v30 = vmul.f32 %v6425_v23, %v11044_v7  ;;  %v4258_v7 = vmul.f32 %v6425_v23, %v8110_v49 }
 0x330   : > { %5584 = vst.msk [vmem:[%s6885_s13 + $0x84] sm:$0xf] %vm2535_vm2, %v2835_v41  ;;  %v8167_v4 = vadd.f32 %v7962_v19, %v1801_v43  ;;  %2798 = vmatmul.bf16.gmra.mxu2 %v2738_v50  ;;  %v11046_v41 = vld [vmem:[#allocation125_spill] sm:$0xff]  ;;  %v4226_v43 = vmul.f32 %v6432_v44, %v7012_v12  ;;  %v2952_v12 = vmul.f32 %v6425_v23, %v11052_v2 }
 0x331   : > { %v8182_v0 = vadd.f32 %v7962_v19, %v11046_v41  ;;  %v3994_v41 = vmul.f32 %v6443_v40, %v2094_v39 }
 0x332   : > { %11043 = vst [vmem:[#allocation103_spill] sm:$0xff] %v8167_v4  ;;  %v2919_v54 = vmul.f32 %v6432_v44, %v8167_v4  ;;  %5473 = vmatmul.msk.bf16.gmra.mxu0 %vm1193_vm1, %v5861_v11  ;;  %v3930_v11 = vmul.f32 %v6425_v23, %v8178_v38  ;;  %v2685_v47 = vmul.f32 %v6443_v40, %v8167_v4 }
 0x333   : > { %v2759_v50 = vpop.f32.mrf.mxu2  ;;  %v3898_v55 = vmul.f32 %v6432_v44, %v8182_v0  ;;  %v4290_v2 = vadd.f32 %v4258_v7, %v4226_v43  ;;  %v11074_v43 = vld [vmem:[#allocation111_spill] sm:$0xff] }
 0x334   : > { %v8184_v32 = vadd.f32 %v2951_v30, %v2919_v54  ;;  %v2760_v6 = vadd.f32 %v7686_v33, %v2759_v50  ;;  %v11050_v54 = vld [vmem:[#allocation109_spill] sm:$0xff]  ;;  %v11051_v50 = vld [vmem:[#allocation99_spill] sm:$0xff] }
 0x335   : > { %v3993_v21 = vmul.f32 %v6443_v40, %v11050_v54  ;;  %v11054_v54 = vld [vmem:[#allocation98_spill] sm:$0xff]  ;;  %v3962_v61 = vadd.f32 %v3930_v11, %v3898_v55 }
 0x336   : > { %11047 = vst [vmem:[#allocation96_spill] sm:$0xff] %v8184_v32  ;;  %v2836_v37 = vpack.c.bf16 %v2760_v6, %v2760_v6  ;;  %v4321_v6 = vmul.f32 %v6443_v40, %v11051_v50  ;;  %v2717_v52 = vadd.f32 %v2685_v47, %v11054_v54  ;;  %v8231_v47 = vadd.f32 %v4322_v14, %v4290_v2 }
 0x337   : > { %v1803_v28 = vpop.f32.mrf.mxu0  ;;  %v8223_v25 = vadd.f32 %v3993_v21, %v11057_v27  ;;  %v8225_v32 = vadd.f32 %v3994_v41, %v3962_v61  ;;  %v11067_v61 = vld [vmem:[#allocation107_spill] sm:$0xff]  ;;  %v4590_v2 = vmul.f32 %v6425_v23, %v2094_v39 }
 0x338   : > { %5585 = vst.msk [vmem:[%s6885_s13 + $0x88] sm:$0xf] %vm2535_vm2, %v2836_v37  ;;  %v8202_v30 = vadd.f32 %v7962_v19, %v1803_v28  ;;  %v8229_v51 = vadd.f32 %v4321_v6, %v11060_v45  ;;  %v11066_v45 = vld [vmem:[#allocation9_spill] sm:$0xff]  ;;  %v2953_v14 = vmul.f32 %v6425_v23, %v11067_v61 }
 0x339   : > { %11058 = vst [vmem:[#allocation11_spill] sm:$0xff] %v8223_v25 }
 0x33a   : > { %11049 = vst [vmem:[#allocation7_spill] sm:$0xff] %v8202_v30  ;;  %v2686_v37 = vmul.f32 %v6443_v40, %v8202_v30  ;;  %v2920_v28 = vmul.f32 %v6432_v44, %v8202_v30  ;;  %v5862_v30 = vld [vmem:[%s6081_s30 + $0x198] sm:$0xff] }
 0x33b   : > { %v2761_v58 = vpop.f32.mrf.mxu2  ;;  %11059 = vst [vmem:[#allocation109_spill] sm:$0xff] %v8225_v32  ;;  %v11078_v32 = vld [vmem:[#allocation117_spill] sm:$0xff] }
 0x33c   : > { %v2762_v50 = vadd.f32 %v7686_v33, %v2761_v58  ;;  %v2718_v9 = vadd.f32 %v2686_v37, %v11055_v53  ;;  %v8220_v48 = vadd.f32 %v2952_v12, %v2920_v28  ;;  %11061 = vst [vmem:[#allocation99_spill] sm:$0xff] %v8229_v51  ;;  %v11071_v28 = vld [vmem:[#allocation17_spill] sm:$0xff]  ;;  %v11077_v51 = vld [vmem:[#allocation110_spill] sm:$0xff] }
 0x33d   : > { %11062 = vst [vmem:[#allocation101_spill] sm:$0xff] %v8231_v47  ;;  %v2099_v54 = vadd.f32 %v7962_v19, %v11071_v28  ;;  %v11075_v53 = vld [vmem:[#allocation113_spill] sm:$0xff] }
 0x33e   : > { %11056 = vst [vmem:[#allocation125_spill] sm:$0xff] %v8220_v48  ;;  %v2837_v4 = vpack.c.bf16 %v2762_v50, %v2762_v50  ;;  %v2739_v1 = vpack.c.bf16 %v2718_v9, %v2717_v52  ;;  %v8246_v52 = vadd.f32 %v7962_v19, %v11066_v45  ;;  %v4323_v9 = vmul.f32 %v6443_v40, %v11074_v43 }
 0x33f   : > { %v1806_v11 = vpop.f32.mrf.mxu0  ;;  %v3996_v28 = vmul.f32 %v6443_v40, %v2099_v54  ;;  %v2954_v58 = vmul.f32 %v6425_v23, %v11075_v53 }
 0x340   : > { %5586 = vst.msk [vmem:[%s6885_s13 + $0x8c] sm:$0xf] %vm2535_vm2, %v2837_v4  ;;  %v8240_v27 = vadd.f32 %v7962_v19, %v1806_v11  ;;  %2803 = vmatmul.bf16.gmra.mxu2 %v2739_v1  ;;  %v11068_v4 = vld [vmem:[#allocation10_spill] sm:$0xff]  ;;  %v3932_v50 = vmul.f32 %v6425_v23, %v8246_v52  ;;  %v8306_v15 = vadd.f32 %v4323_v9, %v11083_v16  ;;  %v11088_v16 = vld [vmem:[#allocation15_spill] sm:$0xff]  ;;  %v11089_v9 = vld [vmem:[#allocation13_spill] sm:$0xff] }
 0x341   : > { %v2174_v21 = vadd.f32 %v7962_v19, %v11068_v4  ;;  %v11069_v1 = vld [vmem:[#allocation134_spill] sm:$0xff]  ;;  %v4260_v4 = vmul.f32 %v6425_v23, %v8182_v0 }
 0x342   : > { %11065 = vst [vmem:[#allocation104_spill] sm:$0xff] %v8240_v27  ;;  %v2921_v7 = vmul.f32 %v6432_v44, %v8240_v27  ;;  %5474 = vmatmul.msk.bf16.gmra.mxu0 %vm1193_vm1, %v5862_v30  ;;  %v8257_v41 = vadd.f32 %v7962_v19, %v11069_v1  ;;  %v2687_v61 = vmul.f32 %v6443_v40, %v8240_v27  ;;  %v11080_v27 = vld [vmem:[#allocation132_spill] sm:$0xff] }
 0x343   : > { %v2764_v6 = vpop.f32.mrf.mxu2  ;;  %v4558_v11 = vmul.f32 %v6432_v44, %v2174_v21  ;;  %11084 = vst [vmem:[#allocation10_spill] sm:$0xff] %v8306_v15 }
 0x344   : > { %v8259_v12 = vadd.f32 %v2953_v14, %v2921_v7  ;;  %v2765_v37 = vadd.f32 %v7686_v33, %v2764_v6  ;;  %v3900_v45 = vmul.f32 %v6432_v44, %v8257_v41  ;;  %v4228_v7 = vmul.f32 %v6432_v44, %v2094_v39  ;;  %v11073_v6 = vld [vmem:[#allocation14_spill] sm:$0xff] }
 0x345   : > { %v4324_v39 = vmul.f32 %v6443_v40, %v2174_v21  ;;  %v8292_v55 = vadd.f32 %v4590_v2, %v4558_v11  ;;  %v2719_v47 = vadd.f32 %v2687_v61, %v11077_v51  ;;  %v5863_v11 = vld [vmem:[%s6081_s30 + $0x1a0] sm:$0xff]  ;;  %v2955_v61 = vmul.f32 %v6425_v23, %v11089_v9 }
 0x346   : > { %11070 = vst [vmem:[#allocation98_spill] sm:$0xff] %v8259_v12  ;;  %v2838_v30 = vpack.c.bf16 %v2765_v37, %v2765_v37  ;;  %v3995_v37 = vmul.f32 %v6443_v40, %v11073_v6  ;;  %v3964_v25 = vadd.f32 %v3932_v50, %v3900_v45  ;;  %v4292_v21 = vadd.f32 %v4260_v4, %v4228_v7  ;;  %v11090_v4 = vld [vmem:[#allocation16_spill] sm:$0xff] }
 0x347   : > { %v1808_v14 = vpop.f32.mrf.mxu0  ;;  %11076 = vst [vmem:[#allocation123_spill] sm:$0xff] %v8292_v55  ;;  %v11099_v55 = vld [vmem:[#allocation118_spill] sm:$0xff] }
 0x348   : > { %5587 = vst.msk [vmem:[%s6885_s13 + $0x90] sm:$0xf] %vm2535_vm2, %v2838_v30  ;;  %v8278_v1 = vadd.f32 %v7962_v19, %v1808_v14  ;;  %v8300_v48 = vadd.f32 %v3995_v37, %v11080_v27  ;;  %v8302_v29 = vadd.f32 %v3996_v28, %v3964_v25  ;;  %v8308_v51 = vadd.f32 %v4324_v39, %v4292_v21  ;;  %v11091_v37 = vld [vmem:[#allocation143_spill] sm:$0xff] }
 0x349   : > { %v8323_v27 = vadd.f32 %v7962_v19, %v11088_v16  ;;  %v8334_v28 = vadd.f32 %v7962_v19, %v11091_v37  ;;  %v11095_v37 = vld [vmem:[#allocation20_spill] sm:$0xff] }
 0x34a   : > { %11072 = vst [vmem:[#allocation105_spill] sm:$0xff] %v8278_v1  ;;  %v2688_v30 = vmul.f32 %v6443_v40, %v8278_v1  ;;  %v2922_v14 = vmul.f32 %v6432_v44, %v8278_v1 }
 0x34b   : > { %v2766_v6 = vpop.f32.mrf.mxu2  ;;  %11081 = vst [vmem:[#allocation9_spill] sm:$0xff] %v8300_v48  ;;  %v11100_v48 = vld [vmem:[#allocation126_spill] sm:$0xff] }
 0x34c   : > { %v2767_v43 = vadd.f32 %v7686_v33, %v2766_v6  ;;  %v2720_v53 = vadd.f32 %v2688_v30, %v11078_v32  ;;  %v8297_v12 = vadd.f32 %v2954_v58, %v2922_v14  ;;  %11082 = vst [vmem:[#allocation107_spill] sm:$0xff] %v8302_v29  ;;  %v11093_v6 = vld [vmem:[#allocation23_spill] sm:$0xff] }
 0x34d   : > { %11085 = vst [vmem:[#allocation134_spill] sm:$0xff] %v8308_v51 }
 0x34e   : > { %11079 = vst [vmem:[#allocation116_spill] sm:$0xff] %v8297_v12  ;;  %v2839_v1 = vpack.c.bf16 %v2767_v43, %v2767_v43  ;;  %v2740_v2 = vpack.c.bf16 %v2720_v53, %v2719_v47  ;;  %v2104_v43 = vadd.f32 %v7962_v19, %v11093_v6  ;;  %v3934_v53 = vmul.f32 %v6425_v23, %v8323_v27  ;;  %v11096_v6 = vld [vmem:[#allocation119_spill] sm:$0xff]  ;;  %v11097_v47 = vld [vmem:[#allocation121_spill] sm:$0xff] }
 0x34f   : > { %v1811_v50 = vpop.f32.mrf.mxu0  ;;  %v4325_v45 = vmul.f32 %v6443_v40, %v11096_v6  ;;  %v2956_v32 = vmul.f32 %v6425_v23, %v11097_v47 }
 0x350   : > { %5588 = vst.msk [vmem:[%s6885_s13 + $0x94] sm:$0xf] %vm2535_vm2, %v2839_v1  ;;  %v8317_v25 = vadd.f32 %v7962_v19, %v1811_v50  ;;  %2808 = vmatmul.bf16.gmra.mxu2 %v2740_v2  ;;  %v2179_v1 = vadd.f32 %v7962_v19, %v11090_v4  ;;  %v4592_v2 = vmul.f32 %v6425_v23, %v2099_v54 }
 0x351   : > { %v3902_v50 = vmul.f32 %v6432_v44, %v8334_v28  ;;  %v8383_v13 = vadd.f32 %v4325_v45, %v11105_v62  ;;  %v11110_v62 = vld [vmem:[#allocation21_spill] sm:$0xff] }
 0x352   : > { %11087 = vst [vmem:[#allocation17_spill] sm:$0xff] %v8317_v25  ;;  %v2923_v7 = vmul.f32 %v6432_v44, %v8317_v25  ;;  %5475 = vmatmul.msk.bf16.gmra.mxu0 %vm1193_vm1, %v5863_v11  ;;  %v4560_v11 = vmul.f32 %v6432_v44, %v2179_v1  ;;  %v2689_v16 = vmul.f32 %v6443_v40, %v8317_v25 }
 0x353   : > { %v2769_v39 = vpop.f32.mrf.mxu2  ;;  %v3966_v51 = vadd.f32 %v3934_v53, %v3902_v50  ;;  %11106 = vst [vmem:[#allocation124_spill] sm:$0xff] %v8383_v13  ;;  %v8400_v45 = vadd.f32 %v7962_v19, %v11110_v62  ;;  %v4232_v62 = vmul.f32 %v6432_v44, %v2104_v43  ;;  %v11119_v50 = vld [vmem:[#allocation130_spill] sm:$0xff] }
 0x354   : > { %v8336_v30 = vadd.f32 %v2955_v61, %v2923_v7  ;;  %v2770_v14 = vadd.f32 %v7686_v33, %v2769_v39  ;;  %v4230_v61 = vmul.f32 %v6432_v44, %v2099_v54  ;;  %v4262_v7 = vmul.f32 %v6425_v23, %v8257_v41 }
 0x355   : > { %v3997_v39 = vmul.f32 %v6443_v40, %v11095_v37  ;;  %v4326_v54 = vmul.f32 %v6443_v40, %v2179_v1  ;;  %v8369_v58 = vadd.f32 %v4592_v2, %v4560_v11  ;;  %v2721_v15 = vadd.f32 %v2689_v16, %v11099_v55  ;;  %v5864_v11 = vld [vmem:[%s6081_s30 + $0x1a8] sm:$0xff]  ;;  %11111 = vst [vmem:[#allocation16_spill] sm:$0xff] %v8400_v45 }
 0x356   : > { %11092 = vst [vmem:[#allocation14_spill] sm:$0xff] %v8336_v30  ;;  %v2840_v21 = vpack.c.bf16 %v2770_v14, %v2770_v14  ;;  %v3998_v14 = vmul.f32 %v6443_v40, %v2104_v43  ;;  %v4294_v1 = vadd.f32 %v4262_v7, %v4230_v61  ;;  %v11102_v30 = vld [vmem:[#allocation141_spill] sm:$0xff]  ;;  %v11113_v7 = vld [vmem:[#allocation22_spill] sm:$0xff] }
 0x357   : > { %v1813_v9 = vpop.f32.mrf.mxu0  ;;  %11098 = vst [vmem:[#allocation113_spill] sm:$0xff] %v8369_v58  ;;  %v8377_v25 = vadd.f32 %v3997_v39, %v11102_v30  ;;  %v11112_v30 = vld [vmem:[#allocation19_spill] sm:$0xff]  ;;  %v8411_v39 = vadd.f32 %v7962_v19, %v7417_v60 }
 0x358   : > { %5589 = vst.msk [vmem:[%s6885_s13 + $0x98] sm:$0xf] %vm2535_vm2, %v2840_v21  ;;  %v8355_v4 = vadd.f32 %v7962_v19, %v1813_v9  ;;  %v8379_v12 = vadd.f32 %v3998_v14, %v3966_v51  ;;  %v8385_v55 = vadd.f32 %v4326_v54, %v4294_v1  ;;  %v2957_v16 = vmul.f32 %v6425_v23, %v11112_v30 }
 0x359   : > { %11103 = vst [vmem:[#allocation117_spill] sm:$0xff] %v8377_v25  ;;  %v4594_v1 = vmul.f32 %v6425_v23, %v2104_v43  ;;  %v3904_v60 = vmul.f32 %v6432_v44, %v8411_v39  ;;  %v4264_v30 = vmul.f32 %v6425_v23, %v8334_v28 }
 0x35a   : > { %11094 = vst [vmem:[#allocation111_spill] sm:$0xff] %v8355_v4  ;;  %v2690_v21 = vmul.f32 %v6443_v40, %v8355_v4  ;;  %v2924_v9 = vmul.f32 %v6432_v44, %v8355_v4 }
 0x35b   : > { %v2771_v37 = vpop.f32.mrf.mxu2  ;;  %11104 = vst [vmem:[#allocation132_spill] sm:$0xff] %v8379_v12  ;;  %v11124_v12 = vld [vmem:[#allocation150_spill] sm:$0xff] }
 0x35c   : > { %v2772_v6 = vadd.f32 %v7686_v33, %v2771_v37  ;;  %v2722_v47 = vadd.f32 %v2690_v21, %v11100_v48  ;;  %v8374_v29 = vadd.f32 %v2956_v32, %v2924_v9  ;;  %11107 = vst [vmem:[#allocation15_spill] sm:$0xff] %v8385_v55  ;;  %v11115_v9 = vld [vmem:[#allocation29_spill] sm:$0xff]  ;;  %v11121_v32 = vld [vmem:[#allocation127_spill] sm:$0xff] }
 0x35d   : > { %v2109_v37 = vadd.f32 %v7962_v19, %v11115_v9  ;;  %v11122_v55 = vld [vmem:[#allocation135_spill] sm:$0xff] }
 0x35e   : > { %11101 = vst [vmem:[#allocation110_spill] sm:$0xff] %v8374_v29  ;;  %v2841_v4 = vpack.c.bf16 %v2772_v6, %v2772_v6  ;;  %v2741_v2 = vpack.c.bf16 %v2722_v47, %v2721_v15  ;;  %v3936_v6 = vmul.f32 %v6425_v23, %v8400_v45  ;;  %v2958_v15 = vmul.f32 %v6425_v23, %v11119_v50  ;;  %v11127_v29 = vld [vmem:[#allocation142_spill] sm:$0xff] }
 0x35f   : > { %v1816_v53 = vpop.f32.mrf.mxu0 }
 0x360   : > { %5590 = vst.msk [vmem:[%s6885_s13 + $0x9c] sm:$0xf] %vm2535_vm2, %v2841_v4  ;;  %v8394_v51 = vadd.f32 %v7962_v19, %v1816_v53  ;;  %2813 = vmatmul.bf16.gmra.mxu2 %v2741_v2  ;;  %v2184_v4 = vadd.f32 %v7962_v19, %v11113_v7  ;;  %v3968_v13 = vadd.f32 %v3936_v6, %v3904_v60 }
 0x362   : > { %11109 = vst [vmem:[#allocation13_spill] sm:$0xff] %v8394_v51  ;;  %v2925_v61 = vmul.f32 %v6432_v44, %v8394_v51  ;;  %5476 = vmatmul.msk.bf16.gmra.mxu0 %vm1193_vm1, %v5864_v11  ;;  %v4562_v2 = vmul.f32 %v6432_v44, %v2184_v4  ;;  %v2691_v11 = vmul.f32 %v6443_v40, %v8394_v51 }
 0x363   : > { %v2774_v14 = vpop.f32.mrf.mxu2  ;;  %v4328_v43 = vmul.f32 %v6443_v40, %v2184_v4  ;;  %v4296_v4 = vadd.f32 %v4264_v30, %v4232_v62 }
 0x364   : > { %v8413_v54 = vadd.f32 %v2957_v16, %v2925_v61  ;;  %v2775_v21 = vadd.f32 %v7686_v33, %v2774_v14  ;;  %v11117_v61 = vld [vmem:[#allocation26_spill] sm:$0xff]  ;;  %v4000_v14 = vmul.f32 %v6443_v40, %v2109_v37  ;;  %v8446_v48 = vadd.f32 %v4594_v1, %v4562_v2  ;;  %v5865_v2 = vld [vmem:[%s6081_s30 + $0x1b0] sm:$0xff] }
 0x365   : > { %v3999_v7 = vmul.f32 %v6443_v40, %v11117_v61  ;;  %v2723_v58 = vadd.f32 %v2691_v11, %v11121_v32  ;;  %v8462_v32 = vadd.f32 %v4328_v43, %v4296_v4  ;;  %v11133_v11 = vld [vmem:[#allocation25_spill] sm:$0xff]  ;;  %v4596_v4 = vmul.f32 %v6425_v23, %v2109_v37 }
 0x366   : > { %11114 = vst [vmem:[#allocation143_spill] sm:$0xff] %v8413_v54  ;;  %v2842_v47 = vpack.c.bf16 %v2775_v21, %v2775_v21  ;;  %v11118_v21 = vld [vmem:[#allocation128_spill] sm:$0xff]  ;;  %v8456_v51 = vadd.f32 %v4000_v14, %v3968_v13  ;;  %v2959_v62 = vmul.f32 %v6425_v23, %v11133_v11  ;;  %v8488_v14 = vadd.f32 %v7962_v19, %v7487_v20 }
 0x367   : > { %v1818_v53 = vpop.f32.mrf.mxu0  ;;  %v4327_v9 = vmul.f32 %v6443_v40, %v11118_v21  ;;  %11120 = vst [vmem:[#allocation20_spill] sm:$0xff] %v8446_v48  ;;  %v8454_v54 = vadd.f32 %v3999_v7, %v11124_v12 }
 0x368   : > { %5591 = vst.msk [vmem:[%s6885_s13 + $0xa0] sm:$0xf] %vm2535_vm2, %v2842_v47  ;;  %v8432_v16 = vadd.f32 %v7962_v19, %v1818_v53  ;;  %v3906_v20 = vmul.f32 %v6432_v44, %v8488_v14 }
 0x369   : > { %11125 = vst [vmem:[#allocation121_spill] sm:$0xff] %v8454_v54  ;;  %v8460_v45 = vadd.f32 %v4327_v9, %v11127_v29  ;;  %v11132_v29 = vld [vmem:[#allocation27_spill] sm:$0xff] }
 0x36a   : > { %11116 = vst [vmem:[#allocation23_spill] sm:$0xff] %v8432_v16  ;;  %v2692_v47 = vmul.f32 %v6443_v40, %v8432_v16  ;;  %v2926_v53 = vmul.f32 %v6432_v44, %v8432_v16 }
 0x36b   : > { %v2776_v61 = vpop.f32.mrf.mxu2  ;;  %11126 = vst [vmem:[#allocation118_spill] sm:$0xff] %v8456_v51 }
 0x36c   : > { %v2777_v21 = vadd.f32 %v7686_v33, %v2776_v61  ;;  %v2724_v50 = vadd.f32 %v2692_v47, %v11122_v55  ;;  %v8451_v25 = vadd.f32 %v2958_v15, %v2926_v53  ;;  %11128 = vst [vmem:[#allocation126_spill] sm:$0xff] %v8460_v45  ;;  %v11136_v53 = vld [vmem:[#allocation35_spill] sm:$0xff]  ;;  %v11142_v55 = vld [vmem:[#allocation136_spill] sm:$0xff] }
 0x36d   : > { %11129 = vst [vmem:[#allocation141_spill] sm:$0xff] %v8462_v32  ;;  %v2114_v61 = vadd.f32 %v7962_v19, %v11136_v53  ;;  %v11140_v53 = vld [vmem:[#allocation139_spill] sm:$0xff] }
 0x36e   : > { %11123 = vst [vmem:[#allocation119_spill] sm:$0xff] %v8451_v25  ;;  %v2843_v16 = vpack.c.bf16 %v2777_v21, %v2777_v21  ;;  %v2742_v1 = vpack.c.bf16 %v2724_v50, %v2723_v58  ;;  %v8477_v58 = vadd.f32 %v7962_v19, %v11132_v29  ;;  %v4266_v29 = vmul.f32 %v6425_v23, %v8411_v39  ;;  %v5869_v25 = vld [vmem:[%s6081_s30 + $0x1d0] sm:$0xff] }
 0x36f   : > { %v1821_v6 = vpop.f32.mrf.mxu0  ;;  %v2960_v60 = vmul.f32 %v6425_v23, %v11140_v53  ;;  %v11143_v53 = vld [vmem:[#allocation144_spill] sm:$0xff] }
 0x370   : > { %5592 = vst.msk [vmem:[%s6885_s13 + $0xa4] sm:$0xf] %vm2535_vm2, %v2843_v16  ;;  %v8471_v13 = vadd.f32 %v7962_v19, %v1821_v6  ;;  %2818 = vmatmul.bf16.gmra.mxu2 %v2742_v1  ;;  %v11134_v16 = vld [vmem:[#allocation28_spill] sm:$0xff]  ;;  %v3938_v21 = vmul.f32 %v6425_v23, %v8477_v58 }
 0x371   : > { %v2189_v7 = vadd.f32 %v7962_v19, %v11134_v16  ;;  %v4002_v16 = vmul.f32 %v6443_v40, %v2114_v61 }
 0x372   : > { %11131 = vst [vmem:[#allocation133_spill] sm:$0xff] %v8471_v13  ;;  %v2927_v30 = vmul.f32 %v6432_v44, %v8471_v13  ;;  %5477 = vmatmul.msk.bf16.gmra.mxu0 %vm1193_vm1, %v5865_v2  ;;  %v2693_v2 = vmul.f32 %v6443_v40, %v8471_v13  ;;  %v3970_v48 = vadd.f32 %v3938_v21, %v3906_v20  ;;  %v5866_v20 = vld [vmem:[%s6081_s30 + $0x1b8] sm:$0xff]  ;;  %v5867_v13 = vld [vmem:[%s6081_s30 + $0x1c0] sm:$0xff] }
 0x373   : > { %v2779_v9 = vpop.f32.mrf.mxu2  ;;  %v4564_v1 = vmul.f32 %v6432_v44, %v2189_v7 }
 0x374   : > { %v8490_v43 = vadd.f32 %v2959_v62, %v2927_v30  ;;  %v2780_v47 = vadd.f32 %v7686_v33, %v2779_v9  ;;  %v4234_v33 = vmul.f32 %v6432_v44, %v2109_v37  ;;  %v11138_v62 = vld [vmem:[#allocation32_spill] sm:$0xff]  ;;  %v11139_v9 = vld [vmem:[#allocation137_spill] sm:$0xff]  ;;  %v4330_v37 = vmul.f32 %v6443_v40, %v2189_v7 }
 0x375   : > { %v4001_v30 = vmul.f32 %v6443_v40, %v11138_v62  ;;  %v8523_v12 = vadd.f32 %v4596_v4, %v4564_v1  ;;  %v2725_v15 = vadd.f32 %v2693_v2, %v11142_v55  ;;  %v8538_v1 = vadd.f32 %v4002_v16, %v3970_v48  ;;  %v11147_v2 = vld [vmem:[#allocation151_spill] sm:$0xff]  ;;  %v11159_v48 = vld [vmem:[#allocation146_spill] sm:$0xff] }
 0x376   : > { %11135 = vst [vmem:[#allocation21_spill] sm:$0xff] %v8490_v43  ;;  %v2844_v50 = vpack.c.bf16 %v2780_v47, %v2780_v47  ;;  %v4329_v47 = vmul.f32 %v6443_v40, %v11139_v9  ;;  %v8529_v9 = vld [vmem:[%s10447_s5] ss:$0 sm:$0xff]  ;;  %v4298_v54 = vadd.f32 %v4266_v29, %v4234_v33 }
 0x377   : > { %v1823_v6 = vpop.f32.mrf.mxu0  ;;  %11141 = vst [vmem:[#allocation22_spill] sm:$0xff] %v8523_v12  ;;  %v8536_v4 = vadd.f32 %v4001_v30, %v7471_v24  ;;  %v11153_v29 = vld [vmem:[#allocation34_spill] sm:$0xff]  ;;  %v11161_v12 = vld [vmem:[#allocation145_spill] sm:$0xff] }
 0x378   : > { %5593 = vst.msk [vmem:[%s6885_s13 + $0xa8] sm:$0xf] %vm2535_vm2, %v2844_v50  ;;  %v8509_v11 = vadd.f32 %v7962_v19, %v1823_v6  ;;  %v8542_v51 = vadd.f32 %v4329_v47, %v11147_v2  ;;  %v8544_v43 = vadd.f32 %v4330_v37, %v4298_v54  ;;  %v2194_v30 = vadd.f32 %v7962_v19, %v11153_v29  ;;  %v11154_v47 = vld [vmem:[#allocation33_spill] sm:$0xff] }
 0x379   : > { %11145 = vst [vmem:[#allocation26_spill] sm:$0xff] %v8536_v4  ;;  %v8570_v37 = vadd.f32 %v7962_v19, %v7562_v31  ;;  %v4236_v29 = vmul.f32 %v6432_v44, %v2114_v61 }
 0x37a   : > { %11137 = vst [vmem:[#allocation19_spill] sm:$0xff] %v8509_v11  ;;  %v2694_v50 = vmul.f32 %v6443_v40, %v8509_v11  ;;  %v2928_v6 = vmul.f32 %v6432_v44, %v8509_v11 }
 0x37b   : > { %v2781_v62 = vpop.f32.mrf.mxu2  ;;  %11146 = vst [vmem:[#allocation128_spill] sm:$0xff] %v8538_v1 }
 0x37c   : > { %v2782_v7 = vadd.f32 %v8529_v9, %v2781_v62  ;;  %v2726_v45 = vadd.f32 %v2694_v50, %v11143_v53  ;;  %v8533_v32 = vadd.f32 %v2960_v60, %v2928_v6  ;;  %11148 = vst [vmem:[#allocation130_spill] sm:$0xff] %v8542_v51 }
 0x37d   : > { %11149 = vst [vmem:[#allocation127_spill] sm:$0xff] %v8544_v43 }
 0x37e   : > { %11144 = vst [vmem:[#allocation29_spill] sm:$0xff] %v8533_v32  ;;  %v2845_v55 = vpack.c.bf16 %v2782_v7, %v2782_v7  ;;  %v2743_v21 = vpack.c.bf16 %v2726_v45, %v2725_v15  ;;  %v11152_v45 = vld [vmem:[#allocation31_spill] sm:$0xff]  ;;  %v11156_v7 = vld [vmem:[#allocation41_spill] sm:$0xff] }
 0x37f   : > { %v1826_v11 = vpop.f32.mrf.mxu0  ;;  %v2961_v54 = vmul.f32 %v6425_v23, %v11152_v45  ;;  %v2119_v53 = vadd.f32 %v7962_v19, %v11156_v7  ;;  %v11158_v7 = vld [vmem:[#allocation148_spill] sm:$0xff] }
 0x380   : > { %5594 = vst.msk [vmem:[%s6885_s13 + $0xac] sm:$0xf] %vm2535_vm2, %v2845_v55  ;;  %v8553_v24 = vadd.f32 %v7962_v19, %v1826_v11  ;;  %2823 = vmatmul.bf16.gmra.mxu2 %v2743_v21  ;;  %v8566_v11 = vadd.f32 %v7962_v19, %v11154_v47  ;;  %v4598_v21 = vmul.f32 %v6425_v23, %v2114_v61 }
 0x381   : > { %v4268_v47 = vmul.f32 %v6425_v23, %v8488_v14  ;;  %v2962_v33 = vmul.f32 %v6425_v23, %v11158_v7  ;;  %v4331_v61 = vmul.f32 %v6443_v40, %v11159_v48  ;;  %v11162_v7 = vld [vmem:[#allocation152_spill] sm:$0xff] }
 0x382   : > { %11151 = vst [vmem:[#allocation135_spill] sm:$0xff] %v8553_v24  ;;  %v2929_v15 = vmul.f32 %v6432_v44, %v8553_v24  ;;  %5478 = vmatmul.msk.bf16.gmra.mxu0 %vm1193_vm1, %v5866_v20  ;;  %v4566_v20 = vmul.f32 %v6432_v44, %v2194_v30  ;;  %v2695_v2 = vmul.f32 %v6443_v40, %v8553_v24 }
 0x383   : > { %v2784_v16 = vpop.f32.mrf.mxu2  ;;  %v3940_v31 = vmul.f32 %v6425_v23, %v8566_v11  ;;  %v4300_v24 = vadd.f32 %v4268_v47, %v4236_v29  ;;  %v11174_v47 = vld [vmem:[#allocation44_spill] sm:$0xff] }
 0x384   : > { %v8572_v6 = vadd.f32 %v2961_v54, %v2929_v15  ;;  %v2785_v62 = vadd.f32 %v8529_v9, %v2784_v16  ;;  %v3908_v54 = vmul.f32 %v6432_v44, %v8570_v37  ;;  %v4003_v16 = vmul.f32 %v6443_v40, %v7434_v17 }
 0x385   : > { %v4332_v17 = vmul.f32 %v6443_v40, %v2194_v30  ;;  %v8605_v50 = vadd.f32 %v4598_v21, %v4566_v20  ;;  %v2727_v51 = vadd.f32 %v2695_v2, %v11161_v12  ;;  %v8619_v20 = vadd.f32 %v4331_v61, %v7473_v35 }
 0x386   : > { %11155 = vst [vmem:[#allocation150_spill] sm:$0xff] %v8572_v6  ;;  %v2846_v55 = vpack.c.bf16 %v2785_v62, %v2785_v62  ;;  %v4004_v62 = vmul.f32 %v6443_v40, %v2119_v53  ;;  %v3972_v6 = vadd.f32 %v3940_v31, %v3908_v54  ;;  %v8614_v48 = vadd.f32 %v4003_v16, %v7545_v3 }
 0x387   : > { %v1828_v45 = vpop.f32.mrf.mxu0  ;;  %11160 = vst [vmem:[#allocation27_spill] sm:$0xff] %v8605_v50  ;;  %v8621_v12 = vadd.f32 %v4332_v17, %v4300_v24 }
 0x388   : > { %5595 = vst.msk [vmem:[%s6885_s13 + $0xb0] sm:$0xf] %vm2535_vm2, %v2846_v55  ;;  %v8588_v15 = vadd.f32 %v7962_v19, %v1828_v45  ;;  %v8616_v30 = vadd.f32 %v4004_v62, %v3972_v6  ;;  %v11171_v6 = vld [vmem:[#allocation157_spill] sm:$0xff]  ;;  %v8654_v62 = vadd.f32 %v7962_v19, %v11174_v47 }
 0x389   : > { %11164 = vst [vmem:[#allocation28_spill] sm:$0xff] %v8614_v48  ;;  %v2199_v2 = vadd.f32 %v7962_v19, %v11171_v6 }
 0x38a   : > { %11157 = vst [vmem:[#allocation142_spill] sm:$0xff] %v8588_v15  ;;  %v2696_v55 = vmul.f32 %v6443_v40, %v8588_v15  ;;  %v2930_v45 = vmul.f32 %v6432_v44, %v8588_v15  ;;  %v4006_v6 = vmul.f32 %v6443_v40, %v8654_v62 }
 0x38b   : > { %v2786_v60 = vpop.f32.mrf.mxu2  ;;  %11165 = vst [vmem:[#allocation35_spill] sm:$0xff] %v8616_v30 }
 0x38c   : > { %v2787_v43 = vadd.f32 %v8529_v9, %v2786_v60  ;;  %v2728_v4 = vadd.f32 %v2696_v55, %v11162_v7  ;;  %v8610_v1 = vadd.f32 %v2962_v33, %v2930_v45  ;;  %11166 = vst [vmem:[#allocation32_spill] sm:$0xff] %v8619_v20  ;;  %v4600_v55 = vmul.f32 %v6425_v23, %v2119_v53  ;;  %v11179_v33 = vld [vmem:[#allocation38_spill] sm:$0xff] }
 0x38d   : > { %11167 = vst [vmem:[#allocation137_spill] sm:$0xff] %v8621_v12  ;;  %v4568_v45 = vmul.f32 %v6432_v44, %v2199_v2 }
 0x38e   : > { %11163 = vst [vmem:[#allocation25_spill] sm:$0xff] %v8610_v1  ;;  %v2847_v15 = vpack.c.bf16 %v2787_v43, %v2787_v43  ;;  %v2744_v32 = vpack.c.bf16 %v2728_v4, %v2727_v51  ;;  %v11170_v4 = vld [vmem:[#allocation153_spill] sm:$0xff] }
 0x38f   : > { %v1831_v21 = vpop.f32.mrf.mxu0  ;;  %v3261_v35 = vmul.f32 %v6425_v23, %v11170_v4  ;;  %v4238_v4 = vmul.f32 %v6432_v44, %v2119_v53  ;;  %v11177_v53 = vld [vmem:[#allocation37_spill] sm:$0xff] }
 0x390   : > { %5596 = vst.msk [vmem:[%s6885_s13 + $0xb4] sm:$0xf] %vm2535_vm2, %v2847_v15  ;;  %v8628_v43 = vadd.f32 %v7962_v19, %v1831_v21  ;;  %2828 = vmatmul.bf16.gmra.mxu2 %v2744_v32  ;;  %v11172_v32 = vld [vmem:[#allocation40_spill] sm:$0xff]  ;;  %v8647_v15 = vadd.f32 %v7962_v19, %v7642_v22 }
 0x391   : > { %v8643_v54 = vadd.f32 %v7962_v19, %v11172_v32 }
 0x392   : > { %11169 = vst [vmem:[#allocation139_spill] sm:$0xff] %v8628_v43  ;;  %v3229_v24 = vmul.f32 %v6432_v44, %v8628_v43  ;;  %5479 = vmatmul.msk.bf16.gmra.mxu0 %vm1193_vm1, %v5867_v13  ;;  %v2995_v61 = vmul.f32 %v6443_v40, %v8628_v43  ;;  %v3910_v7 = vmul.f32 %v6432_v44, %v8647_v15 }
 0x393   : > { %v2789_v31 = vpop.f32.mrf.mxu2  ;;  %v3942_v22 = vmul.f32 %v6425_v23, %v8643_v54 }
 0x394   : > { %v8649_v29 = vadd.f32 %v3261_v35, %v3229_v24  ;;  %v2790_v16 = vadd.f32 %v8529_v9, %v2789_v31  ;;  %v4005_v35 = vmul.f32 %v6443_v40, %v7505_v63  ;;  %v4270_v24 = vmul.f32 %v6425_v23, %v8570_v37  ;;  %v11176_v31 = vld [vmem:[#allocation155_spill] sm:$0xff] }
 0x395   : > { %v3262_v32 = vmul.f32 %v6425_v23, %v11176_v31  ;;  %v4334_v63 = vmul.f32 %v6443_v40, %v2199_v2  ;;  %v3027_v51 = vadd.f32 %v2995_v61, %v11179_v33  ;;  %v3974_v20 = vadd.f32 %v3942_v22, %v3910_v7  ;;  %v11198_v61 = vld [vmem:[#allocation158_spill] sm:$0xff] }
 0x396   : > { %11173 = vst [vmem:[#allocation136_spill] sm:$0xff] %v8649_v29  ;;  %v2848_v13 = vpack.c.bf16 %v2790_v16, %v2790_v16  ;;  %v4302_v12 = vadd.f32 %v4270_v24, %v4238_v4  ;;  %v5868_v29 = vld [vmem:[%s6081_s30 + $0x1c8] sm:$0xff] }
 0x397   : > { %v1833_v17 = vpop.f32.mrf.mxu0  ;;  %v8696_v2 = vadd.f32 %v4006_v6, %v3974_v20  ;;  %v4335_v20 = vmul.f32 %v6443_v40, %v11198_v61 }
 0x398   : > { %5597 = vst.msk [vmem:[%s6885_s13 + $0xb8] sm:$0xf] %vm2535_vm2, %v2848_v13  ;;  %v8667_v21 = vadd.f32 %v7962_v19, %v1833_v17  ;;  %v4333_v13 = vmul.f32 %v6443_v40, %v11177_v53  ;;  %v8685_v17 = vadd.f32 %v4600_v55, %v4568_v45  ;;  %v8694_v53 = vadd.f32 %v4005_v35, %v7625_v8  ;;  %v11190_v35 = vld [vmem:[#allocation90_spill] sm:$0xff] }
 0x399   : > { %11182 = vst [vmem:[#allocation33_spill] sm:$0xff] %v8696_v2  ;;  %v8701_v45 = vadd.f32 %v4334_v63, %v4302_v12  ;;  %v3657_v24 = vmul.f32 %v6443_v40, %v11190_v35 }
 0x39a   : > { %11175 = vst [vmem:[#allocation144_spill] sm:$0xff] %v8667_v21  ;;  %v2996_v16 = vmul.f32 %v6443_v40, %v8667_v21  ;;  %v3230_v47 = vmul.f32 %v6432_v44, %v8667_v21  ;;  %v8699_v33 = vadd.f32 %v4333_v13, %v7547_v5 }
 0x39b   : > { %11178 = vst [vmem:[#allocation151_spill] sm:$0xff] %v8685_v17  ;;  %v2791_v3 = vpop.f32.mrf.mxu2  ;;  %v11199_v17 = vld [vmem:[#allocation30_spill] sm:$0xff] }
 0x39c   : > { %v3028_v60 = vadd.f32 %v2996_v16, %v7485_v34  ;;  %v8689_v31 = vadd.f32 %v3262_v32, %v3230_v47  ;;  %v2792_v50 = vadd.f32 %v8529_v9, %v2791_v3  ;;  %11181 = vst [vmem:[#allocation34_spill] sm:$0xff] %v8694_v53  ;;  %v11187_v3 = vld [vmem:[#allocation42_spill] sm:$0xff]  ;;  %v11191_v47 = vld [vmem:[#allocation47_spill] sm:$0xff] }
 0x39d   : > { %11183 = vst [vmem:[#allocation41_spill] sm:$0xff] %v8699_v33  ;;  %v3263_v12 = vmul.f32 %v6425_v23, %v11187_v3  ;;  %v8730_v13 = vadd.f32 %v7962_v19, %v11191_v47  ;;  %v4240_v47 = vmul.f32 %v6432_v44, %v8654_v62 }
 0x39e   : > { %11180 = vst [vmem:[#allocation31_spill] sm:$0xff] %v8689_v31  ;;  %v2849_v48 = vpack.c.bf16 %v2792_v50, %v2792_v50  ;;  %v3059_v30 = vpack.c.bf16 %v3028_v60, %v3027_v51  ;;  %v11186_v60 = vld [vmem:[#allocation87_spill] sm:$0xff] }
 0x39f   : > { %v1836_v55 = vpop.f32.mrf.mxu0  ;;  %11184 = vst [vmem:[#allocation148_spill] sm:$0xff] %v8701_v45  ;;  %v3561_v5 = vmul.f32 %v6432_v44, %v11186_v60  ;;  %v11200_v45 = vld [vmem:[#allocation163_spill] sm:$0xff] }
 0x3a0   : > { %5598 = vst.msk [vmem:[%s6885_s13 + $0xbc] sm:$0xf] %vm2535_vm2, %v2849_v48  ;;  %v1837_v50 = vadd.f32 %v7962_v19, %v1836_v55  ;;  %3083 = vmatmul.bf16.vlgmr.msrb.gmra.mxu3 %v3059_v30  ;;  %v3327_v48 = vmul.f32 %v6443_v40, %v11186_v60  ;;  %v11188_v30 = vld [vmem:[#allocation43_spill] sm:$0xff]  ;;  %v11193_v55 = vld [vmem:[#allocation53_spill] sm:$0xff] }
 0x3a1   : > { %v8723_v7 = vadd.f32 %v7962_v19, %v11188_v30  ;;  %v8736_v60 = vadd.f32 %v7962_v19, %v11193_v55  ;;  %v11197_v55 = vld [vmem:[#allocation160_spill] sm:$0xff] }
 0x3a2   : > { %v3231_v51 = vmul.f32 %v6432_v44, %v1837_v50  ;;  %v3593_v22 = vmul.f32 %v6425_v23, %v1837_v50  ;;  %5480 = vmatmul.msk.bf16.gmra.mxu0 %vm1193_vm1, %v5868_v29  ;;  %v11192_v29 = vld [vmem:[#allocation162_spill] sm:$0xff] }
 0x3a3   : > { %11189 = vst [vmem:[#allocation146_spill] sm:$0xff] %v8723_v7  ;;  %v2794_v4 = vpop.f32.mrf.mxu2  ;;  %v2204_v63 = vadd.f32 %v7962_v19, %v11192_v29  ;;  %v3912_v29 = vmul.f32 %v6432_v44, %v8736_v60 }
 0x3a4   : > { %v3295_v6 = vadd.f32 %v3263_v12, %v3231_v51  ;;  %v3625_v32 = vadd.f32 %v3593_v22, %v3561_v5  ;;  %v2795_v16 = vadd.f32 %v8529_v9, %v2794_v4  ;;  %v3328_v5 = vmul.f32 %v6443_v40, %v7980_v57 }
 0x3a5   : > { %v3562_v12 = vmul.f32 %v6432_v44, %v7980_v57  ;;  %v3944_v51 = vmul.f32 %v6425_v23, %v8723_v7  ;;  %v2997_v22 = vmul.f32 %v6443_v40, %v1837_v50  ;;  %v4008_v57 = vmul.f32 %v6443_v40, %v8730_v13 }
 0x3a6   : > { %v2850_v3 = vpack.c.bf16 %v2795_v16, %v2795_v16  ;;  %v8738_v30 = vadd.f32 %v3327_v48, %v3295_v6  ;;  %v8740_v35 = vadd.f32 %v3657_v24, %v3625_v32  ;;  %v4602_v48 = vmul.f32 %v6425_v23, %v8654_v62  ;;  %v11196_v24 = vld [vmem:[#allocation165_spill] sm:$0xff] }
 0x3a7   : > { %v1838_v4 = vpop.f32.mrf.mxu0  ;;  %v4007_v6 = vmul.f32 %v6443_v40, %v11196_v24  ;;  %v4570_v16 = vmul.f32 %v6432_v44, %v2204_v63  ;;  %v4272_v50 = vmul.f32 %v6425_v23, %v8647_v15  ;;  %v3264_v62 = vmul.f32 %v6425_v23, %v11197_v55 }
 0x3a8   : > { %11194 = vst [vmem:[#allocation145_spill] sm:$0xff] %v8738_v30  ;;  %v1839_v32 = vadd.f32 %v7962_v19, %v1838_v4  ;;  %v3658_v4 = vmul.f32 %v6443_v40, %v7984_v26  ;;  %v4336_v8 = vmul.f32 %v6443_v40, %v2204_v63  ;;  %v3029_v33 = vadd.f32 %v2997_v22, %v11199_v17  ;;  %v11204_v17 = vld [vmem:[#allocation182_spill] sm:$0xff] }
 0x3a9   : > { %11195 = vst [vmem:[#allocation152_spill] sm:$0xff] %v8740_v35  ;;  %v8778_v21 = vadd.f32 %v4602_v48, %v4570_v16  ;;  %v4304_v43 = vadd.f32 %v4272_v50, %v4240_v47  ;;  %v8786_v22 = vadd.f32 %v4007_v6, %v11204_v17  ;;  %v11213_v16 = vld [vmem:[#allocation46_spill] sm:$0xff] }
 0x3aa   : > { %5599 = vst.msk [vmem:[%s6885_s13 + $0xc0] sm:$0xf] %vm2535_vm2, %v2850_v3  ;;  %v2998_v24 = vmul.f32 %v6443_v40, %v1839_v32  ;;  %v3232_v3 = vmul.f32 %v6432_v44, %v1839_v32  ;;  %v3594_v19 = vmul.f32 %v6425_v23, %v1839_v32  ;;  %v3976_v32 = vadd.f32 %v3944_v51, %v3912_v29  ;;  %v11211_v51 = vld [vmem:[#allocation97_spill] sm:$0xff] }
 0x3ab   : > { %v2796_v34 = vpop.f32.mrf.mxu2  ;;  %11201 = vst [vmem:[#allocation153_spill] sm:$0xff] %v8778_v21  ;;  %v3563_v47 = vmul.f32 %v6432_v44, %v11211_v51 }
 0x3ac   : > { %v2797_v55 = vadd.f32 %v8529_v9, %v2796_v34  ;;  %v3030_v53 = vadd.f32 %v2998_v24, %v11200_v45  ;;  %v3296_v2 = vadd.f32 %v3264_v62, %v3232_v3  ;;  %v3626_v31 = vadd.f32 %v3594_v19, %v3562_v12  ;;  %11205 = vst [vmem:[#allocation44_spill] sm:$0xff] %v8786_v22  ;;  %v11207_v45 = vld [vmem:[#allocation172_spill] sm:$0xff] }
 0x3ad   : > { %v8788_v34 = vadd.f32 %v4008_v57, %v3976_v32  ;;  %v8791_v62 = vadd.f32 %v4335_v20, %v11207_v45  ;;  %v8793_v12 = vadd.f32 %v4336_v8, %v4304_v43  ;;  %v3329_v57 = vmul.f32 %v6443_v40, %v11211_v51  ;;  %v11215_v24 = vld [vmem:[#allocation100_spill] sm:$0xff]  ;;  %v11218_v45 = vld [vmem:[#allocation58_spill] sm:$0xff]  ;;  %v11223_v8 = vld [vmem:[#allocation167_spill] sm:$0xff] }
 0x3ae   : > { %v2851_v26 = vpack.c.bf16 %v2797_v55, %v2797_v55  ;;  %v3060_v1 = vpack.c.bf16 %v3030_v53, %v3029_v33  ;;  %v8781_v61 = vadd.f32 %v3328_v5, %v3296_v2  ;;  %v8783_v63 = vadd.f32 %v3658_v4, %v3626_v31  ;;  %v8800_v53 = vld [vmem:[%s10444_s2] ss:$0 sm:$0xff]  ;;  %v11216_v32 = vld [vmem:[#allocation52_spill] sm:$0xff] }
 0x3af   : > { %v1841_v7 = vpop.f32.mrf.mxu0  ;;  %11206 = vst [vmem:[#allocation155_spill] sm:$0xff] %v8788_v34  ;;  %v8824_v50 = vadd.f32 %v8800_v53, %v11213_v16  ;;  %v3659_v3 = vmul.f32 %v6443_v40, %v11215_v24  ;;  %v8837_v51 = vadd.f32 %v8800_v53, %v11218_v45  ;;  %v11222_v45 = vld [vmem:[#allocation169_spill] sm:$0xff]  ;;  %v3660_v5 = vmul.f32 %v6443_v40, %v8039_v18  ;;  %v11224_v20 = vld [vmem:[#allocation166_spill] sm:$0xff] }
 0x3b0   : > { %11202 = vst [vmem:[#allocation157_spill] sm:$0xff] %v8781_v61  ;;  %v1842_v31 = vadd.f32 %v8800_v53, %v1841_v7  ;;  %3088 = vmatmul.bf16.gmra.mxu3 %v3060_v1  ;;  %v11212_v7 = vld [vmem:[#allocation164_spill] sm:$0xff]  ;;  %v4337_v43 = vmul.f32 %v6443_v40, %v11223_v8  ;;  %v5870_v61 = vld [vmem:[%s6081_s30 + $0x1d8] sm:$0xff] }
 0x3b1   : > { %11203 = vst [vmem:[#allocation40_spill] sm:$0xff] %v8783_v63  ;;  %v3265_v1 = vmul.f32 %v6425_v23, %v11212_v7 }
 0x3b2   : > { %11208 = vst [vmem:[#allocation37_spill] sm:$0xff] %v8791_v62  ;;  %v3233_v48 = vmul.f32 %v6432_v44, %v1842_v31  ;;  %v3595_v6 = vmul.f32 %v6425_v23, %v1842_v31  ;;  %5481 = vmatmul.msk.bf16.gmra.mxu0 %vm1193_vm1, %v5869_v25  ;;  %v11217_v25 = vld [vmem:[#allocation171_spill] sm:$0xff]  ;;  %v11225_v62 = vld [vmem:[#allocation173_spill] sm:$0xff] }
 0x3b3   : > { %11209 = vst [vmem:[#allocation38_spill] sm:$0xff] %v8793_v12  ;;  %v2799_v29 = vpop.f32.mrf.mxu2  ;;  %v2209_v17 = vadd.f32 %v8800_v53, %v11217_v25  ;;  %v3914_v25 = vmul.f32 %v6432_v44, %v8837_v51 }
 0x3b4   : > { %5600 = vst.msk [vmem:[%s6885_s13 + $0xc4] sm:$0xf] %vm2535_vm2, %v2851_v26  ;;  %v3297_v19 = vadd.f32 %v3265_v1, %v3233_v48  ;;  %v3627_v4 = vadd.f32 %v3595_v6, %v3563_v47  ;;  %v2800_v55 = vadd.f32 %v8529_v9, %v2799_v29  ;;  %v8831_v26 = vadd.f32 %v8800_v53, %v11216_v32 }
 0x3b5   : > { %11214 = vst [vmem:[#allocation87_spill] sm:$0xff] %v8824_v50  ;;  %v3330_v47 = vmul.f32 %v6443_v40, %v8035_v10  ;;  %v3564_v1 = vmul.f32 %v6432_v44, %v8035_v10  ;;  %v3946_v48 = vmul.f32 %v6425_v23, %v8824_v50  ;;  %v2999_v6 = vmul.f32 %v6443_v40, %v1842_v31 }
 0x3b6   : > { %v2852_v7 = vpack.c.bf16 %v2800_v55, %v2800_v55  ;;  %v8839_v16 = vadd.f32 %v3329_v57, %v3297_v19  ;;  %v8841_v24 = vadd.f32 %v3659_v3, %v3627_v4  ;;  %v4242_v32 = vmul.f32 %v6432_v44, %v8730_v13  ;;  %v11221_v3 = vld [vmem:[#allocation49_spill] sm:$0xff] }
 0x3b7   : > { %v1843_v29 = vpop.f32.mrf.mxu0  ;;  %v4604_v57 = vmul.f32 %v6425_v23, %v8730_v13  ;;  %v4009_v19 = vmul.f32 %v6443_v40, %v11221_v3  ;;  %v4010_v10 = vmul.f32 %v6443_v40, %v8831_v26  ;;  %v4572_v55 = vmul.f32 %v6432_v44, %v2209_v17 }
 0x3b8   : > { %11219 = vst [vmem:[#allocation42_spill] sm:$0xff] %v8839_v16  ;;  %v1844_v4 = vadd.f32 %v8800_v53, %v1843_v29  ;;  %v4274_v31 = vmul.f32 %v6425_v23, %v8736_v60  ;;  %v3266_v13 = vmul.f32 %v6425_v23, %v11222_v45  ;;  %v4338_v33 = vmul.f32 %v6443_v40, %v2209_v17  ;;  %v5871_v16 = vld [vmem:[%s6081_s30 + $0x1e0] sm:$0xff] }
 0x3b9   : > { %11220 = vst [vmem:[#allocation43_spill] sm:$0xff] %v8841_v24  ;;  %v3031_v21 = vadd.f32 %v2999_v6, %v11224_v20  ;;  %v8879_v35 = vadd.f32 %v4604_v57, %v4572_v55  ;;  %v11229_v20 = vld [vmem:[#allocation192_spill] sm:$0xff] }
 0x3ba   : > { %5601 = vst.msk [vmem:[%s6885_s13 + $0xc8] sm:$0xf] %vm2535_vm2, %v2852_v7  ;;  %v3000_v3 = vmul.f32 %v6443_v40, %v1844_v4  ;;  %v3234_v7 = vmul.f32 %v6432_v44, %v1844_v4  ;;  %v3596_v29 = vmul.f32 %v6425_v23, %v1844_v4  ;;  %v3978_v4 = vadd.f32 %v3946_v48, %v3914_v25 }
 0x3bb   : > { %v2801_v2 = vpop.f32.mrf.mxu2  ;;  %11226 = vst [vmem:[#allocation90_spill] sm:$0xff] %v8879_v35  ;;  %v4306_v63 = vadd.f32 %v4274_v31, %v4242_v32  ;;  %v8887_v6 = vadd.f32 %v4009_v19, %v11229_v20  ;;  %v11238_v19 = vld [vmem:[#allocation51_spill] sm:$0xff]  ;;  %v11239_v31 = vld [vmem:[#allocation112_spill] sm:$0xff]  ;;  %v11242_v20 = vld [vmem:[#allocation65_spill] sm:$0xff] }
 0x3bc   : > { %v2802_v45 = vadd.f32 %v8529_v9, %v2801_v2  ;;  %v3032_v12 = vadd.f32 %v3000_v3, %v11225_v62  ;;  %v3298_v22 = vadd.f32 %v3266_v13, %v3234_v7  ;;  %v3628_v34 = vadd.f32 %v3596_v29, %v3564_v1  ;;  %v11232_v62 = vld [vmem:[#allocation183_spill] sm:$0xff]  ;;  %v11249_v35 = vld [vmem:[#allocation50_spill] sm:$0xff] }
 0x3bd   : > { %11230 = vst [vmem:[#allocation53_spill] sm:$0xff] %v8887_v6  ;;  %v8889_v2 = vadd.f32 %v4010_v10, %v3978_v4  ;;  %v8892_v13 = vadd.f32 %v4337_v43, %v11232_v62  ;;  %v8894_v1 = vadd.f32 %v4338_v33, %v4306_v63  ;;  %v11236_v33 = vld [vmem:[#allocation108_spill] sm:$0xff]  ;;  %v8920_v10 = vadd.f32 %v8800_v53, %v11238_v19  ;;  %v11247_v63 = vld [vmem:[#allocation177_spill] sm:$0xff] }
 0x3be   : > { %v2853_v18 = vpack.c.bf16 %v2802_v45, %v2802_v45  ;;  %v3061_v30 = vpack.c.bf16 %v3032_v12, %v3031_v21  ;;  %v8882_v8 = vadd.f32 %v3330_v47, %v3298_v22  ;;  %v8884_v17 = vadd.f32 %v3660_v5, %v3628_v34  ;;  %v11240_v45 = vld [vmem:[#allocation57_spill] sm:$0xff]  ;;  %v11248_v22 = vld [vmem:[#allocation176_spill] sm:$0xff] }
 0x3bf   : > { %v1846_v50 = vpop.f32.mrf.mxu0  ;;  %11231 = vst [vmem:[#allocation165_spill] sm:$0xff] %v8889_v2  ;;  %v3565_v47 = vmul.f32 %v6432_v44, %v11236_v33  ;;  %v3331_v57 = vmul.f32 %v6443_v40, %v11236_v33  ;;  %v3661_v25 = vmul.f32 %v6443_v40, %v11239_v31  ;;  %v8927_v4 = vadd.f32 %v8800_v53, %v11240_v45 }
 0x3c0   : > { %11227 = vst [vmem:[#allocation47_spill] sm:$0xff] %v8882_v8  ;;  %v1847_v21 = vadd.f32 %v8800_v53, %v1846_v50  ;;  %3093 = vmatmul.bf16.gmra.mxu3 %v3061_v30  ;;  %v11237_v50 = vld [vmem:[#allocation174_spill] sm:$0xff]  ;;  %v8933_v62 = vadd.f32 %v8800_v53, %v11242_v20  ;;  %v4244_v31 = vmul.f32 %v6432_v44, %v8831_v26 }
 0x3c1   : > { %11228 = vst [vmem:[#allocation162_spill] sm:$0xff] %v8884_v17  ;;  %v3267_v30 = vmul.f32 %v6425_v23, %v11237_v50  ;;  %v4339_v43 = vmul.f32 %v6443_v40, %v11247_v63 }
 0x3c2   : > { %11233 = vst [vmem:[#allocation160_spill] sm:$0xff] %v8892_v13  ;;  %v3235_v48 = vmul.f32 %v6432_v44, %v1847_v21  ;;  %v3597_v32 = vmul.f32 %v6425_v23, %v1847_v21  ;;  %5482 = vmatmul.msk.bf16.gmra.mxu0 %vm1193_vm1, %v5870_v61  ;;  %v11241_v61 = vld [vmem:[#allocation181_spill] sm:$0xff]  ;;  %v3916_v45 = vmul.f32 %v6432_v44, %v8933_v62 }
 0x3c3   : > { %11234 = vst [vmem:[#allocation158_spill] sm:$0xff] %v8894_v1  ;;  %v2804_v55 = vpop.f32.mrf.mxu2 }
 0x3c4   : > { %5602 = vst.msk [vmem:[%s6885_s13 + $0xcc] sm:$0xf] %vm2535_vm2, %v2853_v18  ;;  %v3299_v3 = vadd.f32 %v3267_v30, %v3235_v48  ;;  %v3629_v7 = vadd.f32 %v3597_v32, %v3565_v47  ;;  %v2805_v29 = vadd.f32 %v8529_v9, %v2804_v55  ;;  %v2214_v18 = vadd.f32 %v8800_v53, %v11241_v61  ;;  %v11246_v61 = vld [vmem:[#allocation179_spill] sm:$0xff] }
 0x3c5   : > { %v3332_v47 = vmul.f32 %v6443_v40, %v8106_v36  ;;  %v3566_v30 = vmul.f32 %v6432_v44, %v8106_v36  ;;  %v3948_v48 = vmul.f32 %v6425_v23, %v8920_v10  ;;  %v3001_v32 = vmul.f32 %v6443_v40, %v1847_v21 }
 0x3c6   : > { %v2854_v33 = vpack.c.bf16 %v2805_v29, %v2805_v29  ;;  %v8935_v50 = vadd.f32 %v3331_v57, %v3299_v3  ;;  %v8937_v19 = vadd.f32 %v3661_v25, %v3629_v7  ;;  %v4606_v57 = vmul.f32 %v6425_v23, %v8831_v26  ;;  %v11245_v25 = vld [vmem:[#allocation185_spill] sm:$0xff] }
 0x3c7   : > { %v1848_v55 = vpop.f32.mrf.mxu0  ;;  %v4011_v3 = vmul.f32 %v6443_v40, %v11245_v25  ;;  %v4012_v36 = vmul.f32 %v6443_v40, %v8927_v4  ;;  %v4574_v29 = vmul.f32 %v6432_v44, %v2214_v18  ;;  %v4276_v21 = vmul.f32 %v6425_v23, %v8837_v51 }
 0x3c8   : > { %11243 = vst [vmem:[#allocation30_spill] sm:$0xff] %v8935_v50  ;;  %v1849_v7 = vadd.f32 %v8800_v53, %v1848_v55  ;;  %v3268_v26 = vmul.f32 %v6425_v23, %v11246_v61  ;;  %v3662_v25 = vmul.f32 %v6443_v40, %v8110_v49  ;;  %v4340_v12 = vmul.f32 %v6443_v40, %v2214_v18 }
 0x3c9   : > { %11244 = vst [vmem:[#allocation163_spill] sm:$0xff] %v8937_v19  ;;  %v3033_v5 = vadd.f32 %v3001_v32, %v11248_v22  ;;  %v8975_v2 = vadd.f32 %v4606_v57, %v4574_v29  ;;  %v4308_v24 = vadd.f32 %v4276_v21, %v4244_v31  ;;  %v11252_v22 = vld [vmem:[#allocation201_spill] sm:$0xff] }
 0x3ca   : > { %5603 = vst.msk [vmem:[%s6885_s13 + $0xd0] sm:$0xf] %vm2535_vm2, %v2854_v33  ;;  %v3002_v20 = vmul.f32 %v6443_v40, %v1849_v7  ;;  %v3236_v33 = vmul.f32 %v6432_v44, %v1849_v7  ;;  %v3598_v55 = vmul.f32 %v6425_v23, %v1849_v7  ;;  %v3980_v7 = vadd.f32 %v3948_v48, %v3916_v45  ;;  %v11262_v45 = vld [vmem:[#allocation120_spill] sm:$0xff] }
 0x3cb   : > { %v2806_v34 = vpop.f32.mrf.mxu2  ;;  %11250 = vst [vmem:[#allocation182_spill] sm:$0xff] %v8975_v2  ;;  %v8983_v32 = vadd.f32 %v4011_v3, %v11252_v22  ;;  %v9029_v22 = vadd.f32 %v8800_v53, %v8063_v59  ;;  %v4246_v59 = vmul.f32 %v6432_v44, %v8927_v4 }
 0x3cc   : > { %v2807_v61 = vadd.f32 %v8529_v9, %v2806_v34  ;;  %v3034_v13 = vadd.f32 %v3002_v20, %v11249_v35  ;;  %v3300_v1 = vadd.f32 %v3268_v26, %v3236_v33  ;;  %v3630_v6 = vadd.f32 %v3598_v55, %v3566_v30  ;;  %v11255_v35 = vld [vmem:[#allocation193_spill] sm:$0xff] }
 0x3cd   : > { %11253 = vst [vmem:[#allocation97_spill] sm:$0xff] %v8983_v32  ;;  %v8985_v34 = vadd.f32 %v4012_v36, %v3980_v7  ;;  %v8988_v26 = vadd.f32 %v4339_v43, %v11255_v35  ;;  %v8990_v30 = vadd.f32 %v4340_v12, %v4308_v24  ;;  %v11259_v12 = vld [vmem:[#allocation6_spill] sm:$0xff]  ;;  %v11261_v36 = vld [vmem:[#allocation56_spill] sm:$0xff]  ;;  %v3663_v20 = vmul.f32 %v6443_v40, %v11262_v45 }
 0x3ce   : > { %v2855_v49 = vpack.c.bf16 %v2807_v61, %v2807_v61  ;;  %v3062_v17 = vpack.c.bf16 %v3034_v13, %v3033_v5  ;;  %v8978_v63 = vadd.f32 %v3332_v47, %v3300_v1  ;;  %v8980_v18 = vadd.f32 %v3662_v25, %v3630_v6  ;;  %v11263_v61 = vld [vmem:[#allocation64_spill] sm:$0xff]  ;;  %v11268_v1 = vld [vmem:[#allocation186_spill] sm:$0xff]  ;;  %v11269_v47 = vld [vmem:[#allocation55_spill] sm:$0xff] }
 0x3cf   : > { %v1851_v8 = vpop.f32.mrf.mxu0  ;;  %11254 = vst [vmem:[#allocation164_spill] sm:$0xff] %v8985_v34  ;;  %v3567_v48 = vmul.f32 %v6432_v44, %v11259_v12  ;;  %v3333_v3 = vmul.f32 %v6443_v40, %v11259_v12  ;;  %v9016_v29 = vadd.f32 %v8800_v53, %v11261_v36  ;;  %v9023_v7 = vadd.f32 %v8800_v53, %v11263_v61 }
 0x3d0   : > { %11251 = vst [vmem:[#allocation172_spill] sm:$0xff] %v8980_v18  ;;  %v1852_v13 = vadd.f32 %v8800_v53, %v1851_v8  ;;  %3098 = vmatmul.bf16.gmra.mxu3 %v3062_v17  ;;  %v11260_v8 = vld [vmem:[#allocation184_spill] sm:$0xff]  ;;  %v5872_v18 = vld [vmem:[%s6081_s30 + $0x1e8] sm:$0xff] }
 0x3d1   : > { %11256 = vst [vmem:[#allocation46_spill] sm:$0xff] %v8988_v26  ;;  %v3269_v17 = vmul.f32 %v6425_v23, %v11260_v8 }
 0x3d2   : > { %11257 = vst [vmem:[#allocation100_spill] sm:$0xff] %v8990_v30  ;;  %v3237_v31 = vmul.f32 %v6432_v44, %v1852_v13  ;;  %v3599_v57 = vmul.f32 %v6425_v23, %v1852_v13  ;;  %5483 = vmatmul.msk.bf16.gmra.mxu0 %vm1193_vm1, %v5871_v16  ;;  %v11264_v16 = vld [vmem:[#allocation191_spill] sm:$0xff] }
 0x3d3   : > { %5604 = vst.msk [vmem:[%s6885_s13 + $0xd4] sm:$0xf] %vm2535_vm2, %v2855_v49  ;;  %v2809_v21 = vpop.f32.mrf.mxu2  ;;  %v2219_v49 = vadd.f32 %v8800_v53, %v11264_v16 }
 0x3d4   : > { %v3301_v33 = vadd.f32 %v3269_v17, %v3237_v31  ;;  %v3631_v55 = vadd.f32 %v3599_v57, %v3567_v48  ;;  %v2810_v25 = vadd.f32 %v8529_v9, %v2809_v21  ;;  %v3334_v48 = vmul.f32 %v6443_v40, %v8178_v38  ;;  %v11265_v21 = vld [vmem:[#allocation61_spill] sm:$0xff] }
 0x3d5   : > { %v3568_v17 = vmul.f32 %v6432_v44, %v8178_v38  ;;  %v3950_v31 = vmul.f32 %v6425_v23, %v9016_v29  ;;  %v3003_v57 = vmul.f32 %v6443_v40, %v1852_v13  ;;  %v4013_v45 = vmul.f32 %v6443_v40, %v11265_v21  ;;  %v11267_v21 = vld [vmem:[#allocation187_spill] sm:$0xff] }
 0x3d6   : > { %v2856_v35 = vpack.c.bf16 %v2810_v25, %v2810_v25  ;;  %v9031_v12 = vadd.f32 %v3333_v3, %v3301_v33  ;;  %v9033_v8 = vadd.f32 %v3663_v20, %v3631_v55  ;;  %v4608_v3 = vmul.f32 %v6425_v23, %v8927_v4  ;;  %v11266_v25 = vld [vmem:[#allocation189_spill] sm:$0xff] }
 0x3d7   : > { %v1853_v36 = vpop.f32.mrf.mxu0  ;;  %v4014_v38 = vmul.f32 %v6443_v40, %v9023_v7  ;;  %v4576_v33 = vmul.f32 %v6432_v44, %v2219_v49  ;;  %v4278_v13 = vmul.f32 %v6425_v23, %v8933_v62  ;;  %v3918_v55 = vmul.f32 %v6432_v44, %v9029_v22 }
 0x3d8   : > { %5605 = vst.msk [vmem:[%s6885_s13 + $0xd8] sm:$0xf] %vm2535_vm2, %v2856_v35  ;;  %v1854_v20 = vadd.f32 %v8800_v53, %v1853_v36  ;;  %v3270_v4 = vmul.f32 %v6425_v23, %v11266_v25  ;;  %v3664_v36 = vmul.f32 %v6443_v40, %v8182_v0  ;;  %v4341_v24 = vmul.f32 %v6443_v40, %v11267_v21 }
 0x3d9   : > { %v4342_v43 = vmul.f32 %v6443_v40, %v2219_v49  ;;  %v3035_v6 = vadd.f32 %v3003_v57, %v11268_v1  ;;  %v9071_v32 = vadd.f32 %v4608_v3, %v4576_v33  ;;  %v4310_v34 = vadd.f32 %v4278_v13, %v4246_v59  ;;  %v11280_v13 = vld [vmem:[#allocation129_spill] sm:$0xff] }
 0x3da   : > { %v3004_v61 = vmul.f32 %v6443_v40, %v1854_v20  ;;  %v3238_v16 = vmul.f32 %v6432_v44, %v1854_v20  ;;  %v3600_v35 = vmul.f32 %v6425_v23, %v1854_v20  ;;  %v3982_v20 = vadd.f32 %v3950_v31, %v3918_v55 }
 0x3db   : > { %v2811_v5 = vpop.f32.mrf.mxu2  ;;  %11270 = vst [vmem:[#allocation52_spill] sm:$0xff] %v9071_v32  ;;  %v9079_v1 = vadd.f32 %v4013_v45, %v7929_v56  ;;  %v11279_v45 = vld [vmem:[#allocation200_spill] sm:$0xff]  ;;  %v3665_v55 = vmul.f32 %v6443_v40, %v11280_v13 }
 0x3dc   : > { %v2812_v25 = vadd.f32 %v8529_v9, %v2811_v5  ;;  %v3036_v2 = vadd.f32 %v3004_v61, %v11269_v47  ;;  %v3302_v26 = vadd.f32 %v3270_v4, %v3238_v16  ;;  %v3632_v30 = vadd.f32 %v3600_v35, %v3568_v17  ;;  %v11273_v47 = vld [vmem:[#allocation202_spill] sm:$0xff] }
 0x3dd   : > { %11271 = vst [vmem:[#allocation171_spill] sm:$0xff] %v9079_v1  ;;  %v9081_v5 = vadd.f32 %v4014_v38, %v3982_v20  ;;  %v9084_v57 = vadd.f32 %v4341_v24, %v11273_v47  ;;  %v9086_v17 = vadd.f32 %v4342_v43, %v4310_v34  ;;  %v11277_v43 = vld [vmem:[#allocation8_spill] sm:$0xff]  ;;  %v2224_v38 = vadd.f32 %v8800_v53, %v11279_v45  ;;  %v11285_v34 = vld [vmem:[#allocation63_spill] sm:$0xff] }
 0x3de   : > { %v2857_v0 = vpack.c.bf16 %v2812_v25, %v2812_v25  ;;  %v3063_v19 = vpack.c.bf16 %v3036_v2, %v3035_v6  ;;  %v9074_v21 = vadd.f32 %v3334_v48, %v3302_v26  ;;  %v9076_v49 = vadd.f32 %v3664_v36, %v3632_v30  ;;  %v5873_v26 = vld [vmem:[%s6081_s30 + $0x1f0] sm:$0xff] }
 0x3df   : > { %v1856_v50 = vpop.f32.mrf.mxu0  ;;  %11272 = vst [vmem:[#allocation58_spill] sm:$0xff] %v9081_v5  ;;  %v3569_v48 = vmul.f32 %v6432_v44, %v11277_v43  ;;  %v3335_v3 = vmul.f32 %v6443_v40, %v11277_v43  ;;  %v4578_v20 = vmul.f32 %v6432_v44, %v2224_v38  ;;  %v3336_v43 = vmul.f32 %v6443_v40, %v8246_v52 }
 0x3e0   : > { %11274 = vst [vmem:[#allocation49_spill] sm:$0xff] %v9084_v57  ;;  %v1857_v2 = vadd.f32 %v8800_v53, %v1856_v50  ;;  %3103 = vmatmul.bf16.gmra.mxu3 %v3063_v19  ;;  %v11278_v50 = vld [vmem:[#allocation194_spill] sm:$0xff] }
 0x3e1   : > { %11275 = vst [vmem:[#allocation169_spill] sm:$0xff] %v9086_v17  ;;  %v3271_v19 = vmul.f32 %v6425_v23, %v11278_v50  ;;  %v3570_v50 = vmul.f32 %v6432_v44, %v8246_v52  ;;  %v11282_v52 = vld [vmem:[#allocation196_spill] sm:$0xff] }
 0x3e2   : > { %5606 = vst.msk [vmem:[%s6885_s13 + $0xdc] sm:$0xf] %vm2535_vm2, %v2857_v0  ;;  %v3239_v31 = vmul.f32 %v6432_v44, %v1857_v2  ;;  %v3601_v59 = vmul.f32 %v6425_v23, %v1857_v2  ;;  %5484 = vmatmul.msk.bf16.gmra.mxu0 %vm1193_vm1, %v5872_v18  ;;  %v4610_v18 = vmul.f32 %v6425_v23, %v9023_v7 }
 0x3e3   : > { %v2814_v33 = vpop.f32.mrf.mxu2  ;;  %v3005_v0 = vmul.f32 %v6443_v40, %v1857_v2  ;;  %v4280_v2 = vmul.f32 %v6425_v23, %v9029_v22 }
 0x3e4   : > { %v3303_v4 = vadd.f32 %v3271_v19, %v3239_v31  ;;  %v3633_v61 = vadd.f32 %v3601_v59, %v3569_v48  ;;  %v2815_v16 = vadd.f32 %v8529_v9, %v2814_v33  ;;  %v4248_v19 = vmul.f32 %v6432_v44, %v9023_v7  ;;  %v11281_v59 = vld [vmem:[#allocation198_spill] sm:$0xff] }
 0x3e5   : > { %v3666_v31 = vmul.f32 %v6443_v40, %v8257_v41  ;;  %v4344_v7 = vmul.f32 %v6443_v40, %v2224_v38 }
 0x3e6   : > { %v2858_v35 = vpack.c.bf16 %v2815_v16, %v2815_v16  ;;  %v9115_v36 = vadd.f32 %v3335_v3, %v3303_v4  ;;  %v9117_v25 = vadd.f32 %v3665_v55, %v3633_v61  ;;  %v3272_v3 = vmul.f32 %v6425_v23, %v11281_v59  ;;  %v11284_v61 = vld [vmem:[#allocation195_spill] sm:$0xff] }
 0x3e7   : > { %v1858_v47 = vpop.f32.mrf.mxu0  ;;  %v4343_v55 = vmul.f32 %v6443_v40, %v11282_v52  ;;  %v9144_v4 = vadd.f32 %v4610_v18, %v4578_v20  ;;  %v3037_v16 = vadd.f32 %v3005_v0, %v11284_v61  ;;  %v4312_v56 = vadd.f32 %v4280_v2, %v4248_v19  ;;  %v11289_v19 = vld [vmem:[#allocation12_spill] sm:$0xff] }
 0x3e8   : > { %5607 = vst.msk [vmem:[%s6885_s13 + $0xe0] sm:$0xf] %vm2535_vm2, %v2858_v35  ;;  %v1859_v48 = vadd.f32 %v8800_v53, %v1858_v47 }
 0x3e9   : > { %11283 = vst [vmem:[#allocation167_spill] sm:$0xff] %v9144_v4  ;;  %v9155_v18 = vadd.f32 %v4343_v55, %v7931_v42  ;;  %v9157_v20 = vadd.f32 %v4344_v7, %v4312_v56  ;;  %v3571_v56 = vmul.f32 %v6432_v44, %v11289_v19  ;;  %v5874_v42 = vld [vmem:[%s6081_s30 + $0x1f8] sm:$0xff] }
 0x3ea   : > { %v3006_v45 = vmul.f32 %v6443_v40, %v1859_v48  ;;  %v3240_v33 = vmul.f32 %v6432_v44, %v1859_v48  ;;  %v3602_v13 = vmul.f32 %v6425_v23, %v1859_v48 }
 0x3eb   : > { %v2816_v41 = vpop.f32.mrf.mxu2  ;;  %11286 = vst [vmem:[#allocation166_spill] sm:$0xff] %v9155_v18 }
 0x3ec   : > { %v3304_v35 = vadd.f32 %v3272_v3, %v3240_v33  ;;  %v3634_v47 = vadd.f32 %v3602_v13, %v3570_v50  ;;  %v2817_v59 = vadd.f32 %v8529_v9, %v2816_v41  ;;  %v3038_v6 = vadd.f32 %v3006_v45, %v11285_v34  ;;  %11287 = vst [vmem:[#allocation173_spill] sm:$0xff] %v9157_v20  ;;  %v11291_v13 = vld [vmem:[#allocation138_spill] sm:$0xff] }
 0x3ed   : > { %v3337_v45 = vmul.f32 %v6443_v40, %v11289_v19  ;;  %v3667_v55 = vmul.f32 %v6443_v40, %v11291_v13 }
 0x3ee   : > { %v2859_v30 = vpack.c.bf16 %v2817_v59, %v2817_v59  ;;  %v3064_v48 = vpack.c.bf16 %v3038_v6, %v3037_v16  ;;  %v9150_v24 = vadd.f32 %v3336_v43, %v3304_v35  ;;  %v9152_v52 = vadd.f32 %v3666_v31, %v3634_v47  ;;  %v11290_v31 = vld [vmem:[#allocation2_spill] sm:$0xff] }
 0x3ef   : > { %v1861_v38 = vpop.f32.mrf.mxu0  ;;  %v3273_v2 = vmul.f32 %v6425_v23, %v11290_v31  ;;  %v4612_v59 = vmul.f32 %v6425_v23, %v7884_v46  ;;  %v3572_v31 = vmul.f32 %v6432_v44, %v8323_v27 }
 0x3f0   : > { %5608 = vst.msk [vmem:[%s6885_s13 + $0xe4] sm:$0xf] %vm2535_vm2, %v2859_v30  ;;  %v1862_v34 = vadd.f32 %v8800_v53, %v1861_v38  ;;  %3108 = vmatmul.bf16.gmra.mxu3 %v3064_v48 }
 0x3f2   : > { %v3241_v30 = vmul.f32 %v6432_v44, %v1862_v34  ;;  %v3603_v3 = vmul.f32 %v6425_v23, %v1862_v34  ;;  %5485 = vmatmul.msk.bf16.gmra.mxu0 %vm1193_vm1, %v5873_v26  ;;  %v11292_v26 = vld [vmem:[#allocation71_spill] sm:$0xff]  ;;  %v3007_v38 = vmul.f32 %v6443_v40, %v1862_v34  ;;  %v3338_v34 = vmul.f32 %v6443_v40, %v8323_v27 }
 0x3f3   : > { %v2819_v33 = vpop.f32.mrf.mxu2  ;;  %v4580_v48 = vmul.f32 %v6432_v44, %v11292_v26 }
 0x3f4   : > { %v3305_v7 = vadd.f32 %v3273_v2, %v3241_v30  ;;  %v3635_v41 = vadd.f32 %v3603_v3, %v3571_v56  ;;  %v2820_v61 = vadd.f32 %v8529_v9, %v2819_v33  ;;  %v11293_v2 = vld [vmem:[#allocation203_spill] sm:$0xff]  ;;  %v3668_v33 = vmul.f32 %v6443_v40, %v8334_v28 }
 0x3f5   : > { %v3274_v30 = vmul.f32 %v6425_v23, %v11293_v2  ;;  %v9205_v13 = vadd.f32 %v4612_v59, %v4580_v48 }
 0x3f6   : > { %v2860_v16 = vpack.c.bf16 %v2820_v61, %v2820_v61  ;;  %v9182_v35 = vadd.f32 %v3337_v45, %v3305_v7  ;;  %v9184_v47 = vadd.f32 %v3667_v55, %v3635_v41  ;;  %v11295_v7 = vld [vmem:[#allocation68_spill] sm:$0xff] }
 0x3f7   : > { %v1863_v19 = vpop.f32.mrf.mxu0  ;;  %11294 = vst [vmem:[#allocation192_spill] sm:$0xff] %v9205_v13  ;;  %v3039_v41 = vadd.f32 %v3007_v38, %v11295_v7 }
 0x3f8   : > { %5609 = vst.msk [vmem:[%s6885_s13 + $0xe8] sm:$0xf] %vm2535_vm2, %v2860_v16  ;;  %v1864_v56 = vadd.f32 %v8800_v53, %v1863_v19  ;;  %v11296_v19 = vld [vmem:[#allocation69_spill] sm:$0xff] }
 0x3fa   : > { %v3008_v3 = vmul.f32 %v6443_v40, %v1864_v56  ;;  %v3242_v46 = vmul.f32 %v6432_v44, %v1864_v56  ;;  %v3604_v45 = vmul.f32 %v6425_v23, %v1864_v56 }
 0x3fb   : > { %v2821_v55 = vpop.f32.mrf.mxu2 }
 0x3fc   : > { %v3306_v61 = vadd.f32 %v3274_v30, %v3242_v46  ;;  %v3636_v16 = vadd.f32 %v3604_v45, %v3572_v31  ;;  %v2822_v26 = vadd.f32 %v8529_v9, %v2821_v55  ;;  %v3040_v2 = vadd.f32 %v3008_v3, %v11296_v19  ;;  %v11298_v30 = vld [vmem:[#allocation18_spill] sm:$0xff]  ;;  %v11299_v46 = vld [vmem:[#allocation207_spill] sm:$0xff] }
 0x3fd   : > { %v3573_v3 = vmul.f32 %v6432_v44, %v11298_v30  ;;  %v3275_v45 = vmul.f32 %v6425_v23, %v11299_v46  ;;  %v11300_v55 = vld [vmem:[#allocation147_spill] sm:$0xff] }
 0x3fe   : > { %v2861_v50 = vpack.c.bf16 %v2822_v26, %v2822_v26  ;;  %v3065_v56 = vpack.c.bf16 %v3040_v2, %v3039_v41  ;;  %v9211_v43 = vadd.f32 %v3338_v34, %v3306_v61  ;;  %v9213_v27 = vadd.f32 %v3668_v33, %v3636_v16 }
 0x3ff   : > { %v1866_v6 = vpop.f32.mrf.mxu0  ;;  %v3669_v7 = vmul.f32 %v6443_v40, %v11300_v55  ;;  %v11302_v55 = vld [vmem:[#allocation3_spill] sm:$0xff] }
 0x400   : > { %5610 = vst.msk [vmem:[%s6885_s13 + $0xec] sm:$0xf] %vm2535_vm2, %v2861_v50  ;;  %v1867_v48 = vadd.f32 %v8800_v53, %v1866_v6  ;;  %3113 = vmatmul.bf16.gmra.mxu3 %v3065_v56  ;;  %v3339_v6 = vmul.f32 %v6443_v40, %v11298_v30  ;;  %v11301_v30 = vld [vmem:[#allocation16_spill] sm:$0xff] }
 0x401   : > { %v3574_v59 = vmul.f32 %v6432_v44, %v11301_v30 }
 0x402   : > { %v3243_v34 = vmul.f32 %v6432_v44, %v1867_v48  ;;  %v3605_v50 = vmul.f32 %v6425_v23, %v1867_v48  ;;  %5486 = vmatmul.msk.bf16.gmra.mxu0 %vm1193_vm1, %v5874_v42  ;;  %v3009_v56 = vmul.f32 %v6443_v40, %v1867_v48  ;;  %v3340_v48 = vmul.f32 %v6443_v40, %v11301_v30  ;;  %v5875_v30 = vld [vmem:[%s6081_s30 + $0x200] sm:$0xff] }
 0x403   : > { %v2824_v33 = vpop.f32.mrf.mxu2 }
 0x404   : > { %v3307_v41 = vadd.f32 %v3275_v45, %v3243_v34  ;;  %v3637_v61 = vadd.f32 %v3605_v50, %v3573_v3  ;;  %v2825_v16 = vadd.f32 %v8529_v9, %v2824_v33  ;;  %v3276_v3 = vmul.f32 %v6425_v23, %v11302_v55  ;;  %v11303_v33 = vld [vmem:[#allocation75_spill] sm:$0xff] }
 0x405   : > { %v3670_v50 = vmul.f32 %v6443_v40, %v8411_v39 }
 0x406   : > { %v2862_v26 = vpack.c.bf16 %v2825_v16, %v2825_v16  ;;  %v9236_v19 = vadd.f32 %v3339_v6, %v3307_v41  ;;  %v9238_v2 = vadd.f32 %v3669_v7, %v3637_v61  ;;  %v3041_v7 = vadd.f32 %v3009_v56, %v11303_v33  ;;  %v9259_v16 = vld [vmem:[%s10447_s5] ss:$0 sm:$0xff] }
 0x407   : > { %v1868_v46 = vpop.f32.mrf.mxu0  ;;  %v11307_v33 = vld [vmem:[#allocation154_spill] sm:$0xff] }
 0x408   : > { %5611 = vst.msk [vmem:[%s6885_s13 + $0xf0] sm:$0xf] %vm2535_vm2, %v2862_v26  ;;  %v1869_v42 = vadd.f32 %v8800_v53, %v1868_v46  ;;  %v11304_v46 = vld [vmem:[#allocation79_spill] sm:$0xff] }
 0x40a   : > { %v3010_v9 = vmul.f32 %v6443_v40, %v1869_v42  ;;  %v3244_v45 = vmul.f32 %v6432_v44, %v1869_v42  ;;  %v3606_v34 = vmul.f32 %v6425_v23, %v1869_v42 }
 0x40b   : > { %v2826_v6 = vpop.f32.mrf.mxu2 }
 0x40c   : > { %v3308_v41 = vadd.f32 %v3276_v3, %v3244_v45  ;;  %v3638_v61 = vadd.f32 %v3606_v34, %v3574_v59  ;;  %v2827_v26 = vadd.f32 %v9259_v16, %v2826_v6  ;;  %v3042_v42 = vadd.f32 %v3010_v9, %v11304_v46  ;;  %v11305_v9 = vld [vmem:[#allocation24_spill] sm:$0xff]  ;;  %v11306_v34 = vld [vmem:[#allocation209_spill] sm:$0xff] }
 0x40d   : > { %v3575_v45 = vmul.f32 %v6432_v44, %v11305_v9 }
 0x40e   : > { %v2863_v55 = vpack.c.bf16 %v2827_v26, %v2827_v26  ;;  %v3066_v31 = vpack.c.bf16 %v3042_v42, %v3041_v7  ;;  %v9264_v38 = vadd.f32 %v3340_v48, %v3308_v41  ;;  %v9266_v39 = vadd.f32 %v3670_v50, %v3638_v61 }
 0x40f   : > { %v1871_v28 = vpop.f32.mrf.mxu0  ;;  %v3277_v48 = vmul.f32 %v6425_v23, %v11306_v34  ;;  %v3671_v7 = vmul.f32 %v6443_v40, %v11307_v33  ;;  %v11308_v33 = vld [vmem:[#allocation210_spill] sm:$0xff] }
 0x410   : > { %5612 = vst.msk [vmem:[%s6885_s13 + $0xf4] sm:$0xf] %vm2535_vm2, %v2863_v55  ;;  %v1872_v59 = vadd.f32 %v8800_v53, %v1871_v28  ;;  %3118 = vmatmul.bf16.gmra.mxu3 %v3066_v31  ;;  %v3341_v28 = vmul.f32 %v6443_v40, %v11305_v9  ;;  %v3576_v9 = vmul.f32 %v6432_v44, %v8477_v58 }
 0x412   : > { %v3245_v50 = vmul.f32 %v6432_v44, %v1872_v59  ;;  %v3607_v6 = vmul.f32 %v6425_v23, %v1872_v59  ;;  %5487 = vmatmul.msk.bf16.gmra.mxu0 %vm1193_vm1, %v5875_v30  ;;  %v3011_v34 = vmul.f32 %v6443_v40, %v1872_v59  ;;  %v3342_v59 = vmul.f32 %v6443_v40, %v8477_v58 }
 0x413   : > { %v2829_v31 = vpop.f32.mrf.mxu2 }
 0x414   : > { %v3309_v41 = vadd.f32 %v3277_v48, %v3245_v50  ;;  %v3639_v61 = vadd.f32 %v3607_v6, %v3575_v45  ;;  %v2830_v26 = vadd.f32 %v9259_v16, %v2829_v31  ;;  %v3278_v45 = vmul.f32 %v6425_v23, %v11308_v33  ;;  %v11309_v31 = vld [vmem:[#allocation4_spill] sm:$0xff] }
 0x416   : > { %v2864_v46 = vpack.c.bf16 %v2830_v26, %v2830_v26  ;;  %v9287_v42 = vadd.f32 %v3341_v28, %v3309_v41  ;;  %v9289_v55 = vadd.f32 %v3671_v7, %v3639_v61  ;;  %v3672_v28 = vmul.f32 %v6443_v40, %v8488_v14 }
 0x417   : > { %v1873_v3 = vpop.f32.mrf.mxu0  ;;  %v3043_v7 = vadd.f32 %v3011_v34, %v11309_v31 }
 0x418   : > { %5613 = vst.msk [vmem:[%s6885_s13 + $0xf8] sm:$0xf] %vm2535_vm2, %v2864_v46  ;;  %v1874_v30 = vadd.f32 %v8800_v53, %v1873_v3  ;;  %v11310_v46 = vld [vmem:[#allocation211_spill] sm:$0xff] }
 0x41a   : > { %v3012_v48 = vmul.f32 %v6443_v40, %v1874_v30  ;;  %v3246_v50 = vmul.f32 %v6432_v44, %v1874_v30  ;;  %v3608_v6 = vmul.f32 %v6425_v23, %v1874_v30 }
 0x41b   : > { %v2831_v3 = vpop.f32.mrf.mxu2 }
 0x41c   : > { %v3310_v41 = vadd.f32 %v3278_v45, %v3246_v50  ;;  %v3640_v61 = vadd.f32 %v3608_v6, %v3576_v9  ;;  %v2832_v26 = vadd.f32 %v9259_v16, %v2831_v3  ;;  %v3044_v33 = vadd.f32 %v3012_v48, %v11310_v46  ;;  %v11311_v9 = vld [vmem:[#allocation39_spill] sm:$0xff] }
 0x41d   : > { %v3577_v45 = vmul.f32 %v6432_v44, %v11311_v9  ;;  %v11312_v48 = vld [vmem:[#allocation215_spill] sm:$0xff] }
 0x41e   : > { %v2865_v56 = vpack.c.bf16 %v2832_v26, %v2832_v26  ;;  %v3067_v13 = vpack.c.bf16 %v3044_v33, %v3043_v7  ;;  %v9309_v0 = vadd.f32 %v3342_v59, %v3310_v41  ;;  %v9311_v30 = vadd.f32 %v3672_v28, %v3640_v61  ;;  %v11313_v59 = vld [vmem:[#allocation159_spill] sm:$0xff] }
 0x41f   : > { %v1876_v4 = vpop.f32.mrf.mxu0  ;;  %v3279_v50 = vmul.f32 %v6425_v23, %v11312_v48  ;;  %v3673_v28 = vmul.f32 %v6443_v40, %v11313_v59  ;;  %v3578_v48 = vmul.f32 %v6432_v44, %v8566_v11  ;;  %v11314_v59 = vld [vmem:[#allocation5_spill] sm:$0xff] }
 0x420   : > { %5614 = vst.msk [vmem:[%s6885_s13 + $0xfc] sm:$0xf] %vm2535_vm2, %v2865_v56  ;;  %v1877_v58 = vadd.f32 %v8800_v53, %v1876_v4  ;;  %3123 = vmatmul.bf16.gmra.mxu3 %v3067_v13  ;;  %v3343_v4 = vmul.f32 %v6443_v40, %v11311_v9 }
 0x422   : > { %v3247_v6 = vmul.f32 %v6432_v44, %v1877_v58  ;;  %v3609_v56 = vmul.f32 %v6425_v23, %v1877_v58  ;;  %v3013_v46 = vmul.f32 %v6443_v40, %v1877_v58  ;;  %v3344_v58 = vmul.f32 %v6443_v40, %v8566_v11 }
 0x423   : > { %v3084_v13 = vpop.f32.mrf.mxu3 }
 0x424   : > { %v3311_v3 = vadd.f32 %v3279_v50, %v3247_v6  ;;  %v3641_v31 = vadd.f32 %v3609_v56, %v3577_v45  ;;  %v3085_v7 = vadd.f32 %v9259_v16, %v3084_v13  ;;  %v3280_v45 = vmul.f32 %v6425_v23, %v11314_v59 }
 0x426   : > { %v3164_v41 = vpack.c.bf16 %v3085_v7, %v3085_v7  ;;  %v9331_v61 = vadd.f32 %v3343_v4, %v3311_v3  ;;  %v9333_v26 = vadd.f32 %v3673_v28, %v3641_v31  ;;  %v3674_v4 = vmul.f32 %v6443_v40, %v8570_v37  ;;  %v11315_v28 = vld [vmem:[#allocation86_spill] sm:$0xff] }
 0x427   : > { %v1878_v33 = vpop.f32.mrf.mxu0  ;;  %v3045_v3 = vadd.f32 %v3013_v46, %v11315_v28 }
 0x428   : > { %5615 = vst.msk [vmem:[%s6885_s13 + $0x100] sm:$0xf] %vm2535_vm2, %v3164_v41  ;;  %v1879_v9 = vadd.f32 %v8800_v53, %v1878_v33  ;;  %v11316_v33 = vld [vmem:[#allocation89_spill] sm:$0xff] }
 0x42a   : > { %v3014_v50 = vmul.f32 %v6443_v40, %v1879_v9  ;;  %v3248_v6 = vmul.f32 %v6432_v44, %v1879_v9  ;;  %v3610_v56 = vmul.f32 %v6425_v23, %v1879_v9 }
 0x42b   : > { %v3086_v13 = vpop.f32.mrf.mxu3 }
 0x42c   : > { %v3312_v31 = vadd.f32 %v3280_v45, %v3248_v6  ;;  %v3642_v7 = vadd.f32 %v3610_v56, %v3578_v48  ;;  %v3087_v41 = vadd.f32 %v9259_v16, %v3086_v13  ;;  %v3046_v59 = vadd.f32 %v3014_v50, %v11316_v33  ;;  %v11317_v48 = vld [vmem:[#allocation36_spill] sm:$0xff]  ;;  %v11318_v50 = vld [vmem:[#allocation103_spill] sm:$0xff] }
 0x42d   : > { %v3579_v45 = vmul.f32 %v6432_v44, %v11317_v48  ;;  %v3281_v6 = vmul.f32 %v6425_v23, %v11318_v50  ;;  %v3580_v50 = vmul.f32 %v6432_v44, %v8643_v54 }
 0x42e   : > { %v3165_v34 = vpack.c.bf16 %v3087_v41, %v3087_v41  ;;  %v3068_v14 = vpack.c.bf16 %v3046_v59, %v3045_v3  ;;  %v9353_v18 = vadd.f32 %v3344_v58, %v3312_v31  ;;  %v9355_v9 = vadd.f32 %v3674_v4, %v3642_v7  ;;  %v11319_v58 = vld [vmem:[#allocation168_spill] sm:$0xff] }
 0x42f   : > { %v1881_v20 = vpop.f32.mrf.mxu0  ;;  %v3675_v4 = vmul.f32 %v6443_v40, %v11319_v58  ;;  %v11320_v58 = vld [vmem:[#allocation7_spill] sm:$0xff] }
 0x430   : > { %5616 = vst.msk [vmem:[%s6885_s13 + $0x104] sm:$0xf] %vm2535_vm2, %v3165_v34  ;;  %v1882_v11 = vadd.f32 %v8800_v53, %v1881_v20  ;;  %3128 = vmatmul.bf16.gmra.mxu3 %v3068_v14  ;;  %v3345_v20 = vmul.f32 %v6443_v40, %v11317_v48 }
 0x432   : > { %v3249_v56 = vmul.f32 %v6432_v44, %v1882_v11  ;;  %v3611_v34 = vmul.f32 %v6425_v23, %v1882_v11  ;;  %v3015_v33 = vmul.f32 %v6443_v40, %v1882_v11  ;;  %v3346_v11 = vmul.f32 %v6443_v40, %v8643_v54 }
 0x433   : > { %v3089_v14 = vpop.f32.mrf.mxu3 }
 0x434   : > { %v3313_v13 = vadd.f32 %v3281_v6, %v3249_v56  ;;  %v3643_v28 = vadd.f32 %v3611_v34, %v3579_v45  ;;  %v3090_v3 = vadd.f32 %v9259_v16, %v3089_v14  ;;  %v3282_v45 = vmul.f32 %v6425_v23, %v11320_v58 }
 0x436   : > { %v3166_v31 = vpack.c.bf16 %v3090_v3, %v3090_v3  ;;  %v9375_v7 = vadd.f32 %v3345_v20, %v3313_v13  ;;  %v9377_v41 = vadd.f32 %v3675_v4, %v3643_v28  ;;  %v3676_v20 = vmul.f32 %v6443_v40, %v8647_v15  ;;  %v11321_v4 = vld [vmem:[#allocation96_spill] sm:$0xff] }
 0x437   : > { %v1883_v59 = vpop.f32.mrf.mxu0  ;;  %v3047_v13 = vadd.f32 %v3015_v33, %v11321_v4 }
 0x438   : > { %5617 = vst.msk [vmem:[%s6885_s13 + $0x108] sm:$0xf] %vm2535_vm2, %v3166_v31  ;;  %v1884_v48 = vadd.f32 %v8800_v53, %v1883_v59  ;;  %v11322_v59 = vld [vmem:[#allocation125_spill] sm:$0xff] }
 0x43a   : > { %v3016_v6 = vmul.f32 %v6443_v40, %v1884_v48  ;;  %v3250_v56 = vmul.f32 %v6432_v44, %v1884_v48  ;;  %v3612_v34 = vmul.f32 %v6425_v23, %v1884_v48 }
 0x43b   : > { %v3091_v14 = vpop.f32.mrf.mxu3 }
 0x43c   : > { %v3314_v28 = vadd.f32 %v3282_v45, %v3250_v56  ;;  %v3644_v3 = vadd.f32 %v3612_v34, %v3580_v50  ;;  %v3092_v31 = vadd.f32 %v9259_v16, %v3091_v14  ;;  %v3048_v58 = vadd.f32 %v3016_v6, %v11322_v59  ;;  %v11323_v50 = vld [vmem:[#allocation175_spill] sm:$0xff]  ;;  %v11324_v6 = vld [vmem:[#allocation104_spill] sm:$0xff] }
 0x43d   : > { %v3581_v45 = vmul.f32 %v6432_v44, %v11323_v50  ;;  %v3283_v56 = vmul.f32 %v6425_v23, %v11324_v6  ;;  %v11328_v6 = vld [vmem:[#allocation146_spill] sm:$0xff] }
 0x43e   : > { %v3167_v46 = vpack.c.bf16 %v3092_v31, %v3092_v31  ;;  %v3069_v37 = vpack.c.bf16 %v3048_v58, %v3047_v13  ;;  %v9397_v32 = vadd.f32 %v3346_v11, %v3314_v28  ;;  %v9399_v48 = vadd.f32 %v3676_v20, %v3644_v3  ;;  %v11325_v11 = vld [vmem:[#allocation178_spill] sm:$0xff] }
 0x43f   : > { %v1886_v57 = vpop.f32.mrf.mxu0  ;;  %v3677_v20 = vmul.f32 %v6443_v40, %v11325_v11  ;;  %v3582_v33 = vmul.f32 %v6432_v44, %v11328_v6  ;;  %v11329_v11 = vld [vmem:[#allocation105_spill] sm:$0xff] }
 0x440   : > { %5618 = vst.msk [vmem:[%s6885_s13 + $0x10c] sm:$0xf] %vm2535_vm2, %v3167_v46  ;;  %v1887_v54 = vadd.f32 %v8800_v53, %v1886_v57  ;;  %3133 = vmatmul.bf16.gmra.mxu3 %v3069_v37  ;;  %v3347_v57 = vmul.f32 %v6443_v40, %v11323_v50 }
 0x442   : > { %v3251_v34 = vmul.f32 %v6432_v44, %v1887_v54  ;;  %v3613_v46 = vmul.f32 %v6425_v23, %v1887_v54  ;;  %v3017_v59 = vmul.f32 %v6443_v40, %v1887_v54  ;;  %v3348_v54 = vmul.f32 %v6443_v40, %v11328_v6  ;;  %v11333_v6 = vld [vmem:[#allocation45_spill] sm:$0xff] }
 0x443   : > { %v3094_v37 = vpop.f32.mrf.mxu3 }
 0x444   : > { %v3315_v14 = vadd.f32 %v3283_v56, %v3251_v34  ;;  %v3645_v4 = vadd.f32 %v3613_v46, %v3581_v45  ;;  %v3095_v13 = vadd.f32 %v9259_v16, %v3094_v37  ;;  %v3284_v45 = vmul.f32 %v6425_v23, %v11329_v11 }
 0x446   : > { %v3168_v28 = vpack.c.bf16 %v3095_v13, %v3095_v13  ;;  %v9419_v3 = vadd.f32 %v3347_v57, %v3315_v14  ;;  %v9421_v31 = vadd.f32 %v3677_v20, %v3645_v4  ;;  %v3678_v57 = vmul.f32 %v6443_v40, %v8736_v60  ;;  %v11330_v20 = vld [vmem:[#allocation98_spill] sm:$0xff] }
 0x447   : > { %v1888_v58 = vpop.f32.mrf.mxu0  ;;  %v3049_v14 = vadd.f32 %v3017_v59, %v11330_v20 }
 0x448   : > { %11326 = vst [vmem:[#allocation183_spill] sm:$0xff] %v9419_v3  ;;  %v1889_v50 = vadd.f32 %v8800_v53, %v1888_v58  ;;  %v11331_v58 = vld [vmem:[#allocation116_spill] sm:$0xff] }
 0x449   : > { %11327 = vst [vmem:[#allocation108_spill] sm:$0xff] %v9421_v31 }
 0x44a   : > { %5619 = vst.msk [vmem:[%s6885_s13 + $0x110] sm:$0xf] %vm2535_vm2, %v3168_v28  ;;  %v3018_v56 = vmul.f32 %v6443_v40, %v1889_v50  ;;  %v3252_v34 = vmul.f32 %v6432_v44, %v1889_v50  ;;  %v3614_v46 = vmul.f32 %v6425_v23, %v1889_v50 }
 0x44b   : > { %v3096_v37 = vpop.f32.mrf.mxu3 }
 0x44c   : > { %v3316_v4 = vadd.f32 %v3284_v45, %v3252_v34  ;;  %v3646_v13 = vadd.f32 %v3614_v46, %v3582_v33  ;;  %v3097_v28 = vadd.f32 %v9259_v16, %v3096_v37  ;;  %v3050_v11 = vadd.f32 %v3018_v56, %v11331_v58  ;;  %v11334_v56 = vld [vmem:[#allocation17_spill] sm:$0xff] }
 0x44d   : > { %v3583_v45 = vmul.f32 %v6432_v44, %v11333_v6  ;;  %v3285_v34 = vmul.f32 %v6425_v23, %v11334_v56 }
 0x44e   : > { %v3169_v15 = vpack.c.bf16 %v3097_v28, %v3097_v28  ;;  %v3070_v17 = vpack.c.bf16 %v3050_v11, %v3049_v14  ;;  %v9441_v1 = vadd.f32 %v3348_v54, %v3316_v4  ;;  %v9443_v50 = vadd.f32 %v3678_v57, %v3646_v13  ;;  %v9473_v11 = vld [vmem:[%s10444_s2] ss:$0 sm:$0xff] }
 0x44f   : > { %v1891_v5 = vpop.f32.mrf.mxu0 }
 0x450   : > { %11332 = vst [vmem:[#allocation174_spill] sm:$0xff] %v9443_v50  ;;  %v1892_v60 = vadd.f32 %v8800_v53, %v1891_v5  ;;  %3138 = vmatmul.bf16.gmra.mxu3 %v3070_v17  ;;  %v3349_v53 = vmul.f32 %v6443_v40, %v11333_v6  ;;  %v11335_v17 = vld [vmem:[#allocation188_spill] sm:$0xff] }
 0x451   : > { %5620 = vst.msk [vmem:[%s6885_s13 + $0x114] sm:$0xf] %vm2535_vm2, %v3169_v15  ;;  %v3679_v54 = vmul.f32 %v6443_v40, %v11335_v17  ;;  %v3680_v17 = vmul.f32 %v6443_v40, %v8837_v51 }
 0x452   : > { %v3253_v46 = vmul.f32 %v6432_v44, %v1892_v60  ;;  %v3615_v15 = vmul.f32 %v6425_v23, %v1892_v60  ;;  %v3019_v28 = vmul.f32 %v6443_v40, %v1892_v60 }
 0x453   : > { %v3099_v5 = vpop.f32.mrf.mxu3 }
 0x454   : > { %v3317_v57 = vadd.f32 %v3285_v34, %v3253_v46  ;;  %v3647_v37 = vadd.f32 %v3615_v15, %v3583_v45  ;;  %v3100_v20 = vadd.f32 %v9259_v16, %v3099_v5  ;;  %v11337_v45 = vld [vmem:[#allocation87_spill] sm:$0xff] }
 0x455   : > { %v3584_v56 = vmul.f32 %v6432_v44, %v11337_v45  ;;  %v11338_v34 = vld [vmem:[#allocation111_spill] sm:$0xff]  ;;  %v3350_v5 = vmul.f32 %v6443_v40, %v11337_v45 }
 0x456   : > { %v3170_v14 = vpack.c.bf16 %v3100_v20, %v3100_v20  ;;  %v9463_v4 = vadd.f32 %v3349_v53, %v3317_v57  ;;  %v9465_v13 = vadd.f32 %v3679_v54, %v3647_v37  ;;  %v3286_v46 = vmul.f32 %v6425_v23, %v11338_v34  ;;  %v11339_v57 = vld [vmem:[#allocation14_spill] sm:$0xff] }
 0x457   : > { %v1893_v58 = vpop.f32.mrf.mxu0  ;;  %v3051_v37 = vadd.f32 %v3019_v28, %v11339_v57  ;;  %v11340_v34 = vld [vmem:[#allocation110_spill] sm:$0xff] }
 0x458   : > { %11336 = vst [vmem:[#allocation51_spill] sm:$0xff] %v9465_v13  ;;  %v1894_v6 = vadd.f32 %v9473_v11, %v1893_v58 }
 0x459   : > { %5621 = vst.msk [vmem:[%s6885_s13 + $0x118] sm:$0xf] %vm2535_vm2, %v3170_v14 }
 0x45a   : > { %v3020_v15 = vmul.f32 %v6443_v40, %v1894_v6  ;;  %v3254_v60 = vmul.f32 %v6432_v44, %v1894_v6  ;;  %v3616_v53 = vmul.f32 %v6425_v23, %v1894_v6 }
 0x45b   : > { %v3101_v54 = vpop.f32.mrf.mxu3 }
 0x45c   : > { %v3318_v20 = vadd.f32 %v3286_v46, %v3254_v60  ;;  %v3648_v14 = vadd.f32 %v3616_v53, %v3584_v56  ;;  %v3102_v58 = vadd.f32 %v9259_v16, %v3101_v54  ;;  %v3052_v33 = vadd.f32 %v3020_v15, %v11340_v34  ;;  %v11342_v56 = vld [vmem:[#allocation48_spill] sm:$0xff]  ;;  %v11343_v46 = vld [vmem:[#allocation13_spill] sm:$0xff] }
 0x45d   : > { %v3287_v15 = vmul.f32 %v6425_v23, %v11343_v46  ;;  %v11344_v53 = vld [vmem:[#allocation197_spill] sm:$0xff]  ;;  %v3586_v46 = vmul.f32 %v6432_v44, %v8920_v10 }
 0x45e   : > { %v3171_v59 = vpack.c.bf16 %v3102_v58, %v3102_v58  ;;  %v3071_v31 = vpack.c.bf16 %v3052_v33, %v3051_v37  ;;  %v9490_v50 = vadd.f32 %v3350_v5, %v3318_v20  ;;  %v9492_v6 = vadd.f32 %v3680_v17, %v3648_v14 }
 0x45f   : > { %v1896_v3 = vpop.f32.mrf.mxu0  ;;  %v3585_v33 = vmul.f32 %v6432_v44, %v11342_v56  ;;  %v3681_v5 = vmul.f32 %v6443_v40, %v11344_v53  ;;  %v11346_v53 = vld [vmem:[#allocation23_spill] sm:$0xff] }
 0x460   : > { %11341 = vst [vmem:[#allocation112_spill] sm:$0xff] %v9492_v6  ;;  %v1897_v51 = vadd.f32 %v9473_v11, %v1896_v3  ;;  %3143 = vmatmul.bf16.gmra.mxu3 %v3071_v31  ;;  %v3351_v3 = vmul.f32 %v6443_v40, %v11342_v56 }
 0x461   : > { %5622 = vst.msk [vmem:[%s6885_s13 + $0x11c] sm:$0xf] %vm2535_vm2, %v3171_v59 }
 0x462   : > { %v3255_v60 = vmul.f32 %v6432_v44, %v1897_v51  ;;  %v3617_v59 = vmul.f32 %v6425_v23, %v1897_v51  ;;  %v3021_v58 = vmul.f32 %v6443_v40, %v1897_v51  ;;  %v3352_v51 = vmul.f32 %v6443_v40, %v8920_v10 }
 0x463   : > { %v3104_v31 = vpop.f32.mrf.mxu3 }
 0x464   : > { %v3319_v17 = vadd.f32 %v3287_v15, %v3255_v60  ;;  %v3649_v54 = vadd.f32 %v3617_v59, %v3585_v33  ;;  %v3105_v57 = vadd.f32 %v9259_v16, %v3104_v31  ;;  %v3288_v33 = vmul.f32 %v6425_v23, %v11346_v53 }
 0x466   : > { %v3172_v37 = vpack.c.bf16 %v3105_v57, %v3105_v57  ;;  %v9512_v20 = vadd.f32 %v3351_v3, %v3319_v17  ;;  %v9514_v14 = vadd.f32 %v3681_v5, %v3649_v54  ;;  %v3682_v3 = vmul.f32 %v6443_v40, %v8933_v62  ;;  %v11347_v5 = vld [vmem:[#allocation143_spill] sm:$0xff] }
 0x467   : > { %v1898_v34 = vpop.f32.mrf.mxu0  ;;  %v3053_v17 = vadd.f32 %v3021_v58, %v11347_v5 }
 0x468   : > { %11345 = vst [vmem:[#allocation57_spill] sm:$0xff] %v9514_v14  ;;  %v1899_v56 = vadd.f32 %v9473_v11, %v1898_v34  ;;  %v11348_v34 = vld [vmem:[#allocation119_spill] sm:$0xff] }
 0x469   : > { %5623 = vst.msk [vmem:[%s6885_s13 + $0x120] sm:$0xf] %vm2535_vm2, %v3172_v37 }
 0x46a   : > { %v3022_v15 = vmul.f32 %v6443_v40, %v1899_v56  ;;  %v3256_v60 = vmul.f32 %v6432_v44, %v1899_v56  ;;  %v3618_v59 = vmul.f32 %v6425_v23, %v1899_v56 }
 0x46b   : > { %v3106_v31 = vpop.f32.mrf.mxu3 }
 0x46c   : > { %v3320_v54 = vadd.f32 %v3288_v33, %v3256_v60  ;;  %v3650_v57 = vadd.f32 %v3618_v59, %v3586_v46  ;;  %v3107_v37 = vadd.f32 %v9259_v16, %v3106_v31  ;;  %v3054_v53 = vadd.f32 %v3022_v15, %v11348_v34  ;;  %v11350_v46 = vld [vmem:[#allocation54_spill] sm:$0xff]  ;;  %v11351_v15 = vld [vmem:[#allocation133_spill] sm:$0xff] }
 0x46d   : > { %v3587_v33 = vmul.f32 %v6432_v44, %v11350_v46  ;;  %v3289_v60 = vmul.f32 %v6425_v23, %v11351_v15  ;;  %v3588_v15 = vmul.f32 %v6432_v44, %v9016_v29 }
 0x46e   : > { %v3173_v45 = vpack.c.bf16 %v3107_v37, %v3107_v37  ;;  %v3072_v28 = vpack.c.bf16 %v3054_v53, %v3053_v17  ;;  %v9534_v13 = vadd.f32 %v3352_v51, %v3320_v54  ;;  %v9536_v56 = vadd.f32 %v3682_v3, %v3650_v57  ;;  %v11352_v51 = vld [vmem:[#allocation70_spill] sm:$0xff] }
 0x46f   : > { %v1901_v6 = vpop.f32.mrf.mxu0  ;;  %v3683_v3 = vmul.f32 %v6443_v40, %v11352_v51  ;;  %v11355_v51 = vld [vmem:[#allocation19_spill] sm:$0xff] }
 0x470   : > { %11349 = vst [vmem:[#allocation181_spill] sm:$0xff] %v9536_v56  ;;  %v1902_v10 = vadd.f32 %v9473_v11, %v1901_v6  ;;  %3148 = vmatmul.bf16.gmra.mxu3 %v3072_v28  ;;  %v3353_v6 = vmul.f32 %v6443_v40, %v11350_v46 }
 0x471   : > { %5624 = vst.msk [vmem:[%s6885_s13 + $0x124] sm:$0xf] %vm2535_vm2, %v3173_v45 }
 0x472   : > { %v3257_v59 = vmul.f32 %v6432_v44, %v1902_v10  ;;  %v3619_v45 = vmul.f32 %v6425_v23, %v1902_v10  ;;  %v3023_v34 = vmul.f32 %v6443_v40, %v1902_v10  ;;  %v3354_v10 = vmul.f32 %v6443_v40, %v9016_v29 }
 0x473   : > { %v3109_v28 = vpop.f32.mrf.mxu3 }
 0x474   : > { %v3321_v31 = vadd.f32 %v3289_v60, %v3257_v59  ;;  %v3651_v5 = vadd.f32 %v3619_v45, %v3587_v33  ;;  %v3110_v17 = vadd.f32 %v9259_v16, %v3109_v28  ;;  %v3290_v33 = vmul.f32 %v6425_v23, %v11355_v51 }
 0x476   : > { %v3174_v54 = vpack.c.bf16 %v3110_v17, %v3110_v17  ;;  %v9556_v57 = vadd.f32 %v3353_v6, %v3321_v31  ;;  %v9558_v37 = vadd.f32 %v3683_v3, %v3651_v5  ;;  %v3684_v6 = vmul.f32 %v6443_v40, %v9029_v22  ;;  %v11356_v3 = vld [vmem:[#allocation21_spill] sm:$0xff] }
 0x477   : > { %v1903_v53 = vpop.f32.mrf.mxu0  ;;  %v3055_v31 = vadd.f32 %v3023_v34, %v11356_v3 }
 0x478   : > { %11353 = vst [vmem:[#allocation65_spill] sm:$0xff] %v9556_v57  ;;  %v1904_v46 = vadd.f32 %v9473_v11, %v1903_v53  ;;  %v11357_v53 = vld [vmem:[#allocation29_spill] sm:$0xff] }
 0x479   : > { %11354 = vst [vmem:[#allocation185_spill] sm:$0xff] %v9558_v37 }
 0x47a   : > { %5625 = vst.msk [vmem:[%s6885_s13 + $0x128] sm:$0xf] %vm2535_vm2, %v3174_v54  ;;  %v3024_v60 = vmul.f32 %v6443_v40, %v1904_v46  ;;  %v3258_v59 = vmul.f32 %v6432_v44, %v1904_v46  ;;  %v3620_v45 = vmul.f32 %v6425_v23, %v1904_v46 }
 0x47b   : > { %v3111_v28 = vpop.f32.mrf.mxu3 }
 0x47c   : > { %v3322_v5 = vadd.f32 %v3290_v33, %v3258_v59  ;;  %v3652_v17 = vadd.f32 %v3620_v45, %v3588_v15  ;;  %v3112_v54 = vadd.f32 %v9259_v16, %v3111_v28  ;;  %v3056_v51 = vadd.f32 %v3024_v60, %v11357_v53  ;;  %v11360_v15 = vld [vmem:[#allocation60_spill] sm:$0xff]  ;;  %v11361_v60 = vld [vmem:[#allocation135_spill] sm:$0xff] }
 0x47d   : > { %v3589_v33 = vmul.f32 %v6432_v44, %v11360_v15  ;;  %v3291_v59 = vmul.f32 %v6425_v23, %v11361_v60 }
 0x47e   : > { %v3175_v58 = vpack.c.bf16 %v3112_v54, %v3112_v54  ;;  %v3073_v62 = vpack.c.bf16 %v3056_v51, %v3055_v31  ;;  %v9578_v14 = vadd.f32 %v3354_v10, %v3322_v5  ;;  %v9580_v46 = vadd.f32 %v3684_v6, %v3652_v17  ;;  %v11362_v10 = vld [vmem:[#allocation59_spill] sm:$0xff] }
 0x47f   : > { %v1906_v56 = vpop.f32.mrf.mxu0  ;;  %v3355_v6 = vmul.f32 %v6443_v40, %v11360_v15  ;;  %v11365_v15 = vld [vmem:[#allocation142_spill] sm:$0xff] }
 0x480   : > { %11358 = vst [vmem:[#allocation179_spill] sm:$0xff] %v9578_v14  ;;  %v1907_v29 = vadd.f32 %v9473_v11, %v1906_v56  ;;  %3153 = vmatmul.bf16.gmra.mxu3 %v3073_v62  ;;  %v3685_v56 = vmul.f32 %v6443_v40, %v11362_v10  ;;  %v11364_v10 = vld [vmem:[#allocation67_spill] sm:$0xff] }
 0x481   : > { %11359 = vst [vmem:[#allocation177_spill] sm:$0xff] %v9580_v46  ;;  %v3590_v34 = vmul.f32 %v6432_v44, %v11364_v10 }
 0x482   : > { %5626 = vst.msk [vmem:[%s6885_s13 + $0x12c] sm:$0xf] %vm2535_vm2, %v3175_v58  ;;  %v3259_v45 = vmul.f32 %v6432_v44, %v1907_v29  ;;  %v3621_v58 = vmul.f32 %v6425_v23, %v1907_v29  ;;  %v3025_v53 = vmul.f32 %v6443_v40, %v1907_v29 }
 0x483   : > { %v3114_v62 = vpop.f32.mrf.mxu3 }
 0x484   : > { %v3323_v28 = vadd.f32 %v3291_v59, %v3259_v45  ;;  %v3653_v3 = vadd.f32 %v3621_v58, %v3589_v33  ;;  %v3115_v31 = vadd.f32 %v9259_v16, %v3114_v62  ;;  %v3292_v33 = vmul.f32 %v6425_v23, %v11365_v15  ;;  %v11368_v15 = vld [vmem:[#allocation25_spill] sm:$0xff] }
 0x485   : > { %v3356_v62 = vmul.f32 %v6443_v40, %v11364_v10 }
 0x486   : > { %v3176_v5 = vpack.c.bf16 %v3115_v31, %v3115_v31  ;;  %v9600_v17 = vadd.f32 %v3355_v6, %v3323_v28  ;;  %v9602_v54 = vadd.f32 %v3685_v56, %v3653_v3  ;;  %v11366_v56 = vld [vmem:[#allocation66_spill] sm:$0xff] }
 0x487   : > { %v1908_v51 = vpop.f32.mrf.mxu0  ;;  %v3686_v29 = vmul.f32 %v6443_v40, %v11366_v56  ;;  %v11367_v28 = vld [vmem:[#allocation150_spill] sm:$0xff]  ;;  %v11371_v56 = vld [vmem:[#allocation72_spill] sm:$0xff] }
 0x488   : > { %11363 = vst [vmem:[#allocation176_spill] sm:$0xff] %v9602_v54  ;;  %v1909_v60 = vadd.f32 %v9473_v11, %v1908_v51  ;;  %v3057_v3 = vadd.f32 %v3025_v53, %v11367_v28  ;;  %v11373_v53 = vld [vmem:[#allocation144_spill] sm:$0xff] }
 0x489   : > { %5627 = vst.msk [vmem:[%s6885_s13 + $0x130] sm:$0xf] %vm2535_vm2, %v3176_v5 }
 0x48a   : > { %v3026_v59 = vmul.f32 %v6443_v40, %v1909_v60  ;;  %v3260_v45 = vmul.f32 %v6432_v44, %v1909_v60  ;;  %v3622_v58 = vmul.f32 %v6425_v23, %v1909_v60 }
 0x48b   : > { %v3116_v6 = vpop.f32.mrf.mxu3 }
 0x48c   : > { %v3324_v31 = vadd.f32 %v3292_v33, %v3260_v45  ;;  %v3654_v5 = vadd.f32 %v3622_v58, %v3590_v34  ;;  %v3117_v51 = vadd.f32 %v9259_v16, %v3116_v6  ;;  %v3058_v22 = vadd.f32 %v3026_v59, %v11368_v15  ;;  %v11369_v33 = vld [vmem:[#allocation73_spill] sm:$0xff]  ;;  %v11370_v59 = vld [vmem:[#allocation139_spill] sm:$0xff] }
 0x48d   : > { %v3591_v45 = vmul.f32 %v6425_v23, %v11370_v59  ;;  %v11372_v34 = vld [vmem:[#allocation77_spill] sm:$0xff] }
 0x48e   : > { %v3177_v37 = vpack.c.bf16 %v3117_v51, %v3117_v51  ;;  %v3074_v46 = vpack.c.bf16 %v3058_v22, %v3057_v3  ;;  %v9622_v57 = vadd.f32 %v3356_v62, %v3324_v31  ;;  %v9624_v60 = vadd.f32 %v3686_v29, %v3654_v5 }
 0x48f   : > { %v1911_v14 = vpop.f32.mrf.mxu0  ;;  %v3889_v22 = vmul.f32 %v6432_v44, %v11369_v33  ;;  %v3655_v29 = vmul.f32 %v6443_v40, %v11369_v33  ;;  %v3592_v33 = vmul.f32 %v6425_v23, %v11373_v53 }
 0x490   : > { %5628 = vst.msk [vmem:[%s6885_s13 + $0x134] sm:$0xf] %vm2535_vm2, %v3177_v37  ;;  %v1912_v10 = vadd.f32 %v9473_v11, %v1911_v14  ;;  %3158 = vmatmul.bf16.gmra.mxu3 %v3074_v46  ;;  %v3985_v14 = vmul.f32 %v6443_v40, %v11371_v56  ;;  %v3890_v56 = vmul.f32 %v6432_v44, %v11372_v34 }
 0x492   : > { %v3559_v58 = vmul.f32 %v6432_v44, %v1912_v10  ;;  %v3921_v37 = vmul.f32 %v6425_v23, %v1912_v10  ;;  %v3325_v51 = vmul.f32 %v6443_v40, %v1912_v10 }
 0x493   : > { %v3119_v46 = vpop.f32.mrf.mxu3 }
 0x494   : > { %v3623_v62 = vadd.f32 %v3591_v45, %v3559_v58  ;;  %v3953_v6 = vadd.f32 %v3921_v37, %v3889_v22  ;;  %v3120_v28 = vadd.f32 %v9259_v16, %v3119_v46  ;;  %v11374_v37 = vld [vmem:[#allocation76_spill] sm:$0xff] }
 0x495   : > { %v3986_v10 = vmul.f32 %v6443_v40, %v11374_v37 }
 0x496   : > { %v3687_v3 = vadd.f32 %v3655_v29, %v3623_v62  ;;  %v4017_v31 = vadd.f32 %v3985_v14, %v3953_v6  ;;  %v3178_v5 = vpack.c.bf16 %v3120_v28, %v3120_v28  ;;  %v3656_v14 = vmul.f32 %v6443_v40, %v11372_v34  ;;  %v11376_v62 = vld [vmem:[#allocation31_spill] sm:$0xff] }
 0x497   : > { %v1913_v15 = vpop.f32.mrf.mxu0 }
 0x498   : > { %5629 = vst.msk [vmem:[%s6885_s13 + $0x138] sm:$0xf] %vm2535_vm2, %v3178_v5  ;;  %v1914_v59 = vadd.f32 %v9473_v11, %v1913_v15  ;;  %v11375_v11 = vld [vmem:[#allocation136_spill] sm:$0xff] }
 0x499   : > { %v3357_v46 = vadd.f32 %v3325_v51, %v11375_v11  ;;  %v11384_v11 = vld [vmem:[#allocation78_spill] sm:$0xff] }
 0x49a   : > { %v3326_v22 = vmul.f32 %v6443_v40, %v1914_v59  ;;  %v3560_v45 = vmul.f32 %v6432_v44, %v1914_v59  ;;  %v3922_v58 = vmul.f32 %v6425_v23, %v1914_v59 }
 0x49b   : > { %v3121_v29 = vpop.f32.mrf.mxu3 }
 0x49c   : > { %v3358_v6 = vadd.f32 %v3326_v22, %v11376_v62  ;;  %v3624_v28 = vadd.f32 %v3592_v33, %v3560_v45  ;;  %v3954_v53 = vadd.f32 %v3922_v58, %v3890_v56  ;;  %v3122_v5 = vadd.f32 %v9259_v16, %v3121_v29  ;;  %v11381_v58 = vld [vmem:[#allocation152_spill] sm:$0xff] }
 0x49e   : > { %v3389_v44 = vpack.c.bf16 %v3358_v6, %v3357_v46  ;;  %v3688_v15 = vadd.f32 %v3656_v14, %v3624_v28  ;;  %v4018_v23 = vadd.f32 %v3986_v10, %v3954_v53  ;;  %v3179_v59 = vpack.c.bf16 %v3122_v5, %v3122_v5  ;;  %v11383_v14 = vld [vmem:[#allocation208_spill] sm:$0xff] }
 0x49f   : > { %v11385_v46 = vpack.c.bf16 %v11383_v14, %v11384_v11  ;;  %v11397_v14 = vld [vmem:[#allocation172_spill] sm:$0xff]  ;;  %v11398_v11 = vld [vmem:[#allocation163_spill] sm:$0xff] }
 0x4a0   : > { %v3719_v54 = vpack.c.bf16 %v3688_v15, %v3687_v3  ;;  %v4049_v37 = vpack.c.bf16 %v4018_v23, %v4017_v31  ;;  %5630 = vst.msk [vmem:[%s6885_s13 + $0x13c] sm:$0xf] %vm2535_vm2, %v3179_v59  ;;  %3413 = vmatmul.bf16.vlgmr.msra.gmra.mxu1 %v3389_v44  ;;  %v11377_v3 = vld [vmem:[#allocation157_spill] sm:$0xff]  ;;  %v11386_v44 = vld [vmem:[#allocation47_spill] sm:$0xff]  ;;  %v11387_v15 = vld [vmem:[#allocation42_spill] sm:$0xff] }
 0x4a1   : > { %v11378_v31 = vld [vmem:[#allocation145_spill] sm:$0xff]  ;;  %v11388_v23 = vpack.c.bf16 %v11386_v44, %v11387_v15  ;;  %v11389_v59 = vld [vmem:[#allocation162_spill] sm:$0xff] }
 0x4a2   : > { %3743 = vmatmul.bf16.vlgmr.msra.gmra.mxu2 %v3719_v54  ;;  %4073 = vmatmul.bf16.vlgmr.msra.gmra.mxu3 %v4049_v37  ;;  %v11379_v45 = vpack.c.bf16 %v11377_v3, %v11378_v31  ;;  %v11380_v54 = vld [vmem:[#allocation40_spill] sm:$0xff]  ;;  %v11390_v37 = vld [vmem:[#allocation43_spill] sm:$0xff] }
 0x4a3   : > { %v3124_v40 = vpop.f32.mrf.mxu3  ;;  %v11382_v10 = vpack.c.bf16 %v11380_v54, %v11381_v58  ;;  %v11395_v58 = vld [vmem:[#allocation30_spill] sm:$0xff] }
 0x4a4   : > { %v3125_v34 = vadd.f32 %v9259_v16, %v3124_v40  ;;  %v11391_v40 = vpack.c.bf16 %v11389_v59, %v11390_v37  ;;  %v11404_v59 = vpack.c.bf16 %v9076_v49, %v9033_v8  ;;  %v11405_v37 = vld [vmem:[#allocation109_spill] sm:$0xff]  ;;  %v11408_v8 = vpack.c.bf16 %v9150_v24, %v9115_v36 }
 0x4a5   : > { %v11409_v49 = vpack.c.bf16 %v9152_v52, %v9117_v25  ;;  %v11413_v25 = vpack.c.bf16 %v9211_v43, %v9182_v35  ;;  %v11414_v52 = vpack.c.bf16 %v9213_v27, %v9184_v47  ;;  %v11418_v47 = vpack.c.bf16 %v9264_v38, %v9236_v19 }
 0x4a6   : > { %v3180_v51 = vpack.c.bf16 %v3125_v34, %v3125_v34  ;;  %v11392_v34 = vld [vmem:[#allocation213_spill] sm:$0xff]  ;;  %v11419_v27 = vpack.c.bf16 %v9266_v39, %v9238_v2  ;;  %v11423_v39 = vpack.c.bf16 %v9309_v0, %v9287_v42 }
 0x4a8   : > { %5631 = vst.msk [vmem:[%s6885_s13 + $0x140] sm:$0xf] %vm2535_vm2, %v3180_v51  ;;  %v11393_v51 = vld [vmem:[#allocation212_spill] sm:$0xff] }
 0x4ab   : > { %v3126_v56 = vpop.f32.mrf.mxu3 }
 0x4ac   : > { %v3127_v33 = vadd.f32 %v9259_v16, %v3126_v56  ;;  %v11394_v56 = vpack.c.bf16 %v11392_v34, %v11393_v51 }
 0x4ae   : > { %v3181_v22 = vpack.c.bf16 %v3127_v33, %v3127_v33 }
 0x4b0   : > { %5632 = vst.msk [vmem:[%s6885_s13 + $0x144] sm:$0xf] %vm2535_vm2, %v3181_v22  ;;  %3418 = vmatmul.bf16.gmra.mxu1 %v11379_v45 }
 0x4b2   : > { %3748 = vmatmul.bf16.gmra.mxu2 %v11382_v10  ;;  %4078 = vmatmul.bf16.gmra.mxu3 %v11385_v46  ;;  %v11396_v10 = vpack.c.bf16 %v8978_v63, %v11395_v58  ;;  %v11399_v46 = vpack.c.bf16 %v11397_v14, %v11398_v11  ;;  %v11415_v11 = vld [vmem:[#allocation132_spill] sm:$0xff] }
 0x4b3   : > { %v3129_v29 = vpop.f32.mrf.mxu3 }
 0x4b4   : > { %v3130_v62 = vadd.f32 %v9259_v16, %v3129_v29  ;;  %v11400_v29 = vld [vmem:[#allocation94_spill] sm:$0xff] }
 0x4b6   : > { %v3182_v6 = vpack.c.bf16 %v3130_v62, %v3130_v62  ;;  %v11401_v62 = vld [vmem:[#allocation91_spill] sm:$0xff] }
 0x4b8   : > { %5633 = vst.msk [vmem:[%s6885_s13 + $0x148] sm:$0xf] %vm2535_vm2, %v3182_v6  ;;  %v11402_v6 = vpack.c.bf16 %v11400_v29, %v11401_v62 }
 0x4bb   : > { %v3131_v28 = vpop.f32.mrf.mxu3 }
 0x4bc   : > { %v3132_v53 = vadd.f32 %v9259_v16, %v3131_v28 }
 0x4be   : > { %v3183_v5 = vpack.c.bf16 %v3132_v53, %v3132_v53 }
 0x4c0   : > { %5634 = vst.msk [vmem:[%s6885_s13 + $0x14c] sm:$0xf] %vm2535_vm2, %v3183_v5  ;;  %3423 = vmatmul.bf16.gmra.mxu1 %v11388_v23  ;;  %v11403_v23 = vpack.c.bf16 %v9074_v21, %v9031_v12 }
 0x4c2   : > { %3753 = vmatmul.bf16.gmra.mxu2 %v11391_v40  ;;  %4083 = vmatmul.bf16.gmra.mxu3 %v11394_v56  ;;  %v11406_v40 = vld [vmem:[#allocation11_spill] sm:$0xff] }
 0x4c3   : > { %v3134_v33 = vpop.f32.mrf.mxu3  ;;  %v11407_v34 = vpack.c.bf16 %v11405_v37, %v11406_v40 }
 0x4c4   : > { %v3135_v22 = vadd.f32 %v9259_v16, %v3134_v33 }
 0x4c6   : > { %v3184_v3 = vpack.c.bf16 %v3135_v22, %v3135_v22 }
 0x4c8   : > { %5635 = vst.msk [vmem:[%s6885_s13 + $0x150] sm:$0xf] %vm2535_vm2, %v3184_v3  ;;  %v11410_v3 = vld [vmem:[#allocation107_spill] sm:$0xff] }
 0x4cb   : > { %v3136_v31 = vpop.f32.mrf.mxu3 }
 0x4cc   : > { %v3137_v45 = vadd.f32 %v9259_v16, %v3136_v31  ;;  %v11411_v31 = vld [vmem:[#allocation9_spill] sm:$0xff] }
 0x4ce   : > { %v3185_v54 = vpack.c.bf16 %v3137_v45, %v3137_v45  ;;  %v11412_v45 = vpack.c.bf16 %v11410_v3, %v11411_v31 }
 0x4d0   : > { %5636 = vst.msk [vmem:[%s6885_s13 + $0x154] sm:$0xf] %vm2535_vm2, %v3185_v54  ;;  %3428 = vmatmul.bf16.gmra.mxu1 %v11396_v10 }
 0x4d2   : > { %3758 = vmatmul.bf16.gmra.mxu2 %v11399_v46  ;;  %4088 = vmatmul.bf16.gmra.mxu3 %v11402_v6  ;;  %v11416_v46 = vld [vmem:[#allocation117_spill] sm:$0xff] }
 0x4d3   : > { %v3139_v28 = vpop.f32.mrf.mxu3  ;;  %v11417_v29 = vpack.c.bf16 %v11415_v11, %v11416_v46  ;;  %v11429_v11 = vpack.c.bf16 %v9355_v9, %v9333_v26  ;;  %v11430_v46 = vld [vmem:[#allocation35_spill] sm:$0xff] }
 0x4d4   : > { %v3140_v53 = vadd.f32 %v9259_v16, %v3139_v28 }
 0x4d6   : > { %v3186_v5 = vpack.c.bf16 %v3140_v53, %v3140_v53 }
 0x4d8   : > { %5637 = vst.msk [vmem:[%s6885_s13 + $0x158] sm:$0xf] %vm2535_vm2, %v3186_v5  ;;  %v11420_v5 = vld [vmem:[#allocation118_spill] sm:$0xff] }
 0x4db   : > { %v3141_v44 = vpop.f32.mrf.mxu3 }
 0x4dc   : > { %v3142_v63 = vadd.f32 %v9259_v16, %v3141_v44  ;;  %v11421_v44 = vld [vmem:[#allocation121_spill] sm:$0xff] }
 0x4de   : > { %v3187_v15 = vpack.c.bf16 %v3142_v63, %v3142_v63  ;;  %v11422_v63 = vpack.c.bf16 %v11420_v5, %v11421_v44 }
 0x4e0   : > { %5638 = vst.msk [vmem:[%s6885_s13 + $0x15c] sm:$0xf] %vm2535_vm2, %v3187_v15  ;;  %3433 = vmatmul.bf16.gmra.mxu1 %v11403_v23 }
 0x4e2   : > { %3763 = vmatmul.bf16.gmra.mxu2 %v11404_v59  ;;  %4093 = vmatmul.bf16.gmra.mxu3 %v11407_v34 }
 0x4e3   : > { %v3144_v51 = vpop.f32.mrf.mxu3 }
 0x4e4   : > { %v3145_v56 = vadd.f32 %v9259_v16, %v3144_v51  ;;  %v11424_v51 = vpack.c.bf16 %v9311_v30, %v9289_v55 }
 0x4e6   : > { %v3188_v33 = vpack.c.bf16 %v3145_v56, %v3145_v56  ;;  %v11425_v56 = vld [vmem:[#allocation128_spill] sm:$0xff] }
 0x4e8   : > { %5639 = vst.msk [vmem:[%s6885_s13 + $0x160] sm:$0xf] %vm2535_vm2, %v3188_v33  ;;  %v11426_v33 = vld [vmem:[#allocation26_spill] sm:$0xff] }
 0x4eb   : > { %v3146_v22 = vpop.f32.mrf.mxu3 }
 0x4ec   : > { %v3147_v12 = vadd.f32 %v9259_v16, %v3146_v22  ;;  %v11427_v22 = vpack.c.bf16 %v11425_v56, %v11426_v33 }
 0x4ee   : > { %v3189_v21 = vpack.c.bf16 %v3147_v12, %v3147_v12 }
 0x4f0   : > { %5640 = vst.msk [vmem:[%s6885_s13 + $0x164] sm:$0xf] %vm2535_vm2, %v3189_v21  ;;  %3438 = vmatmul.bf16.gmra.mxu1 %v11408_v8 }
 0x4f2   : > { %3768 = vmatmul.bf16.gmra.mxu2 %v11409_v49  ;;  %4098 = vmatmul.bf16.gmra.mxu3 %v11412_v45 }
 0x4f3   : > { %v3149_v54 = vpop.f32.mrf.mxu3 }
 0x4f4   : > { %v3150_v58 = vadd.f32 %v9259_v16, %v3149_v54 }
 0x4f6   : > { %v3190_v10 = vpack.c.bf16 %v3150_v58, %v3150_v58 }
 0x4f8   : > { %5641 = vst.msk [vmem:[%s6885_s13 + $0x168] sm:$0xf] %vm2535_vm2, %v3190_v10 }
 0x4fb   : > { %v3151_v14 = vpop.f32.mrf.mxu3 }
 0x4fc   : > { %v3152_v24 = vadd.f32 %v9259_v16, %v3151_v14 }
 0x4fe   : > { %v3191_v36 = vpack.c.bf16 %v3152_v24, %v3152_v24 }
 0x500   : > { %5642 = vst.msk [vmem:[%s6885_s13 + $0x16c] sm:$0xf] %vm2535_vm2, %v3191_v36  ;;  %3443 = vmatmul.bf16.gmra.mxu1 %v11413_v25  ;;  %v11428_v25 = vpack.c.bf16 %v9353_v18, %v9331_v61 }
 0x502   : > { %3773 = vmatmul.bf16.gmra.mxu2 %v11414_v52  ;;  %4103 = vmatmul.bf16.gmra.mxu3 %v11417_v29  ;;  %v11431_v29 = vld [vmem:[#allocation28_spill] sm:$0xff] }
 0x503   : > { %v3154_v62 = vpop.f32.mrf.mxu3 }
 0x504   : > { %v3155_v6 = vadd.f32 %v9259_v16, %v3154_v62  ;;  %v11432_v62 = vpack.c.bf16 %v11430_v46, %v11431_v29 }
 0x506   : > { %v3192_v28 = vpack.c.bf16 %v3155_v6, %v3155_v6 }
 0x508   : > { %5643 = vst.msk [vmem:[%s6885_s13 + $0x170] sm:$0xf] %vm2535_vm2, %v3192_v28 }
 0x50b   : > { %v3156_v53 = vpop.f32.mrf.mxu3 }
 0x50c   : > { %v3157_v43 = vadd.f32 %v9259_v16, %v3156_v53 }
 0x50e   : > { %v3193_v35 = vpack.c.bf16 %v3157_v43, %v3157_v43 }
 0x510   : > { %5644 = vst.msk [vmem:[%s6885_s13 + $0x174] sm:$0xf] %vm2535_vm2, %v3193_v35  ;;  %3448 = vmatmul.bf16.gmra.mxu1 %v11418_v47 }
 0x512   : > { %3778 = vmatmul.bf16.gmra.mxu2 %v11419_v27  ;;  %4108 = vmatmul.bf16.gmra.mxu3 %v11422_v63 }
 0x513   : > { %v3159_v15 = vpop.f32.mrf.mxu3 }
 0x514   : > { %v3160_v23 = vadd.f32 %v9259_v16, %v3159_v15 }
 0x516   : > { %v3194_v59 = vpack.c.bf16 %v3160_v23, %v3160_v23 }
 0x518   : > { %5645 = vst.msk [vmem:[%s6885_s13 + $0x178] sm:$0xf] %vm2535_vm2, %v3194_v59 }
 0x51b   : > { %v3161_v37 = vpop.f32.mrf.mxu3 }
 0x51c   : > { %v3162_v40 = vadd.f32 %v9259_v16, %v3161_v37  ;;  %v11433_v37 = vpack.c.bf16 %v9397_v32, %v9375_v7  ;;  %v9844_v7 = vld [vmem:[%s10447_s5] ss:$0 sm:$0xff] }
 0x51d   : > { %v3414_v38 = vpop.f32.mrf.mxu1 }
 0x51e   : > { %v3195_v19 = vpack.c.bf16 %v3162_v40, %v3162_v40  ;;  %v3415_v34 = vadd.f32 %v9259_v16, %v3414_v38  ;;  %v11434_v38 = vpack.c.bf16 %v9399_v48, %v9377_v41 }
 0x520   : > { %5646 = vst.msk [vmem:[%s6885_s13 + $0x17c] sm:$0xf] %vm2535_vm2, %v3195_v19  ;;  %v3494_v2 = vpack.c.bf16 %v3415_v34, %v3415_v34  ;;  %3453 = vmatmul.bf16.gmra.mxu1 %v11423_v39  ;;  %v11435_v19 = vld [vmem:[#allocation33_spill] sm:$0xff]  ;;  %v11436_v34 = vld [vmem:[#allocation34_spill] sm:$0xff] }
 0x522   : > { %5647 = vst.msk [vmem:[%s6885_s13 + $0x180] sm:$0xf] %vm2535_vm2, %v3494_v2  ;;  %3783 = vmatmul.bf16.gmra.mxu2 %v11424_v51  ;;  %4113 = vmatmul.bf16.gmra.mxu3 %v11427_v22  ;;  %v11437_v2 = vpack.c.bf16 %v11435_v19, %v11436_v34 }
 0x525   : > { %v3416_v12 = vpop.f32.mrf.mxu1  ;;  %v3744_v21 = vpop.f32.mrf.mxu2 }
 0x526   : > { %v3417_v8 = vadd.f32 %v9259_v16, %v3416_v12  ;;  %v3745_v49 = vadd.f32 %v9259_v16, %v3744_v21  ;;  %v4074_v3 = vpop.f32.mrf.mxu3 }
 0x527   : > { %v4075_v0 = vadd.f32 %v9259_v16, %v4074_v3 }
 0x528   : > { %v3495_v42 = vpack.c.bf16 %v3417_v8, %v3417_v8  ;;  %v3824_v31 = vpack.c.bf16 %v3745_v49, %v3745_v49 }
 0x529   : > { %v4154_v45 = vpack.c.bf16 %v4075_v0, %v4075_v0 }
 0x52a   : > { %5648 = vst.msk [vmem:[%s6885_s13 + $0x184] sm:$0xf] %vm2535_vm2, %v3495_v42 }
 0x52b   : > { %5679 = vst.msk [vmem:[%s6885_s13 + $0x200] sm:$0xf] %vm2535_vm2, %v3824_v31 }
 0x52c   : > { %5711 = vst.msk [vmem:[%s6885_s13 + $0x280] sm:$0xf] %vm2535_vm2, %v4154_v45  ;;  %v11438_v45 = vld [vmem:[#allocation183_spill] sm:$0xff] }
 0x52d   : > { %v3419_v55 = vpop.f32.mrf.mxu1  ;;  %v3746_v30 = vpop.f32.mrf.mxu2 }
 0x52e   : > { %v3420_v54 = vadd.f32 %v9259_v16, %v3419_v55  ;;  %v3747_v58 = vadd.f32 %v9259_v16, %v3746_v30  ;;  %v4076_v10 = vpop.f32.mrf.mxu3  ;;  %v11439_v55 = vpack.c.bf16 %v9441_v1, %v11438_v45 }
 0x52f   : > { %v4077_v14 = vadd.f32 %v9259_v16, %v4076_v10 }
 0x530   : > { %v3496_v24 = vpack.c.bf16 %v3420_v54, %v3420_v54  ;;  %v3825_v36 = vpack.c.bf16 %v3747_v58, %v3747_v58  ;;  %3458 = vmatmul.bf16.gmra.mxu1 %v11428_v25  ;;  %v11440_v54 = vld [vmem:[#allocation174_spill] sm:$0xff]  ;;  %v11441_v58 = vld [vmem:[#allocation108_spill] sm:$0xff] }
 0x531   : > { %v4155_v52 = vpack.c.bf16 %v4077_v14, %v4077_v14  ;;  %v11442_v10 = vpack.c.bf16 %v11440_v54, %v11441_v58  ;;  %v11443_v14 = vld [vmem:[#allocation155_spill] sm:$0xff] }
 0x532   : > { %5649 = vst.msk [vmem:[%s6885_s13 + $0x188] sm:$0xf] %vm2535_vm2, %v3496_v24  ;;  %3788 = vmatmul.bf16.gmra.mxu2 %v11429_v11  ;;  %4118 = vmatmul.bf16.gmra.mxu3 %v11432_v62  ;;  %v11444_v24 = vld [vmem:[#allocation44_spill] sm:$0xff] }
 0x533   : > { %5680 = vst.msk [vmem:[%s6885_s13 + $0x204] sm:$0xf] %vm2535_vm2, %v3825_v36  ;;  %v11445_v36 = vpack.c.bf16 %v11443_v14, %v11444_v24 }
 0x534   : > { %5712 = vst.msk [vmem:[%s6885_s13 + $0x284] sm:$0xf] %vm2535_vm2, %v4155_v52 }
 0x535   : > { %v3421_v18 = vpop.f32.mrf.mxu1  ;;  %v3749_v61 = vpop.f32.mrf.mxu2 }
 0x536   : > { %v3422_v6 = vadd.f32 %v9259_v16, %v3421_v18  ;;  %v3750_v28 = vadd.f32 %v9259_v16, %v3749_v61  ;;  %v4079_v53 = vpop.f32.mrf.mxu3 }
 0x537   : > { %v4080_v43 = vadd.f32 %v9259_v16, %v4079_v53 }
 0x538   : > { %v3497_v26 = vpack.c.bf16 %v3422_v6, %v3422_v6  ;;  %v3826_v9 = vpack.c.bf16 %v3750_v28, %v3750_v28 }
 0x539   : > { %v4156_v35 = vpack.c.bf16 %v4080_v43, %v4080_v43 }
 0x53a   : > { %5650 = vst.msk [vmem:[%s6885_s13 + $0x18c] sm:$0xf] %vm2535_vm2, %v3497_v26 }
 0x53b   : > { %5681 = vst.msk [vmem:[%s6885_s13 + $0x208] sm:$0xf] %vm2535_vm2, %v3826_v9 }
 0x53c   : > { %5713 = vst.msk [vmem:[%s6885_s13 + $0x288] sm:$0xf] %vm2535_vm2, %v4156_v35 }
 0x53d   : > { %v3424_v47 = vpop.f32.mrf.mxu1  ;;  %v3751_v27 = vpop.f32.mrf.mxu2 }
 0x53e   : > { %v3425_v5 = vadd.f32 %v9259_v16, %v3424_v47  ;;  %v3752_v44 = vadd.f32 %v9259_v16, %v3751_v27  ;;  %v4081_v63 = vpop.f32.mrf.mxu3  ;;  %v11446_v27 = vpack.c.bf16 %v9490_v50, %v9463_v4 }
 0x53f   : > { %v4082_v15 = vadd.f32 %v9259_v16, %v4081_v63  ;;  %v11448_v63 = vld [vmem:[#allocation51_spill] sm:$0xff] }
 0x540   : > { %v3498_v23 = vpack.c.bf16 %v3425_v5, %v3425_v5  ;;  %v3827_v59 = vpack.c.bf16 %v3752_v44, %v3752_v44  ;;  %3463 = vmatmul.bf16.gmra.mxu1 %v11433_v37  ;;  %v11447_v44 = vld [vmem:[#allocation112_spill] sm:$0xff] }
 0x541   : > { %v4157_v40 = vpack.c.bf16 %v4082_v15, %v4082_v15  ;;  %v11449_v15 = vpack.c.bf16 %v11447_v44, %v11448_v63 }
 0x542   : > { %5651 = vst.msk [vmem:[%s6885_s13 + $0x190] sm:$0xf] %vm2535_vm2, %v3498_v23  ;;  %3793 = vmatmul.bf16.gmra.mxu2 %v11434_v38  ;;  %4123 = vmatmul.bf16.gmra.mxu3 %v11437_v2  ;;  %v11450_v23 = vld [vmem:[#allocation165_spill] sm:$0xff] }
 0x543   : > { %5682 = vst.msk [vmem:[%s6885_s13 + $0x20c] sm:$0xf] %vm2535_vm2, %v3827_v59  ;;  %v11451_v59 = vld [vmem:[#allocation53_spill] sm:$0xff] }
 0x544   : > { %5714 = vst.msk [vmem:[%s6885_s13 + $0x28c] sm:$0xf] %vm2535_vm2, %v4157_v40  ;;  %v11452_v37 = vpack.c.bf16 %v11450_v23, %v11451_v59 }
 0x545   : > { %v3426_v32 = vpop.f32.mrf.mxu1  ;;  %v3754_v16 = vpop.f32.mrf.mxu2 }
 0x546   : > { %v3427_v41 = vadd.f32 %v9844_v7, %v3426_v32  ;;  %v3755_v48 = vadd.f32 %v9844_v7, %v3754_v16  ;;  %v4084_v39 = vpop.f32.mrf.mxu3 }
 0x547   : > { %v4085_v51 = vadd.f32 %v9844_v7, %v4084_v39 }
 0x548   : > { %v3499_v56 = vpack.c.bf16 %v3427_v41, %v3427_v41  ;;  %v3828_v33 = vpack.c.bf16 %v3755_v48, %v3755_v48 }
 0x549   : > { %v4158_v22 = vpack.c.bf16 %v4085_v51, %v4085_v51 }
 0x54a   : > { %5652 = vst.msk [vmem:[%s6885_s13 + $0x194] sm:$0xf] %vm2535_vm2, %v3499_v56 }
 0x54b   : > { %5683 = vst.msk [vmem:[%s6885_s13 + $0x210] sm:$0xf] %vm2535_vm2, %v3828_v33 }
 0x54c   : > { %5715 = vst.msk [vmem:[%s6885_s13 + $0x290] sm:$0xf] %vm2535_vm2, %v4158_v22 }
 0x54d   : > { %v3429_v12 = vpop.f32.mrf.mxu1  ;;  %v3756_v21 = vpop.f32.mrf.mxu2 }
 0x54e   : > { %v3430_v8 = vadd.f32 %v9844_v7, %v3429_v12  ;;  %v3757_v49 = vadd.f32 %v9844_v7, %v3756_v21  ;;  %v4086_v3 = vpop.f32.mrf.mxu3  ;;  %v11453_v21 = vpack.c.bf16 %v9534_v13, %v9512_v20 }
 0x54f   : > { %v4087_v0 = vadd.f32 %v9844_v7, %v4086_v3  ;;  %v11455_v3 = vld [vmem:[#allocation57_spill] sm:$0xff] }
 0x550   : > { %v3500_v42 = vpack.c.bf16 %v3430_v8, %v3430_v8  ;;  %v3829_v31 = vpack.c.bf16 %v3757_v49, %v3757_v49  ;;  %3468 = vmatmul.bf16.gmra.mxu1 %v11439_v55  ;;  %v11454_v49 = vld [vmem:[#allocation181_spill] sm:$0xff] }
 0x551   : > { %v4159_v30 = vpack.c.bf16 %v4087_v0, %v4087_v0  ;;  %v11456_v0 = vpack.c.bf16 %v11454_v49, %v11455_v3 }
 0x552   : > { %5653 = vst.msk [vmem:[%s6885_s13 + $0x198] sm:$0xf] %vm2535_vm2, %v3500_v42  ;;  %3798 = vmatmul.bf16.gmra.mxu2 %v11442_v10  ;;  %4128 = vmatmul.bf16.gmra.mxu3 %v11445_v36  ;;  %v11457_v42 = vld [vmem:[#allocation164_spill] sm:$0xff] }
 0x553   : > { %5684 = vst.msk [vmem:[%s6885_s13 + $0x214] sm:$0xf] %vm2535_vm2, %v3829_v31  ;;  %v11458_v31 = vld [vmem:[#allocation97_spill] sm:$0xff] }
 0x554   : > { %5716 = vst.msk [vmem:[%s6885_s13 + $0x294] sm:$0xf] %vm2535_vm2, %v4159_v30  ;;  %v11459_v45 = vpack.c.bf16 %v11457_v42, %v11458_v31 }
 0x555   : > { %v3431_v1 = vpop.f32.mrf.mxu1  ;;  %v3759_v25 = vpop.f32.mrf.mxu2 }
 0x556   : > { %v3432_v52 = vadd.f32 %v9844_v7, %v3431_v1  ;;  %v3760_v11 = vadd.f32 %v9844_v7, %v3759_v25  ;;  %v4089_v46 = vpop.f32.mrf.mxu3 }
 0x557   : > { %v4090_v29 = vadd.f32 %v9844_v7, %v4089_v46 }
 0x558   : > { %v3501_v62 = vpack.c.bf16 %v3432_v52, %v3432_v52  ;;  %v3830_v18 = vpack.c.bf16 %v3760_v11, %v3760_v11 }
 0x559   : > { %v4160_v61 = vpack.c.bf16 %v4090_v29, %v4090_v29 }
 0x55a   : > { %5654 = vst.msk [vmem:[%s6885_s13 + $0x19c] sm:$0xf] %vm2535_vm2, %v3501_v62 }
 0x55b   : > { %5685 = vst.msk [vmem:[%s6885_s13 + $0x218] sm:$0xf] %vm2535_vm2, %v3830_v18  ;;  %v11460_v18 = vld [vmem:[#allocation179_spill] sm:$0xff] }
 0x55c   : > { %5717 = vst.msk [vmem:[%s6885_s13 + $0x298] sm:$0xf] %vm2535_vm2, %v4160_v61  ;;  %v11461_v61 = vld [vmem:[#allocation65_spill] sm:$0xff] }
 0x55d   : > { %v3434_v6 = vpop.f32.mrf.mxu1  ;;  %v3761_v28 = vpop.f32.mrf.mxu2 }
 0x55e   : > { %v3435_v53 = vadd.f32 %v9844_v7, %v3434_v6  ;;  %v3762_v43 = vadd.f32 %v9844_v7, %v3761_v28  ;;  %v4091_v26 = vpop.f32.mrf.mxu3  ;;  %v11462_v6 = vpack.c.bf16 %v11460_v18, %v11461_v61 }
 0x55f   : > { %v4092_v9 = vadd.f32 %v9844_v7, %v4091_v26 }
 0x560   : > { %v3502_v35 = vpack.c.bf16 %v3435_v53, %v3435_v53  ;;  %v3831_v47 = vpack.c.bf16 %v3762_v43, %v3762_v43  ;;  %3473 = vmatmul.bf16.gmra.mxu1 %v11446_v27  ;;  %v11463_v53 = vld [vmem:[#allocation177_spill] sm:$0xff] }
 0x561   : > { %v4161_v5 = vpack.c.bf16 %v4092_v9, %v4092_v9  ;;  %v11464_v43 = vld [vmem:[#allocation185_spill] sm:$0xff]  ;;  %v11466_v9 = vld [vmem:[#allocation58_spill] sm:$0xff] }
 0x562   : > { %5655 = vst.msk [vmem:[%s6885_s13 + $0x1a0] sm:$0xf] %vm2535_vm2, %v3502_v35  ;;  %3803 = vmatmul.bf16.gmra.mxu2 %v11449_v15  ;;  %4133 = vmatmul.bf16.gmra.mxu3 %v11452_v37  ;;  %v11465_v26 = vpack.c.bf16 %v11463_v53, %v11464_v43  ;;  %v11467_v35 = vld [vmem:[#allocation171_spill] sm:$0xff] }
 0x563   : > { %5686 = vst.msk [vmem:[%s6885_s13 + $0x21c] sm:$0xf] %vm2535_vm2, %v3831_v47  ;;  %v11468_v47 = vpack.c.bf16 %v11466_v9, %v11467_v35 }
 0x564   : > { %5718 = vst.msk [vmem:[%s6885_s13 + $0x29c] sm:$0xf] %vm2535_vm2, %v4161_v5 }
 0x565   : > { %v3436_v50 = vpop.f32.mrf.mxu1  ;;  %v3764_v4 = vpop.f32.mrf.mxu2 }
 0x566   : > { %v3437_v40 = vadd.f32 %v9844_v7, %v3436_v50  ;;  %v3765_v38 = vadd.f32 %v9844_v7, %v3764_v4  ;;  %v4094_v19 = vpop.f32.mrf.mxu3 }
 0x567   : > { %v4095_v34 = vadd.f32 %v9844_v7, %v4094_v19 }
 0x568   : > { %v3503_v2 = vpack.c.bf16 %v3437_v40, %v3437_v40  ;;  %v3832_v32 = vpack.c.bf16 %v3765_v38, %v3765_v38 }
 0x569   : > { %v4162_v16 = vpack.c.bf16 %v4095_v34, %v4095_v34 }
 0x56a   : > { %5656 = vst.msk [vmem:[%s6885_s13 + $0x1a4] sm:$0xf] %vm2535_vm2, %v3503_v2 }
 0x56b   : > { %5687 = vst.msk [vmem:[%s6885_s13 + $0x220] sm:$0xf] %vm2535_vm2, %v3832_v32 }
 0x56c   : > { %5719 = vst.msk [vmem:[%s6885_s13 + $0x2a0] sm:$0xf] %vm2535_vm2, %v4162_v16 }
 0x56d   : > { %v3439_v41 = vpop.f32.mrf.mxu1  ;;  %v3766_v48 = vpop.f32.mrf.mxu2 }
 0x56e   : > { %v3440_v39 = vadd.f32 %v9844_v7, %v3439_v41  ;;  %v3767_v51 = vadd.f32 %v9844_v7, %v3766_v48  ;;  %v4096_v56 = vpop.f32.mrf.mxu3  ;;  %v11469_v41 = vpack.c.bf16 %v9622_v57, %v9600_v17 }
 0x56f   : > { %v4097_v33 = vadd.f32 %v9844_v7, %v4096_v56  ;;  %v11472_v56 = vld [vmem:[#allocation206_spill] sm:$0xff] }
 0x570   : > { %v3504_v22 = vpack.c.bf16 %v3440_v39, %v3440_v39  ;;  %v3833_v12 = vpack.c.bf16 %v3767_v51, %v3767_v51  ;;  %3478 = vmatmul.bf16.gmra.mxu1 %v11453_v21  ;;  %v11470_v39 = vld [vmem:[#allocation176_spill] sm:$0xff] }
 0x571   : > { %v4163_v8 = vpack.c.bf16 %v4097_v33, %v4097_v33  ;;  %v11471_v51 = vpack.c.bf16 %v9624_v60, %v11470_v39  ;;  %v11473_v33 = vld [vmem:[#allocation62_spill] sm:$0xff] }
 0x572   : > { %5657 = vst.msk [vmem:[%s6885_s13 + $0x1a8] sm:$0xf] %vm2535_vm2, %v3504_v22  ;;  %3808 = vmatmul.bf16.gmra.mxu2 %v11456_v0  ;;  %4138 = vmatmul.bf16.gmra.mxu3 %v11459_v45  ;;  %v11474_v22 = vpack.c.bf16 %v11472_v56, %v11473_v33 }
 0x573   : > { %5688 = vst.msk [vmem:[%s6885_s13 + $0x224] sm:$0xf] %vm2535_vm2, %v3833_v12 }
 0x574   : > { %5720 = vst.msk [vmem:[%s6885_s13 + $0x2a4] sm:$0xf] %vm2535_vm2, %v4163_v8 }
 0x575   : > { %v3441_v13 = vpop.f32.mrf.mxu1  ;;  %v3769_v20 = vpop.f32.mrf.mxu2 }
 0x576   : > { %v3442_v55 = vadd.f32 %v9844_v7, %v3441_v13  ;;  %v3770_v30 = vadd.f32 %v9844_v7, %v3769_v20  ;;  %v4099_v54 = vpop.f32.mrf.mxu3 }
 0x577   : > { %v4100_v58 = vadd.f32 %v9844_v7, %v4099_v54 }
 0x578   : > { %v3505_v10 = vpack.c.bf16 %v3442_v55, %v3442_v55  ;;  %v3834_v14 = vpack.c.bf16 %v3770_v30, %v3770_v30 }
 0x579   : > { %v4164_v24 = vpack.c.bf16 %v4100_v58, %v4100_v58  ;;  %v11475_v58 = vld [vmem:[#allocation82_spill] sm:$0xff] }
 0x57a   : > { %5658 = vst.msk [vmem:[%s6885_s13 + $0x1ac] sm:$0xf] %vm2535_vm2, %v3505_v10  ;;  %v11476_v10 = vld [vmem:[#allocation80_spill] sm:$0xff] }
 0x57b   : > { %5689 = vst.msk [vmem:[%s6885_s13 + $0x228] sm:$0xf] %vm2535_vm2, %v3834_v14  ;;  %v11477_v14 = vpack.c.bf16 %v11475_v58, %v11476_v10 }
 0x57c   : > { %5721 = vst.msk [vmem:[%s6885_s13 + $0x2a8] sm:$0xf] %vm2535_vm2, %v4164_v24 }
 0x57d   : > { %v3444_v36 = vpop.f32.mrf.mxu1  ;;  %v3771_v1 = vpop.f32.mrf.mxu2 }
 0x57e   : > { %v3445_v25 = vadd.f32 %v9844_v7, %v3444_v36  ;;  %v3772_v52 = vadd.f32 %v9844_v7, %v3771_v1  ;;  %v4101_v11 = vpop.f32.mrf.mxu3  ;;  %v11478_v36 = vld [vmem:[#allocation83_spill] sm:$0xff]  ;;  %v11479_v1 = vld [vmem:[#allocation81_spill] sm:$0xff] }
 0x57f   : > { %v4102_v46 = vadd.f32 %v9844_v7, %v4101_v11 }
 0x580   : > { %v3506_v29 = vpack.c.bf16 %v3445_v25, %v3445_v25  ;;  %v3835_v62 = vpack.c.bf16 %v3772_v52, %v3772_v52  ;;  %3483 = vmatmul.bf16.gmra.mxu1 %v11462_v6  ;;  %v11480_v25 = vpack.c.bf16 %v11478_v36, %v11479_v1 }
 0x581   : > { %v4165_v28 = vpack.c.bf16 %v4102_v46, %v4102_v46 }
 0x582   : > { %5659 = vst.msk [vmem:[%s6885_s13 + $0x1b0] sm:$0xf] %vm2535_vm2, %v3506_v29  ;;  %3813 = vmatmul.bf16.gmra.mxu2 %v11465_v26  ;;  %4143 = vmatmul.bf16.gmra.mxu3 %v11468_v47 }
 0x583   : > { %5690 = vst.msk [vmem:[%s6885_s13 + $0x22c] sm:$0xf] %vm2535_vm2, %v3835_v62 }
 0x584   : > { %5722 = vst.msk [vmem:[%s6885_s13 + $0x2ac] sm:$0xf] %vm2535_vm2, %v4165_v28 }
 0x585   : > { %v3446_v27 = vpop.f32.mrf.mxu1  ;;  %v3774_v5 = vpop.f32.mrf.mxu2 }
 0x586   : > { %v3447_v44 = vadd.f32 %v9844_v7, %v3446_v27  ;;  %v3775_v63 = vadd.f32 %v9844_v7, %v3774_v5  ;;  %v4104_v15 = vpop.f32.mrf.mxu3 }
 0x587   : > { %v4105_v23 = vadd.f32 %v9844_v7, %v4104_v15 }
 0x588   : > { %v3507_v59 = vpack.c.bf16 %v3447_v44, %v3447_v44  ;;  %v3836_v37 = vpack.c.bf16 %v3775_v63, %v3775_v63  ;;  %v11481_v44 = vld [vmem:[#allocation214_spill] sm:$0xff]  ;;  %v11482_v63 = vld [vmem:[#allocation93_spill] sm:$0xff] }
 0x589   : > { %v4166_v50 = vpack.c.bf16 %v4105_v23, %v4105_v23  ;;  %v11483_v15 = vpack.c.bf16 %v11481_v44, %v11482_v63 }
 0x58a   : > { %5660 = vst.msk [vmem:[%s6885_s13 + $0x1b4] sm:$0xf] %vm2535_vm2, %v3507_v59  ;;  %v11484_v59 = vld [vmem:[#allocation85_spill] sm:$0xff] }
 0x58b   : > { %5691 = vst.msk [vmem:[%s6885_s13 + $0x230] sm:$0xf] %vm2535_vm2, %v3836_v37  ;;  %v11485_v37 = vld [vmem:[#allocation84_spill] sm:$0xff] }
 0x58c   : > { %5723 = vst.msk [vmem:[%s6885_s13 + $0x2b0] sm:$0xf] %vm2535_vm2, %v4166_v50  ;;  %v11486_v50 = vpack.c.bf16 %v11484_v59, %v11485_v37 }
 0x58d   : > { %v3449_v4 = vpop.f32.mrf.mxu1  ;;  %v3776_v40 = vpop.f32.mrf.mxu2 }
 0x58e   : > { %v3450_v38 = vadd.f32 %v9844_v7, %v3449_v4  ;;  %v3777_v19 = vadd.f32 %v9844_v7, %v3776_v40  ;;  %v4106_v34 = vpop.f32.mrf.mxu3 }
 0x58f   : > { %v4107_v2 = vadd.f32 %v9844_v7, %v4106_v34 }
 0x590   : > { %v3508_v32 = vpack.c.bf16 %v3450_v38, %v3450_v38  ;;  %v3837_v16 = vpack.c.bf16 %v3777_v19, %v3777_v19  ;;  %3488 = vmatmul.bf16.gmra.mxu1 %v11469_v41 }
 0x591   : > { %v4167_v48 = vpack.c.bf16 %v4107_v2, %v4107_v2 }
 0x592   : > { %5661 = vst.msk [vmem:[%s6885_s13 + $0x1b8] sm:$0xf] %vm2535_vm2, %v3508_v32  ;;  %3818 = vmatmul.bf16.gmra.mxu2 %v11471_v51  ;;  %4148 = vmatmul.bf16.gmra.mxu3 %v11474_v22 }
 0x593   : > { %5692 = vst.msk [vmem:[%s6885_s13 + $0x234] sm:$0xf] %vm2535_vm2, %v3837_v16 }
 0x594   : > { %5724 = vst.msk [vmem:[%s6885_s13 + $0x2b4] sm:$0xf] %vm2535_vm2, %v4167_v48 }
 0x595   : > { %v3451_v57 = vpop.f32.mrf.mxu1  ;;  %v3779_v17 = vpop.f32.mrf.mxu2 }
 0x596   : > { %v3452_v12 = vadd.f32 %v9844_v7, %v3451_v57  ;;  %v3780_v21 = vadd.f32 %v9844_v7, %v3779_v17  ;;  %v4109_v8 = vpop.f32.mrf.mxu3 }
 0x597   : > { %v4110_v49 = vadd.f32 %v9844_v7, %v4109_v8 }
 0x598   : > { %v3509_v60 = vpack.c.bf16 %v3452_v12, %v3452_v12  ;;  %v3838_v3 = vpack.c.bf16 %v3780_v21, %v3780_v21  ;;  %v11487_v12 = vld [vmem:[#allocation115_spill] sm:$0xff]  ;;  %v11488_v21 = vld [vmem:[#allocation88_spill] sm:$0xff] }
 0x599   : > { %v4168_v0 = vpack.c.bf16 %v4110_v49, %v4110_v49  ;;  %v11489_v8 = vpack.c.bf16 %v11487_v12, %v11488_v21 }
 0x59a   : > { %5662 = vst.msk [vmem:[%s6885_s13 + $0x1bc] sm:$0xf] %vm2535_vm2, %v3509_v60  ;;  %v11490_v60 = vld [vmem:[#allocation95_spill] sm:$0xff] }
 0x59b   : > { %5693 = vst.msk [vmem:[%s6885_s13 + $0x238] sm:$0xf] %vm2535_vm2, %v3838_v3  ;;  %v11491_v3 = vld [vmem:[#allocation92_spill] sm:$0xff] }
 0x59c   : > { %5725 = vst.msk [vmem:[%s6885_s13 + $0x2b8] sm:$0xf] %vm2535_vm2, %v4168_v0  ;;  %v11492_v0 = vpack.c.bf16 %v11490_v60, %v11491_v3 }
 0x59d   : > { %v3454_v42 = vpop.f32.mrf.mxu1  ;;  %v3781_v31 = vpop.f32.mrf.mxu2 }
 0x59e   : > { %v3455_v45 = vadd.f32 %v9844_v7, %v3454_v42  ;;  %v3782_v13 = vadd.f32 %v9844_v7, %v3781_v31  ;;  %v4111_v20 = vpop.f32.mrf.mxu3 }
 0x59f   : > { %v4112_v55 = vadd.f32 %v9844_v7, %v4111_v20 }
 0x5a0   : > { %v3510_v30 = vpack.c.bf16 %v3455_v45, %v3455_v45  ;;  %v3839_v54 = vpack.c.bf16 %v3782_v13, %v3782_v13  ;;  %4403 = vmatmul.bf16.vlgmr.msrb.gmra.mxu1 %v11477_v14 }
 0x5a1   : > { %v4169_v24 = vpack.c.bf16 %v4112_v55, %v4112_v55 }
 0x5a2   : > { %5663 = vst.msk [vmem:[%s6885_s13 + $0x1c0] sm:$0xf] %vm2535_vm2, %v3510_v30  ;;  %4669 = vmatmul.bf16.vlgmr.msrb.gmra.mxu2 %v11480_v25 }
 0x5a3   : > { %5694 = vst.msk [vmem:[%s6885_s13 + $0x23c] sm:$0xf] %vm2535_vm2, %v3839_v54 }
 0x5a4   : > { %5726 = vst.msk [vmem:[%s6885_s13 + $0x2bc] sm:$0xf] %vm2535_vm2, %v4169_v24 }
 0x5a5   : > { %v3456_v52 = vpop.f32.mrf.mxu1  ;;  %v3784_v11 = vpop.f32.mrf.mxu2 }
 0x5a6   : > { %v3457_v46 = vadd.f32 %v9844_v7, %v3456_v52  ;;  %v3785_v29 = vadd.f32 %v9844_v7, %v3784_v11  ;;  %v4114_v62 = vpop.f32.mrf.mxu3 }
 0x5a7   : > { %v4115_v18 = vadd.f32 %v9844_v7, %v4114_v62 }
 0x5a8   : > { %v3511_v61 = vpack.c.bf16 %v3457_v46, %v3457_v46  ;;  %v3840_v6 = vpack.c.bf16 %v3785_v29, %v3785_v29  ;;  %v11493_v46 = vld [vmem:[#allocation101_spill] sm:$0xff]  ;;  %v11494_v29 = vld [vmem:[#allocation99_spill] sm:$0xff] }
 0x5a9   : > { %v4170_v28 = vpack.c.bf16 %v4115_v18, %v4115_v18  ;;  %v11495_v62 = vpack.c.bf16 %v11493_v46, %v11494_v29 }
 0x5aa   : > { %5664 = vst.msk [vmem:[%s6885_s13 + $0x1c4] sm:$0xf] %vm2535_vm2, %v3511_v61  ;;  %v11496_v61 = vld [vmem:[#allocation106_spill] sm:$0xff] }
 0x5ab   : > { %5695 = vst.msk [vmem:[%s6885_s13 + $0x240] sm:$0xf] %vm2535_vm2, %v3840_v6  ;;  %v11497_v6 = vld [vmem:[#allocation102_spill] sm:$0xff] }
 0x5ac   : > { %5727 = vst.msk [vmem:[%s6885_s13 + $0x2c0] sm:$0xf] %vm2535_vm2, %v4170_v28  ;;  %v11498_v28 = vpack.c.bf16 %v11496_v61, %v11497_v6 }
 0x5ad   : > { %v3459_v53 = vpop.f32.mrf.mxu1  ;;  %v3786_v43 = vpop.f32.mrf.mxu2 }
 0x5ae   : > { %v3460_v26 = vadd.f32 %v9844_v7, %v3459_v53  ;;  %v3787_v9 = vadd.f32 %v9844_v7, %v3786_v43  ;;  %v4116_v35 = vpop.f32.mrf.mxu3 }
 0x5af   : > { %v4117_v47 = vadd.f32 %v9844_v7, %v4116_v35 }
 0x5b0   : > { %v3512_v27 = vpack.c.bf16 %v3460_v26, %v3460_v26  ;;  %v3841_v5 = vpack.c.bf16 %v3787_v9, %v3787_v9  ;;  %4408 = vmatmul.bf16.gmra.mxu1 %v11483_v15 }
 0x5b1   : > { %v4171_v23 = vpack.c.bf16 %v4117_v47, %v4117_v47 }
 0x5b2   : > { %5665 = vst.msk [vmem:[%s6885_s13 + $0x1c8] sm:$0xf] %vm2535_vm2, %v3512_v27  ;;  %4674 = vmatmul.bf16.gmra.mxu2 %v11486_v50 }
 0x5b3   : > { %5696 = vst.msk [vmem:[%s6885_s13 + $0x244] sm:$0xf] %vm2535_vm2, %v3841_v5 }
 0x5b4   : > { %5728 = vst.msk [vmem:[%s6885_s13 + $0x2c4] sm:$0xf] %vm2535_vm2, %v4171_v23 }
 0x5b5   : > { %v3461_v4 = vpop.f32.mrf.mxu1  ;;  %v3789_v40 = vpop.f32.mrf.mxu2 }
 0x5b6   : > { %v3462_v38 = vadd.f32 %v9844_v7, %v3461_v4  ;;  %v3790_v19 = vadd.f32 %v9844_v7, %v3789_v40  ;;  %v4119_v34 = vpop.f32.mrf.mxu3 }
 0x5b7   : > { %v4120_v2 = vadd.f32 %v9844_v7, %v4119_v34 }
 0x5b8   : > { %v3513_v32 = vpack.c.bf16 %v3462_v38, %v3462_v38  ;;  %v3842_v16 = vpack.c.bf16 %v3790_v19, %v3790_v19  ;;  %v11499_v38 = vld [vmem:[#allocation134_spill] sm:$0xff] }
 0x5b9   : > { %v4172_v41 = vpack.c.bf16 %v4120_v2, %v4120_v2  ;;  %v11500_v19 = vld [vmem:[#allocation10_spill] sm:$0xff] }
 0x5ba   : > { %5666 = vst.msk [vmem:[%s6885_s13 + $0x1cc] sm:$0xf] %vm2535_vm2, %v3513_v32  ;;  %v11501_v34 = vpack.c.bf16 %v11499_v38, %v11500_v19  ;;  %v11502_v32 = vld [vmem:[#allocation123_spill] sm:$0xff] }
 0x5bb   : > { %5697 = vst.msk [vmem:[%s6885_s13 + $0x248] sm:$0xf] %vm2535_vm2, %v3842_v16  ;;  %v11503_v16 = vld [vmem:[#allocation114_spill] sm:$0xff] }
 0x5bc   : > { %5729 = vst.msk [vmem:[%s6885_s13 + $0x2c8] sm:$0xf] %vm2535_vm2, %v4172_v41  ;;  %v11504_v41 = vpack.c.bf16 %v11502_v32, %v11503_v16 }
 0x5bd   : > { %v3464_v48 = vpop.f32.mrf.mxu1  ;;  %v3791_v39 = vpop.f32.mrf.mxu2 }
 0x5be   : > { %v3465_v51 = vadd.f32 %v9844_v7, %v3464_v48  ;;  %v3792_v56 = vadd.f32 %v9844_v7, %v3791_v39  ;;  %v4121_v33 = vpop.f32.mrf.mxu3 }
 0x5bf   : > { %v4122_v22 = vadd.f32 %v9844_v7, %v4121_v33 }
 0x5c0   : > { %v3514_v57 = vpack.c.bf16 %v3465_v51, %v3465_v51  ;;  %v3843_v17 = vpack.c.bf16 %v3792_v56, %v3792_v56  ;;  %4413 = vmatmul.bf16.gmra.mxu1 %v11489_v8 }
 0x5c1   : > { %v4173_v49 = vpack.c.bf16 %v4122_v22, %v4122_v22 }
 0x5c2   : > { %5667 = vst.msk [vmem:[%s6885_s13 + $0x1d0] sm:$0xf] %vm2535_vm2, %v3514_v57  ;;  %4679 = vmatmul.bf16.gmra.mxu2 %v11492_v0 }
 0x5c3   : > { %5698 = vst.msk [vmem:[%s6885_s13 + $0x24c] sm:$0xf] %vm2535_vm2, %v3843_v17 }
 0x5c4   : > { %5730 = vst.msk [vmem:[%s6885_s13 + $0x2cc] sm:$0xf] %vm2535_vm2, %v4173_v49 }
 0x5c5   : > { %v3466_v42 = vpop.f32.mrf.mxu1  ;;  %v3794_v31 = vpop.f32.mrf.mxu2 }
 0x5c6   : > { %v3467_v45 = vadd.f32 %v9844_v7, %v3466_v42  ;;  %v3795_v13 = vadd.f32 %v9844_v7, %v3794_v31  ;;  %v4124_v20 = vpop.f32.mrf.mxu3 }
 0x5c7   : > { %v4125_v55 = vadd.f32 %v9844_v7, %v4124_v20 }
 0x5c8   : > { %v3515_v30 = vpack.c.bf16 %v3467_v45, %v3467_v45  ;;  %v3844_v54 = vpack.c.bf16 %v3795_v13, %v3795_v13  ;;  %v11505_v45 = vld [vmem:[#allocation15_spill] sm:$0xff]  ;;  %v11506_v13 = vld [vmem:[#allocation124_spill] sm:$0xff] }
 0x5c9   : > { %v4174_v58 = vpack.c.bf16 %v4125_v55, %v4125_v55  ;;  %v11507_v20 = vpack.c.bf16 %v11505_v45, %v11506_v13 }
 0x5ca   : > { %5668 = vst.msk [vmem:[%s6885_s13 + $0x1d4] sm:$0xf] %vm2535_vm2, %v3515_v30  ;;  %v11508_v30 = vld [vmem:[#allocation113_spill] sm:$0xff] }
 0x5cb   : > { %5699 = vst.msk [vmem:[%s6885_s13 + $0x250] sm:$0xf] %vm2535_vm2, %v3844_v54  ;;  %v11509_v54 = vld [vmem:[#allocation122_spill] sm:$0xff] }
 0x5cc   : > { %5731 = vst.msk [vmem:[%s6885_s13 + $0x2d0] sm:$0xf] %vm2535_vm2, %v4174_v58  ;;  %v11510_v58 = vpack.c.bf16 %v11508_v30, %v11509_v54 }
 0x5cd   : > { %v3469_v10 = vpop.f32.mrf.mxu1  ;;  %v3796_v14 = vpop.f32.mrf.mxu2 }
 0x5ce   : > { %v3470_v24 = vadd.f32 %v9844_v7, %v3469_v10  ;;  %v3797_v36 = vadd.f32 %v9844_v7, %v3796_v14  ;;  %v4126_v1 = vpop.f32.mrf.mxu3 }
 0x5cf   : > { %v4127_v25 = vadd.f32 %v9844_v7, %v4126_v1 }
 0x5d0   : > { %v3516_v52 = vpack.c.bf16 %v3470_v24, %v3470_v24  ;;  %v3845_v11 = vpack.c.bf16 %v3797_v36, %v3797_v36  ;;  %4418 = vmatmul.bf16.gmra.mxu1 %v11495_v62 }
 0x5d1   : > { %v4175_v18 = vpack.c.bf16 %v4127_v25, %v4127_v25 }
 0x5d2   : > { %5669 = vst.msk [vmem:[%s6885_s13 + $0x1d8] sm:$0xf] %vm2535_vm2, %v3516_v52  ;;  %4684 = vmatmul.bf16.gmra.mxu2 %v11498_v28 }
 0x5d3   : > { %5700 = vst.msk [vmem:[%s6885_s13 + $0x254] sm:$0xf] %vm2535_vm2, %v3845_v11 }
 0x5d4   : > { %5732 = vst.msk [vmem:[%s6885_s13 + $0x2d4] sm:$0xf] %vm2535_vm2, %v4175_v18 }
 0x5d5   : > { %v3471_v53 = vpop.f32.mrf.mxu1  ;;  %v3799_v43 = vpop.f32.mrf.mxu2 }
 0x5d6   : > { %v3472_v26 = vadd.f32 %v9844_v7, %v3471_v53  ;;  %v3800_v9 = vadd.f32 %v9844_v7, %v3799_v43  ;;  %v4129_v35 = vpop.f32.mrf.mxu3 }
 0x5d7   : > { %v4130_v47 = vadd.f32 %v9844_v7, %v4129_v35 }
 0x5d8   : > { %v3517_v27 = vpack.c.bf16 %v3472_v26, %v3472_v26  ;;  %v3846_v5 = vpack.c.bf16 %v3800_v9, %v3800_v9  ;;  %v11511_v26 = vld [vmem:[#allocation141_spill] sm:$0xff]  ;;  %v11512_v9 = vld [vmem:[#allocation126_spill] sm:$0xff] }
 0x5d9   : > { %v4176_v44 = vpack.c.bf16 %v4130_v47, %v4130_v47  ;;  %v11513_v35 = vpack.c.bf16 %v11511_v26, %v11512_v9 }
 0x5da   : > { %5670 = vst.msk [vmem:[%s6885_s13 + $0x1dc] sm:$0xf] %vm2535_vm2, %v3517_v27  ;;  %v11514_v27 = vld [vmem:[#allocation20_spill] sm:$0xff] }
 0x5db   : > { %5701 = vst.msk [vmem:[%s6885_s13 + $0x258] sm:$0xf] %vm2535_vm2, %v3846_v5  ;;  %v11515_v5 = vld [vmem:[#allocation131_spill] sm:$0xff] }
 0x5dc   : > { %5733 = vst.msk [vmem:[%s6885_s13 + $0x2d8] sm:$0xf] %vm2535_vm2, %v4176_v44  ;;  %v11516_v44 = vpack.c.bf16 %v11514_v27, %v11515_v5  ;;  %v11529_v27 = vld [vmem:[#allocation148_spill] sm:$0xff]  ;;  %v11530_v5 = vld [vmem:[#allocation41_spill] sm:$0xff] }
 0x5dd   : > { %v3474_v63 = vpop.f32.mrf.mxu1  ;;  %v3801_v15 = vpop.f32.mrf.mxu2 }
 0x5de   : > { %v3475_v23 = vadd.f32 %v9844_v7, %v3474_v63  ;;  %v3802_v59 = vadd.f32 %v9844_v7, %v3801_v15  ;;  %v4131_v37 = vpop.f32.mrf.mxu3 }
 0x5df   : > { %v4132_v50 = vadd.f32 %v9844_v7, %v4131_v37 }
 0x5e0   : > { %v3518_v4 = vpack.c.bf16 %v3475_v23, %v3475_v23  ;;  %v3847_v40 = vpack.c.bf16 %v3802_v59, %v3802_v59  ;;  %4423 = vmatmul.bf16.gmra.mxu1 %v11501_v34 }
 0x5e1   : > { %v4177_v2 = vpack.c.bf16 %v4132_v50, %v4132_v50 }
 0x5e2   : > { %5671 = vst.msk [vmem:[%s6885_s13 + $0x1e0] sm:$0xf] %vm2535_vm2, %v3518_v4  ;;  %4689 = vmatmul.bf16.gmra.mxu2 %v11504_v41 }
 0x5e3   : > { %5702 = vst.msk [vmem:[%s6885_s13 + $0x25c] sm:$0xf] %vm2535_vm2, %v3847_v40 }
 0x5e4   : > { %5734 = vst.msk [vmem:[%s6885_s13 + $0x2dc] sm:$0xf] %vm2535_vm2, %v4177_v2 }
 0x5e5   : > { %v3476_v48 = vpop.f32.mrf.mxu1  ;;  %v3804_v39 = vpop.f32.mrf.mxu2 }
 0x5e6   : > { %v3477_v51 = vadd.f32 %v9844_v7, %v3476_v48  ;;  %v3805_v56 = vadd.f32 %v9844_v7, %v3804_v39  ;;  %v4134_v33 = vpop.f32.mrf.mxu3 }
 0x5e7   : > { %v4135_v22 = vadd.f32 %v9844_v7, %v4134_v33 }
 0x5e8   : > { %v3519_v57 = vpack.c.bf16 %v3477_v51, %v3477_v51  ;;  %v3848_v17 = vpack.c.bf16 %v3805_v56, %v3805_v56  ;;  %v11517_v51 = vld [vmem:[#allocation127_spill] sm:$0xff]  ;;  %v11518_v56 = vld [vmem:[#allocation130_spill] sm:$0xff] }
 0x5e9   : > { %v4178_v12 = vpack.c.bf16 %v4135_v22, %v4135_v22  ;;  %v11519_v33 = vpack.c.bf16 %v11517_v51, %v11518_v56  ;;  %v11538_v56 = vld [vmem:[#allocation153_spill] sm:$0xff] }
 0x5ea   : > { %5672 = vst.msk [vmem:[%s6885_s13 + $0x1e4] sm:$0xf] %vm2535_vm2, %v3519_v57  ;;  %v11520_v57 = vld [vmem:[#allocation22_spill] sm:$0xff] }
 0x5eb   : > { %5703 = vst.msk [vmem:[%s6885_s13 + $0x260] sm:$0xf] %vm2535_vm2, %v3848_v17  ;;  %v11521_v17 = vld [vmem:[#allocation140_spill] sm:$0xff] }
 0x5ec   : > { %5735 = vst.msk [vmem:[%s6885_s13 + $0x2e0] sm:$0xf] %vm2535_vm2, %v4178_v12  ;;  %v11522_v12 = vpack.c.bf16 %v11520_v57, %v11521_v17 }
 0x5ed   : > { %v3479_v21 = vpop.f32.mrf.mxu1  ;;  %v3806_v8 = vpop.f32.mrf.mxu2 }
 0x5ee   : > { %v3480_v49 = vadd.f32 %v9844_v7, %v3479_v21  ;;  %v3807_v60 = vadd.f32 %v9844_v7, %v3806_v8  ;;  %v4136_v3 = vpop.f32.mrf.mxu3 }
 0x5ef   : > { %v4137_v0 = vadd.f32 %v9844_v7, %v4136_v3 }
 0x5f0   : > { %v3520_v42 = vpack.c.bf16 %v3480_v49, %v3480_v49  ;;  %v3849_v31 = vpack.c.bf16 %v3807_v60, %v3807_v60  ;;  %4428 = vmatmul.bf16.gmra.mxu1 %v11507_v20 }
 0x5f1   : > { %v4179_v55 = vpack.c.bf16 %v4137_v0, %v4137_v0 }
 0x5f2   : > { %5673 = vst.msk [vmem:[%s6885_s13 + $0x1e8] sm:$0xf] %vm2535_vm2, %v3520_v42  ;;  %4694 = vmatmul.bf16.gmra.mxu2 %v11510_v58 }
 0x5f3   : > { %5704 = vst.msk [vmem:[%s6885_s13 + $0x264] sm:$0xf] %vm2535_vm2, %v3849_v31 }
 0x5f4   : > { %5736 = vst.msk [vmem:[%s6885_s13 + $0x2e4] sm:$0xf] %vm2535_vm2, %v4179_v55 }
 0x5f5   : > { %v3481_v10 = vpop.f32.mrf.mxu1  ;;  %v3809_v14 = vpop.f32.mrf.mxu2 }
 0x5f6   : > { %v3482_v24 = vadd.f32 %v9844_v7, %v3481_v10  ;;  %v3810_v36 = vadd.f32 %v9844_v7, %v3809_v14  ;;  %v4139_v1 = vpop.f32.mrf.mxu3 }
 0x5f7   : > { %v4140_v25 = vadd.f32 %v9844_v7, %v4139_v1 }
 0x5f8   : > { %v3521_v52 = vpack.c.bf16 %v3482_v24, %v3482_v24  ;;  %v3850_v11 = vpack.c.bf16 %v3810_v36, %v3810_v36  ;;  %v11523_v24 = vld [vmem:[#allocation137_spill] sm:$0xff]  ;;  %v11524_v36 = vld [vmem:[#allocation32_spill] sm:$0xff] }
 0x5f9   : > { %v4180_v46 = vpack.c.bf16 %v4140_v25, %v4140_v25  ;;  %v11525_v1 = vpack.c.bf16 %v11523_v24, %v11524_v36 }
 0x5fa   : > { %5674 = vst.msk [vmem:[%s6885_s13 + $0x1ec] sm:$0xf] %vm2535_vm2, %v3521_v52  ;;  %v11526_v52 = vld [vmem:[#allocation27_spill] sm:$0xff] }
 0x5fb   : > { %5705 = vst.msk [vmem:[%s6885_s13 + $0x268] sm:$0xf] %vm2535_vm2, %v3850_v11  ;;  %v11527_v11 = vld [vmem:[#allocation149_spill] sm:$0xff] }
 0x5fc   : > { %5737 = vst.msk [vmem:[%s6885_s13 + $0x2e8] sm:$0xf] %vm2535_vm2, %v4180_v46  ;;  %v11528_v46 = vpack.c.bf16 %v11526_v52, %v11527_v11 }
 0x5fd   : > { %v3484_v29 = vpop.f32.mrf.mxu1  ;;  %v3811_v62 = vpop.f32.mrf.mxu2 }
 0x5fe   : > { %v3485_v18 = vadd.f32 %v9844_v7, %v3484_v29  ;;  %v3812_v61 = vadd.f32 %v9844_v7, %v3811_v62  ;;  %v4141_v6 = vpop.f32.mrf.mxu3 }
 0x5ff   : > { %v4142_v28 = vadd.f32 %v9844_v7, %v4141_v6 }
 0x600   : > { %v3522_v53 = vpack.c.bf16 %v3485_v18, %v3485_v18  ;;  %v3851_v43 = vpack.c.bf16 %v3812_v61, %v3812_v61  ;;  %4433 = vmatmul.bf16.gmra.mxu1 %v11513_v35 }
 0x601   : > { %v4181_v47 = vpack.c.bf16 %v4142_v28, %v4142_v28 }
 0x602   : > { %5675 = vst.msk [vmem:[%s6885_s13 + $0x1f0] sm:$0xf] %vm2535_vm2, %v3522_v53  ;;  %4699 = vmatmul.bf16.gmra.mxu2 %v11516_v44  ;;  %v11531_v44 = vpack.c.bf16 %v11529_v27, %v11530_v5 }
 0x603   : > { %5706 = vst.msk [vmem:[%s6885_s13 + $0x26c] sm:$0xf] %vm2535_vm2, %v3851_v43 }
 0x604   : > { %5738 = vst.msk [vmem:[%s6885_s13 + $0x2ec] sm:$0xf] %vm2535_vm2, %v4181_v47 }
 0x605   : > { %v3486_v63 = vpop.f32.mrf.mxu1  ;;  %v3814_v15 = vpop.f32.mrf.mxu2 }
 0x606   : > { %v3487_v23 = vadd.f32 %v9844_v7, %v3486_v63  ;;  %v3815_v59 = vadd.f32 %v9844_v7, %v3814_v15  ;;  %v4144_v37 = vpop.f32.mrf.mxu3  ;;  %v11532_v63 = vld [vmem:[#allocation151_spill] sm:$0xff]  ;;  %v11533_v15 = vld [vmem:[#allocation156_spill] sm:$0xff] }
 0x607   : > { %v4145_v50 = vadd.f32 %v9844_v7, %v4144_v37 }
 0x608   : > { %v3523_v4 = vpack.c.bf16 %v3487_v23, %v3487_v23  ;;  %v3852_v40 = vpack.c.bf16 %v3815_v59, %v3815_v59  ;;  %v11534_v23 = vpack.c.bf16 %v11532_v63, %v11533_v15 }
 0x609   : > { %v4182_v38 = vpack.c.bf16 %v4145_v50, %v4145_v50 }
 0x60a   : > { %5676 = vst.msk [vmem:[%s6885_s13 + $0x1f4] sm:$0xf] %vm2535_vm2, %v3523_v4 }
 0x60b   : > { %5707 = vst.msk [vmem:[%s6885_s13 + $0x270] sm:$0xf] %vm2535_vm2, %v3852_v40 }
 0x60c   : > { %5739 = vst.msk [vmem:[%s6885_s13 + $0x2f0] sm:$0xf] %vm2535_vm2, %v4182_v38 }
 0x60d   : > { %v3489_v19 = vpop.f32.mrf.mxu1  ;;  %v3816_v34 = vpop.f32.mrf.mxu2 }
 0x60e   : > { %v3490_v2 = vadd.f32 %v9844_v7, %v3489_v19  ;;  %v3817_v32 = vadd.f32 %v9844_v7, %v3816_v34  ;;  %v4146_v16 = vpop.f32.mrf.mxu3 }
 0x60f   : > { %v4147_v41 = vadd.f32 %v9844_v7, %v4146_v16 }
 0x610   : > { %v3524_v48 = vpack.c.bf16 %v3490_v2, %v3490_v2  ;;  %v3853_v39 = vpack.c.bf16 %v3817_v32, %v3817_v32  ;;  %4438 = vmatmul.bf16.gmra.mxu1 %v11519_v33  ;;  %v11539_v33 = vld [vmem:[#allocation161_spill] sm:$0xff] }
 0x611   : > { %v4183_v22 = vpack.c.bf16 %v4147_v41, %v4147_v41 }
 0x612   : > { %5677 = vst.msk [vmem:[%s6885_s13 + $0x1f8] sm:$0xf] %vm2535_vm2, %v3524_v48  ;;  %4704 = vmatmul.bf16.gmra.mxu2 %v11522_v12  ;;  %v11535_v48 = vld [vmem:[#allocation38_spill] sm:$0xff] }
 0x613   : > { %5708 = vst.msk [vmem:[%s6885_s13 + $0x274] sm:$0xf] %vm2535_vm2, %v3853_v39  ;;  %v11536_v39 = vld [vmem:[#allocation37_spill] sm:$0xff] }
 0x614   : > { %5740 = vst.msk [vmem:[%s6885_s13 + $0x2f4] sm:$0xf] %vm2535_vm2, %v4183_v22  ;;  %v11537_v51 = vpack.c.bf16 %v11535_v48, %v11536_v39  ;;  %v11540_v22 = vpack.c.bf16 %v11538_v56, %v11539_v33 }
 0x615   : > { %v3491_v21 = vpop.f32.mrf.mxu1  ;;  %v3819_v8 = vpop.f32.mrf.mxu2 }
 0x616   : > { %v3492_v49 = vadd.f32 %v9844_v7, %v3491_v21  ;;  %v3820_v60 = vadd.f32 %v9844_v7, %v3819_v8  ;;  %v4149_v3 = vpop.f32.mrf.mxu3 }
 0x617   : > { %v4150_v0 = vadd.f32 %v9844_v7, %v4149_v3 }
 0x618   : > { %v3525_v42 = vpack.c.bf16 %v3492_v49, %v3492_v49  ;;  %v3854_v31 = vpack.c.bf16 %v3820_v60, %v3820_v60 }
 0x619   : > { %v4184_v45 = vpack.c.bf16 %v4150_v0, %v4150_v0 }
 0x61a   : > { %5678 = vst.msk [vmem:[%s6885_s13 + $0x1fc] sm:$0xf] %vm2535_vm2, %v3525_v42 }
 0x61b   : > { %5709 = vst.msk [vmem:[%s6885_s13 + $0x278] sm:$0xf] %vm2535_vm2, %v3854_v31 }
 0x61c   : > { %5741 = vst.msk [vmem:[%s6885_s13 + $0x2f8] sm:$0xf] %vm2535_vm2, %v4184_v45 }
 0x61d   : > { %v3821_v13 = vpop.f32.mrf.mxu2  ;;  %v4404_v20 = vpop.f32.mrf.mxu1 }
 0x61e   : > { %v3822_v55 = vadd.f32 %v9844_v7, %v3821_v13  ;;  %v4151_v30 = vpop.f32.mrf.mxu3  ;;  %v4405_v54 = vadd.f32 %v9844_v7, %v4404_v20  ;;  %v11541_v13 = vld [vmem:[#allocation158_spill] sm:$0xff]  ;;  %v11542_v20 = vld [vmem:[#allocation160_spill] sm:$0xff] }
 0x61f   : > { %v4152_v58 = vadd.f32 %v9844_v7, %v4151_v30  ;;  %v11544_v30 = vld [vmem:[#allocation90_spill] sm:$0xff] }
 0x620   : > { %v3855_v10 = vpack.c.bf16 %v3822_v55, %v3822_v55  ;;  %v4484_v14 = vpack.c.bf16 %v4405_v54, %v4405_v54  ;;  %4443 = vmatmul.bf16.gmra.mxu1 %v11525_v1  ;;  %v11543_v55 = vpack.c.bf16 %v11541_v13, %v11542_v20  ;;  %v11545_v54 = vld [vmem:[#allocation170_spill] sm:$0xff] }
 0x621   : > { %v4185_v25 = vpack.c.bf16 %v4152_v58, %v4152_v58  ;;  %v11546_v58 = vpack.c.bf16 %v11544_v30, %v11545_v54 }
 0x622   : > { %5710 = vst.msk [vmem:[%s6885_s13 + $0x27c] sm:$0xf] %vm2535_vm2, %v3855_v10  ;;  %4709 = vmatmul.bf16.gmra.mxu2 %v11528_v46 }
 0x623   : > { %5742 = vst.msk [vmem:[%s6885_s13 + $0x2fc] sm:$0xf] %vm2535_vm2, %v4185_v25 }
 0x624   : > { %5743 = vst.msk [vmem:[%s6885_s13 + $0x300] sm:$0xf] %vm2535_vm2, %v4484_v14 }
 0x625   : > { %v4406_v29 = vpop.f32.mrf.mxu1  ;;  %v4670_v62 = vpop.f32.mrf.mxu2 }
 0x626   : > { %v4407_v18 = vadd.f32 %v9844_v7, %v4406_v29  ;;  %v4671_v61 = vadd.f32 %v9844_v7, %v4670_v62 }
 0x628   : > { %v4485_v6 = vpack.c.bf16 %v4407_v18, %v4407_v18  ;;  %v4750_v28 = vpack.c.bf16 %v4671_v61, %v4671_v61  ;;  %v11547_v61 = vld [vmem:[#allocation100_spill] sm:$0xff] }
 0x62a   : > { %5744 = vst.msk [vmem:[%s6885_s13 + $0x304] sm:$0xf] %vm2535_vm2, %v4485_v6  ;;  %v11548_v6 = vld [vmem:[#allocation46_spill] sm:$0xff] }
 0x62b   : > { %5775 = vst.msk [vmem:[%s6885_s13 + $0x380] sm:$0xf] %vm2535_vm2, %v4750_v28  ;;  %v11549_v28 = vpack.c.bf16 %v11547_v61, %v11548_v6 }
 0x62d   : > { %v4409_v53 = vpop.f32.mrf.mxu1  ;;  %v4672_v43 = vpop.f32.mrf.mxu2 }
 0x62e   : > { %v4410_v26 = vadd.f32 %v9844_v7, %v4409_v53  ;;  %v4673_v9 = vadd.f32 %v9844_v7, %v4672_v43  ;;  %v11550_v53 = vld [vmem:[#allocation182_spill] sm:$0xff]  ;;  %v11551_v43 = vld [vmem:[#allocation180_spill] sm:$0xff] }
 0x630   : > { %v4486_v35 = vpack.c.bf16 %v4410_v26, %v4410_v26  ;;  %v4751_v47 = vpack.c.bf16 %v4673_v9, %v4673_v9  ;;  %4448 = vmatmul.bf16.gmra.mxu1 %v11531_v44  ;;  %v11552_v26 = vpack.c.bf16 %v11550_v53, %v11551_v43 }
 0x632   : > { %5745 = vst.msk [vmem:[%s6885_s13 + $0x308] sm:$0xf] %vm2535_vm2, %v4486_v35  ;;  %4714 = vmatmul.bf16.gmra.mxu2 %v11534_v23 }
 0x633   : > { %5776 = vst.msk [vmem:[%s6885_s13 + $0x384] sm:$0xf] %vm2535_vm2, %v4751_v47 }
 0x635   : > { %v4411_v59 = vpop.f32.mrf.mxu1  ;;  %v4675_v37 = vpop.f32.mrf.mxu2 }
 0x636   : > { %v4412_v50 = vadd.f32 %v9844_v7, %v4411_v59  ;;  %v4676_v4 = vadd.f32 %v9844_v7, %v4675_v37 }
 0x638   : > { %v4487_v40 = vpack.c.bf16 %v4412_v50, %v4412_v50  ;;  %v4752_v38 = vpack.c.bf16 %v4676_v4, %v4676_v4  ;;  %v11553_v4 = vld [vmem:[#allocation169_spill] sm:$0xff] }
 0x63a   : > { %5746 = vst.msk [vmem:[%s6885_s13 + $0x30c] sm:$0xf] %vm2535_vm2, %v4487_v40  ;;  %v11554_v40 = vld [vmem:[#allocation49_spill] sm:$0xff] }
 0x63b   : > { %5777 = vst.msk [vmem:[%s6885_s13 + $0x388] sm:$0xf] %vm2535_vm2, %v4752_v38  ;;  %v11555_v38 = vpack.c.bf16 %v11553_v4, %v11554_v40 }
 0x63d   : > { %v4414_v19 = vpop.f32.mrf.mxu1  ;;  %v4677_v34 = vpop.f32.mrf.mxu2 }
 0x63e   : > { %v4415_v2 = vadd.f32 %v9844_v7, %v4414_v19  ;;  %v4678_v32 = vadd.f32 %v9844_v7, %v4677_v34  ;;  %v11556_v19 = vld [vmem:[#allocation52_spill] sm:$0xff]  ;;  %v11557_v34 = vld [vmem:[#allocation190_spill] sm:$0xff] }
 0x640   : > { %v4488_v16 = vpack.c.bf16 %v4415_v2, %v4415_v2  ;;  %v4753_v41 = vpack.c.bf16 %v4678_v32, %v4678_v32  ;;  %4453 = vmatmul.bf16.gmra.mxu1 %v11537_v51  ;;  %v11558_v2 = vpack.c.bf16 %v11556_v19, %v11557_v34 }
 0x642   : > { %5747 = vst.msk [vmem:[%s6885_s13 + $0x310] sm:$0xf] %vm2535_vm2, %v4488_v16  ;;  %4719 = vmatmul.bf16.gmra.mxu2 %v11540_v22 }
 0x643   : > { %5778 = vst.msk [vmem:[%s6885_s13 + $0x38c] sm:$0xf] %vm2535_vm2, %v4753_v41 }
 0x645   : > { %v4416_v57 = vpop.f32.mrf.mxu1  ;;  %v4680_v17 = vpop.f32.mrf.mxu2 }
 0x646   : > { %v4417_v12 = vadd.f32 %v9844_v7, %v4416_v57  ;;  %v4681_v21 = vadd.f32 %v9844_v7, %v4680_v17 }
 0x648   : > { %v4489_v8 = vpack.c.bf16 %v4417_v12, %v4417_v12  ;;  %v4754_v49 = vpack.c.bf16 %v4681_v21, %v4681_v21  ;;  %v11559_v21 = vld [vmem:[#allocation173_spill] sm:$0xff] }
 0x64a   : > { %5748 = vst.msk [vmem:[%s6885_s13 + $0x314] sm:$0xf] %vm2535_vm2, %v4489_v8  ;;  %v11560_v8 = vld [vmem:[#allocation166_spill] sm:$0xff] }
 0x64b   : > { %5779 = vst.msk [vmem:[%s6885_s13 + $0x390] sm:$0xf] %vm2535_vm2, %v4754_v49  ;;  %v11561_v49 = vpack.c.bf16 %v11559_v21, %v11560_v8 }
 0x64d   : > { %v4419_v60 = vpop.f32.mrf.mxu1  ;;  %v4682_v3 = vpop.f32.mrf.mxu2 }
 0x64e   : > { %v4420_v0 = vadd.f32 %v9844_v7, %v4419_v60  ;;  %v4683_v42 = vadd.f32 %v9844_v7, %v4682_v3  ;;  %v11562_v60 = vld [vmem:[#allocation167_spill] sm:$0xff] }
 0x64f   : > { %v11563_v3 = vld [vmem:[#allocation199_spill] sm:$0xff] }
 0x650   : > { %v4490_v31 = vpack.c.bf16 %v4420_v0, %v4420_v0  ;;  %v4755_v45 = vpack.c.bf16 %v4683_v42, %v4683_v42  ;;  %4458 = vmatmul.bf16.gmra.mxu1 %v11543_v55  ;;  %v11564_v0 = vpack.c.bf16 %v11562_v60, %v11563_v3 }
 0x652   : > { %5749 = vst.msk [vmem:[%s6885_s13 + $0x318] sm:$0xf] %vm2535_vm2, %v4490_v31  ;;  %4724 = vmatmul.bf16.gmra.mxu2 %v11546_v58 }
 0x653   : > { %5780 = vst.msk [vmem:[%s6885_s13 + $0x394] sm:$0xf] %vm2535_vm2, %v4755_v45 }
 0x655   : > { %v4421_v10 = vpop.f32.mrf.mxu1  ;;  %v4685_v14 = vpop.f32.mrf.mxu2 }
 0x656   : > { %v4422_v24 = vadd.f32 %v9844_v7, %v4421_v10  ;;  %v4686_v36 = vadd.f32 %v9844_v7, %v4685_v14 }
 0x658   : > { %v4491_v1 = vpack.c.bf16 %v4422_v24, %v4422_v24  ;;  %v4756_v25 = vpack.c.bf16 %v4686_v36, %v4686_v36  ;;  %v11565_v36 = vld [vmem:[#allocation74_spill] sm:$0xff] }
 0x65a   : > { %5750 = vst.msk [vmem:[%s6885_s13 + $0x31c] sm:$0xf] %vm2535_vm2, %v4491_v1  ;;  %v11566_v1 = vld [vmem:[#allocation204_spill] sm:$0xff] }
 0x65b   : > { %5781 = vst.msk [vmem:[%s6885_s13 + $0x398] sm:$0xf] %vm2535_vm2, %v4756_v25  ;;  %v11567_v25 = vpack.c.bf16 %v11565_v36, %v11566_v1 }
 0x65d   : > { %v4424_v52 = vpop.f32.mrf.mxu1  ;;  %v4687_v11 = vpop.f32.mrf.mxu2 }
 0x65e   : > { %v4425_v46 = vadd.f32 %v9844_v7, %v4424_v52  ;;  %v4688_v29 = vadd.f32 %v9844_v7, %v4687_v11  ;;  %v11568_v52 = vld [vmem:[#allocation192_spill] sm:$0xff]  ;;  %v11569_v11 = vld [vmem:[#allocation205_spill] sm:$0xff] }
 0x660   : > { %v4492_v62 = vpack.c.bf16 %v4425_v46, %v4425_v46  ;;  %v4757_v18 = vpack.c.bf16 %v4688_v29, %v4688_v29  ;;  %4463 = vmatmul.bf16.gmra.mxu1 %v11549_v28  ;;  %v11570_v46 = vpack.c.bf16 %v11568_v52, %v11569_v11 }
 0x662   : > { %5751 = vst.msk [vmem:[%s6885_s13 + $0x320] sm:$0xf] %vm2535_vm2, %v4492_v62  ;;  %4729 = vmatmul.bf16.gmra.mxu2 %v11552_v26 }
 0x663   : > { %5782 = vst.msk [vmem:[%s6885_s13 + $0x39c] sm:$0xf] %vm2535_vm2, %v4757_v18 }
 0x665   : > { %v4426_v9 = vpop.f32.mrf.mxu1  ;;  %v4690_v35 = vpop.f32.mrf.mxu2 }
 0x666   : > { %v4427_v47 = vadd.f32 %v9844_v7, %v4426_v9  ;;  %v4691_v27 = vadd.f32 %v9844_v7, %v4690_v35 }
 0x668   : > { %v4493_v5 = vpack.c.bf16 %v4427_v47, %v4427_v47  ;;  %v4758_v44 = vpack.c.bf16 %v4691_v27, %v4691_v27 }
 0x66a   : > { %5752 = vst.msk [vmem:[%s6885_s13 + $0x324] sm:$0xf] %vm2535_vm2, %v4493_v5 }
 0x66b   : > { %5783 = vst.msk [vmem:[%s6885_s13 + $0x3a0] sm:$0xf] %vm2535_vm2, %v4758_v44 }
 0x66d   : > { %v4429_v63 = vpop.f32.mrf.mxu1  ;;  %v4692_v15 = vpop.f32.mrf.mxu2 }
 0x66e   : > { %v4430_v23 = vadd.f32 %v9844_v7, %v4429_v63  ;;  %v4693_v59 = vadd.f32 %v9844_v7, %v4692_v15  ;;  %v10339_v63 = vld [vmem:[%s10447_s5] ss:$0 sm:$0xff] }
 0x670   : > { %v4494_v37 = vpack.c.bf16 %v4430_v23, %v4430_v23  ;;  %v4759_v50 = vpack.c.bf16 %v4693_v59, %v4693_v59  ;;  %4468 = vmatmul.bf16.gmra.mxu1 %v11555_v38 }
 0x672   : > { %5753 = vst.msk [vmem:[%s6885_s13 + $0x328] sm:$0xf] %vm2535_vm2, %v4494_v37  ;;  %4734 = vmatmul.bf16.gmra.mxu2 %v11558_v2 }
 0x673   : > { %5784 = vst.msk [vmem:[%s6885_s13 + $0x3a4] sm:$0xf] %vm2535_vm2, %v4759_v50 }
 0x675   : > { %v4431_v32 = vpop.f32.mrf.mxu1  ;;  %v4695_v16 = vpop.f32.mrf.mxu2 }
 0x676   : > { %v4432_v41 = vadd.f32 %v9844_v7, %v4431_v32  ;;  %v4696_v48 = vadd.f32 %v9844_v7, %v4695_v16 }
 0x678   : > { %v4495_v39 = vpack.c.bf16 %v4432_v41, %v4432_v41  ;;  %v4760_v51 = vpack.c.bf16 %v4696_v48, %v4696_v48 }
 0x67a   : > { %5754 = vst.msk [vmem:[%s6885_s13 + $0x32c] sm:$0xf] %vm2535_vm2, %v4495_v39 }
 0x67b   : > { %5785 = vst.msk [vmem:[%s6885_s13 + $0x3a8] sm:$0xf] %vm2535_vm2, %v4760_v51 }
 0x67d   : > { %v4434_v56 = vpop.f32.mrf.mxu1  ;;  %v4697_v33 = vpop.f32.mrf.mxu2 }
 0x67e   : > { %v4435_v22 = vadd.f32 %v9844_v7, %v4434_v56  ;;  %v4698_v57 = vadd.f32 %v9844_v7, %v4697_v33 }
 0x680   : > { %v4496_v17 = vpack.c.bf16 %v4435_v22, %v4435_v22  ;;  %v4761_v12 = vpack.c.bf16 %v4698_v57, %v4698_v57  ;;  %4473 = vmatmul.bf16.gmra.mxu1 %v11561_v49 }
 0x682   : > { %5755 = vst.msk [vmem:[%s6885_s13 + $0x330] sm:$0xf] %vm2535_vm2, %v4496_v17  ;;  %4739 = vmatmul.bf16.gmra.mxu2 %v11564_v0 }
 0x683   : > { %5786 = vst.msk [vmem:[%s6885_s13 + $0x3ac] sm:$0xf] %vm2535_vm2, %v4761_v12 }
 0x685   : > { %v4436_v42 = vpop.f32.mrf.mxu1  ;;  %v4700_v31 = vpop.f32.mrf.mxu2 }
 0x686   : > { %v4437_v45 = vadd.f32 %v9844_v7, %v4436_v42  ;;  %v4701_v13 = vadd.f32 %v9844_v7, %v4700_v31 }
 0x688   : > { %v4497_v20 = vpack.c.bf16 %v4437_v45, %v4437_v45  ;;  %v4762_v55 = vpack.c.bf16 %v4701_v13, %v4701_v13 }
 0x68a   : > { %5756 = vst.msk [vmem:[%s6885_s13 + $0x334] sm:$0xf] %vm2535_vm2, %v4497_v20 }
 0x68b   : > { %5787 = vst.msk [vmem:[%s6885_s13 + $0x3b0] sm:$0xf] %vm2535_vm2, %v4762_v55 }
 0x68d   : > { %v4439_v30 = vpop.f32.mrf.mxu1  ;;  %v4702_v54 = vpop.f32.mrf.mxu2 }
 0x68e   : > { %v4440_v58 = vadd.f32 %v9844_v7, %v4439_v30  ;;  %v4703_v10 = vadd.f32 %v9844_v7, %v4702_v54 }
 0x690   : > { %v4498_v14 = vpack.c.bf16 %v4440_v58, %v4440_v58  ;;  %v4763_v24 = vpack.c.bf16 %v4703_v10, %v4703_v10  ;;  %4478 = vmatmul.bf16.gmra.mxu1 %v11567_v25 }
 0x692   : > { %5757 = vst.msk [vmem:[%s6885_s13 + $0x338] sm:$0xf] %vm2535_vm2, %v4498_v14  ;;  %4744 = vmatmul.bf16.gmra.mxu2 %v11570_v46 }
 0x693   : > { %5788 = vst.msk [vmem:[%s6885_s13 + $0x3b4] sm:$0xf] %vm2535_vm2, %v4763_v24 }
 0x695   : > { %v4441_v29 = vpop.f32.mrf.mxu1  ;;  %v4705_v62 = vpop.f32.mrf.mxu2 }
 0x696   : > { %v4442_v18 = vadd.f32 %v9844_v7, %v4441_v29  ;;  %v4706_v61 = vadd.f32 %v9844_v7, %v4705_v62 }
 0x698   : > { %v4499_v6 = vpack.c.bf16 %v4442_v18, %v4442_v18  ;;  %v4764_v28 = vpack.c.bf16 %v4706_v61, %v4706_v61 }
 0x69a   : > { %5758 = vst.msk [vmem:[%s6885_s13 + $0x33c] sm:$0xf] %vm2535_vm2, %v4499_v6 }
 0x69b   : > { %5789 = vst.msk [vmem:[%s6885_s13 + $0x3b8] sm:$0xf] %vm2535_vm2, %v4764_v28 }
 0x69d   : > { %v4444_v53 = vpop.f32.mrf.mxu1  ;;  %v4707_v43 = vpop.f32.mrf.mxu2 }
 0x69e   : > { %v4445_v26 = vadd.f32 %v9844_v7, %v4444_v53  ;;  %v4708_v9 = vadd.f32 %v9844_v7, %v4707_v43 }
 0x6a0   : > { %v4500_v35 = vpack.c.bf16 %v4445_v26, %v4445_v26  ;;  %v4765_v47 = vpack.c.bf16 %v4708_v9, %v4708_v9 }
 0x6a2   : > { %5759 = vst.msk [vmem:[%s6885_s13 + $0x340] sm:$0xf] %vm2535_vm2, %v4500_v35 }
 0x6a3   : > { %5790 = vst.msk [vmem:[%s6885_s13 + $0x3bc] sm:$0xf] %vm2535_vm2, %v4765_v47 }
 0x6a5   : > { %v4446_v27 = vpop.f32.mrf.mxu1  ;;  %v4710_v5 = vpop.f32.mrf.mxu2 }
 0x6a6   : > { %v4447_v44 = vadd.f32 %v9844_v7, %v4446_v27  ;;  %v4711_v15 = vadd.f32 %v10339_v63, %v4710_v5 }
 0x6a8   : > { %v4501_v23 = vpack.c.bf16 %v4447_v44, %v4447_v44  ;;  %v4766_v59 = vpack.c.bf16 %v4711_v15, %v4711_v15 }
 0x6aa   : > { %5760 = vst.msk [vmem:[%s6885_s13 + $0x344] sm:$0xf] %vm2535_vm2, %v4501_v23 }
 0x6ab   : > { %5791 = vst.msk [vmem:[%s6885_s13 + $0x3c0] sm:$0xf] %vm2535_vm2, %v4766_v59 }
 0x6ad   : > { %v4449_v37 = vpop.f32.mrf.mxu1  ;;  %v4712_v50 = vpop.f32.mrf.mxu2 }
 0x6ae   : > { %v4450_v4 = vadd.f32 %v10339_v63, %v4449_v37  ;;  %v4713_v7 = vadd.f32 %v10339_v63, %v4712_v50 }
 0x6b0   : > { %v4502_v40 = vpack.c.bf16 %v4450_v4, %v4450_v4  ;;  %v4767_v38 = vpack.c.bf16 %v4713_v7, %v4713_v7 }
 0x6b2   : > { %5761 = vst.msk [vmem:[%s6885_s13 + $0x348] sm:$0xf] %vm2535_vm2, %v4502_v40 }
 0x6b3   : > { %5792 = vst.msk [vmem:[%s6885_s13 + $0x3c4] sm:$0xf] %vm2535_vm2, %v4767_v38 }
 0x6b5   : > { %v4451_v19 = vpop.f32.mrf.mxu1  ;;  %v4715_v34 = vpop.f32.mrf.mxu2 }
 0x6b6   : > { %v4452_v2 = vadd.f32 %v10339_v63, %v4451_v19  ;;  %v4716_v32 = vadd.f32 %v10339_v63, %v4715_v34 }
 0x6b8   : > { %v4503_v16 = vpack.c.bf16 %v4452_v2, %v4452_v2  ;;  %v4768_v41 = vpack.c.bf16 %v4716_v32, %v4716_v32 }
 0x6ba   : > { %5762 = vst.msk [vmem:[%s6885_s13 + $0x34c] sm:$0xf] %vm2535_vm2, %v4503_v16 }
 0x6bb   : > { %5793 = vst.msk [vmem:[%s6885_s13 + $0x3c8] sm:$0xf] %vm2535_vm2, %v4768_v41 }
 0x6bd   : > { %v4454_v48 = vpop.f32.mrf.mxu1  ;;  %v4717_v39 = vpop.f32.mrf.mxu2 }
 0x6be   : > { %v4455_v51 = vadd.f32 %v10339_v63, %v4454_v48  ;;  %v4718_v56 = vadd.f32 %v10339_v63, %v4717_v39 }
 0x6c0   : > { %v4504_v33 = vpack.c.bf16 %v4455_v51, %v4455_v51  ;;  %v4769_v22 = vpack.c.bf16 %v4718_v56, %v4718_v56 }
 0x6c2   : > { %5763 = vst.msk [vmem:[%s6885_s13 + $0x350] sm:$0xf] %vm2535_vm2, %v4504_v33 }
 0x6c3   : > { %5794 = vst.msk [vmem:[%s6885_s13 + $0x3cc] sm:$0xf] %vm2535_vm2, %v4769_v22 }
 0x6c5   : > { %v4456_v57 = vpop.f32.mrf.mxu1  ;;  %v4720_v17 = vpop.f32.mrf.mxu2 }
 0x6c6   : > { %v4457_v12 = vadd.f32 %v10339_v63, %v4456_v57  ;;  %v4721_v21 = vadd.f32 %v10339_v63, %v4720_v17 }
 0x6c8   : > { %v4505_v8 = vpack.c.bf16 %v4457_v12, %v4457_v12  ;;  %v4770_v49 = vpack.c.bf16 %v4721_v21, %v4721_v21 }
 0x6ca   : > { %5764 = vst.msk [vmem:[%s6885_s13 + $0x354] sm:$0xf] %vm2535_vm2, %v4505_v8 }
 0x6cb   : > { %5795 = vst.msk [vmem:[%s6885_s13 + $0x3d0] sm:$0xf] %vm2535_vm2, %v4770_v49 }
 0x6cd   : > { %v4459_v60 = vpop.f32.mrf.mxu1  ;;  %v4722_v3 = vpop.f32.mrf.mxu2 }
 0x6ce   : > { %v4460_v0 = vadd.f32 %v10339_v63, %v4459_v60  ;;  %v4723_v42 = vadd.f32 %v10339_v63, %v4722_v3 }
 0x6d0   : > { %v4506_v31 = vpack.c.bf16 %v4460_v0, %v4460_v0  ;;  %v4771_v45 = vpack.c.bf16 %v4723_v42, %v4723_v42 }
 0x6d2   : > { %5765 = vst.msk [vmem:[%s6885_s13 + $0x358] sm:$0xf] %vm2535_vm2, %v4506_v31 }
 0x6d3   : > { %5796 = vst.msk [vmem:[%s6885_s13 + $0x3d4] sm:$0xf] %vm2535_vm2, %v4771_v45 }
 0x6d5   : > { %v4461_v13 = vpop.f32.mrf.mxu1  ;;  %v4725_v20 = vpop.f32.mrf.mxu2 }
 0x6d6   : > { %v4462_v55 = vadd.f32 %v10339_v63, %v4461_v13  ;;  %v4726_v30 = vadd.f32 %v10339_v63, %v4725_v20 }
 0x6d8   : > { %v4507_v54 = vpack.c.bf16 %v4462_v55, %v4462_v55  ;;  %v4772_v58 = vpack.c.bf16 %v4726_v30, %v4726_v30 }
 0x6da   : > { %5766 = vst.msk [vmem:[%s6885_s13 + $0x35c] sm:$0xf] %vm2535_vm2, %v4507_v54 }
 0x6db   : > { %5797 = vst.msk [vmem:[%s6885_s13 + $0x3d8] sm:$0xf] %vm2535_vm2, %v4772_v58 }
 0x6dd   : > { %v4464_v10 = vpop.f32.mrf.mxu1  ;;  %v4727_v14 = vpop.f32.mrf.mxu2 }
 0x6de   : > { %v4465_v24 = vadd.f32 %v10339_v63, %v4464_v10  ;;  %v4728_v36 = vadd.f32 %v10339_v63, %v4727_v14 }
 0x6e0   : > { %v4508_v1 = vpack.c.bf16 %v4465_v24, %v4465_v24  ;;  %v4773_v25 = vpack.c.bf16 %v4728_v36, %v4728_v36 }
 0x6e2   : > { %5767 = vst.msk [vmem:[%s6885_s13 + $0x360] sm:$0xf] %vm2535_vm2, %v4508_v1 }
 0x6e3   : > { %5798 = vst.msk [vmem:[%s6885_s13 + $0x3dc] sm:$0xf] %vm2535_vm2, %v4773_v25 }
 0x6e5   : > { %v4466_v52 = vpop.f32.mrf.mxu1  ;;  %v4730_v11 = vpop.f32.mrf.mxu2 }
 0x6e6   : > { %v4467_v46 = vadd.f32 %v10339_v63, %v4466_v52  ;;  %v4731_v29 = vadd.f32 %v10339_v63, %v4730_v11 }
 0x6e8   : > { %v4509_v62 = vpack.c.bf16 %v4467_v46, %v4467_v46  ;;  %v4774_v18 = vpack.c.bf16 %v4731_v29, %v4731_v29 }
 0x6ea   : > { %5768 = vst.msk [vmem:[%s6885_s13 + $0x364] sm:$0xf] %vm2535_vm2, %v4509_v62 }
 0x6eb   : > { %5799 = vst.msk [vmem:[%s6885_s13 + $0x3e0] sm:$0xf] %vm2535_vm2, %v4774_v18 }
 0x6ed   : > { %v4469_v61 = vpop.f32.mrf.mxu1  ;;  %v4732_v6 = vpop.f32.mrf.mxu2 }
 0x6ee   : > { %v4470_v28 = vadd.f32 %v10339_v63, %v4469_v61  ;;  %v4733_v53 = vadd.f32 %v10339_v63, %v4732_v6 }
 0x6f0   : > { %v4510_v43 = vpack.c.bf16 %v4470_v28, %v4470_v28  ;;  %v4775_v26 = vpack.c.bf16 %v4733_v53, %v4733_v53 }
 0x6f2   : > { %5769 = vst.msk [vmem:[%s6885_s13 + $0x368] sm:$0xf] %vm2535_vm2, %v4510_v43 }
 0x6f3   : > { %5800 = vst.msk [vmem:[%s6885_s13 + $0x3e4] sm:$0xf] %vm2535_vm2, %v4775_v26 }
 0x6f5   : > { %v4471_v9 = vpop.f32.mrf.mxu1  ;;  %v4735_v35 = vpop.f32.mrf.mxu2 }
 0x6f6   : > { %v4472_v47 = vadd.f32 %v10339_v63, %v4471_v9  ;;  %v4736_v27 = vadd.f32 %v10339_v63, %v4735_v35 }
 0x6f8   : > { %v4511_v5 = vpack.c.bf16 %v4472_v47, %v4472_v47  ;;  %v4776_v44 = vpack.c.bf16 %v4736_v27, %v4736_v27 }
 0x6fa   : > { %5770 = vst.msk [vmem:[%s6885_s13 + $0x36c] sm:$0xf] %vm2535_vm2, %v4511_v5 }
 0x6fb   : > { %5801 = vst.msk [vmem:[%s6885_s13 + $0x3e8] sm:$0xf] %vm2535_vm2, %v4776_v44 }
 0x6fd   : > { %v4474_v15 = vpop.f32.mrf.mxu1  ;;  %v4737_v23 = vpop.f32.mrf.mxu2 }
 0x6fe   : > { %v4475_v59 = vadd.f32 %v10339_v63, %v4474_v15  ;;  %v4738_v37 = vadd.f32 %v10339_v63, %v4737_v23 }
 0x700   : > { %v4512_v50 = vpack.c.bf16 %v4475_v59, %v4475_v59  ;;  %v4777_v4 = vpack.c.bf16 %v4738_v37, %v4738_v37 }
 0x702   : > { %5771 = vst.msk [vmem:[%s6885_s13 + $0x370] sm:$0xf] %vm2535_vm2, %v4512_v50 }
 0x703   : > { %5802 = vst.msk [vmem:[%s6885_s13 + $0x3ec] sm:$0xf] %vm2535_vm2, %v4777_v4 }
 0x705   : > { %v4476_v7 = vpop.f32.mrf.mxu1  ;;  %v4740_v40 = vpop.f32.mrf.mxu2 }
 0x706   : > { %v4477_v38 = vadd.f32 %v10339_v63, %v4476_v7  ;;  %v4741_v19 = vadd.f32 %v10339_v63, %v4740_v40 }
 0x708   : > { %v4513_v34 = vpack.c.bf16 %v4477_v38, %v4477_v38  ;;  %v4778_v2 = vpack.c.bf16 %v4741_v19, %v4741_v19 }
 0x70a   : > { %5772 = vst.msk [vmem:[%s6885_s13 + $0x374] sm:$0xf] %vm2535_vm2, %v4513_v34 }
 0x70b   : > { %5803 = vst.msk [vmem:[%s6885_s13 + $0x3f0] sm:$0xf] %vm2535_vm2, %v4778_v2 }
 0x70d   : > { %v4479_v32 = vpop.f32.mrf.mxu1  ;;  %v4742_v16 = vpop.f32.mrf.mxu2 }
 0x70e   : > { %v4480_v41 = vadd.f32 %v10339_v63, %v4479_v32  ;;  %v4743_v48 = vadd.f32 %v10339_v63, %v4742_v16 }
 0x710   : > { %v4514_v39 = vpack.c.bf16 %v4480_v41, %v4480_v41  ;;  %v4779_v51 = vpack.c.bf16 %v4743_v48, %v4743_v48 }
 0x712   : > { %5773 = vst.msk [vmem:[%s6885_s13 + $0x378] sm:$0xf] %vm2535_vm2, %v4514_v39 }
 0x713   : > { %5804 = vst.msk [vmem:[%s6885_s13 + $0x3f4] sm:$0xf] %vm2535_vm2, %v4779_v51 }
 0x715   : > { %v4481_v56 = vpop.f32.mrf.mxu1  ;;  %v4745_v33 = vpop.f32.mrf.mxu2 }
 0x716   : > { %v4482_v22 = vadd.f32 %v10339_v63, %v4481_v56  ;;  %v4746_v57 = vadd.f32 %v10339_v63, %v4745_v33 }
 0x718   : > { %v4515_v17 = vpack.c.bf16 %v4482_v22, %v4482_v22  ;;  %v4780_v12 = vpack.c.bf16 %v4746_v57, %v4746_v57 }
 0x71a   : > { %5774 = vst.msk [vmem:[%s6885_s13 + $0x37c] sm:$0xf] %vm2535_vm2, %v4515_v17 }
 0x71b   : > { %5805 = vst.msk [vmem:[%s6885_s13 + $0x3f8] sm:$0xf] %vm2535_vm2, %v4780_v12 }
 0x71d   : > { %v4747_v21 = vpop.f32.mrf.mxu2 }
 0x71e   : > { %v4748_v8 = vadd.f32 %v10339_v63, %v4747_v21 }
 0x720   : > { %v4781_v49 = vpack.c.bf16 %v4748_v8, %v4748_v8 }
 0x722   : > { %5806 = vst.msk [vmem:[%s6885_s13 + $0x3fc] sm:$0xf] %vm2535_vm2, %v4781_v49 }
 0x723 PF: > { %s16_s23 = sadd.s32 1, %s6015_s23   ;;  %s11571_s21 = smov %s6011_s22 }
 0x724   : > { %p13_p5 = scmp.ge.s32.totalorder %s16_s23, 4   ;;  %s11572_s22 = smov %s11574_s24 }
 0x726   :  { %15 = sbr.rel (!%p13_p5) target bundleno = 2 (0x2), region = 81 }

</bundles_post_ra>
